<compile_context>
chip_gen: v5e
topology: v5e:2x2
jax: 0.10.0
libtpu: 0.0.40
codegen_flags: <defaults>
</compile_context>

<pallas_src>
import functools

import jax
import jax.numpy as jnp
from jax import lax
from jax.experimental import pallas as pl
from jax.experimental.pallas import tpu as pltpu


def _round_up(x, m):
    return ((x + m - 1) // m) * m


def intra_chunk_rnn_kernel(x_ref,          # (C, R, F)  time-major, R = B_TILE * L rows
                           wx_ref,         # (F, 8Hp)   bf16  [W_ih_fwd | W_ih_bwd]^T (padded)
                           bx_ref,         # (1, 8Hp)   f32   folded LSTM biases
                           whhT_f_ref,     # (Hp, 4Hp)  bf16
                           whhT_b_ref,     # (Hp, 4Hp)  bf16
                           fcwT_f_ref,     # (Hp, F)    bf16
                           fcwT_b_ref,     # (Hp, F)    bf16
                           fcb_ref,        # (1, F)     f32
                           gamma_ref,      # (1, F)     f32
                           beta_ref,       # (1, F)     f32
                           out_ref,        # (C, R, F)
                           gxf_ref,        # scratch (C, R, 4Hp) bf16
                           gxb_ref,        # scratch (C, R, 4Hp) bf16
                           hf_ref,         # scratch (C, R, Hp)  bf16
                           hb_ref,         # scratch (C, R, Hp)  bf16
                           *, eps, hidden_p, inter_len, b_tile, unroll):
    C, R, F = x_ref.shape
    Hp = hidden_p
    L = inter_len

    x = x_ref[...].astype(jnp.float32)                          # (C, R, F) for residual
    x_bf = x.astype(jnp.bfloat16)                               # MXU operand

    # --- Hoisted input projection: one bf16 MXU GEMM for BOTH directions,
    #     LSTM biases folded in; result split per direction into bf16 scratch
    #     (128-lane aligned split, done once, outside the serial loop). ---
    gx = (jnp.dot(x_bf.reshape(C * R, F), wx_ref[...],
                  preferred_element_type=jnp.float32)
          + bx_ref[...]).reshape(C, R, 8 * Hp)
    gxf_ref[...] = gx[:, :, :4 * Hp].astype(gxf_ref.dtype)
    gxb_ref[...] = gx[:, :, 4 * Hp:].astype(gxb_ref.dtype)

    def cell(gx_t, h, c, whhT_ref):
        # h is bf16 (MXU operand); gates / cell state stay f32.
        # Gate slices are 128-lane aligned because Hp % 128 == 0.
        gates = gx_t.astype(jnp.float32) + jnp.dot(
            h, whhT_ref[...], preferred_element_type=jnp.float32)
        i = jax.nn.sigmoid(gates[:, 0 * Hp:1 * Hp])
        f = jax.nn.sigmoid(gates[:, 1 * Hp:2 * Hp])
        g = jnp.tanh(gates[:, 2 * Hp:3 * Hp])
        o = jax.nn.sigmoid(gates[:, 3 * Hp:4 * Hp])
        c_new = f * c + i * g
        h_new = (o * jnp.tanh(c_new)).astype(jnp.bfloat16)
        return h_new, c_new

    # --- Fused bidirectional recurrence: iteration t runs forward step t and
    #     backward step C-1-t.  FC is deferred: only h goes to scratch (plain
    #     stores, no read-modify-write on any output slab). ---
    def body(t, carry):
        h_f, c_f, h_b, c_b = carry
        tb = C - 1 - t

        h_f, c_f = cell(gxf_ref[t], h_f, c_f, whhT_f_ref)
        hf_ref[t] = h_f

        h_b, c_b = cell(gxb_ref[tb], h_b, c_b, whhT_b_ref)
        hb_ref[tb] = h_b
        return h_f, c_f, h_b, c_b

    h0 = jnp.zeros((R, Hp), jnp.bfloat16)
    c0 = jnp.zeros((R, Hp), jnp.float32)
    lax.fori_loop(0, C, body, (h0, c0, h0, c0), unroll=unroll)

    # --- Deferred Linear(2H -> F): one MXU-dense GEMM per direction over all
    #     timesteps at once (replaces 2C tiny per-step matmuls + z RMW). ---
    z = (jnp.dot(hf_ref[...].reshape(C * R, Hp), fcwT_f_ref[...],
                 preferred_element_type=jnp.float32)
         + jnp.dot(hb_ref[...].reshape(C * R, Hp), fcwT_b_ref[...],
                   preferred_element_type=jnp.float32)
         + fcb_ref[...]).reshape(C, R, F)

    # --- gLN per original batch sample (stats over that sample's (C, L, F)
    #     sub-block), single-pass sum / sum-of-squares, then residual add. ---
    gamma = gamma_ref[...]
    beta = beta_ref[...]
    inv_n = 1.0 / float(C * L * F)
    for b in range(b_tile):
        rows = slice(b * L, (b + 1) * L)
        zb = z[:, rows, :]
        mean = jnp.sum(zb) * inv_n
        var = jnp.maximum(jnp.sum(zb * zb) * inv_n - mean * mean, 0.0)
        zn = gamma * (zb - mean) * lax.rsqrt(var + eps) + beta
        out_ref[:, rows, :] = (zn + x[:, rows, :]).astype(out_ref.dtype)


def intra_chunk_rnn(x_bflc, params, eps=1e-8, target_rows=64):
    """x_bflc: (batch, num_features, inter_length, chunk_size) -- PyTorch layout."""
    B, F, L, C = x_bflc.shape
    H = params['whh_f'].shape[1]
    Hp = _round_up(H, 128)     # lane-align gate slices; exact (zero-padded units)

    # Batch tile: stack B_TILE samples on the sublane/row axis of the recurrence
    # (aim for ~target_rows rows per step).  NOTE(v7x): for best megacore use,
    # B should leave the resulting grid a multiple of 2.
    b_tile = 1
    for d in range(1, B + 1):
        if B % d == 0 and d * L <= max(target_rows, L):
            b_tile = d
    n_tiles = B // b_tile
    R = b_tile * L

    # Wrapper-side layout: (n_tiles, C, R, F), rows ordered (sample-in-tile, l).
    x = jnp.transpose(x_bflc, (0, 3, 2, 1))                      # (B, C, L, F)
    x = x.reshape(n_tiles, b_tile, C, L, F)
    x = jnp.transpose(x, (0, 2, 1, 3, 4)).reshape(n_tiles, C, R, F)

    # --- Weight prep: pad hidden dim to Hp with zeros (exact), fold biases,
    #     pre-transpose, cast MXU operands to bf16. ---
    def pad_gate_rows(w):                       # (4H, ...) -> (4Hp, ...)
        if Hp == H:
            return w
        w4 = w.reshape((4, H) + w.shape[1:])
        pad = [(0, 0), (0, Hp - H)] + [(0, 0)] * (w.ndim - 1)
        return jnp.pad(w4, pad).reshape((4 * Hp,) + w.shape[1:])

    def pad_last(w):                            # (..., H) -> (..., Hp)
        if Hp == H:
            return w
        return jnp.pad(w, [(0, 0)] * (w.ndim - 1) + [(0, Hp - H)])

    def pad_rows(w):                            # (H, ...) -> (Hp, ...)
        if Hp == H:
            return w
        return jnp.pad(w, [(0, Hp - H)] + [(0, 0)] * (w.ndim - 1))

    wih_f = pad_gate_rows(params['wih_f'])                        # (4Hp, F)
    wih_b = pad_gate_rows(params['wih_b'])
    whh_f = pad_gate_rows(pad_last(params['whh_f']))              # (4Hp, Hp)
    whh_b = pad_gate_rows(pad_last(params['whh_b']))
    b_f = pad_gate_rows(params['bih_f'] + params['bhh_f'])        # (4Hp,)
    b_b = pad_gate_rows(params['bih_b'] + params['bhh_b'])

    w_x = jnp.concatenate([wih_f.T, wih_b.T], axis=1).astype(jnp.bfloat16)  # (F, 8Hp)
    b_x = jnp.concatenate([b_f, b_b]).reshape(1, 8 * Hp).astype(jnp.float32)
    whhT_f = whh_f.T.astype(jnp.bfloat16)                         # (Hp, 4Hp)
    whhT_b = whh_b.T.astype(jnp.bfloat16)
    fcw = params['fc_w']                                          # (F, 2H)
    fcwT_f = pad_rows(fcw[:, :H].T).astype(jnp.bfloat16)          # (Hp, F)
    fcwT_b = pad_rows(fcw[:, H:].T).astype(jnp.bfloat16)
    fcb = params['fc_b'].reshape(1, F).astype(jnp.float32)
    gamma = params['gamma'].reshape(1, F).astype(jnp.float32)
    beta = params['beta'].reshape(1, F).astype(jnp.float32)

    inputs = (x, w_x, b_x, whhT_f, whhT_b, fcwT_f, fcwT_b, fcb, gamma, beta)

    # Weight blocks never change across the grid (could be single-buffered via
    # pipeline_mode=pl.Buffered(1) for extra v7x VMEM headroom).
    def full_spec(a):
        zeros = (0,) * a.ndim
        return pl.BlockSpec(a.shape, lambda i: zeros)

    xo_spec = pl.BlockSpec((pl.Squeezed(), C, R, F), lambda i: (i, 0, 0, 0))
    in_specs = [xo_spec] + [full_spec(a) for a in inputs[1:]]

    unroll = C if C <= 16 else 4    # full unroll only for small static C

    # Advisory cost model: input GEMM + recurrent matmuls + deferred FC.
    flops = (2 * B * C * L * F * 8 * Hp
             + 2 * (2 * B * C * L * Hp * 4 * Hp)
             + 2 * (2 * B * C * L * Hp * F))
    transcendentals = 2 * 5 * B * C * L * Hp
    bytes_accessed = int(2 * x.size * x.dtype.itemsize
                         + sum(int(a.size) * a.dtype.itemsize for a in inputs[1:]))
    cost = pl.CostEstimate(flops=flops, transcendentals=transcendentals,
                           bytes_accessed=bytes_accessed)

    # Generation-aware VMEM budget (v7x has 64 MiB/TC vs 128 MiB on v5e/v6e).
    try:
        vmem_cap = int(pltpu.get_tpu_info().vmem_capacity_bytes)
    except Exception:
        vmem_cap = 64 * 1024 * 1024
    vmem_limit = max(16 * 1024 * 1024, min(3 * vmem_cap // 4, 96 * 1024 * 1024))

    out = pl.pallas_call(
        functools.partial(intra_chunk_rnn_kernel, eps=eps, hidden_p=Hp,
                          inter_len=L, b_tile=b_tile, unroll=unroll),
        out_shape=jax.ShapeDtypeStruct((n_tiles, C, R, F), x.dtype),
        grid=(n_tiles,),
        in_specs=in_specs,
        out_specs=xo_spec,
        scratch_shapes=[
            pltpu.VMEM((C, R, 4 * Hp), jnp.bfloat16),   # fwd input-proj gates
            pltpu.VMEM((C, R, 4 * Hp), jnp.bfloat16),   # bwd input-proj gates
            pltpu.VMEM((C, R, Hp), jnp.bfloat16),       # fwd hidden states
            pltpu.VMEM((C, R, Hp), jnp.bfloat16),       # bwd hidden states
        ],
        compiler_params=pltpu.CompilerParams(
            dimension_semantics=("parallel",),
            vmem_limit_bytes=vmem_limit),
        cost_estimate=cost,
    )(*inputs)

    # Undo the wrapper layout: (n_tiles, C, R, F) -> (B, F, L, C).
    out = out.reshape(n_tiles, C, b_tile, L, F)
    out = jnp.transpose(out, (0, 2, 1, 3, 4)).reshape(B, C, L, F)
    return jnp.transpose(out, (0, 3, 2, 1))


def reference(x_bflc, params, eps=1e-8):
    """Pure-JAX f32 reference mirroring the PyTorch forward, for correctness checks."""
    B, F, L, C = x_bflc.shape
    H = params['whh_f'].shape[1]
    x = jnp.transpose(x_bflc, (0, 2, 3, 1)).reshape(B * L, C, F)

    def run_lstm(xs, wih, whh, bih, bhh, reverse):
        def step(carry, x_t):
            h, c = carry
            gates = x_t @ wih.T + h @ whh.T + bih + bhh
            i, f, g, o = jnp.split(gates, 4, axis=-1)
            c = jax.nn.sigmoid(f) * c + jax.nn.sigmoid(i) * jnp.tanh(g)
            h = jax.nn.sigmoid(o) * jnp.tanh(c)
            return (h, c), h

        h0 = jnp.zeros((xs.shape[0], H), jnp.float32)
        c0 = jnp.zeros((xs.shape[0], H), jnp.float32)
        _, ys = lax.scan(step, (h0, c0), jnp.swapaxes(xs, 0, 1), reverse=reverse)
        return jnp.swapaxes(ys, 0, 1)

    yf = run_lstm(x, params['wih_f'], params['whh_f'],
                  params['bih_f'], params['bhh_f'], reverse=False)
    yb = run_lstm(x, params['wih_b'], params['whh_b'],
                  params['bih_b'], params['bhh_b'], reverse=True)
    y = jnp.concatenate([yf, yb], axis=-1)
    z = y @ params['fc_w'].T + params['fc_b']                   # (B*L, C, F)
    z = jnp.transpose(z.reshape(B, L * C, F), (0, 2, 1))        # (B, F, L*C)
    mean = jnp.mean(z, axis=(1, 2), keepdims=True)
    var = jnp.mean((z - mean) ** 2, axis=(1, 2), keepdims=True)
    z = (params['gamma'].reshape(1, F, 1) * (z - mean) / jnp.sqrt(var + eps)
         + params['beta'].reshape(1, F, 1))
    return z.reshape(B, F, L, C) + x_bflc


if __name__ == "__main__":
    # num_features=16, hidden_channels=32, batch=2, inter_length=4, chunk_size=8
    B, F, L, C, H = 2, 16, 4, 8, 32

    key = jax.random.PRNGKey(0)
    keys = jax.random.split(key, 11)

    def u(k, shape, scale):
        return jax.random.uniform(k, shape, jnp.float32, -scale, scale)

    k_rnn = 1.0 / float(jnp.sqrt(jnp.float32(H)))
    k_fc = 1.0 / float(jnp.sqrt(jnp.float32(2 * H)))
    params = {
        'wih_f': u(keys[0], (4 * H, F), k_rnn),
        'whh_f': u(keys[1], (4 * H, H), k_rnn),
        'bih_f': u(keys[2], (4 * H,), k_rnn),
        'bhh_f': u(keys[3], (4 * H,), k_rnn),
        'wih_b': u(keys[4], (4 * H, F), k_rnn),
        'whh_b': u(keys[5], (4 * H, H), k_rnn),
        'bih_b': u(keys[6], (4 * H,), k_rnn),
        'bhh_b': u(keys[7], (4 * H,), k_rnn),
        'fc_w': u(keys[8], (F, 2 * H), k_fc),
        'fc_b': u(keys[9], (F,), k_fc),
        'gamma': jnp.ones((F,), jnp.float32),   # gLN weight
        'beta': jnp.zeros((F,), jnp.float32),   # gLN bias
    }

    x = jax.random.normal(keys[10], (B, F, L, C), dtype=jnp.float32)

    out = jax.block_until_ready(intra_chunk_rnn(x, params))
    ref = reference(x, params)

    assert out.shape == (B, F, L, C)
    assert out.dtype == x.dtype
    # bf16 MXU operands / bf16 gate+hidden scratch => looser tolerance than pure f32.
    assert jnp.allclose(out, ref, atol=5e-2, rtol=5e-2), "mismatch vs pure-JAX reference"

    print("KERNEL_OK")
</pallas_src>

<mosaic_0001>
module attributes {stable_mosaic.version = 11 : i64} {
  func.func @intra_chunk_rnn_kernel(%arg0: i32, %arg1: memref<1x8x8x16xf32, #tpu.memory_space<vmem>>, %arg2: memref<16x1024xbf16, #tpu.memory_space<vmem>>, %arg3: memref<1x1024xf32, #tpu.memory_space<vmem>>, %arg4: memref<128x512xbf16, #tpu.memory_space<vmem>>, %arg5: memref<128x512xbf16, #tpu.memory_space<vmem>>, %arg6: memref<128x16xbf16, #tpu.memory_space<vmem>>, %arg7: memref<128x16xbf16, #tpu.memory_space<vmem>>, %arg8: memref<1x16xf32, #tpu.memory_space<vmem>>, %arg9: memref<1x16xf32, #tpu.memory_space<vmem>>, %arg10: memref<1x16xf32, #tpu.memory_space<vmem>>, %arg11: memref<1x8x8x16xf32, #tpu.memory_space<vmem>>, %arg12: memref<8x8x512xbf16, #tpu.memory_space<vmem>>, %arg13: memref<8x8x512xbf16, #tpu.memory_space<vmem>>, %arg14: memref<8x8x128xbf16, #tpu.memory_space<vmem>>, %arg15: memref<8x8x128xbf16, #tpu.memory_space<vmem>>) attributes {dimension_semantics = [#tpu.dimension_semantics<parallel>], iteration_bounds = array<i64: 1>, scalar_prefetch = 0 : i64, scratch_operands = 4 : i64, tpu.core_type = #tpu.core_type<tc>, window_params = [{transform_indices = @transform_0, window_bounds = array<i64: 1, 8, 8, 16>}, {pipeline_mode = #tpu.pipeline_mode<synchronous>, transform_indices = @transform_1, window_bounds = array<i64: 16, 1024>}, {pipeline_mode = #tpu.pipeline_mode<synchronous>, transform_indices = @transform_2, window_bounds = array<i64: 1, 1024>}, {pipeline_mode = #tpu.pipeline_mode<synchronous>, transform_indices = @transform_3, window_bounds = array<i64: 128, 512>}, {pipeline_mode = #tpu.pipeline_mode<synchronous>, transform_indices = @transform_4, window_bounds = array<i64: 128, 512>}, {pipeline_mode = #tpu.pipeline_mode<synchronous>, transform_indices = @transform_5, window_bounds = array<i64: 128, 16>}, {pipeline_mode = #tpu.pipeline_mode<synchronous>, transform_indices = @transform_6, window_bounds = array<i64: 128, 16>}, {pipeline_mode = #tpu.pipeline_mode<synchronous>, transform_indices = @transform_7, window_bounds = array<i64: 1, 16>}, {pipeline_mode = #tpu.pipeline_mode<synchronous>, transform_indices = @transform_8, window_bounds = array<i64: 1, 16>}, {pipeline_mode = #tpu.pipeline_mode<synchronous>, transform_indices = @transform_9, window_bounds = array<i64: 1, 16>}, {transform_indices = @transform_10, window_bounds = array<i64: 1, 8, 8, 16>}]} {
    %c0 = arith.constant 0 : index
    %c0_0 = arith.constant 0 : index
    %c0_1 = arith.constant 0 : index
    %c0_2 = arith.constant 0 : index
    %0 = vector.load %arg1[%c0, %c0_0, %c0_1, %c0_2] : memref<1x8x8x16xf32, #tpu.memory_space<vmem>>, vector<1x8x8x16xf32>
    %1 = vector.shape_cast %0 : vector<1x8x8x16xf32> to vector<8x8x16xf32>
    %2 = arith.truncf %1 : vector<8x8x16xf32> to vector<8x8x16xbf16>
    %3 = vector.shape_cast %2 : vector<8x8x16xbf16> to vector<64x16xbf16>
    %c0_3 = arith.constant 0 : index
    %c0_4 = arith.constant 0 : index
    %4 = vector.load %arg2[%c0_3, %c0_4] : memref<16x1024xbf16, #tpu.memory_space<vmem>>, vector<16x1024xbf16>
    %cst = arith.constant dense<0.000000e+00> : vector<64x1024xf32>
    %5 = tpu.matmul %3, %4, %cst {dimension_numbers = #tpu.dot_dimension_numbers<[1], [0], [0], [1], [0, 0, 1, 1], [], []>} : vector<64x16xbf16>, vector<16x1024xbf16>, vector<64x1024xf32> -> vector<64x1024xf32>
    %c0_5 = arith.constant 0 : index
    %c0_6 = arith.constant 0 : index
    %6 = vector.load %arg3[%c0_5, %c0_6] : memref<1x1024xf32, #tpu.memory_space<vmem>>, vector<1x1024xf32>
    %7 = vector.broadcast %6 : vector<1x1024xf32> to vector<64x1024xf32>
    %8 = arith.addf %5, %7 : vector<64x1024xf32>
    %9 = vector.shape_cast %8 : vector<64x1024xf32> to vector<8x8x1024xf32>
    %10 = vector.extract_strided_slice %9 {offsets = [0, 0, 0], sizes = [8, 8, 512], strides = [1, 1, 1]} : vector<8x8x1024xf32> to vector<8x8x512xf32>
    %11 = arith.truncf %10 : vector<8x8x512xf32> to vector<8x8x512xbf16>
    %c0_7 = arith.constant 0 : index
    %c0_8 = arith.constant 0 : index
    %c0_9 = arith.constant 0 : index
    %12 = vector.load %arg12[%c0_7, %c0_8, %c0_9] : memref<8x8x512xbf16, #tpu.memory_space<vmem>>, vector<8x8x512xbf16>
    tpu.vector_store %arg12[%c0_7, %c0_8, %c0_9], %11 {strides = array<i32>} : memref<8x8x512xbf16, #tpu.memory_space<vmem>>, vector<8x8x512xbf16>,
    %13 = vector.extract_strided_slice %9 {offsets = [0, 0, 512], sizes = [8, 8, 512], strides = [1, 1, 1]} : vector<8x8x1024xf32> to vector<8x8x512xf32>
    %14 = arith.truncf %13 : vector<8x8x512xf32> to vector<8x8x512xbf16>
    %c0_10 = arith.constant 0 : index
    %c0_11 = arith.constant 0 : index
    %c0_12 = arith.constant 0 : index
    %15 = vector.load %arg13[%c0_10, %c0_11, %c0_12] : memref<8x8x512xbf16, #tpu.memory_space<vmem>>, vector<8x8x512xbf16>
    tpu.vector_store %arg13[%c0_10, %c0_11, %c0_12], %14 {strides = array<i32>} : memref<8x8x512xbf16, #tpu.memory_space<vmem>>, vector<8x8x512xbf16>,
    %cst_13 = arith.constant 0.000000e+00 : bf16
    %16 = vector.broadcast %cst_13 : bf16 to vector<8x128xbf16>
    %cst_14 = arith.constant 0.000000e+00 : f32
    %17 = vector.broadcast %cst_14 : f32 to vector<8x128xf32>
    %c0_i32 = arith.constant 0 : i32
    %c7_i32 = arith.constant 7 : i32
    %18 = arith.subi %c7_i32, %c0_i32 : i32
    %19 = arith.index_cast %c0_i32 : i32 to index
    %c0_15 = arith.constant 0 : index
    %c0_16 = arith.constant 0 : index
    %20 = vector.load %arg12[%19, %c0_15, %c0_16] : memref<8x8x512xbf16, #tpu.memory_space<vmem>>, vector<1x8x512xbf16>
    %21 = vector.shape_cast %20 : vector<1x8x512xbf16> to vector<8x512xbf16>
    %22 = arith.extf %21 : vector<8x512xbf16> to vector<8x512xf32>
    %c0_17 = arith.constant 0 : index
    %c0_18 = arith.constant 0 : index
    %23 = vector.load %arg4[%c0_17, %c0_18] : memref<128x512xbf16, #tpu.memory_space<vmem>>, vector<128x512xbf16>
    %cst_19 = arith.constant dense<0.000000e+00> : vector<8x512xf32>
    %24 = tpu.matmul %16, %23, %cst_19 {dimension_numbers = #tpu.dot_dimension_numbers<[1], [0], [0], [1], [0, 0, 1, 1], [], []>} : vector<8x128xbf16>, vector<128x512xbf16>, vector<8x512xf32> -> vector<8x512xf32>
    %25 = arith.addf %22, %24 : vector<8x512xf32>
    %26 = vector.extract_strided_slice %25 {offsets = [0, 0], sizes = [8, 128], strides = [1, 1]} : vector<8x512xf32> to vector<8x128xf32>
    %27 = arith.negf %26 : vector<8x128xf32>
    %28 = math.exp %27 : vector<8x128xf32>
    %cst_20 = arith.constant 1.000000e+00 : f32
    %29 = vector.broadcast %cst_20 : f32 to vector<8x128xf32>
    %30 = arith.addf %29, %28 : vector<8x128xf32>
    %31 = arith.divf %29, %30 : vector<8x128xf32>
    %32 = vector.extract_strided_slice %25 {offsets = [0, 128], sizes = [8, 128], strides = [1, 1]} : vector<8x512xf32> to vector<8x128xf32>
    %33 = arith.negf %32 : vector<8x128xf32>
    %34 = math.exp %33 : vector<8x128xf32>
    %cst_21 = arith.constant 1.000000e+00 : f32
    %35 = vector.broadcast %cst_21 : f32 to vector<8x128xf32>
    %36 = arith.addf %35, %34 : vector<8x128xf32>
    %37 = arith.divf %35, %36 : vector<8x128xf32>
    %38 = vector.extract_strided_slice %25 {offsets = [0, 256], sizes = [8, 128], strides = [1, 1]} : vector<8x512xf32> to vector<8x128xf32>
    %39 = math.tanh %38 : vector<8x128xf32>
    %40 = vector.extract_strided_slice %25 {offsets = [0, 384], sizes = [8, 128], strides = [1, 1]} : vector<8x512xf32> to vector<8x128xf32>
    %41 = arith.negf %40 : vector<8x128xf32>
    %42 = math.exp %41 : vector<8x128xf32>
    %cst_22 = arith.constant 1.000000e+00 : f32
    %43 = vector.broadcast %cst_22 : f32 to vector<8x128xf32>
    %44 = arith.addf %43, %42 : vector<8x128xf32>
    %45 = arith.divf %43, %44 : vector<8x128xf32>
    %46 = arith.mulf %37, %17 : vector<8x128xf32>
    %47 = arith.mulf %31, %39 : vector<8x128xf32>
    %48 = arith.addf %46, %47 : vector<8x128xf32>
    %49 = math.tanh %48 : vector<8x128xf32>
    %50 = arith.mulf %45, %49 : vector<8x128xf32>
    %51 = arith.truncf %50 : vector<8x128xf32> to vector<8x128xbf16>
    %52 = arith.index_cast %c0_i32 : i32 to index
    %c0_23 = arith.constant 0 : index
    %c0_24 = arith.constant 0 : index
    %53 = vector.load %arg14[%52, %c0_23, %c0_24] : memref<8x8x128xbf16, #tpu.memory_space<vmem>>, vector<1x8x128xbf16>
    %54 = vector.shape_cast %53 : vector<1x8x128xbf16> to vector<8x128xbf16>
    %55 = vector.shape_cast %51 : vector<8x128xbf16> to vector<1x8x128xbf16>
    tpu.vector_store %arg14[%52, %c0_23, %c0_24], %55 {strides = array<i32>} : memref<8x8x128xbf16, #tpu.memory_space<vmem>>, vector<1x8x128xbf16>,
    %56 = arith.index_cast %18 : i32 to index
    %c0_25 = arith.constant 0 : index
    %c0_26 = arith.constant 0 : index
    %57 = vector.load %arg13[%56, %c0_25, %c0_26] : memref<8x8x512xbf16, #tpu.memory_space<vmem>>, vector<1x8x512xbf16>
    %58 = vector.shape_cast %57 : vector<1x8x512xbf16> to vector<8x512xbf16>
    %59 = arith.extf %58 : vector<8x512xbf16> to vector<8x512xf32>
    %c0_27 = arith.constant 0 : index
    %c0_28 = arith.constant 0 : index
    %60 = vector.load %arg5[%c0_27, %c0_28] : memref<128x512xbf16, #tpu.memory_space<vmem>>, vector<128x512xbf16>
    %cst_29 = arith.constant dense<0.000000e+00> : vector<8x512xf32>
    %61 = tpu.matmul %16, %60, %cst_29 {dimension_numbers = #tpu.dot_dimension_numbers<[1], [0], [0], [1], [0, 0, 1, 1], [], []>} : vector<8x128xbf16>, vector<128x512xbf16>, vector<8x512xf32> -> vector<8x512xf32>
    %62 = arith.addf %59, %61 : vector<8x512xf32>
    %63 = vector.extract_strided_slice %62 {offsets = [0, 0], sizes = [8, 128], strides = [1, 1]} : vector<8x512xf32> to vector<8x128xf32>
    %64 = arith.negf %63 : vector<8x128xf32>
    %65 = math.exp %64 : vector<8x128xf32>
    %cst_30 = arith.constant 1.000000e+00 : f32
    %66 = vector.broadcast %cst_30 : f32 to vector<8x128xf32>
    %67 = arith.addf %66, %65 : vector<8x128xf32>
    %68 = arith.divf %66, %67 : vector<8x128xf32>
    %69 = vector.extract_strided_slice %62 {offsets = [0, 128], sizes = [8, 128], strides = [1, 1]} : vector<8x512xf32> to vector<8x128xf32>
    %70 = arith.negf %69 : vector<8x128xf32>
    %71 = math.exp %70 : vector<8x128xf32>
    %cst_31 = arith.constant 1.000000e+00 : f32
    %72 = vector.broadcast %cst_31 : f32 to vector<8x128xf32>
    %73 = arith.addf %72, %71 : vector<8x128xf32>
    %74 = arith.divf %72, %73 : vector<8x128xf32>
    %75 = vector.extract_strided_slice %62 {offsets = [0, 256], sizes = [8, 128], strides = [1, 1]} : vector<8x512xf32> to vector<8x128xf32>
    %76 = math.tanh %75 : vector<8x128xf32>
    %77 = vector.extract_strided_slice %62 {offsets = [0, 384], sizes = [8, 128], strides = [1, 1]} : vector<8x512xf32> to vector<8x128xf32>
    %78 = arith.negf %77 : vector<8x128xf32>
    %79 = math.exp %78 : vector<8x128xf32>
    %cst_32 = arith.constant 1.000000e+00 : f32
    %80 = vector.broadcast %cst_32 : f32 to vector<8x128xf32>
    %81 = arith.addf %80, %79 : vector<8x128xf32>
    %82 = arith.divf %80, %81 : vector<8x128xf32>
    %83 = arith.mulf %74, %17 : vector<8x128xf32>
    %84 = arith.mulf %68, %76 : vector<8x128xf32>
    %85 = arith.addf %83, %84 : vector<8x128xf32>
    %86 = math.tanh %85 : vector<8x128xf32>
    %87 = arith.mulf %82, %86 : vector<8x128xf32>
    %88 = arith.truncf %87 : vector<8x128xf32> to vector<8x128xbf16>
    %89 = arith.index_cast %18 : i32 to index
    %c0_33 = arith.constant 0 : index
    %c0_34 = arith.constant 0 : index
    %90 = vector.load %arg15[%89, %c0_33, %c0_34] : memref<8x8x128xbf16, #tpu.memory_space<vmem>>, vector<1x8x128xbf16>
    %91 = vector.shape_cast %90 : vector<1x8x128xbf16> to vector<8x128xbf16>
    %92 = vector.shape_cast %88 : vector<8x128xbf16> to vector<1x8x128xbf16>
    tpu.vector_store %arg15[%89, %c0_33, %c0_34], %92 {strides = array<i32>} : memref<8x8x128xbf16, #tpu.memory_space<vmem>>, vector<1x8x128xbf16>,
    %c1_i32 = arith.constant 1 : i32
    %c7_i32_35 = arith.constant 7 : i32
    %93 = arith.subi %c7_i32_35, %c1_i32 : i32
    %94 = arith.index_cast %c1_i32 : i32 to index
    %c0_36 = arith.constant 0 : index
    %c0_37 = arith.constant 0 : index
    %95 = vector.load %arg12[%94, %c0_36, %c0_37] : memref<8x8x512xbf16, #tpu.memory_space<vmem>>, vector<1x8x512xbf16>
    %96 = vector.shape_cast %95 : vector<1x8x512xbf16> to vector<8x512xbf16>
    %97 = arith.extf %96 : vector<8x512xbf16> to vector<8x512xf32>
    %c0_38 = arith.constant 0 : index
    %c0_39 = arith.constant 0 : index
    %98 = vector.load %arg4[%c0_38, %c0_39] : memref<128x512xbf16, #tpu.memory_space<vmem>>, vector<128x512xbf16>
    %cst_40 = arith.constant dense<0.000000e+00> : vector<8x512xf32>
    %99 = tpu.matmul %51, %98, %cst_40 {dimension_numbers = #tpu.dot_dimension_numbers<[1], [0], [0], [1], [0, 0, 1, 1], [], []>} : vector<8x128xbf16>, vector<128x512xbf16>, vector<8x512xf32> -> vector<8x512xf32>
    %100 = arith.addf %97, %99 : vector<8x512xf32>
    %101 = vector.extract_strided_slice %100 {offsets = [0, 0], sizes = [8, 128], strides = [1, 1]} : vector<8x512xf32> to vector<8x128xf32>
    %102 = arith.negf %101 : vector<8x128xf32>
    %103 = math.exp %102 : vector<8x128xf32>
    %cst_41 = arith.constant 1.000000e+00 : f32
    %104 = vector.broadcast %cst_41 : f32 to vector<8x128xf32>
    %105 = arith.addf %104, %103 : vector<8x128xf32>
    %106 = arith.divf %104, %105 : vector<8x128xf32>
    %107 = vector.extract_strided_slice %100 {offsets = [0, 128], sizes = [8, 128], strides = [1, 1]} : vector<8x512xf32> to vector<8x128xf32>
    %108 = arith.negf %107 : vector<8x128xf32>
    %109 = math.exp %108 : vector<8x128xf32>
    %cst_42 = arith.constant 1.000000e+00 : f32
    %110 = vector.broadcast %cst_42 : f32 to vector<8x128xf32>
    %111 = arith.addf %110, %109 : vector<8x128xf32>
    %112 = arith.divf %110, %111 : vector<8x128xf32>
    %113 = vector.extract_strided_slice %100 {offsets = [0, 256], sizes = [8, 128], strides = [1, 1]} : vector<8x512xf32> to vector<8x128xf32>
    %114 = math.tanh %113 : vector<8x128xf32>
    %115 = vector.extract_strided_slice %100 {offsets = [0, 384], sizes = [8, 128], strides = [1, 1]} : vector<8x512xf32> to vector<8x128xf32>
    %116 = arith.negf %115 : vector<8x128xf32>
    %117 = math.exp %116 : vector<8x128xf32>
    %cst_43 = arith.constant 1.000000e+00 : f32
    %118 = vector.broadcast %cst_43 : f32 to vector<8x128xf32>
    %119 = arith.addf %118, %117 : vector<8x128xf32>
    %120 = arith.divf %118, %119 : vector<8x128xf32>
    %121 = arith.mulf %112, %48 : vector<8x128xf32>
    %122 = arith.mulf %106, %114 : vector<8x128xf32>
    %123 = arith.addf %121, %122 : vector<8x128xf32>
    %124 = math.tanh %123 : vector<8x128xf32>
    %125 = arith.mulf %120, %124 : vector<8x128xf32>
    %126 = arith.truncf %125 : vector<8x128xf32> to vector<8x128xbf16>
    %127 = arith.index_cast %c1_i32 : i32 to index
    %c0_44 = arith.constant 0 : index
    %c0_45 = arith.constant 0 : index
    %128 = vector.load %arg14[%127, %c0_44, %c0_45] : memref<8x8x128xbf16, #tpu.memory_space<vmem>>, vector<1x8x128xbf16>
    %129 = vector.shape_cast %128 : vector<1x8x128xbf16> to vector<8x128xbf16>
    %130 = vector.shape_cast %126 : vector<8x128xbf16> to vector<1x8x128xbf16>
    tpu.vector_store %arg14[%127, %c0_44, %c0_45], %130 {strides = array<i32>} : memref<8x8x128xbf16, #tpu.memory_space<vmem>>, vector<1x8x128xbf16>,
    %131 = arith.index_cast %93 : i32 to index
    %c0_46 = arith.constant 0 : index
    %c0_47 = arith.constant 0 : index
    %132 = vector.load %arg13[%131, %c0_46, %c0_47] : memref<8x8x512xbf16, #tpu.memory_space<vmem>>, vector<1x8x512xbf16>
    %133 = vector.shape_cast %132 : vector<1x8x512xbf16> to vector<8x512xbf16>
    %134 = arith.extf %133 : vector<8x512xbf16> to vector<8x512xf32>
    %c0_48 = arith.constant 0 : index
    %c0_49 = arith.constant 0 : index
    %135 = vector.load %arg5[%c0_48, %c0_49] : memref<128x512xbf16, #tpu.memory_space<vmem>>, vector<128x512xbf16>
    %cst_50 = arith.constant dense<0.000000e+00> : vector<8x512xf32>
    %136 = tpu.matmul %88, %135, %cst_50 {dimension_numbers = #tpu.dot_dimension_numbers<[1], [0], [0], [1], [0, 0, 1, 1], [], []>} : vector<8x128xbf16>, vector<128x512xbf16>, vector<8x512xf32> -> vector<8x512xf32>
    %137 = arith.addf %134, %136 : vector<8x512xf32>
    %138 = vector.extract_strided_slice %137 {offsets = [0, 0], sizes = [8, 128], strides = [1, 1]} : vector<8x512xf32> to vector<8x128xf32>
    %139 = arith.negf %138 : vector<8x128xf32>
    %140 = math.exp %139 : vector<8x128xf32>
    %cst_51 = arith.constant 1.000000e+00 : f32
    %141 = vector.broadcast %cst_51 : f32 to vector<8x128xf32>
    %142 = arith.addf %141, %140 : vector<8x128xf32>
    %143 = arith.divf %141, %142 : vector<8x128xf32>
    %144 = vector.extract_strided_slice %137 {offsets = [0, 128], sizes = [8, 128], strides = [1, 1]} : vector<8x512xf32> to vector<8x128xf32>
    %145 = arith.negf %144 : vector<8x128xf32>
    %146 = math.exp %145 : vector<8x128xf32>
    %cst_52 = arith.constant 1.000000e+00 : f32
    %147 = vector.broadcast %cst_52 : f32 to vector<8x128xf32>
    %148 = arith.addf %147, %146 : vector<8x128xf32>
    %149 = arith.divf %147, %148 : vector<8x128xf32>
    %150 = vector.extract_strided_slice %137 {offsets = [0, 256], sizes = [8, 128], strides = [1, 1]} : vector<8x512xf32> to vector<8x128xf32>
    %151 = math.tanh %150 : vector<8x128xf32>
    %152 = vector.extract_strided_slice %137 {offsets = [0, 384], sizes = [8, 128], strides = [1, 1]} : vector<8x512xf32> to vector<8x128xf32>
    %153 = arith.negf %152 : vector<8x128xf32>
    %154 = math.exp %153 : vector<8x128xf32>
    %cst_53 = arith.constant 1.000000e+00 : f32
    %155 = vector.broadcast %cst_53 : f32 to vector<8x128xf32>
    %156 = arith.addf %155, %154 : vector<8x128xf32>
    %157 = arith.divf %155, %156 : vector<8x128xf32>
    %158 = arith.mulf %149, %85 : vector<8x128xf32>
    %159 = arith.mulf %143, %151 : vector<8x128xf32>
    %160 = arith.addf %158, %159 : vector<8x128xf32>
    %161 = math.tanh %160 : vector<8x128xf32>
    %162 = arith.mulf %157, %161 : vector<8x128xf32>
    %163 = arith.truncf %162 : vector<8x128xf32> to vector<8x128xbf16>
    %164 = arith.index_cast %93 : i32 to index
    %c0_54 = arith.constant 0 : index
    %c0_55 = arith.constant 0 : index
    %165 = vector.load %arg15[%164, %c0_54, %c0_55] : memref<8x8x128xbf16, #tpu.memory_space<vmem>>, vector<1x8x128xbf16>
    %166 = vector.shape_cast %165 : vector<1x8x128xbf16> to vector<8x128xbf16>
    %167 = vector.shape_cast %163 : vector<8x128xbf16> to vector<1x8x128xbf16>
    tpu.vector_store %arg15[%164, %c0_54, %c0_55], %167 {strides = array<i32>} : memref<8x8x128xbf16, #tpu.memory_space<vmem>>, vector<1x8x128xbf16>,
    %c2_i32 = arith.constant 2 : i32
    %c7_i32_56 = arith.constant 7 : i32
    %168 = arith.subi %c7_i32_56, %c2_i32 : i32
    %169 = arith.index_cast %c2_i32 : i32 to index
    %c0_57 = arith.constant 0 : index
    %c0_58 = arith.constant 0 : index
    %170 = vector.load %arg12[%169, %c0_57, %c0_58] : memref<8x8x512xbf16, #tpu.memory_space<vmem>>, vector<1x8x512xbf16>
    %171 = vector.shape_cast %170 : vector<1x8x512xbf16> to vector<8x512xbf16>
    %172 = arith.extf %171 : vector<8x512xbf16> to vector<8x512xf32>
    %c0_59 = arith.constant 0 : index
    %c0_60 = arith.constant 0 : index
    %173 = vector.load %arg4[%c0_59, %c0_60] : memref<128x512xbf16, #tpu.memory_space<vmem>>, vector<128x512xbf16>
    %cst_61 = arith.constant dense<0.000000e+00> : vector<8x512xf32>
    %174 = tpu.matmul %126, %173, %cst_61 {dimension_numbers = #tpu.dot_dimension_numbers<[1], [0], [0], [1], [0, 0, 1, 1], [], []>} : vector<8x128xbf16>, vector<128x512xbf16>, vector<8x512xf32> -> vector<8x512xf32>
    %175 = arith.addf %172, %174 : vector<8x512xf32>
    %176 = vector.extract_strided_slice %175 {offsets = [0, 0], sizes = [8, 128], strides = [1, 1]} : vector<8x512xf32> to vector<8x128xf32>
    %177 = arith.negf %176 : vector<8x128xf32>
    %178 = math.exp %177 : vector<8x128xf32>
    %cst_62 = arith.constant 1.000000e+00 : f32
    %179 = vector.broadcast %cst_62 : f32 to vector<8x128xf32>
    %180 = arith.addf %179, %178 : vector<8x128xf32>
    %181 = arith.divf %179, %180 : vector<8x128xf32>
    %182 = vector.extract_strided_slice %175 {offsets = [0, 128], sizes = [8, 128], strides = [1, 1]} : vector<8x512xf32> to vector<8x128xf32>
    %183 = arith.negf %182 : vector<8x128xf32>
    %184 = math.exp %183 : vector<8x128xf32>
    %cst_63 = arith.constant 1.000000e+00 : f32
    %185 = vector.broadcast %cst_63 : f32 to vector<8x128xf32>
    %186 = arith.addf %185, %184 : vector<8x128xf32>
    %187 = arith.divf %185, %186 : vector<8x128xf32>
    %188 = vector.extract_strided_slice %175 {offsets = [0, 256], sizes = [8, 128], strides = [1, 1]} : vector<8x512xf32> to vector<8x128xf32>
    %189 = math.tanh %188 : vector<8x128xf32>
    %190 = vector.extract_strided_slice %175 {offsets = [0, 384], sizes = [8, 128], strides = [1, 1]} : vector<8x512xf32> to vector<8x128xf32>
    %191 = arith.negf %190 : vector<8x128xf32>
    %192 = math.exp %191 : vector<8x128xf32>
    %cst_64 = arith.constant 1.000000e+00 : f32
    %193 = vector.broadcast %cst_64 : f32 to vector<8x128xf32>
    %194 = arith.addf %193, %192 : vector<8x128xf32>
    %195 = arith.divf %193, %194 : vector<8x128xf32>
    %196 = arith.mulf %187, %123 : vector<8x128xf32>
    %197 = arith.mulf %181, %189 : vector<8x128xf32>
    %198 = arith.addf %196, %197 : vector<8x128xf32>
    %199 = math.tanh %198 : vector<8x128xf32>
    %200 = arith.mulf %195, %199 : vector<8x128xf32>
    %201 = arith.truncf %200 : vector<8x128xf32> to vector<8x128xbf16>
    %202 = arith.index_cast %c2_i32 : i32 to index
    %c0_65 = arith.constant 0 : index
    %c0_66 = arith.constant 0 : index
    %203 = vector.load %arg14[%202, %c0_65, %c0_66] : memref<8x8x128xbf16, #tpu.memory_space<vmem>>, vector<1x8x128xbf16>
    %204 = vector.shape_cast %203 : vector<1x8x128xbf16> to vector<8x128xbf16>
    %205 = vector.shape_cast %201 : vector<8x128xbf16> to vector<1x8x128xbf16>
    tpu.vector_store %arg14[%202, %c0_65, %c0_66], %205 {strides = array<i32>} : memref<8x8x128xbf16, #tpu.memory_space<vmem>>, vector<1x8x128xbf16>,
    %206 = arith.index_cast %168 : i32 to index
    %c0_67 = arith.constant 0 : index
    %c0_68 = arith.constant 0 : index
    %207 = vector.load %arg13[%206, %c0_67, %c0_68] : memref<8x8x512xbf16, #tpu.memory_space<vmem>>, vector<1x8x512xbf16>
    %208 = vector.shape_cast %207 : vector<1x8x512xbf16> to vector<8x512xbf16>
    %209 = arith.extf %208 : vector<8x512xbf16> to vector<8x512xf32>
    %c0_69 = arith.constant 0 : index
    %c0_70 = arith.constant 0 : index
    %210 = vector.load %arg5[%c0_69, %c0_70] : memref<128x512xbf16, #tpu.memory_space<vmem>>, vector<128x512xbf16>
    %cst_71 = arith.constant dense<0.000000e+00> : vector<8x512xf32>
    %211 = tpu.matmul %163, %210, %cst_71 {dimension_numbers = #tpu.dot_dimension_numbers<[1], [0], [0], [1], [0, 0, 1, 1], [], []>} : vector<8x128xbf16>, vector<128x512xbf16>, vector<8x512xf32> -> vector<8x512xf32>
    %212 = arith.addf %209, %211 : vector<8x512xf32>
    %213 = vector.extract_strided_slice %212 {offsets = [0, 0], sizes = [8, 128], strides = [1, 1]} : vector<8x512xf32> to vector<8x128xf32>
    %214 = arith.negf %213 : vector<8x128xf32>
    %215 = math.exp %214 : vector<8x128xf32>
    %cst_72 = arith.constant 1.000000e+00 : f32
    %216 = vector.broadcast %cst_72 : f32 to vector<8x128xf32>
    %217 = arith.addf %216, %215 : vector<8x128xf32>
    %218 = arith.divf %216, %217 : vector<8x128xf32>
    %219 = vector.extract_strided_slice %212 {offsets = [0, 128], sizes = [8, 128], strides = [1, 1]} : vector<8x512xf32> to vector<8x128xf32>
    %220 = arith.negf %219 : vector<8x128xf32>
    %221 = math.exp %220 : vector<8x128xf32>
    %cst_73 = arith.constant 1.000000e+00 : f32
    %222 = vector.broadcast %cst_73 : f32 to vector<8x128xf32>
    %223 = arith.addf %222, %221 : vector<8x128xf32>
    %224 = arith.divf %222, %223 : vector<8x128xf32>
    %225 = vector.extract_strided_slice %212 {offsets = [0, 256], sizes = [8, 128], strides = [1, 1]} : vector<8x512xf32> to vector<8x128xf32>
    %226 = math.tanh %225 : vector<8x128xf32>
    %227 = vector.extract_strided_slice %212 {offsets = [0, 384], sizes = [8, 128], strides = [1, 1]} : vector<8x512xf32> to vector<8x128xf32>
    %228 = arith.negf %227 : vector<8x128xf32>
    %229 = math.exp %228 : vector<8x128xf32>
    %cst_74 = arith.constant 1.000000e+00 : f32
    %230 = vector.broadcast %cst_74 : f32 to vector<8x128xf32>
    %231 = arith.addf %230, %229 : vector<8x128xf32>
    %232 = arith.divf %230, %231 : vector<8x128xf32>
    %233 = arith.mulf %224, %160 : vector<8x128xf32>
    %234 = arith.mulf %218, %226 : vector<8x128xf32>
    %235 = arith.addf %233, %234 : vector<8x128xf32>
    %236 = math.tanh %235 : vector<8x128xf32>
    %237 = arith.mulf %232, %236 : vector<8x128xf32>
    %238 = arith.truncf %237 : vector<8x128xf32> to vector<8x128xbf16>
    %239 = arith.index_cast %168 : i32 to index
    %c0_75 = arith.constant 0 : index
    %c0_76 = arith.constant 0 : index
    %240 = vector.load %arg15[%239, %c0_75, %c0_76] : memref<8x8x128xbf16, #tpu.memory_space<vmem>>, vector<1x8x128xbf16>
    %241 = vector.shape_cast %240 : vector<1x8x128xbf16> to vector<8x128xbf16>
    %242 = vector.shape_cast %238 : vector<8x128xbf16> to vector<1x8x128xbf16>
    tpu.vector_store %arg15[%239, %c0_75, %c0_76], %242 {strides = array<i32>} : memref<8x8x128xbf16, #tpu.memory_space<vmem>>, vector<1x8x128xbf16>,
    %c3_i32 = arith.constant 3 : i32
    %c7_i32_77 = arith.constant 7 : i32
    %243 = arith.subi %c7_i32_77, %c3_i32 : i32
    %244 = arith.index_cast %c3_i32 : i32 to index
    %c0_78 = arith.constant 0 : index
    %c0_79 = arith.constant 0 : index
    %245 = vector.load %arg12[%244, %c0_78, %c0_79] : memref<8x8x512xbf16, #tpu.memory_space<vmem>>, vector<1x8x512xbf16>
    %246 = vector.shape_cast %245 : vector<1x8x512xbf16> to vector<8x512xbf16>
    %247 = arith.extf %246 : vector<8x512xbf16> to vector<8x512xf32>
    %c0_80 = arith.constant 0 : index
    %c0_81 = arith.constant 0 : index
    %248 = vector.load %arg4[%c0_80, %c0_81] : memref<128x512xbf16, #tpu.memory_space<vmem>>, vector<128x512xbf16>
    %cst_82 = arith.constant dense<0.000000e+00> : vector<8x512xf32>
    %249 = tpu.matmul %201, %248, %cst_82 {dimension_numbers = #tpu.dot_dimension_numbers<[1], [0], [0], [1], [0, 0, 1, 1], [], []>} : vector<8x128xbf16>, vector<128x512xbf16>, vector<8x512xf32> -> vector<8x512xf32>
    %250 = arith.addf %247, %249 : vector<8x512xf32>
    %251 = vector.extract_strided_slice %250 {offsets = [0, 0], sizes = [8, 128], strides = [1, 1]} : vector<8x512xf32> to vector<8x128xf32>
    %252 = arith.negf %251 : vector<8x128xf32>
    %253 = math.exp %252 : vector<8x128xf32>
    %cst_83 = arith.constant 1.000000e+00 : f32
    %254 = vector.broadcast %cst_83 : f32 to vector<8x128xf32>
    %255 = arith.addf %254, %253 : vector<8x128xf32>
    %256 = arith.divf %254, %255 : vector<8x128xf32>
    %257 = vector.extract_strided_slice %250 {offsets = [0, 128], sizes = [8, 128], strides = [1, 1]} : vector<8x512xf32> to vector<8x128xf32>
    %258 = arith.negf %257 : vector<8x128xf32>
    %259 = math.exp %258 : vector<8x128xf32>
    %cst_84 = arith.constant 1.000000e+00 : f32
    %260 = vector.broadcast %cst_84 : f32 to vector<8x128xf32>
    %261 = arith.addf %260, %259 : vector<8x128xf32>
    %262 = arith.divf %260, %261 : vector<8x128xf32>
    %263 = vector.extract_strided_slice %250 {offsets = [0, 256], sizes = [8, 128], strides = [1, 1]} : vector<8x512xf32> to vector<8x128xf32>
    %264 = math.tanh %263 : vector<8x128xf32>
    %265 = vector.extract_strided_slice %250 {offsets = [0, 384], sizes = [8, 128], strides = [1, 1]} : vector<8x512xf32> to vector<8x128xf32>
    %266 = arith.negf %265 : vector<8x128xf32>
    %267 = math.exp %266 : vector<8x128xf32>
    %cst_85 = arith.constant 1.000000e+00 : f32
    %268 = vector.broadcast %cst_85 : f32 to vector<8x128xf32>
    %269 = arith.addf %268, %267 : vector<8x128xf32>
    %270 = arith.divf %268, %269 : vector<8x128xf32>
    %271 = arith.mulf %262, %198 : vector<8x128xf32>
    %272 = arith.mulf %256, %264 : vector<8x128xf32>
    %273 = arith.addf %271, %272 : vector<8x128xf32>
    %274 = math.tanh %273 : vector<8x128xf32>
    %275 = arith.mulf %270, %274 : vector<8x128xf32>
    %276 = arith.truncf %275 : vector<8x128xf32> to vector<8x128xbf16>
    %277 = arith.index_cast %c3_i32 : i32 to index
    %c0_86 = arith.constant 0 : index
    %c0_87 = arith.constant 0 : index
    %278 = vector.load %arg14[%277, %c0_86, %c0_87] : memref<8x8x128xbf16, #tpu.memory_space<vmem>>, vector<1x8x128xbf16>
    %279 = vector.shape_cast %278 : vector<1x8x128xbf16> to vector<8x128xbf16>
    %280 = vector.shape_cast %276 : vector<8x128xbf16> to vector<1x8x128xbf16>
    tpu.vector_store %arg14[%277, %c0_86, %c0_87], %280 {strides = array<i32>} : memref<8x8x128xbf16, #tpu.memory_space<vmem>>, vector<1x8x128xbf16>,
    %281 = arith.index_cast %243 : i32 to index
    %c0_88 = arith.constant 0 : index
    %c0_89 = arith.constant 0 : index
    %282 = vector.load %arg13[%281, %c0_88, %c0_89] : memref<8x8x512xbf16, #tpu.memory_space<vmem>>, vector<1x8x512xbf16>
    %283 = vector.shape_cast %282 : vector<1x8x512xbf16> to vector<8x512xbf16>
    %284 = arith.extf %283 : vector<8x512xbf16> to vector<8x512xf32>
    %c0_90 = arith.constant 0 : index
    %c0_91 = arith.constant 0 : index
    %285 = vector.load %arg5[%c0_90, %c0_91] : memref<128x512xbf16, #tpu.memory_space<vmem>>, vector<128x512xbf16>
    %cst_92 = arith.constant dense<0.000000e+00> : vector<8x512xf32>
    %286 = tpu.matmul %238, %285, %cst_92 {dimension_numbers = #tpu.dot_dimension_numbers<[1], [0], [0], [1], [0, 0, 1, 1], [], []>} : vector<8x128xbf16>, vector<128x512xbf16>, vector<8x512xf32> -> vector<8x512xf32>
    %287 = arith.addf %284, %286 : vector<8x512xf32>
    %288 = vector.extract_strided_slice %287 {offsets = [0, 0], sizes = [8, 128], strides = [1, 1]} : vector<8x512xf32> to vector<8x128xf32>
    %289 = arith.negf %288 : vector<8x128xf32>
    %290 = math.exp %289 : vector<8x128xf32>
    %cst_93 = arith.constant 1.000000e+00 : f32
    %291 = vector.broadcast %cst_93 : f32 to vector<8x128xf32>
    %292 = arith.addf %291, %290 : vector<8x128xf32>
    %293 = arith.divf %291, %292 : vector<8x128xf32>
    %294 = vector.extract_strided_slice %287 {offsets = [0, 128], sizes = [8, 128], strides = [1, 1]} : vector<8x512xf32> to vector<8x128xf32>
    %295 = arith.negf %294 : vector<8x128xf32>
    %296 = math.exp %295 : vector<8x128xf32>
    %cst_94 = arith.constant 1.000000e+00 : f32
    %297 = vector.broadcast %cst_94 : f32 to vector<8x128xf32>
    %298 = arith.addf %297, %296 : vector<8x128xf32>
    %299 = arith.divf %297, %298 : vector<8x128xf32>
    %300 = vector.extract_strided_slice %287 {offsets = [0, 256], sizes = [8, 128], strides = [1, 1]} : vector<8x512xf32> to vector<8x128xf32>
    %301 = math.tanh %300 : vector<8x128xf32>
    %302 = vector.extract_strided_slice %287 {offsets = [0, 384], sizes = [8, 128], strides = [1, 1]} : vector<8x512xf32> to vector<8x128xf32>
    %303 = arith.negf %302 : vector<8x128xf32>
    %304 = math.exp %303 : vector<8x128xf32>
    %cst_95 = arith.constant 1.000000e+00 : f32
    %305 = vector.broadcast %cst_95 : f32 to vector<8x128xf32>
    %306 = arith.addf %305, %304 : vector<8x128xf32>
    %307 = arith.divf %305, %306 : vector<8x128xf32>
    %308 = arith.mulf %299, %235 : vector<8x128xf32>
    %309 = arith.mulf %293, %301 : vector<8x128xf32>
    %310 = arith.addf %308, %309 : vector<8x128xf32>
    %311 = math.tanh %310 : vector<8x128xf32>
    %312 = arith.mulf %307, %311 : vector<8x128xf32>
    %313 = arith.truncf %312 : vector<8x128xf32> to vector<8x128xbf16>
    %314 = arith.index_cast %243 : i32 to index
    %c0_96 = arith.constant 0 : index
    %c0_97 = arith.constant 0 : index
    %315 = vector.load %arg15[%314, %c0_96, %c0_97] : memref<8x8x128xbf16, #tpu.memory_space<vmem>>, vector<1x8x128xbf16>
    %316 = vector.shape_cast %315 : vector<1x8x128xbf16> to vector<8x128xbf16>
    %317 = vector.shape_cast %313 : vector<8x128xbf16> to vector<1x8x128xbf16>
    tpu.vector_store %arg15[%314, %c0_96, %c0_97], %317 {strides = array<i32>} : memref<8x8x128xbf16, #tpu.memory_space<vmem>>, vector<1x8x128xbf16>,
    %c4_i32 = arith.constant 4 : i32
    %c7_i32_98 = arith.constant 7 : i32
    %318 = arith.subi %c7_i32_98, %c4_i32 : i32
    %319 = arith.index_cast %c4_i32 : i32 to index
    %c0_99 = arith.constant 0 : index
    %c0_100 = arith.constant 0 : index
    %320 = vector.load %arg12[%319, %c0_99, %c0_100] : memref<8x8x512xbf16, #tpu.memory_space<vmem>>, vector<1x8x512xbf16>
    %321 = vector.shape_cast %320 : vector<1x8x512xbf16> to vector<8x512xbf16>
    %322 = arith.extf %321 : vector<8x512xbf16> to vector<8x512xf32>
    %c0_101 = arith.constant 0 : index
    %c0_102 = arith.constant 0 : index
    %323 = vector.load %arg4[%c0_101, %c0_102] : memref<128x512xbf16, #tpu.memory_space<vmem>>, vector<128x512xbf16>
    %cst_103 = arith.constant dense<0.000000e+00> : vector<8x512xf32>
    %324 = tpu.matmul %276, %323, %cst_103 {dimension_numbers = #tpu.dot_dimension_numbers<[1], [0], [0], [1], [0, 0, 1, 1], [], []>} : vector<8x128xbf16>, vector<128x512xbf16>, vector<8x512xf32> -> vector<8x512xf32>
    %325 = arith.addf %322, %324 : vector<8x512xf32>
    %326 = vector.extract_strided_slice %325 {offsets = [0, 0], sizes = [8, 128], strides = [1, 1]} : vector<8x512xf32> to vector<8x128xf32>
    %327 = arith.negf %326 : vector<8x128xf32>
    %328 = math.exp %327 : vector<8x128xf32>
    %cst_104 = arith.constant 1.000000e+00 : f32
    %329 = vector.broadcast %cst_104 : f32 to vector<8x128xf32>
    %330 = arith.addf %329, %328 : vector<8x128xf32>
    %331 = arith.divf %329, %330 : vector<8x128xf32>
    %332 = vector.extract_strided_slice %325 {offsets = [0, 128], sizes = [8, 128], strides = [1, 1]} : vector<8x512xf32> to vector<8x128xf32>
    %333 = arith.negf %332 : vector<8x128xf32>
    %334 = math.exp %333 : vector<8x128xf32>
    %cst_105 = arith.constant 1.000000e+00 : f32
    %335 = vector.broadcast %cst_105 : f32 to vector<8x128xf32>
    %336 = arith.addf %335, %334 : vector<8x128xf32>
    %337 = arith.divf %335, %336 : vector<8x128xf32>
    %338 = vector.extract_strided_slice %325 {offsets = [0, 256], sizes = [8, 128], strides = [1, 1]} : vector<8x512xf32> to vector<8x128xf32>
    %339 = math.tanh %338 : vector<8x128xf32>
    %340 = vector.extract_strided_slice %325 {offsets = [0, 384], sizes = [8, 128], strides = [1, 1]} : vector<8x512xf32> to vector<8x128xf32>
    %341 = arith.negf %340 : vector<8x128xf32>
    %342 = math.exp %341 : vector<8x128xf32>
    %cst_106 = arith.constant 1.000000e+00 : f32
    %343 = vector.broadcast %cst_106 : f32 to vector<8x128xf32>
    %344 = arith.addf %343, %342 : vector<8x128xf32>
    %345 = arith.divf %343, %344 : vector<8x128xf32>
    %346 = arith.mulf %337, %273 : vector<8x128xf32>
    %347 = arith.mulf %331, %339 : vector<8x128xf32>
    %348 = arith.addf %346, %347 : vector<8x128xf32>
    %349 = math.tanh %348 : vector<8x128xf32>
    %350 = arith.mulf %345, %349 : vector<8x128xf32>
    %351 = arith.truncf %350 : vector<8x128xf32> to vector<8x128xbf16>
    %352 = arith.index_cast %c4_i32 : i32 to index
    %c0_107 = arith.constant 0 : index
    %c0_108 = arith.constant 0 : index
    %353 = vector.load %arg14[%352, %c0_107, %c0_108] : memref<8x8x128xbf16, #tpu.memory_space<vmem>>, vector<1x8x128xbf16>
    %354 = vector.shape_cast %353 : vector<1x8x128xbf16> to vector<8x128xbf16>
    %355 = vector.shape_cast %351 : vector<8x128xbf16> to vector<1x8x128xbf16>
    tpu.vector_store %arg14[%352, %c0_107, %c0_108], %355 {strides = array<i32>} : memref<8x8x128xbf16, #tpu.memory_space<vmem>>, vector<1x8x128xbf16>,
    %356 = arith.index_cast %318 : i32 to index
    %c0_109 = arith.constant 0 : index
    %c0_110 = arith.constant 0 : index
    %357 = vector.load %arg13[%356, %c0_109, %c0_110] : memref<8x8x512xbf16, #tpu.memory_space<vmem>>, vector<1x8x512xbf16>
    %358 = vector.shape_cast %357 : vector<1x8x512xbf16> to vector<8x512xbf16>
    %359 = arith.extf %358 : vector<8x512xbf16> to vector<8x512xf32>
    %c0_111 = arith.constant 0 : index
    %c0_112 = arith.constant 0 : index
    %360 = vector.load %arg5[%c0_111, %c0_112] : memref<128x512xbf16, #tpu.memory_space<vmem>>, vector<128x512xbf16>
    %cst_113 = arith.constant dense<0.000000e+00> : vector<8x512xf32>
    %361 = tpu.matmul %313, %360, %cst_113 {dimension_numbers = #tpu.dot_dimension_numbers<[1], [0], [0], [1], [0, 0, 1, 1], [], []>} : vector<8x128xbf16>, vector<128x512xbf16>, vector<8x512xf32> -> vector<8x512xf32>
    %362 = arith.addf %359, %361 : vector<8x512xf32>
    %363 = vector.extract_strided_slice %362 {offsets = [0, 0], sizes = [8, 128], strides = [1, 1]} : vector<8x512xf32> to vector<8x128xf32>
    %364 = arith.negf %363 : vector<8x128xf32>
    %365 = math.exp %364 : vector<8x128xf32>
    %cst_114 = arith.constant 1.000000e+00 : f32
    %366 = vector.broadcast %cst_114 : f32 to vector<8x128xf32>
    %367 = arith.addf %366, %365 : vector<8x128xf32>
    %368 = arith.divf %366, %367 : vector<8x128xf32>
    %369 = vector.extract_strided_slice %362 {offsets = [0, 128], sizes = [8, 128], strides = [1, 1]} : vector<8x512xf32> to vector<8x128xf32>
    %370 = arith.negf %369 : vector<8x128xf32>
    %371 = math.exp %370 : vector<8x128xf32>
    %cst_115 = arith.constant 1.000000e+00 : f32
    %372 = vector.broadcast %cst_115 : f32 to vector<8x128xf32>
    %373 = arith.addf %372, %371 : vector<8x128xf32>
    %374 = arith.divf %372, %373 : vector<8x128xf32>
    %375 = vector.extract_strided_slice %362 {offsets = [0, 256], sizes = [8, 128], strides = [1, 1]} : vector<8x512xf32> to vector<8x128xf32>
    %376 = math.tanh %375 : vector<8x128xf32>
    %377 = vector.extract_strided_slice %362 {offsets = [0, 384], sizes = [8, 128], strides = [1, 1]} : vector<8x512xf32> to vector<8x128xf32>
    %378 = arith.negf %377 : vector<8x128xf32>
    %379 = math.exp %378 : vector<8x128xf32>
    %cst_116 = arith.constant 1.000000e+00 : f32
    %380 = vector.broadcast %cst_116 : f32 to vector<8x128xf32>
    %381 = arith.addf %380, %379 : vector<8x128xf32>
    %382 = arith.divf %380, %381 : vector<8x128xf32>
    %383 = arith.mulf %374, %310 : vector<8x128xf32>
    %384 = arith.mulf %368, %376 : vector<8x128xf32>
    %385 = arith.addf %383, %384 : vector<8x128xf32>
    %386 = math.tanh %385 : vector<8x128xf32>
    %387 = arith.mulf %382, %386 : vector<8x128xf32>
    %388 = arith.truncf %387 : vector<8x128xf32> to vector<8x128xbf16>
    %389 = arith.index_cast %318 : i32 to index
    %c0_117 = arith.constant 0 : index
    %c0_118 = arith.constant 0 : index
    %390 = vector.load %arg15[%389, %c0_117, %c0_118] : memref<8x8x128xbf16, #tpu.memory_space<vmem>>, vector<1x8x128xbf16>
    %391 = vector.shape_cast %390 : vector<1x8x128xbf16> to vector<8x128xbf16>
    %392 = vector.shape_cast %388 : vector<8x128xbf16> to vector<1x8x128xbf16>
    tpu.vector_store %arg15[%389, %c0_117, %c0_118], %392 {strides = array<i32>} : memref<8x8x128xbf16, #tpu.memory_space<vmem>>, vector<1x8x128xbf16>,
    %c5_i32 = arith.constant 5 : i32
    %c7_i32_119 = arith.constant 7 : i32
    %393 = arith.subi %c7_i32_119, %c5_i32 : i32
    %394 = arith.index_cast %c5_i32 : i32 to index
    %c0_120 = arith.constant 0 : index
    %c0_121 = arith.constant 0 : index
    %395 = vector.load %arg12[%394, %c0_120, %c0_121] : memref<8x8x512xbf16, #tpu.memory_space<vmem>>, vector<1x8x512xbf16>
    %396 = vector.shape_cast %395 : vector<1x8x512xbf16> to vector<8x512xbf16>
    %397 = arith.extf %396 : vector<8x512xbf16> to vector<8x512xf32>
    %c0_122 = arith.constant 0 : index
    %c0_123 = arith.constant 0 : index
    %398 = vector.load %arg4[%c0_122, %c0_123] : memref<128x512xbf16, #tpu.memory_space<vmem>>, vector<128x512xbf16>
    %cst_124 = arith.constant dense<0.000000e+00> : vector<8x512xf32>
    %399 = tpu.matmul %351, %398, %cst_124 {dimension_numbers = #tpu.dot_dimension_numbers<[1], [0], [0], [1], [0, 0, 1, 1], [], []>} : vector<8x128xbf16>, vector<128x512xbf16>, vector<8x512xf32> -> vector<8x512xf32>
    %400 = arith.addf %397, %399 : vector<8x512xf32>
    %401 = vector.extract_strided_slice %400 {offsets = [0, 0], sizes = [8, 128], strides = [1, 1]} : vector<8x512xf32> to vector<8x128xf32>
    %402 = arith.negf %401 : vector<8x128xf32>
    %403 = math.exp %402 : vector<8x128xf32>
    %cst_125 = arith.constant 1.000000e+00 : f32
    %404 = vector.broadcast %cst_125 : f32 to vector<8x128xf32>
    %405 = arith.addf %404, %403 : vector<8x128xf32>
    %406 = arith.divf %404, %405 : vector<8x128xf32>
    %407 = vector.extract_strided_slice %400 {offsets = [0, 128], sizes = [8, 128], strides = [1, 1]} : vector<8x512xf32> to vector<8x128xf32>
    %408 = arith.negf %407 : vector<8x128xf32>
    %409 = math.exp %408 : vector<8x128xf32>
    %cst_126 = arith.constant 1.000000e+00 : f32
    %410 = vector.broadcast %cst_126 : f32 to vector<8x128xf32>
    %411 = arith.addf %410, %409 : vector<8x128xf32>
    %412 = arith.divf %410, %411 : vector<8x128xf32>
    %413 = vector.extract_strided_slice %400 {offsets = [0, 256], sizes = [8, 128], strides = [1, 1]} : vector<8x512xf32> to vector<8x128xf32>
    %414 = math.tanh %413 : vector<8x128xf32>
    %415 = vector.extract_strided_slice %400 {offsets = [0, 384], sizes = [8, 128], strides = [1, 1]} : vector<8x512xf32> to vector<8x128xf32>
    %416 = arith.negf %415 : vector<8x128xf32>
    %417 = math.exp %416 : vector<8x128xf32>
    %cst_127 = arith.constant 1.000000e+00 : f32
    %418 = vector.broadcast %cst_127 : f32 to vector<8x128xf32>
    %419 = arith.addf %418, %417 : vector<8x128xf32>
    %420 = arith.divf %418, %419 : vector<8x128xf32>
    %421 = arith.mulf %412, %348 : vector<8x128xf32>
    %422 = arith.mulf %406, %414 : vector<8x128xf32>
    %423 = arith.addf %421, %422 : vector<8x128xf32>
    %424 = math.tanh %423 : vector<8x128xf32>
    %425 = arith.mulf %420, %424 : vector<8x128xf32>
    %426 = arith.truncf %425 : vector<8x128xf32> to vector<8x128xbf16>
    %427 = arith.index_cast %c5_i32 : i32 to index
    %c0_128 = arith.constant 0 : index
    %c0_129 = arith.constant 0 : index
    %428 = vector.load %arg14[%427, %c0_128, %c0_129] : memref<8x8x128xbf16, #tpu.memory_space<vmem>>, vector<1x8x128xbf16>
    %429 = vector.shape_cast %428 : vector<1x8x128xbf16> to vector<8x128xbf16>
    %430 = vector.shape_cast %426 : vector<8x128xbf16> to vector<1x8x128xbf16>
    tpu.vector_store %arg14[%427, %c0_128, %c0_129], %430 {strides = array<i32>} : memref<8x8x128xbf16, #tpu.memory_space<vmem>>, vector<1x8x128xbf16>,
    %431 = arith.index_cast %393 : i32 to index
    %c0_130 = arith.constant 0 : index
    %c0_131 = arith.constant 0 : index
    %432 = vector.load %arg13[%431, %c0_130, %c0_131] : memref<8x8x512xbf16, #tpu.memory_space<vmem>>, vector<1x8x512xbf16>
    %433 = vector.shape_cast %432 : vector<1x8x512xbf16> to vector<8x512xbf16>
    %434 = arith.extf %433 : vector<8x512xbf16> to vector<8x512xf32>
    %c0_132 = arith.constant 0 : index
    %c0_133 = arith.constant 0 : index
    %435 = vector.load %arg5[%c0_132, %c0_133] : memref<128x512xbf16, #tpu.memory_space<vmem>>, vector<128x512xbf16>
    %cst_134 = arith.constant dense<0.000000e+00> : vector<8x512xf32>
    %436 = tpu.matmul %388, %435, %cst_134 {dimension_numbers = #tpu.dot_dimension_numbers<[1], [0], [0], [1], [0, 0, 1, 1], [], []>} : vector<8x128xbf16>, vector<128x512xbf16>, vector<8x512xf32> -> vector<8x512xf32>
    %437 = arith.addf %434, %436 : vector<8x512xf32>
    %438 = vector.extract_strided_slice %437 {offsets = [0, 0], sizes = [8, 128], strides = [1, 1]} : vector<8x512xf32> to vector<8x128xf32>
    %439 = arith.negf %438 : vector<8x128xf32>
    %440 = math.exp %439 : vector<8x128xf32>
    %cst_135 = arith.constant 1.000000e+00 : f32
    %441 = vector.broadcast %cst_135 : f32 to vector<8x128xf32>
    %442 = arith.addf %441, %440 : vector<8x128xf32>
    %443 = arith.divf %441, %442 : vector<8x128xf32>
    %444 = vector.extract_strided_slice %437 {offsets = [0, 128], sizes = [8, 128], strides = [1, 1]} : vector<8x512xf32> to vector<8x128xf32>
    %445 = arith.negf %444 : vector<8x128xf32>
    %446 = math.exp %445 : vector<8x128xf32>
    %cst_136 = arith.constant 1.000000e+00 : f32
    %447 = vector.broadcast %cst_136 : f32 to vector<8x128xf32>
    %448 = arith.addf %447, %446 : vector<8x128xf32>
    %449 = arith.divf %447, %448 : vector<8x128xf32>
    %450 = vector.extract_strided_slice %437 {offsets = [0, 256], sizes = [8, 128], strides = [1, 1]} : vector<8x512xf32> to vector<8x128xf32>
    %451 = math.tanh %450 : vector<8x128xf32>
    %452 = vector.extract_strided_slice %437 {offsets = [0, 384], sizes = [8, 128], strides = [1, 1]} : vector<8x512xf32> to vector<8x128xf32>
    %453 = arith.negf %452 : vector<8x128xf32>
    %454 = math.exp %453 : vector<8x128xf32>
    %cst_137 = arith.constant 1.000000e+00 : f32
    %455 = vector.broadcast %cst_137 : f32 to vector<8x128xf32>
    %456 = arith.addf %455, %454 : vector<8x128xf32>
    %457 = arith.divf %455, %456 : vector<8x128xf32>
    %458 = arith.mulf %449, %385 : vector<8x128xf32>
    %459 = arith.mulf %443, %451 : vector<8x128xf32>
    %460 = arith.addf %458, %459 : vector<8x128xf32>
    %461 = math.tanh %460 : vector<8x128xf32>
    %462 = arith.mulf %457, %461 : vector<8x128xf32>
    %463 = arith.truncf %462 : vector<8x128xf32> to vector<8x128xbf16>
    %464 = arith.index_cast %393 : i32 to index
    %c0_138 = arith.constant 0 : index
    %c0_139 = arith.constant 0 : index
    %465 = vector.load %arg15[%464, %c0_138, %c0_139] : memref<8x8x128xbf16, #tpu.memory_space<vmem>>, vector<1x8x128xbf16>
    %466 = vector.shape_cast %465 : vector<1x8x128xbf16> to vector<8x128xbf16>
    %467 = vector.shape_cast %463 : vector<8x128xbf16> to vector<1x8x128xbf16>
    tpu.vector_store %arg15[%464, %c0_138, %c0_139], %467 {strides = array<i32>} : memref<8x8x128xbf16, #tpu.memory_space<vmem>>, vector<1x8x128xbf16>,
    %c6_i32 = arith.constant 6 : i32
    %c7_i32_140 = arith.constant 7 : i32
    %468 = arith.subi %c7_i32_140, %c6_i32 : i32
    %469 = arith.index_cast %c6_i32 : i32 to index
    %c0_141 = arith.constant 0 : index
    %c0_142 = arith.constant 0 : index
    %470 = vector.load %arg12[%469, %c0_141, %c0_142] : memref<8x8x512xbf16, #tpu.memory_space<vmem>>, vector<1x8x512xbf16>
    %471 = vector.shape_cast %470 : vector<1x8x512xbf16> to vector<8x512xbf16>
    %472 = arith.extf %471 : vector<8x512xbf16> to vector<8x512xf32>
    %c0_143 = arith.constant 0 : index
    %c0_144 = arith.constant 0 : index
    %473 = vector.load %arg4[%c0_143, %c0_144] : memref<128x512xbf16, #tpu.memory_space<vmem>>, vector<128x512xbf16>
    %cst_145 = arith.constant dense<0.000000e+00> : vector<8x512xf32>
    %474 = tpu.matmul %426, %473, %cst_145 {dimension_numbers = #tpu.dot_dimension_numbers<[1], [0], [0], [1], [0, 0, 1, 1], [], []>} : vector<8x128xbf16>, vector<128x512xbf16>, vector<8x512xf32> -> vector<8x512xf32>
    %475 = arith.addf %472, %474 : vector<8x512xf32>
    %476 = vector.extract_strided_slice %475 {offsets = [0, 0], sizes = [8, 128], strides = [1, 1]} : vector<8x512xf32> to vector<8x128xf32>
    %477 = arith.negf %476 : vector<8x128xf32>
    %478 = math.exp %477 : vector<8x128xf32>
    %cst_146 = arith.constant 1.000000e+00 : f32
    %479 = vector.broadcast %cst_146 : f32 to vector<8x128xf32>
    %480 = arith.addf %479, %478 : vector<8x128xf32>
    %481 = arith.divf %479, %480 : vector<8x128xf32>
    %482 = vector.extract_strided_slice %475 {offsets = [0, 128], sizes = [8, 128], strides = [1, 1]} : vector<8x512xf32> to vector<8x128xf32>
    %483 = arith.negf %482 : vector<8x128xf32>
    %484 = math.exp %483 : vector<8x128xf32>
    %cst_147 = arith.constant 1.000000e+00 : f32
    %485 = vector.broadcast %cst_147 : f32 to vector<8x128xf32>
    %486 = arith.addf %485, %484 : vector<8x128xf32>
    %487 = arith.divf %485, %486 : vector<8x128xf32>
    %488 = vector.extract_strided_slice %475 {offsets = [0, 256], sizes = [8, 128], strides = [1, 1]} : vector<8x512xf32> to vector<8x128xf32>
    %489 = math.tanh %488 : vector<8x128xf32>
    %490 = vector.extract_strided_slice %475 {offsets = [0, 384], sizes = [8, 128], strides = [1, 1]} : vector<8x512xf32> to vector<8x128xf32>
    %491 = arith.negf %490 : vector<8x128xf32>
    %492 = math.exp %491 : vector<8x128xf32>
    %cst_148 = arith.constant 1.000000e+00 : f32
    %493 = vector.broadcast %cst_148 : f32 to vector<8x128xf32>
    %494 = arith.addf %493, %492 : vector<8x128xf32>
    %495 = arith.divf %493, %494 : vector<8x128xf32>
    %496 = arith.mulf %487, %423 : vector<8x128xf32>
    %497 = arith.mulf %481, %489 : vector<8x128xf32>
    %498 = arith.addf %496, %497 : vector<8x128xf32>
    %499 = math.tanh %498 : vector<8x128xf32>
    %500 = arith.mulf %495, %499 : vector<8x128xf32>
    %501 = arith.truncf %500 : vector<8x128xf32> to vector<8x128xbf16>
    %502 = arith.index_cast %c6_i32 : i32 to index
    %c0_149 = arith.constant 0 : index
    %c0_150 = arith.constant 0 : index
    %503 = vector.load %arg14[%502, %c0_149, %c0_150] : memref<8x8x128xbf16, #tpu.memory_space<vmem>>, vector<1x8x128xbf16>
    %504 = vector.shape_cast %503 : vector<1x8x128xbf16> to vector<8x128xbf16>
    %505 = vector.shape_cast %501 : vector<8x128xbf16> to vector<1x8x128xbf16>
    tpu.vector_store %arg14[%502, %c0_149, %c0_150], %505 {strides = array<i32>} : memref<8x8x128xbf16, #tpu.memory_space<vmem>>, vector<1x8x128xbf16>,
    %506 = arith.index_cast %468 : i32 to index
    %c0_151 = arith.constant 0 : index
    %c0_152 = arith.constant 0 : index
    %507 = vector.load %arg13[%506, %c0_151, %c0_152] : memref<8x8x512xbf16, #tpu.memory_space<vmem>>, vector<1x8x512xbf16>
    %508 = vector.shape_cast %507 : vector<1x8x512xbf16> to vector<8x512xbf16>
    %509 = arith.extf %508 : vector<8x512xbf16> to vector<8x512xf32>
    %c0_153 = arith.constant 0 : index
    %c0_154 = arith.constant 0 : index
    %510 = vector.load %arg5[%c0_153, %c0_154] : memref<128x512xbf16, #tpu.memory_space<vmem>>, vector<128x512xbf16>
    %cst_155 = arith.constant dense<0.000000e+00> : vector<8x512xf32>
    %511 = tpu.matmul %463, %510, %cst_155 {dimension_numbers = #tpu.dot_dimension_numbers<[1], [0], [0], [1], [0, 0, 1, 1], [], []>} : vector<8x128xbf16>, vector<128x512xbf16>, vector<8x512xf32> -> vector<8x512xf32>
    %512 = arith.addf %509, %511 : vector<8x512xf32>
    %513 = vector.extract_strided_slice %512 {offsets = [0, 0], sizes = [8, 128], strides = [1, 1]} : vector<8x512xf32> to vector<8x128xf32>
    %514 = arith.negf %513 : vector<8x128xf32>
    %515 = math.exp %514 : vector<8x128xf32>
    %cst_156 = arith.constant 1.000000e+00 : f32
    %516 = vector.broadcast %cst_156 : f32 to vector<8x128xf32>
    %517 = arith.addf %516, %515 : vector<8x128xf32>
    %518 = arith.divf %516, %517 : vector<8x128xf32>
    %519 = vector.extract_strided_slice %512 {offsets = [0, 128], sizes = [8, 128], strides = [1, 1]} : vector<8x512xf32> to vector<8x128xf32>
    %520 = arith.negf %519 : vector<8x128xf32>
    %521 = math.exp %520 : vector<8x128xf32>
    %cst_157 = arith.constant 1.000000e+00 : f32
    %522 = vector.broadcast %cst_157 : f32 to vector<8x128xf32>
    %523 = arith.addf %522, %521 : vector<8x128xf32>
    %524 = arith.divf %522, %523 : vector<8x128xf32>
    %525 = vector.extract_strided_slice %512 {offsets = [0, 256], sizes = [8, 128], strides = [1, 1]} : vector<8x512xf32> to vector<8x128xf32>
    %526 = math.tanh %525 : vector<8x128xf32>
    %527 = vector.extract_strided_slice %512 {offsets = [0, 384], sizes = [8, 128], strides = [1, 1]} : vector<8x512xf32> to vector<8x128xf32>
    %528 = arith.negf %527 : vector<8x128xf32>
    %529 = math.exp %528 : vector<8x128xf32>
    %cst_158 = arith.constant 1.000000e+00 : f32
    %530 = vector.broadcast %cst_158 : f32 to vector<8x128xf32>
    %531 = arith.addf %530, %529 : vector<8x128xf32>
    %532 = arith.divf %530, %531 : vector<8x128xf32>
    %533 = arith.mulf %524, %460 : vector<8x128xf32>
    %534 = arith.mulf %518, %526 : vector<8x128xf32>
    %535 = arith.addf %533, %534 : vector<8x128xf32>
    %536 = math.tanh %535 : vector<8x128xf32>
    %537 = arith.mulf %532, %536 : vector<8x128xf32>
    %538 = arith.truncf %537 : vector<8x128xf32> to vector<8x128xbf16>
    %539 = arith.index_cast %468 : i32 to index
    %c0_159 = arith.constant 0 : index
    %c0_160 = arith.constant 0 : index
    %540 = vector.load %arg15[%539, %c0_159, %c0_160] : memref<8x8x128xbf16, #tpu.memory_space<vmem>>, vector<1x8x128xbf16>
    %541 = vector.shape_cast %540 : vector<1x8x128xbf16> to vector<8x128xbf16>
    %542 = vector.shape_cast %538 : vector<8x128xbf16> to vector<1x8x128xbf16>
    tpu.vector_store %arg15[%539, %c0_159, %c0_160], %542 {strides = array<i32>} : memref<8x8x128xbf16, #tpu.memory_space<vmem>>, vector<1x8x128xbf16>,
    %c7_i32_161 = arith.constant 7 : i32
    %c7_i32_162 = arith.constant 7 : i32
    %543 = arith.subi %c7_i32_162, %c7_i32_161 : i32
    %544 = arith.index_cast %c7_i32_161 : i32 to index
    %c0_163 = arith.constant 0 : index
    %c0_164 = arith.constant 0 : index
    %545 = vector.load %arg12[%544, %c0_163, %c0_164] : memref<8x8x512xbf16, #tpu.memory_space<vmem>>, vector<1x8x512xbf16>
    %546 = vector.shape_cast %545 : vector<1x8x512xbf16> to vector<8x512xbf16>
    %547 = arith.extf %546 : vector<8x512xbf16> to vector<8x512xf32>
    %c0_165 = arith.constant 0 : index
    %c0_166 = arith.constant 0 : index
    %548 = vector.load %arg4[%c0_165, %c0_166] : memref<128x512xbf16, #tpu.memory_space<vmem>>, vector<128x512xbf16>
    %cst_167 = arith.constant dense<0.000000e+00> : vector<8x512xf32>
    %549 = tpu.matmul %501, %548, %cst_167 {dimension_numbers = #tpu.dot_dimension_numbers<[1], [0], [0], [1], [0, 0, 1, 1], [], []>} : vector<8x128xbf16>, vector<128x512xbf16>, vector<8x512xf32> -> vector<8x512xf32>
    %550 = arith.addf %547, %549 : vector<8x512xf32>
    %551 = vector.extract_strided_slice %550 {offsets = [0, 0], sizes = [8, 128], strides = [1, 1]} : vector<8x512xf32> to vector<8x128xf32>
    %552 = arith.negf %551 : vector<8x128xf32>
    %553 = math.exp %552 : vector<8x128xf32>
    %cst_168 = arith.constant 1.000000e+00 : f32
    %554 = vector.broadcast %cst_168 : f32 to vector<8x128xf32>
    %555 = arith.addf %554, %553 : vector<8x128xf32>
    %556 = arith.divf %554, %555 : vector<8x128xf32>
    %557 = vector.extract_strided_slice %550 {offsets = [0, 128], sizes = [8, 128], strides = [1, 1]} : vector<8x512xf32> to vector<8x128xf32>
    %558 = arith.negf %557 : vector<8x128xf32>
    %559 = math.exp %558 : vector<8x128xf32>
    %cst_169 = arith.constant 1.000000e+00 : f32
    %560 = vector.broadcast %cst_169 : f32 to vector<8x128xf32>
    %561 = arith.addf %560, %559 : vector<8x128xf32>
    %562 = arith.divf %560, %561 : vector<8x128xf32>
    %563 = vector.extract_strided_slice %550 {offsets = [0, 256], sizes = [8, 128], strides = [1, 1]} : vector<8x512xf32> to vector<8x128xf32>
    %564 = math.tanh %563 : vector<8x128xf32>
    %565 = vector.extract_strided_slice %550 {offsets = [0, 384], sizes = [8, 128], strides = [1, 1]} : vector<8x512xf32> to vector<8x128xf32>
    %566 = arith.negf %565 : vector<8x128xf32>
    %567 = math.exp %566 : vector<8x128xf32>
    %cst_170 = arith.constant 1.000000e+00 : f32
    %568 = vector.broadcast %cst_170 : f32 to vector<8x128xf32>
    %569 = arith.addf %568, %567 : vector<8x128xf32>
    %570 = arith.divf %568, %569 : vector<8x128xf32>
    %571 = arith.mulf %562, %498 : vector<8x128xf32>
    %572 = arith.mulf %556, %564 : vector<8x128xf32>
    %573 = arith.addf %571, %572 : vector<8x128xf32>
    %574 = math.tanh %573 : vector<8x128xf32>
    %575 = arith.mulf %570, %574 : vector<8x128xf32>
    %576 = arith.truncf %575 : vector<8x128xf32> to vector<8x128xbf16>
    %577 = arith.index_cast %c7_i32_161 : i32 to index
    %c0_171 = arith.constant 0 : index
    %c0_172 = arith.constant 0 : index
    %578 = vector.load %arg14[%577, %c0_171, %c0_172] : memref<8x8x128xbf16, #tpu.memory_space<vmem>>, vector<1x8x128xbf16>
    %579 = vector.shape_cast %578 : vector<1x8x128xbf16> to vector<8x128xbf16>
    %580 = vector.shape_cast %576 : vector<8x128xbf16> to vector<1x8x128xbf16>
    tpu.vector_store %arg14[%577, %c0_171, %c0_172], %580 {strides = array<i32>} : memref<8x8x128xbf16, #tpu.memory_space<vmem>>, vector<1x8x128xbf16>,
    %581 = arith.index_cast %543 : i32 to index
    %c0_173 = arith.constant 0 : index
    %c0_174 = arith.constant 0 : index
    %582 = vector.load %arg13[%581, %c0_173, %c0_174] : memref<8x8x512xbf16, #tpu.memory_space<vmem>>, vector<1x8x512xbf16>
    %583 = vector.shape_cast %582 : vector<1x8x512xbf16> to vector<8x512xbf16>
    %584 = arith.extf %583 : vector<8x512xbf16> to vector<8x512xf32>
    %c0_175 = arith.constant 0 : index
    %c0_176 = arith.constant 0 : index
    %585 = vector.load %arg5[%c0_175, %c0_176] : memref<128x512xbf16, #tpu.memory_space<vmem>>, vector<128x512xbf16>
    %cst_177 = arith.constant dense<0.000000e+00> : vector<8x512xf32>
    %586 = tpu.matmul %538, %585, %cst_177 {dimension_numbers = #tpu.dot_dimension_numbers<[1], [0], [0], [1], [0, 0, 1, 1], [], []>} : vector<8x128xbf16>, vector<128x512xbf16>, vector<8x512xf32> -> vector<8x512xf32>
    %587 = arith.addf %584, %586 : vector<8x512xf32>
    %588 = vector.extract_strided_slice %587 {offsets = [0, 0], sizes = [8, 128], strides = [1, 1]} : vector<8x512xf32> to vector<8x128xf32>
    %589 = arith.negf %588 : vector<8x128xf32>
    %590 = math.exp %589 : vector<8x128xf32>
    %cst_178 = arith.constant 1.000000e+00 : f32
    %591 = vector.broadcast %cst_178 : f32 to vector<8x128xf32>
    %592 = arith.addf %591, %590 : vector<8x128xf32>
    %593 = arith.divf %591, %592 : vector<8x128xf32>
    %594 = vector.extract_strided_slice %587 {offsets = [0, 128], sizes = [8, 128], strides = [1, 1]} : vector<8x512xf32> to vector<8x128xf32>
    %595 = arith.negf %594 : vector<8x128xf32>
    %596 = math.exp %595 : vector<8x128xf32>
    %cst_179 = arith.constant 1.000000e+00 : f32
    %597 = vector.broadcast %cst_179 : f32 to vector<8x128xf32>
    %598 = arith.addf %597, %596 : vector<8x128xf32>
    %599 = arith.divf %597, %598 : vector<8x128xf32>
    %600 = vector.extract_strided_slice %587 {offsets = [0, 256], sizes = [8, 128], strides = [1, 1]} : vector<8x512xf32> to vector<8x128xf32>
    %601 = math.tanh %600 : vector<8x128xf32>
    %602 = vector.extract_strided_slice %587 {offsets = [0, 384], sizes = [8, 128], strides = [1, 1]} : vector<8x512xf32> to vector<8x128xf32>
    %603 = arith.negf %602 : vector<8x128xf32>
    %604 = math.exp %603 : vector<8x128xf32>
    %cst_180 = arith.constant 1.000000e+00 : f32
    %605 = vector.broadcast %cst_180 : f32 to vector<8x128xf32>
    %606 = arith.addf %605, %604 : vector<8x128xf32>
    %607 = arith.divf %605, %606 : vector<8x128xf32>
    %608 = arith.mulf %599, %535 : vector<8x128xf32>
    %609 = arith.mulf %593, %601 : vector<8x128xf32>
    %610 = arith.addf %608, %609 : vector<8x128xf32>
    %611 = math.tanh %610 : vector<8x128xf32>
    %612 = arith.mulf %607, %611 : vector<8x128xf32>
    %613 = arith.truncf %612 : vector<8x128xf32> to vector<8x128xbf16>
    %614 = arith.index_cast %543 : i32 to index
    %c0_181 = arith.constant 0 : index
    %c0_182 = arith.constant 0 : index
    %615 = vector.load %arg15[%614, %c0_181, %c0_182] : memref<8x8x128xbf16, #tpu.memory_space<vmem>>, vector<1x8x128xbf16>
    %616 = vector.shape_cast %615 : vector<1x8x128xbf16> to vector<8x128xbf16>
    %617 = vector.shape_cast %613 : vector<8x128xbf16> to vector<1x8x128xbf16>
    tpu.vector_store %arg15[%614, %c0_181, %c0_182], %617 {strides = array<i32>} : memref<8x8x128xbf16, #tpu.memory_space<vmem>>, vector<1x8x128xbf16>,
    %c8_i32 = arith.constant 8 : i32
    %c0_183 = arith.constant 0 : index
    %c0_184 = arith.constant 0 : index
    %c0_185 = arith.constant 0 : index
    %618 = vector.load %arg14[%c0_183, %c0_184, %c0_185] : memref<8x8x128xbf16, #tpu.memory_space<vmem>>, vector<8x8x128xbf16>
    %619 = vector.shape_cast %618 : vector<8x8x128xbf16> to vector<64x128xbf16>
    %c0_186 = arith.constant 0 : index
    %c0_187 = arith.constant 0 : index
    %620 = vector.load %arg6[%c0_186, %c0_187] : memref<128x16xbf16, #tpu.memory_space<vmem>>, vector<128x16xbf16>
    %cst_188 = arith.constant dense<0.000000e+00> : vector<64x16xf32>
    %621 = tpu.matmul %619, %620, %cst_188 {dimension_numbers = #tpu.dot_dimension_numbers<[1], [0], [0], [1], [0, 0, 1, 1], [], []>} : vector<64x128xbf16>, vector<128x16xbf16>, vector<64x16xf32> -> vector<64x16xf32>
    %c0_189 = arith.constant 0 : index
    %c0_190 = arith.constant 0 : index
    %c0_191 = arith.constant 0 : index
    %622 = vector.load %arg15[%c0_189, %c0_190, %c0_191] : memref<8x8x128xbf16, #tpu.memory_space<vmem>>, vector<8x8x128xbf16>
    %623 = vector.shape_cast %622 : vector<8x8x128xbf16> to vector<64x128xbf16>
    %c0_192 = arith.constant 0 : index
    %c0_193 = arith.constant 0 : index
    %624 = vector.load %arg7[%c0_192, %c0_193] : memref<128x16xbf16, #tpu.memory_space<vmem>>, vector<128x16xbf16>
    %cst_194 = arith.constant dense<0.000000e+00> : vector<64x16xf32>
    %625 = tpu.matmul %623, %624, %cst_194 {dimension_numbers = #tpu.dot_dimension_numbers<[1], [0], [0], [1], [0, 0, 1, 1], [], []>} : vector<64x128xbf16>, vector<128x16xbf16>, vector<64x16xf32> -> vector<64x16xf32>
    %626 = arith.addf %621, %625 : vector<64x16xf32>
    %c0_195 = arith.constant 0 : index
    %c0_196 = arith.constant 0 : index
    %627 = vector.load %arg8[%c0_195, %c0_196] : memref<1x16xf32, #tpu.memory_space<vmem>>, vector<1x16xf32>
    %628 = vector.broadcast %627 : vector<1x16xf32> to vector<64x16xf32>
    %629 = arith.addf %626, %628 : vector<64x16xf32>
    %630 = vector.shape_cast %629 : vector<64x16xf32> to vector<8x8x16xf32>
    %c0_197 = arith.constant 0 : index
    %c0_198 = arith.constant 0 : index
    %631 = vector.load %arg9[%c0_197, %c0_198] : memref<1x16xf32, #tpu.memory_space<vmem>>, vector<1x16xf32>
    %c0_199 = arith.constant 0 : index
    %c0_200 = arith.constant 0 : index
    %632 = vector.load %arg10[%c0_199, %c0_200] : memref<1x16xf32, #tpu.memory_space<vmem>>, vector<1x16xf32>
    %633 = vector.extract_strided_slice %630 {offsets = [0, 0, 0], sizes = [8, 4, 16], strides = [1, 1, 1]} : vector<8x8x16xf32> to vector<8x4x16xf32>
    %634 = vector.shape_cast %633 : vector<8x4x16xf32> to vector<1x8x4x16xf32>
    %cst_201 = arith.constant dense<0.000000e+00> : vector<1xf32>
    %635 = vector.multi_reduction <add>, %634, %cst_201 [1, 2, 3] : vector<1x8x4x16xf32> to vector<1xf32>
    %636 = vector.shape_cast %635 : vector<1xf32> to vector<1x1x1x1xf32>
    %637 = vector.extract %636[0, 0, 0, 0] : f32 from vector<1x1x1x1xf32>
    %cst_202 = arith.constant 0.001953125 : f32
    %638 = arith.mulf %637, %cst_202 : f32
    %639 = arith.mulf %633, %633 : vector<8x4x16xf32>
    %640 = vector.shape_cast %639 : vector<8x4x16xf32> to vector<1x8x4x16xf32>
    %cst_203 = arith.constant dense<0.000000e+00> : vector<1xf32>
    %641 = vector.multi_reduction <add>, %640, %cst_203 [1, 2, 3] : vector<1x8x4x16xf32> to vector<1xf32>
    %642 = vector.shape_cast %641 : vector<1xf32> to vector<1x1x1x1xf32>
    %643 = vector.extract %642[0, 0, 0, 0] : f32 from vector<1x1x1x1xf32>
    %cst_204 = arith.constant 0.001953125 : f32
    %644 = arith.mulf %643, %cst_204 : f32
    %645 = arith.mulf %638, %638 : f32
    %646 = arith.subf %644, %645 : f32
    %cst_205 = arith.constant 0.000000e+00 : f32
    %647 = arith.maximumf %646, %cst_205 : f32
    %648 = vector.broadcast %638 : f32 to vector<8x4x16xf32>
    %649 = arith.subf %633, %648 : vector<8x4x16xf32>
    %650 = vector.shape_cast %631 : vector<1x16xf32> to vector<1x1x16xf32>
    %651 = vector.broadcast %650 : vector<1x1x16xf32> to vector<8x4x16xf32>
    %652 = arith.mulf %651, %649 : vector<8x4x16xf32>
    %cst_206 = arith.constant 9.99999993E-9 : f32
    %653 = arith.addf %647, %cst_206 : f32
    %654 = math.rsqrt %653 : f32
    %655 = vector.broadcast %654 : f32 to vector<8x4x16xf32>
    %656 = arith.mulf %652, %655 : vector<8x4x16xf32>
    %657 = vector.shape_cast %632 : vector<1x16xf32> to vector<1x1x16xf32>
    %658 = vector.broadcast %657 : vector<1x1x16xf32> to vector<8x4x16xf32>
    %659 = arith.addf %656, %658 : vector<8x4x16xf32>
    %660 = vector.extract_strided_slice %1 {offsets = [0, 0, 0], sizes = [8, 4, 16], strides = [1, 1, 1]} : vector<8x8x16xf32> to vector<8x4x16xf32>
    %661 = arith.addf %659, %660 : vector<8x4x16xf32>
    %c0_207 = arith.constant 0 : index
    %c0_208 = arith.constant 0 : index
    %c0_209 = arith.constant 0 : index
    %c0_210 = arith.constant 0 : index
    %662 = vector.load %arg11[%c0_207, %c0_208, %c0_209, %c0_210] : memref<1x8x8x16xf32, #tpu.memory_space<vmem>>, vector<1x8x4x16xf32>
    %663 = vector.shape_cast %662 : vector<1x8x4x16xf32> to vector<8x4x16xf32>
    %664 = vector.shape_cast %661 : vector<8x4x16xf32> to vector<1x8x4x16xf32>
    tpu.vector_store %arg11[%c0_207, %c0_208, %c0_209, %c0_210], %664 {strides = array<i32>} : memref<1x8x8x16xf32, #tpu.memory_space<vmem>>, vector<1x8x4x16xf32>,
    %665 = vector.extract_strided_slice %630 {offsets = [0, 4, 0], sizes = [8, 4, 16], strides = [1, 1, 1]} : vector<8x8x16xf32> to vector<8x4x16xf32>
    %666 = vector.shape_cast %665 : vector<8x4x16xf32> to vector<1x8x4x16xf32>
    %cst_211 = arith.constant dense<0.000000e+00> : vector<1xf32>
    %667 = vector.multi_reduction <add>, %666, %cst_211 [1, 2, 3] : vector<1x8x4x16xf32> to vector<1xf32>
    %668 = vector.shape_cast %667 : vector<1xf32> to vector<1x1x1x1xf32>
    %669 = vector.extract %668[0, 0, 0, 0] : f32 from vector<1x1x1x1xf32>
    %cst_212 = arith.constant 0.001953125 : f32
    %670 = arith.mulf %669, %cst_212 : f32
    %671 = arith.mulf %665, %665 : vector<8x4x16xf32>
    %672 = vector.shape_cast %671 : vector<8x4x16xf32> to vector<1x8x4x16xf32>
    %cst_213 = arith.constant dense<0.000000e+00> : vector<1xf32>
    %673 = vector.multi_reduction <add>, %672, %cst_213 [1, 2, 3] : vector<1x8x4x16xf32> to vector<1xf32>
    %674 = vector.shape_cast %673 : vector<1xf32> to vector<1x1x1x1xf32>
    %675 = vector.extract %674[0, 0, 0, 0] : f32 from vector<1x1x1x1xf32>
    %cst_214 = arith.constant 0.001953125 : f32
    %676 = arith.mulf %675, %cst_214 : f32
    %677 = arith.mulf %670, %670 : f32
    %678 = arith.subf %676, %677 : f32
    %cst_215 = arith.constant 0.000000e+00 : f32
    %679 = arith.maximumf %678, %cst_215 : f32
    %680 = vector.broadcast %670 : f32 to vector<8x4x16xf32>
    %681 = arith.subf %665, %680 : vector<8x4x16xf32>
    %682 = vector.shape_cast %631 : vector<1x16xf32> to vector<1x1x16xf32>
    %683 = vector.broadcast %682 : vector<1x1x16xf32> to vector<8x4x16xf32>
    %684 = arith.mulf %683, %681 : vector<8x4x16xf32>
    %cst_216 = arith.constant 9.99999993E-9 : f32
    %685 = arith.addf %679, %cst_216 : f32
    %686 = math.rsqrt %685 : f32
    %687 = vector.broadcast %686 : f32 to vector<8x4x16xf32>
    %688 = arith.mulf %684, %687 : vector<8x4x16xf32>
    %689 = vector.shape_cast %632 : vector<1x16xf32> to vector<1x1x16xf32>
    %690 = vector.broadcast %689 : vector<1x1x16xf32> to vector<8x4x16xf32>
    %691 = arith.addf %688, %690 : vector<8x4x16xf32>
    %692 = vector.extract_strided_slice %1 {offsets = [0, 4, 0], sizes = [8, 4, 16], strides = [1, 1, 1]} : vector<8x8x16xf32> to vector<8x4x16xf32>
    %693 = arith.addf %691, %692 : vector<8x4x16xf32>
    %c0_217 = arith.constant 0 : index
    %c0_218 = arith.constant 0 : index
    %c4 = arith.constant 4 : index
    %c0_219 = arith.constant 0 : index
    %694 = vector.load %arg11[%c0_217, %c0_218, %c4, %c0_219] : memref<1x8x8x16xf32, #tpu.memory_space<vmem>>, vector<1x8x4x16xf32>
    %695 = vector.shape_cast %694 : vector<1x8x4x16xf32> to vector<8x4x16xf32>
    %696 = vector.shape_cast %693 : vector<8x4x16xf32> to vector<1x8x4x16xf32>
    tpu.vector_store %arg11[%c0_217, %c0_218, %c4, %c0_219], %696 {strides = array<i32>} : memref<1x8x8x16xf32, #tpu.memory_space<vmem>>, vector<1x8x4x16xf32>,
    return
  }
  func.func @transform_0(%arg0: i32) -> (i32, i32, i32, i32) {
    %c0_i32 = arith.constant 0 : i32
    %c0_i32_0 = arith.constant 0 : i32
    %c0_i32_1 = arith.constant 0 : i32
    %c0_i32_2 = arith.constant 0 : i32
    return %arg0, %c0_i32, %c0_i32_0, %c0_i32_1 : i32, i32, i32, i32
  }
  func.func @transform_1(%arg0: i32) -> (i32, i32) {
    %c0_i32 = arith.constant 0 : i32
    %c0_i32_0 = arith.constant 0 : i32
    %c0_i32_1 = arith.constant 0 : i32
    return %c0_i32, %c0_i32_0 : i32, i32
  }
  func.func @transform_2(%arg0: i32) -> (i32, i32) {
    %c0_i32 = arith.constant 0 : i32
    %c0_i32_0 = arith.constant 0 : i32
    %c0_i32_1 = arith.constant 0 : i32
    return %c0_i32, %c0_i32_0 : i32, i32
  }
  func.func @transform_3(%arg0: i32) -> (i32, i32) {
    %c0_i32 = arith.constant 0 : i32
    %c0_i32_0 = arith.constant 0 : i32
    %c0_i32_1 = arith.constant 0 : i32
    return %c0_i32, %c0_i32_0 : i32, i32
  }
  func.func @transform_4(%arg0: i32) -> (i32, i32) {
    %c0_i32 = arith.constant 0 : i32
    %c0_i32_0 = arith.constant 0 : i32
    %c0_i32_1 = arith.constant 0 : i32
    return %c0_i32, %c0_i32_0 : i32, i32
  }
  func.func @transform_5(%arg0: i32) -> (i32, i32) {
    %c0_i32 = arith.constant 0 : i32
    %c0_i32_0 = arith.constant 0 : i32
    %c0_i32_1 = arith.constant 0 : i32
    return %c0_i32, %c0_i32_0 : i32, i32
  }
  func.func @transform_6(%arg0: i32) -> (i32, i32) {
    %c0_i32 = arith.constant 0 : i32
    %c0_i32_0 = arith.constant 0 : i32
    %c0_i32_1 = arith.constant 0 : i32
    return %c0_i32, %c0_i32_0 : i32, i32
  }
  func.func @transform_7(%arg0: i32) -> (i32, i32) {
    %c0_i32 = arith.constant 0 : i32
    %c0_i32_0 = arith.constant 0 : i32
    %c0_i32_1 = arith.constant 0 : i32
    return %c0_i32, %c0_i32_0 : i32, i32
  }
  func.func @transform_8(%arg0: i32) -> (i32, i32) {
    %c0_i32 = arith.constant 0 : i32
    %c0_i32_0 = arith.constant 0 : i32
    %c0_i32_1 = arith.constant 0 : i32
    return %c0_i32, %c0_i32_0 : i32, i32
  }
  func.func @transform_9(%arg0: i32) -> (i32, i32) {
    %c0_i32 = arith.constant 0 : i32
    %c0_i32_0 = arith.constant 0 : i32
    %c0_i32_1 = arith.constant 0 : i32
    return %c0_i32, %c0_i32_0 : i32, i32
  }
  func.func @transform_10(%arg0: i32) -> (i32, i32, i32, i32) {
    %c0_i32 = arith.constant 0 : i32
    %c0_i32_0 = arith.constant 0 : i32
    %c0_i32_1 = arith.constant 0 : i32
    %c0_i32_2 = arith.constant 0 : i32
    return %arg0, %c0_i32, %c0_i32_0, %c0_i32_1 : i32, i32, i32, i32
  }
}

</mosaic_0001>

<bundles_post_ra>
// kernel: tpu_custom_call.1
= control target key start
LH: loop header
LB: loop body
LE: loop exit
PB: predicated region body
PF: predicated region fallthrough
CT: control target
= control target key end

     0   :  { %15 = vsyncpa [#allocation7], 0  ;;  %s10888_s0 = inlined_call_operand.vmem [shape: f32[1,8,8,16], index: 0, kind: input, shape index: {}]   ;;  %s10889_s1 = inlined_call_operand.vmem [shape: bf16[16,1024], index: 1, kind: input, shape index: {}]   ;;  %s10890_s2 = inlined_call_operand.vmem [shape: f32[1,1024], index: 2, kind: input, shape index: {}]   ;;  %s10891_s3 = inlined_call_operand.hbm [shape: bf16[128,512], index: 3, kind: input, shape index: {}]   ;;  %s10892_s4 = inlined_call_operand.hbm [shape: bf16[128,512], index: 4, kind: input, shape index: {}]   ;;  %s10893_s5 = inlined_call_operand.vmem [shape: bf16[128,16], index: 5, kind: input, shape index: {}]   ;;  %s10894_s6 = inlined_call_operand.vmem [shape: bf16[128,16], index: 6, kind: input, shape index: {}]   ;;  %s10895_s7 = inlined_call_operand.vmem [shape: f32[1,16], index: 7, kind: input, shape index: {}]   ;;  %s10896_s8 = inlined_call_operand.vmem [shape: f32[1,16], index: 8, kind: input, shape index: {}]   ;;  %s10897_s9 = inlined_call_operand.vmem [shape: f32[1,16], index: 9, kind: input, shape index: {}]   ;;  %s10898_s10 = inlined_call_operand.hbm [shape: f32[1,8,8,16], index: 10, kind: output, shape index: {}]  }
   0x1   :  { %16 = vsyncpa [#allocation10], 0 }
   0x2   :  { %17 = vsyncpa [#allocation8], 0  ;;  %s28_s15 = sshll.u32 %s10891_s3, 4  ;;  %s9364_s16 = smov [#allocation6]   ;;  %s29_s15 = int_to_ptr.hbm [resolvable:$true] %s28_s15 }
   0x3   :  { %s30_s17 = sshll.u32 %s9364_s16, 4  ;;  %s41_s20 = sshll.u32 %s10892_s4, 4  ;;  %s31_s17 = int_to_ptr.vmem [resolvable:$true] %s30_s17  ;;  %s42_s20 = int_to_ptr.hbm [resolvable:$true] %s41_s20 }
   0x4   :  { %s9365_s21 = smov 256   ;;  %s9366_s22 = smov 16  }
   0x5   :  { %36 = dma.hbm_to_vmem [thread:$0]  %s29_s15, 4096, %s31_s17, [#allocation7], %s9365_s21, %s9365_s21, %s9366_s22  }
   0x6   :  { %s9367_s23 = smov [#allocation9]  }
   0x7   :  { %s43_s24 = sshll.u32 %s9367_s23, 4  ;;  %s44_s24 = int_to_ptr.vmem [resolvable:$true] %s43_s24 }
   0x8   :  { %49 = dma.hbm_to_vmem [thread:$0]  %s42_s20, 4096, %s44_s24, [#allocation10], %s9365_s21, %s9365_s21, %s9366_s22  }
   0x9   :  { %9358 = dma.done.wait [#allocation7], 4096  }
   0xa   :  { %9359 = vsyncadd [#allocation7], 4294963200 }
   0xb   :  { %9360 = dma.done.wait [#allocation10], 4096  }
   0xc   :  { %9361 = vsyncadd [#allocation10], 4294963200  ;;  %v6194_v0 = vld [vmem:[%s10889_s1] sm:$0xf]  ;;  %v8448_v2 = vld [vmem:[%s10889_s1 + $0x4] sm:$0xf] }
   0xd   :  { %v8452_v1 = vld [vmem:[%s10889_s1 + $0x1c] sm:$0xf0]  ;;  %v6196_v4 = vld [vmem:[%s10889_s1 + $0x20] sm:$0xf0]  ;;  %v71_v5 = vld [vmem:[%s10888_s0 + $0x10] sm:$0xff]  ;;  %vm171_vm0 = vcmask 130048  }
   0xe   :  { %v6195_v3 = vor.u32 %v8452_v1, %v6194_v0  ;;  %v72_v6 = vld [vmem:[%s10888_s0 + $0x18] sm:$0xff]  ;;  %v6199_v7 = vor.u32 %v8448_v2, %v6196_v4  ;;  %v79_v8 = vpack.c.bf16 %v71_v5, %v71_v5  ;;  %v8449_v10 = vld [vmem:[%s10889_s1 + $0xc] sm:$0xf]  ;;  %v69_v12 = vld [vmem:[%s10888_s0] sm:$0xff]  ;;  %s9369_s20 = smov 0.0   ;;  %s6178_s3 = sshll.u32 %s10898_s10, 4  ;;  %s6179_s3 = int_to_ptr.hbm [resolvable:$true] %s6178_s3 }
   0xf   :  { %v80_v9 = vpack.c.bf16 %v72_v6, %v72_v6  ;;  %v6204_v11 = vld [vmem:[%s10889_s1 + $0x28] sm:$0xf0]  ;;  %v77_v15 = vpack.c.bf16 %v69_v12, %v69_v12  ;;  %v6202_v16 = vld [vmem:[%s10889_s1 + $0x8] sm:$0xf]  ;;  %v6210_v22 = vld [vmem:[%s10889_s1 + $0x10] sm:$0xf] }
  0x10   :  { %8992 = vmatpush.bf16.msra.mxu2 %v6195_v3  ;;  %v6207_v13 = vor.u32 %v8449_v10, %v6204_v11  ;;  %191 = vmatpush.bf16.msra.mxu0 %v6195_v3  ;;  %v70_v14 = vld [vmem:[%s10888_s0 + $0x8] sm:$0xff]  ;;  %v121_v18 = vunpack.c.l.b16 %v79_v8  ;;  %v8454_v24 = vld [vmem:[%s10889_s1 + $0x2c] sm:$0xf0]  ;;  %v8450_v25 = vld [vmem:[%s10889_s1 + $0x14] sm:$0xf]  ;;  %s9372_s10 = smov 8  }
  0x11   :  { %v8453_v17 = vld [vmem:[%s10889_s1 + $0x24] sm:$0xf0]  ;;  %8993 = vmatpush.bf16.msra.mxu3 %v6199_v7  ;;  %v122_v19 = vunpack.c.l.b16 %v80_v9  ;;  %220 = vmatpush.bf16.msra.mxu1 %v6199_v7  ;;  %v78_v20 = vpack.c.bf16 %v70_v14, %v70_v14  ;;  %v119_v23 = vunpack.c.l.b16 %v77_v15  ;;  %v6212_v26 = vld [vmem:[%s10889_s1 + $0x30] sm:$0xf0]  ;;  %v6211_v29 = vor.u32 %v8454_v24, %v6210_v22  ;;  %v73_v32 = vld [vmem:[%s10888_s0 + $0x20] sm:$0xff] }
  0x12   :  { %v6203_v21 = vor.u32 %v8453_v17, %v6202_v16  ;;  %v6215_v30 = vor.u32 %v8450_v25, %v6212_v26  ;;  %v74_v33 = vld [vmem:[%s10888_s0 + $0x28] sm:$0xff]  ;;  %v81_v34 = vpack.c.bf16 %v73_v32, %v73_v32  ;;  %v8451_v39 = vld [vmem:[%s10889_s1 + $0x1c] sm:$0xf]  ;;  %v75_v41 = vld [vmem:[%s10888_s0 + $0x30] sm:$0xff] }
  0x13   :  { %v9482_v27 = vpack.c.b16 %v122_v19, %v121_v18  ;;  %v120_v28 = vunpack.c.l.b16 %v78_v20  ;;  %v82_v35 = vpack.c.bf16 %v74_v33, %v74_v33  ;;  %v6220_v40 = vld [vmem:[%s10889_s1 + $0x38] sm:$0xf0]  ;;  %v6370_v44 = vld [vmem:[#allocation6 + $0xe0] sm:$0xf]  ;;  %v8486_v45 = vld [vmem:[#allocation6 + $0xec] sm:$0xf0]  ;;  %v83_v51 = vpack.c.bf16 %v75_v41, %v75_v41 }
  0x14   :  { %249 = vmatpush.bf16.msrb.mxu2 %v6203_v21  ;;  %307 = vmatpush.bf16.msrb.mxu0 %v6211_v29  ;;  %v123_v36 = vunpack.c.l.b16 %v81_v34  ;;  %v76_v42 = vld [vmem:[%s10888_s0 + $0x38] sm:$0xff]  ;;  %v6223_v43 = vor.u32 %v8451_v39, %v6220_v40  ;;  %v8484_v46 = vld [vmem:[#allocation6 + $0xe4] sm:$0xf]  ;;  %v6371_v47 = vor.u32 %v8486_v45, %v6370_v44  ;;  %v6372_v48 = vld [vmem:[#allocation6 + $0xf0] sm:$0xf0] }
  0x15   :  { %278 = vmatpush.bf16.msrb.mxu3 %v6207_v13  ;;  %6225 = vmatmul.msk.bf16.vlgmr.msra.gmra.mxu2 %vm171_vm0, %v9482_v27  ;;  %v9488_v31 = vpack.c.b16 %v120_v28, %v119_v23  ;;  %v124_v37 = vunpack.c.l.b16 %v82_v35  ;;  %v6354_v49 = vld [vmem:[#allocation6 + $0xc0] sm:$0xf]  ;;  %v8482_v50 = vld [vmem:[#allocation6 + $0xcc] sm:$0xf0]  ;;  %v84_v52 = vpack.c.bf16 %v76_v42, %v76_v42  ;;  %v6375_v53 = vor.u32 %v8484_v46, %v6372_v48  ;;  %v8480_v54 = vld [vmem:[#allocation6 + $0xc4] sm:$0xf] }
  0x16   :  { %6229 = vmatmul.msk.bf16.vlgmr.msra.gmra.mxu3 %vm171_vm0, %v9482_v27  ;;  %336 = vmatpush.bf16.msrb.mxu1 %v6215_v30  ;;  %v6356_v55 = vld [vmem:[#allocation6 + $0xd0] sm:$0xf0]  ;;  %v6218_v56 = vld [vmem:[%s10889_s1 + $0x18] sm:$0xf]  ;;  %v6355_v57 = vor.u32 %v8482_v50, %v6354_v49  ;;  %v6338_v61 = vld [vmem:[#allocation6 + $0xa0] sm:$0xf]  ;;  %v125_v1 = vunpack.c.l.b16 %v83_v51 }
  0x17   :  { %6224 = vmatmul.msk.bf16.vlgmr.msra.gmra.mxu0 %vm171_vm0, %v9488_v31  ;;  %6228 = vmatmul.msk.bf16.vlgmr.msra.gmra.mxu1 %vm171_vm0, %v9488_v31  ;;  %v9500_v38 = vpack.c.b16 %v124_v37, %v123_v36  ;;  %v8455_v58 = vld [vmem:[%s10889_s1 + $0x34] sm:$0xf0]  ;;  %v6359_v59 = vor.u32 %v8480_v54, %v6356_v55  ;;  %v8478_v62 = vld [vmem:[#allocation6 + $0xac] sm:$0xf0]  ;;  %v8476_v63 = vld [vmem:[#allocation6 + $0xa4] sm:$0xf]  ;;  %v126_v2 = vunpack.c.l.b16 %v84_v52 }
  0x18   :  { %678 = vmatpush.bf16.msra.mxu0 %v6371_v47  ;;  %v6219_v60 = vor.u32 %v8455_v58, %v6218_v56  ;;  %v6340_v0 = vld [vmem:[#allocation6 + $0xb0] sm:$0xf0]  ;;  %v6339_v3 = vor.u32 %v8478_v62, %v6338_v61  ;;  %v6322_v6 = vld [vmem:[#allocation6 + $0x80] sm:$0xf]  ;;  %v8474_v7 = vld [vmem:[#allocation6 + $0x8c] sm:$0xf0] }
  0x19   :  { %394 = vmatpush.bf16.msra.mxu3 %v6223_v43  ;;  %v6343_v4 = vor.u32 %v8476_v63, %v6340_v0  ;;  %v9528_v5 = vpack.c.b16 %v126_v2, %v125_v1  ;;  %v8472_v8 = vld [vmem:[#allocation6 + $0x84] sm:$0xf]  ;;  %v6323_v9 = vor.u32 %v8474_v7, %v6322_v6  ;;  %v6324_v10 = vld [vmem:[#allocation6 + $0x90] sm:$0xf0]  ;;  %v6306_v12 = vld [vmem:[#allocation6 + $0x60] sm:$0xf] }
  0x1a   :  { %691 = vmatpush.bf16.msra.mxu1 %v6375_v53  ;;  %365 = vmatpush.bf16.msra.mxu2 %v6219_v60  ;;  %v6327_v11 = vor.u32 %v8472_v8, %v6324_v10  ;;  %v8470_v13 = vld [vmem:[#allocation6 + $0x6c] sm:$0xf0]  ;;  %v8468_v14 = vld [vmem:[#allocation6 + $0x64] sm:$0xf]  ;;  %v6308_v16 = vld [vmem:[#allocation6 + $0x70] sm:$0xf0] }
  0x1b   :  { %v6307_v15 = vor.u32 %v8470_v13, %v6306_v12  ;;  %v6290_v17 = vld [vmem:[#allocation6 + $0x40] sm:$0xf]  ;;  %v8466_v18 = vld [vmem:[#allocation6 + $0x4c] sm:$0xf0]  ;;  %v6311_v19 = vor.u32 %v8468_v14, %v6308_v16  ;;  %v8464_v20 = vld [vmem:[#allocation6 + $0x44] sm:$0xf] }
  0x1c   :  { %679 = vmatpush.bf16.msra.mxu0 %v6355_v57  ;;  %v6292_v21 = vld [vmem:[#allocation6 + $0x50] sm:$0xf0]  ;;  %v6291_v22 = vor.u32 %v8466_v18, %v6290_v17  ;;  %v6274_v23 = vld [vmem:[#allocation6 + $0x20] sm:$0xf]  ;;  %v8462_v24 = vld [vmem:[#allocation6 + $0x2c] sm:$0xf0] }
  0x1d   :  { %v6295_v25 = vor.u32 %v8464_v20, %v6292_v21  ;;  %v8460_v26 = vld [vmem:[#allocation6 + $0x24] sm:$0xf]  ;;  %v6276_v28 = vld [vmem:[#allocation6 + $0x30] sm:$0xf0]  ;;  %v6275_v29 = vor.u32 %v8462_v24, %v6274_v23  ;;  %v6258_v32 = vld [vmem:[#allocation6] sm:$0xf] }
  0x1e   :  { %692 = vmatpush.bf16.msra.mxu1 %v6359_v59  ;;  %v6279_v30 = vor.u32 %v8460_v26, %v6276_v28  ;;  %v8458_v33 = vld [vmem:[#allocation6 + $0xc] sm:$0xf0]  ;;  %v8456_v34 = vld [vmem:[#allocation6 + $0x4] sm:$0xf]  ;;  %v6260_v36 = vld [vmem:[#allocation6 + $0x10] sm:$0xf0] }
  0x1f   :  { %v6259_v35 = vor.u32 %v8458_v33, %v6258_v32  ;;  %v6263_v37 = vor.u32 %v8456_v34, %v6260_v36  ;;  %v8485_v39 = vld [vmem:[#allocation6 + $0xec] sm:$0xf]  ;;  %v6380_v40 = vld [vmem:[#allocation6 + $0xf8] sm:$0xf0]  ;;  %v6501_v41 = vld [vmem:[#allocation9 + $0xe0] sm:$0xf] }
  0x20   :  { %680 = vmatpush.bf16.msra.mxu0 %v6339_v3  ;;  %v6383_v42 = vor.u32 %v8485_v39, %v6380_v40  ;;  %v8518_v43 = vld [vmem:[#allocation9 + $0xec] sm:$0xf0]  ;;  %v8516_v44 = vld [vmem:[#allocation9 + $0xe4] sm:$0xf]  ;;  %v6503_v45 = vld [vmem:[#allocation9 + $0xf0] sm:$0xf0] }
  0x21   :  { %v9368_v46 = vmov 0   ;;  %v6502_v47 = vor.u32 %v8518_v43, %v6501_v41  ;;  %v6506_v48 = vor.u32 %v8516_v44, %v6503_v45  ;;  %v8481_v49 = vld [vmem:[#allocation6 + $0xcc] sm:$0xf]  ;;  %v6364_v50 = vld [vmem:[#allocation6 + $0xd8] sm:$0xf0] }
  0x22   :  { %693 = vmatpush.bf16.msra.mxu1 %v6343_v4  ;;  %v6485_v51 = vld [vmem:[#allocation9 + $0xc0] sm:$0xf]  ;;  %v6367_v52 = vor.u32 %v8481_v49, %v6364_v50  ;;  %v8514_v53 = vld [vmem:[#allocation9 + $0xcc] sm:$0xf0]  ;;  %v8512_v54 = vld [vmem:[#allocation9 + $0xc4] sm:$0xf] }
  0x23   :  { %v6487_v55 = vld [vmem:[#allocation9 + $0xd0] sm:$0xf0]  ;;  %v6486_v56 = vor.u32 %v8514_v53, %v6485_v51  ;;  %v6378_v58 = vld [vmem:[#allocation6 + $0xe8] sm:$0xf]  ;;  %v8487_v59 = vld [vmem:[#allocation6 + $0xf4] sm:$0xf0] }
  0x24   :  { %681 = vmatpush.bf16.msra.mxu0 %v6323_v9  ;;  %v6490_v57 = vor.u32 %v8512_v54, %v6487_v55  ;;  %v6469_v60 = vld [vmem:[#allocation9 + $0xa0] sm:$0xf]  ;;  %v6379_v61 = vor.u32 %v8487_v59, %v6378_v58  ;;  %v8510_v62 = vld [vmem:[#allocation9 + $0xac] sm:$0xf0]  ;;  %v8508_v63 = vld [vmem:[#allocation9 + $0xa4] sm:$0xf] }
  0x25   :  { %6226 = vmatmul.msk.bf16.gmra.mxu2 %vm171_vm0, %v9500_v38  ;;  %v6471_v0 = vld [vmem:[#allocation9 + $0xb0] sm:$0xf0]  ;;  %v6470_v1 = vor.u32 %v8510_v62, %v6469_v60  ;;  %v6453_v3 = vld [vmem:[#allocation9 + $0x80] sm:$0xf]  ;;  %v8506_v4 = vld [vmem:[#allocation9 + $0x8c] sm:$0xf0] }
  0x26   :  { %6230 = vmatmul.msk.bf16.gmra.mxu3 %vm171_vm0, %v9500_v38  ;;  %694 = vmatpush.bf16.msra.mxu1 %v6327_v11  ;;  %v6474_v2 = vor.u32 %v8508_v63, %v6471_v0  ;;  %v8504_v6 = vld [vmem:[#allocation9 + $0x84] sm:$0xf]  ;;  %v6454_v7 = vor.u32 %v8506_v4, %v6453_v3  ;;  %v6455_v8 = vld [vmem:[#allocation9 + $0x90] sm:$0xf0]  ;;  %v8477_v9 = vld [vmem:[#allocation6 + $0xac] sm:$0xf] }
  0x27   :  { %6240 = vmatmul.msk.bf16.vlgmr.msrb.gmra.mxu0 %vm171_vm0, %v9488_v31  ;;  %6244 = vmatmul.msk.bf16.vlgmr.msrb.gmra.mxu1 %vm171_vm0, %v9488_v31  ;;  %v6348_v10 = vld [vmem:[#allocation6 + $0xb8] sm:$0xf0]  ;;  %v6458_v11 = vor.u32 %v8504_v6, %v6455_v8  ;;  %v6362_v13 = vld [vmem:[#allocation6 + $0xc8] sm:$0xf]  ;;  %v8483_v14 = vld [vmem:[#allocation6 + $0xd4] sm:$0xf0] }
  0x28   :  { %682 = vmatpush.bf16.msra.mxu0 %v6307_v15  ;;  %v6351_v12 = vor.u32 %v8477_v9, %v6348_v10  ;;  %v6437_v15 = vld [vmem:[#allocation9 + $0x60] sm:$0xf]  ;;  %v6363_v16 = vor.u32 %v8483_v14, %v6362_v13  ;;  %v8502_v17 = vld [vmem:[#allocation9 + $0x6c] sm:$0xf0]  ;;  %v8500_v18 = vld [vmem:[#allocation9 + $0x64] sm:$0xf] }
  0x29   :  { %v6438_v20 = vor.u32 %v8502_v17, %v6437_v15  ;;  %v6332_v23 = vld [vmem:[#allocation6 + $0x98] sm:$0xf0]  ;;  %v6421_v24 = vld [vmem:[#allocation9 + $0x40] sm:$0xf]  ;;  %v8498_v26 = vld [vmem:[#allocation9 + $0x4c] sm:$0xf0] }
  0x2a   :  { %695 = vmatpush.bf16.msra.mxu1 %v6311_v19  ;;  %v6439_v19 = vld [vmem:[#allocation9 + $0x70] sm:$0xf0]  ;;  %v8496_v28 = vld [vmem:[#allocation9 + $0x44] sm:$0xf]  ;;  %v6346_v33 = vld [vmem:[#allocation6 + $0xa8] sm:$0xf] }
  0x2b   :  { %v6442_v21 = vor.u32 %v8500_v18, %v6439_v19  ;;  %v8479_v34 = vld [vmem:[#allocation6 + $0xb4] sm:$0xf0]  ;;  %v6405_v36 = vld [vmem:[#allocation9 + $0x20] sm:$0xf]  ;;  %v8492_v39 = vld [vmem:[#allocation9 + $0x24] sm:$0xf] }
  0x2c   :  { %683 = vmatpush.bf16.msra.mxu0 %v6291_v22  ;;  %v8473_v22 = vld [vmem:[#allocation6 + $0x8c] sm:$0xf]  ;;  %v6407_v41 = vld [vmem:[#allocation9 + $0x30] sm:$0xf0]  ;;  %v6330_v43 = vld [vmem:[#allocation6 + $0x88] sm:$0xf] }
  0x2d   :  { %v8475_v44 = vld [vmem:[#allocation6 + $0x94] sm:$0xf0]  ;;  %v8488_v49 = vld [vmem:[#allocation9 + $0x4] sm:$0xf]  ;;  %v6391_v51 = vld [vmem:[#allocation9 + $0x10] sm:$0xf0] }
  0x2e   :  { %696 = vmatpush.bf16.msra.mxu1 %v6295_v25  ;;  %v6335_v25 = vor.u32 %v8473_v22, %v6332_v23  ;;  %v6331_v45 = vor.u32 %v8475_v44, %v6330_v43  ;;  %v6316_v53 = vld [vmem:[#allocation6 + $0x78] sm:$0xf0]  ;;  %v6394_v54 = vor.u32 %v8488_v49, %v6391_v51  ;;  %v6298_v59 = vld [vmem:[#allocation6 + $0x48] sm:$0xf]  ;;  %v8467_v60 = vld [vmem:[#allocation6 + $0x54] sm:$0xf0] }
  0x2f   :  { %v6300_v62 = vld [vmem:[#allocation6 + $0x58] sm:$0xf0]  ;;  %v9573_v0 = vld [vmem:[%s10890_s2] sm:$0xff]  ;;  %v8461_v3 = vld [vmem:[#allocation6 + $0x2c] sm:$0xf] }
  0x30   :  { %684 = vmatpush.bf16.msra.mxu0 %v6275_v29  ;;  %v6423_v29 = vld [vmem:[#allocation9 + $0x50] sm:$0xf0]  ;;  %v6284_v6 = vld [vmem:[#allocation6 + $0x38] sm:$0xf0]  ;;  %v9576_v8 = vperm.slane %v9573_v0, 0  ;;  %v9579_v9 = vperm.slane %v9573_v0, 1 }
  0x31   :  { %v6426_v32 = vor.u32 %v8496_v28, %v6423_v29  ;;  %v6266_v10 = vld [vmem:[#allocation6 + $0x8] sm:$0xf]  ;;  %v6268_v14 = vld [vmem:[#allocation6 + $0x18] sm:$0xf0]  ;;  %v8515_v29 = vld [vmem:[#allocation9 + $0xd4] sm:$0xf0] }
  0x32   :  { %697 = vmatpush.bf16.msra.mxu1 %v6279_v30  ;;  %v6422_v30 = vor.u32 %v8498_v26, %v6421_v24  ;;  %v6509_v15 = vld [vmem:[#allocation9 + $0xe8] sm:$0xf]  ;;  %v6511_v22 = vld [vmem:[#allocation9 + $0xf8] sm:$0xf0] }
  0x33   :  { %v6493_v28 = vld [vmem:[#allocation9 + $0xc8] sm:$0xf] }
  0x34   :  { %685 = vmatpush.bf16.msra.mxu0 %v6259_v35  ;;  %v6347_v35 = vor.u32 %v8479_v34, %v6346_v33  ;;  %v6494_v34 = vor.u32 %v8515_v29, %v6493_v28  ;;  %v8495_v28 = vld [vmem:[#allocation9 + $0x34] sm:$0xf0]  ;;  %v8493_v29 = vld [vmem:[#allocation9 + $0x2c] sm:$0xf] }
  0x35   :  { %6227 = vmatmul.msk.bf16.gmra.mxu2 %vm171_vm0, %v9528_v5 }
  0x36   :  { %6231 = vmatmul.msk.bf16.gmra.mxu3 %vm171_vm0, %v9528_v5  ;;  %698 = vmatpush.bf16.msra.mxu1 %v6263_v37  ;;  %v8494_v37 = vld [vmem:[#allocation9 + $0x2c] sm:$0xf0] }
  0x37   :  { %6241 = vmatmul.msk.bf16.gmra.mxu0 %vm171_vm0, %v9482_v27  ;;  %6245 = vmatmul.msk.bf16.gmra.mxu1 %vm171_vm0, %v9482_v27  ;;  %v6406_v40 = vor.u32 %v8494_v37, %v6405_v36 }
  0x38   :  { %998 = vmatpush.bf16.msrb.mxu0 %v6502_v47  ;;  %v6389_v47 = vld [vmem:[#allocation9] sm:$0xf] }
  0x3a   :  { %1011 = vmatpush.bf16.msrb.mxu1 %v6506_v48  ;;  %v8490_v48 = vld [vmem:[#allocation9 + $0xc] sm:$0xf0] }
  0x3b   :  { %v6390_v50 = vor.u32 %v8490_v48, %v6389_v47  ;;  %v6479_v47 = vld [vmem:[#allocation9 + $0xb8] sm:$0xf0] }
  0x3c   :  { %999 = vmatpush.bf16.msrb.mxu0 %v6486_v56  ;;  %v6314_v56 = vld [vmem:[#allocation6 + $0x68] sm:$0xf] }
  0x3e   :  { %1012 = vmatpush.bf16.msrb.mxu1 %v6490_v57  ;;  %v8471_v57 = vld [vmem:[#allocation6 + $0x74] sm:$0xf0] }
  0x3f   :  { %v6315_v58 = vor.u32 %v8471_v57, %v6314_v56  ;;  %v9598_v57 = vperm.slane %v9573_v0, 4 }
  0x40   :  { %1000 = vmatpush.bf16.msrb.mxu0 %v6470_v1  ;;  %v6282_v1 = vld [vmem:[#allocation6 + $0x28] sm:$0xf] }
  0x42   :  { %1013 = vmatpush.bf16.msrb.mxu1 %v6474_v2  ;;  %v8463_v2 = vld [vmem:[#allocation6 + $0x34] sm:$0xf0] }
  0x43   :  { %v6283_v4 = vor.u32 %v8463_v2, %v6282_v1  ;;  %v6445_v1 = vld [vmem:[#allocation9 + $0x68] sm:$0xf]  ;;  %v8503_v2 = vld [vmem:[#allocation9 + $0x74] sm:$0xf0] }
  0x44   :  { %1001 = vmatpush.bf16.msrb.mxu0 %v6454_v7  ;;  %v6287_v7 = vor.u32 %v8461_v3, %v6284_v6  ;;  %v8501_v3 = vld [vmem:[#allocation9 + $0x6c] sm:$0xf] }
  0x45   :  { %6232 = vmatmul.msk.bf16.vlgmr.msrb.gmra.mxu2 %vm171_vm0, %v9488_v31 }
  0x46   :  { %6236 = vmatmul.msk.bf16.vlgmr.msrb.gmra.mxu3 %vm171_vm0, %v9488_v31  ;;  %704 = vmatpush.bf16.msrb.mxu2 %v6379_v61  ;;  %v8465_v61 = vld [vmem:[#allocation6 + $0x4c] sm:$0xf] }
  0x47   :  { %6242 = vmatmul.msk.bf16.gmra.mxu0 %vm171_vm0, %v9500_v38  ;;  %6246 = vmatmul.msk.bf16.gmra.mxu1 %vm171_vm0, %v9500_v38  ;;  %v6303_v63 = vor.u32 %v8465_v61, %v6300_v62 }
  0x48   :  { %717 = vmatpush.bf16.msrb.mxu3 %v6383_v42  ;;  %1014 = vmatpush.bf16.msrb.mxu1 %v6458_v11  ;;  %v6410_v42 = vor.u32 %v8492_v39, %v6407_v41  ;;  %v8459_v11 = vld [vmem:[#allocation6 + $0x14] sm:$0xf0] }
  0x49   :  { %1002 = vmatpush.bf16.msrb.mxu0 %v6438_v20  ;;  %v6267_v13 = vor.u32 %v8459_v11, %v6266_v10  ;;  %v8511_v41 = vld [vmem:[#allocation9 + $0xb4] sm:$0xf0]  ;;  %v6447_v10 = vld [vmem:[#allocation9 + $0x78] sm:$0xf0] }
  0x4a   :  { %705 = vmatpush.bf16.msrb.mxu2 %v6363_v16  ;;  %v8519_v16 = vld [vmem:[#allocation9 + $0xf4] sm:$0xf0] }
  0x4b   :  { %v6510_v20 = vor.u32 %v8519_v16, %v6509_v15  ;;  %v6429_v15 = vld [vmem:[#allocation9 + $0x48] sm:$0xf]  ;;  %v8499_v16 = vld [vmem:[#allocation9 + $0x54] sm:$0xf0] }
  0x4c   :  { %718 = vmatpush.bf16.msrb.mxu3 %v6367_v52  ;;  %1015 = vmatpush.bf16.msrb.mxu1 %v6442_v21  ;;  %v8469_v52 = vld [vmem:[#allocation6 + $0x6c] sm:$0xf] }
  0x4d   :  { %1003 = vmatpush.bf16.msrb.mxu0 %v6422_v30  ;;  %v6319_v55 = vor.u32 %v8469_v52, %v6316_v53  ;;  %v8517_v21 = vld [vmem:[#allocation9 + $0xec] sm:$0xf]  ;;  %v6461_v52 = vld [vmem:[#allocation9 + $0x88] sm:$0xf]  ;;  %v8507_v53 = vld [vmem:[#allocation9 + $0x94] sm:$0xf0] }
  0x4e   :  { %706 = vmatpush.bf16.msrb.mxu2 %v6347_v35  ;;  %v8513_v30 = vld [vmem:[#allocation9 + $0xcc] sm:$0xf]  ;;  %v6495_v35 = vld [vmem:[#allocation9 + $0xd8] sm:$0xf0] }
  0x4f   :  { %v6498_v37 = vor.u32 %v8513_v30, %v6495_v35 }
  0x50   :  { %719 = vmatpush.bf16.msrb.mxu3 %v6351_v12  ;;  %1016 = vmatpush.bf16.msrb.mxu1 %v6426_v32  ;;  %v8457_v12 = vld [vmem:[#allocation6 + $0xc] sm:$0xf] }
  0x51   :  { %1004 = vmatpush.bf16.msrb.mxu0 %v6406_v40  ;;  %v6271_v19 = vor.u32 %v8457_v12, %v6268_v14  ;;  %v6477_v40 = vld [vmem:[#allocation9 + $0xa8] sm:$0xf] }
  0x52   :  { %707 = vmatpush.bf16.msrb.mxu2 %v6331_v45  ;;  %v6478_v45 = vor.u32 %v8511_v41, %v6477_v40  ;;  %v6397_v40 = vld [vmem:[#allocation9 + $0x8] sm:$0xf]  ;;  %v8491_v41 = vld [vmem:[#allocation9 + $0x14] sm:$0xf0] }
  0x54   :  { %720 = vmatpush.bf16.msrb.mxu3 %v6335_v25  ;;  %1017 = vmatpush.bf16.msrb.mxu1 %v6410_v42  ;;  %v6514_v25 = vor.u32 %v8517_v21, %v6511_v22  ;;  %v8509_v42 = vld [vmem:[#allocation9 + $0xac] sm:$0xf]  ;;  %v6431_v21 = vld [vmem:[#allocation9 + $0x58] sm:$0xf0] }
  0x55   :  { %6233 = vmatmul.msk.bf16.gmra.mxu2 %vm171_vm0, %v9482_v27  ;;  %1005 = vmatpush.bf16.msrb.mxu0 %v6390_v50  ;;  %v6482_v50 = vor.u32 %v8509_v42, %v6479_v47  ;;  %v8489_v42 = vld [vmem:[#allocation9 + $0xc] sm:$0xf]  ;;  %v6399_v47 = vld [vmem:[#allocation9 + $0x18] sm:$0xf0] }
  0x56   :  { %6237 = vmatmul.msk.bf16.gmra.mxu3 %vm171_vm0, %v9482_v27  ;;  %708 = vmatpush.bf16.msrb.mxu2 %v6315_v58  ;;  %v6462_v58 = vor.u32 %v8507_v53, %v6461_v52 }
  0x57   :  { %6243 = vmatmul.msk.bf16.gmra.mxu0 %vm171_vm0, %v9528_v5  ;;  %6247 = vmatmul.msk.bf16.gmra.mxu1 %vm171_vm0, %v9528_v5 }
  0x58   :  { %1018 = vmatpush.bf16.msrb.mxu1 %v6394_v54  ;;  %721 = vmatpush.bf16.msrb.mxu3 %v6319_v55  ;;  %v8505_v54 = vld [vmem:[#allocation9 + $0x8c] sm:$0xf] }
  0x5c   :  { %722 = vmatpush.bf16.msrb.mxu3 %v6303_v63 }
  0x60   :  { %723 = vmatpush.bf16.msrb.mxu3 %v6287_v7  ;;  %v6446_v7 = vor.u32 %v8503_v2, %v6445_v1 }
  0x64   :  { %724 = vmatpush.bf16.msrb.mxu3 %v6271_v19  ;;  %v6430_v19 = vor.u32 %v8499_v16, %v6429_v15 }
  0x65   :  { %6234 = vmatmul.msk.bf16.gmra.mxu2 %vm171_vm0, %v9500_v38 }
  0x66   :  { %6238 = vmatmul.msk.bf16.gmra.mxu3 %vm171_vm0, %v9500_v38 }
  0x67   :  { %686 = vmatmul.bf16.vlgmr.msra.gmra.mxu0 %v9368_v46  ;;  %699 = vmatmul.bf16.vlgmr.msra.gmra.mxu1 %v9368_v46 }
  0x75   :  { %6235 = vmatmul.msk.bf16.gmra.mxu2 %vm171_vm0, %v9528_v5 }
  0x76   :  { %6239 = vmatmul.msk.bf16.gmra.mxu3 %vm171_vm0, %v9528_v5 }
  0x77   :  { %1006 = vmatmul.bf16.vlgmr.msrb.gmra.mxu0 %v9368_v46  ;;  %1019 = vmatmul.bf16.vlgmr.msrb.gmra.mxu1 %v9368_v46 }
  0x85   :  { %6248 = vmatmul.msk.bf16.vlgmr.msra.gmra.mxu2 %vm171_vm0, %v9488_v31 }
  0x86   :  { %6252 = vmatmul.msk.bf16.vlgmr.msra.gmra.mxu3 %vm171_vm0, %v9488_v31  ;;  %v6299_v31 = vor.u32 %v8467_v60, %v6298_v59  ;;  %v6463_v59 = vld [vmem:[#allocation9 + $0x98] sm:$0xf0] }
  0x87   :  { %1037 = vmatpush.bf16.msra.mxu3 %v6514_v25  ;;  %v6466_v62 = vor.u32 %v8505_v54, %v6463_v59  ;;  %v6413_v25 = vld [vmem:[#allocation9 + $0x28] sm:$0xf] }
  0x88   :  { %709 = vmatpush.bf16.msrb.mxu2 %v6299_v31  ;;  %v9603_v31 = vperm.slane %v9573_v0, 5 }
  0x8b   :  { %1038 = vmatpush.bf16.msra.mxu3 %v6498_v37 }
  0x8c   :  { %710 = vmatpush.bf16.msrb.mxu2 %v6283_v4 }
  0x8f   :  { %1039 = vmatpush.bf16.msra.mxu3 %v6482_v50  ;;  %v6402_v50 = vor.u32 %v8489_v42, %v6399_v47 }
  0x90   :  { %711 = vmatpush.bf16.msrb.mxu2 %v6267_v13  ;;  %v6450_v13 = vor.u32 %v8501_v3, %v6447_v10 }
  0x93   :  { %1040 = vmatpush.bf16.msra.mxu3 %v6466_v62 }
  0x94   :  { %v193_v17 = vpop.f32.mrf.mxu0  ;;  %v222_v18 = vpop.f32.mrf.mxu1  ;;  %1024 = vmatpush.bf16.msra.mxu2 %v6510_v20  ;;  %v8497_v20 = vld [vmem:[#allocation9 + $0x4c] sm:$0xf] }
  0x95   :  { %6249 = vmatmul.msk.bf16.gmra.mxu2 %vm171_vm0, %v9482_v27  ;;  %v194_v23 = vadd.f32 %v193_v17, %v9576_v8  ;;  %v223_v24 = vadd.f32 %v222_v18, %v9579_v9 }
  0x96   :  { %6253 = vmatmul.msk.bf16.gmra.mxu3 %vm171_vm0, %v9482_v27 }
  0x97   :  { %v9587_v26 = vpack.c.bf16 %v223_v24, %v194_v23  ;;  %1041 = vmatpush.bf16.msra.mxu3 %v6450_v13  ;;  %v6434_v23 = vor.u32 %v8497_v20, %v6431_v21  ;;  %v98_v20 = vperm.slane %v9573_v0, 3 }
  0x98   :  { %v198_v32 = vpop.f32.mrf.mxu2  ;;  %1025 = vmatpush.bf16.msra.mxu2 %v6494_v34  ;;  %v6415_v34 = vld [vmem:[#allocation9 + $0x38] sm:$0xf0] }
  0x99   :  { %v227_v33 = vpop.f32.mrf.mxu3  ;;  %v199_v27 = vadd.f32 %v198_v32, %v9576_v8 }
  0x9a   :  { %v228_v36 = vadd.f32 %v227_v33, %v9579_v9  ;;  %v6414_v33 = vor.u32 %v8495_v28, %v6413_v25 }
  0x9b   :  { %1042 = vmatpush.bf16.msra.mxu3 %v6434_v23 }
  0x9c   :  { %v9591_v39 = vpack.c.bf16 %v228_v36, %v199_v27  ;;  %v195_v43 = vpop.f32.mrf.mxu0  ;;  %v224_v44 = vpop.f32.mrf.mxu1  ;;  %1026 = vmatpush.bf16.msra.mxu2 %v6478_v45  ;;  %v6418_v36 = vor.u32 %v8493_v29, %v6415_v34  ;;  %v6398_v45 = vor.u32 %v8491_v41, %v6397_v40 }
  0x9d   :  { %v196_v48 = vadd.f32 %v195_v43, %v9576_v8  ;;  %v225_v49 = vadd.f32 %v224_v44, %v9579_v9 }
  0x9f   :  { %v9595_v51 = vpack.c.bf16 %v225_v49, %v196_v48  ;;  %1043 = vmatpush.bf16.msra.mxu3 %v6418_v36 }
  0xa0   :  { %v200_v55 = vpop.f32.mrf.mxu2  ;;  %1027 = vmatpush.bf16.msra.mxu2 %v6462_v58 }
  0xa1   :  { %v229_v56 = vpop.f32.mrf.mxu3  ;;  %v201_v60 = vadd.f32 %v200_v55, %v9576_v8 }
  0xa2   :  { %v230_v61 = vadd.f32 %v229_v56, %v9579_v9 }
  0xa3   :  { %1044 = vmatpush.bf16.msra.mxu3 %v6402_v50 }
  0xa4   :  { %v9605_v63 = vpack.c.bf16 %v230_v61, %v201_v60  ;;  %v309_v4 = vpop.f32.mrf.mxu0  ;;  %v338_v6 = vpop.f32.mrf.mxu1  ;;  %1028 = vmatpush.bf16.msra.mxu2 %v6446_v7 }
  0xa5   :  { %6250 = vmatmul.msk.bf16.gmra.mxu2 %vm171_vm0, %v9500_v38  ;;  %v310_v11 = vadd.f32 %v309_v4, %v9598_v57  ;;  %v339_v12 = vadd.f32 %v338_v6, %v9603_v31 }
  0xa6   :  { %6254 = vmatmul.msk.bf16.gmra.mxu3 %vm171_vm0, %v9500_v38 }
  0xa7   :  { %v9613_v14 = vpack.c.bf16 %v339_v12, %v310_v11 }
  0xa8   :  { %v203_v17 = vpop.f32.mrf.mxu2  ;;  %1029 = vmatpush.bf16.msra.mxu2 %v6430_v19  ;;  %v97_v19 = vperm.slane %v9573_v0, 2 }
  0xa9   :  { %10902 = vst [vmem:[#allocation15_spill] sm:$0xff] %v9613_v14  ;;  %v232_v18 = vpop.f32.mrf.mxu3  ;;  %v204_v22 = vadd.f32 %v203_v17, %v9576_v8  ;;  %v8569_v14 = vld [vmem:[#allocation9 + $0x8c] sm:$0xf] }
  0xaa   :  { %v233_v38 = vadd.f32 %v232_v18, %v9579_v9 }
  0xac   :  { %v9617_v24 = vpack.c.bf16 %v233_v38, %v204_v22  ;;  %v311_v30 = vpop.f32.mrf.mxu0  ;;  %v340_v32 = vpop.f32.mrf.mxu1  ;;  %1030 = vmatpush.bf16.msra.mxu2 %v6414_v33 }
  0xad   :  { %v312_v35 = vadd.f32 %v311_v30, %v9598_v57  ;;  %v341_v27 = vadd.f32 %v340_v32, %v9603_v31 }
  0xaf   :  { %v9621_v37 = vpack.c.bf16 %v341_v27, %v312_v35 }
  0xb0   :  { %v205_v43 = vpop.f32.mrf.mxu2  ;;  %1031 = vmatpush.bf16.msra.mxu2 %v6398_v45 }
  0xb1   :  { %v234_v44 = vpop.f32.mrf.mxu3  ;;  %v206_v48 = vadd.f32 %v205_v43, %v9576_v8 }
  0xb2   :  { %v235_v49 = vadd.f32 %v234_v44, %v9579_v9 }
  0xb4   :  { %v9625_v52 = vpack.c.bf16 %v235_v49, %v206_v48  ;;  %v314_v53 = vpop.f32.mrf.mxu0  ;;  %v343_v54 = vpop.f32.mrf.mxu1 }
  0xb5   :  { %6251 = vmatmul.msk.bf16.gmra.mxu2 %vm171_vm0, %v9528_v5  ;;  %v315_v55 = vadd.f32 %v314_v53, %v9598_v57  ;;  %v344_v56 = vadd.f32 %v343_v54, %v9603_v31 }
  0xb6   :  { %6255 = vmatmul.msk.bf16.gmra.mxu3 %vm171_vm0, %v9528_v5 }
  0xb7   :  { %v9633_v58 = vpack.c.bf16 %v344_v56, %v315_v55 }
  0xb8   :  { %v208_v59 = vpop.f32.mrf.mxu2 }
  0xb9   :  { %v237_v60 = vpop.f32.mrf.mxu3  ;;  %v209_v61 = vadd.f32 %v208_v59, %v9576_v8 }
  0xba   :  { %v238_v62 = vadd.f32 %v237_v60, %v9579_v9 }
  0xbc   :  { %v9637_v1 = vpack.c.bf16 %v238_v62, %v209_v61  ;;  %v316_v2 = vpop.f32.mrf.mxu0  ;;  %v345_v3 = vpop.f32.mrf.mxu1  ;;  %v483_v61 = vunpack.c.h.bf16 %v9587_v26 }
  0xbd   :  { %v317_v4 = vadd.f32 %v316_v2, %v9598_v57  ;;  %v346_v5 = vadd.f32 %v345_v3, %v9603_v31 }
  0xbf   :  { %v9641_v6 = vpack.c.bf16 %v346_v5, %v317_v4 }
  0xc0   :  { %v210_v7 = vpop.f32.mrf.mxu2 }
  0xc1   :  { %v239_v10 = vpop.f32.mrf.mxu3  ;;  %v211_v11 = vadd.f32 %v210_v7, %v9576_v8 }
  0xc2   :  { %v240_v12 = vadd.f32 %v239_v10, %v9579_v9 }
  0xc4   :  { %v9645_v13 = vpack.c.bf16 %v240_v12, %v211_v11  ;;  %v319_v15 = vpop.f32.mrf.mxu0  ;;  %v348_v16 = vpop.f32.mrf.mxu1 }
  0xc5   :  { %712 = vmatmul.bf16.vlgmr.msrb.gmra.mxu2 %v9368_v46  ;;  %v320_v17 = vadd.f32 %v319_v15, %v9598_v57  ;;  %v349_v18 = vadd.f32 %v348_v16, %v9603_v31 }
  0xc6   :  { %725 = vmatmul.bf16.vlgmr.msrb.gmra.mxu3 %v9368_v46 }
  0xc7   :  { %v9653_v21 = vpack.c.bf16 %v349_v18, %v320_v17 }
  0xc8   :  { %v251_v8 = vpop.f32.mrf.mxu2 }
  0xc9   :  { %v280_v9 = vpop.f32.mrf.mxu3  ;;  %v252_v22 = vadd.f32 %v251_v8, %v97_v19 }
  0xca   :  { %v281_v38 = vadd.f32 %v280_v9, %v98_v20 }
  0xcc   :  { %v9655_v23 = vpack.c.bf16 %v281_v38, %v252_v22  ;;  %v321_v25 = vpop.f32.mrf.mxu0  ;;  %v350_v28 = vpop.f32.mrf.mxu1 }
  0xcd   :  { %v322_v29 = vadd.f32 %v321_v25, %v9598_v57  ;;  %v351_v30 = vadd.f32 %v350_v28, %v9603_v31 }
  0xcf   :  { %v9659_v32 = vpack.c.bf16 %v351_v30, %v322_v29 }
  0xd0   :  { %v253_v33 = vpop.f32.mrf.mxu2 }
  0xd1   :  { %v282_v34 = vpop.f32.mrf.mxu3  ;;  %v254_v35 = vadd.f32 %v253_v33, %v97_v19 }
  0xd2   :  { %v283_v27 = vadd.f32 %v282_v34, %v98_v20 }
  0xd4   :  { %v9661_v36 = vpack.c.bf16 %v283_v27, %v254_v35  ;;  %v324_v40 = vpop.f32.mrf.mxu0  ;;  %v353_v41 = vpop.f32.mrf.mxu1 }
  0xd5   :  { %1032 = vmatmul.bf16.vlgmr.msra.gmra.mxu2 %v9368_v46  ;;  %v325_v42 = vadd.f32 %v324_v40, %v9598_v57  ;;  %v354_v43 = vadd.f32 %v353_v41, %v9603_v31  ;;  %v9684_v41 = vperm.slane %v9573_v0, 6 }
  0xd6   :  { %1045 = vmatmul.bf16.vlgmr.msra.gmra.mxu3 %v9368_v46  ;;  %v482_v46 = vunpack.c.l.bf16 %v9587_v26 }
  0xd7   :  { %v9667_v44 = vpack.c.bf16 %v354_v43, %v325_v42  ;;  %v9687_v42 = vperm.slane %v9573_v0, 7 }
  0xd8   :  { %v256_v45 = vpop.f32.mrf.mxu2 }
  0xd9   :  { %v285_v47 = vpop.f32.mrf.mxu3  ;;  %v257_v48 = vadd.f32 %v256_v45, %v97_v19 }
  0xda   :  { %v286_v49 = vadd.f32 %v285_v47, %v98_v20 }
  0xdc   :  { %v9669_v50 = vpack.c.bf16 %v286_v49, %v257_v48  ;;  %v326_v53 = vpop.f32.mrf.mxu0  ;;  %v355_v54 = vpop.f32.mrf.mxu1 }
  0xe0   :  { %v258_v55 = vpop.f32.mrf.mxu2 }
  0xe1   :  { %v287_v56 = vpop.f32.mrf.mxu3  ;;  %v259_v59 = vadd.f32 %v258_v55, %v97_v19 }
  0xe2   :  { %v288_v60 = vadd.f32 %v287_v56, %v98_v20 }
  0xe4   :  { %v9673_v62 = vpack.c.bf16 %v288_v60, %v259_v59  ;;  %v687_v2 = vpop.f32.mrf.mxu0  ;;  %v700_v3 = vpop.f32.mrf.mxu1 }
  0xe5   :  { %v730_v4 = vadd.f32 %v687_v2, %v482_v46  ;;  %v731_v5 = vadd.f32 %v700_v3, %v483_v61  ;;  %v327_v2 = vadd.f32 %v326_v53, %v9598_v57  ;;  %v356_v3 = vadd.f32 %v355_v54, %v9603_v31  ;;  %v6640_v57 = vld [vmem:[#allocation6 + $0xe8] sm:$0xf]  ;;  %v8551_v53 = vld [vmem:[#allocation6 + $0xf4] sm:$0xf0] }
  0xe6   :  { %v6641_v54 = vor.u32 %v8551_v53, %v6640_v57  ;;  %v6608_v57 = vld [vmem:[#allocation6 + $0xa8] sm:$0xf]  ;;  %v8543_v53 = vld [vmem:[#allocation6 + $0xb4] sm:$0xf0] }
  0xe8   :  { %v261_v7 = vpop.f32.mrf.mxu2  ;;  %1345 = vmatpush.bf16.msrb.mxu2 %v6641_v54 }
  0xe9   :  { %v290_v10 = vpop.f32.mrf.mxu3  ;;  %v262_v11 = vadd.f32 %v261_v7, %v97_v19  ;;  %v6384_v7 = vmul.f32 -1.442695, %v730_v4  ;;  %v8549_v4 = vld [vmem:[#allocation6 + $0xec] sm:$0xf] }
  0xea   :  { %v291_v12 = vadd.f32 %v290_v10, %v98_v20 }
  0xeb   :  { %9018 = vpow2.f32 %v6384_v7 }
  0xec   :  { %v9675_v15 = vpack.c.bf16 %v291_v12, %v262_v11  ;;  %v689_v16 = vpop.f32.mrf.mxu0  ;;  %v702_v17 = vpop.f32.mrf.mxu1  ;;  %v6385_v12 = vmul.f32 -1.442695, %v731_v5  ;;  %v6642_v5 = vld [vmem:[#allocation6 + $0xf8] sm:$0xf0] }
  0xee   :  { %9020 = vpow2.f32 %v6385_v12 }
  0xf0   :  { %v263_v18 = vpop.f32.mrf.mxu2 }
  0xf1   :  { %v292_v8 = vpop.f32.mrf.mxu3  ;;  %v264_v9 = vadd.f32 %v263_v18, %v97_v19 }
  0xf2   :  { %v293_v22 = vadd.f32 %v292_v8, %v98_v20  ;;  %v6632_v8 = vld [vmem:[#allocation6 + $0xe0] sm:$0xf] }
  0xf4   :  { %v9677_v38 = vpack.c.bf16 %v293_v22, %v264_v9  ;;  %v9689_v43 = vpop.f32.mrf.mxu0  ;;  %v9693_v55 = vpop.f32.mrf.mxu1  ;;  %v8550_v9 = vld [vmem:[#allocation6 + $0xec] sm:$0xf0]  ;;  %v8548_v22 = vld [vmem:[#allocation6 + $0xe4] sm:$0xf] }
  0xf8   :  { %v266_v26 = vpop.f32.mrf.mxu2 }
  0xf9   :  { %v295_v25 = vpop.f32.mrf.mxu3  ;;  %v267_v28 = vadd.f32 %v266_v26, %v97_v19  ;;  %v462_v26 = vpack.c.bf16 %v356_v3, %v327_v2  ;;  %v8545_v2 = vld [vmem:[#allocation6 + $0xcc] sm:$0xf]  ;;  %v6626_v3 = vld [vmem:[#allocation6 + $0xd8] sm:$0xf0] }
  0xfa   :  { %v296_v29 = vadd.f32 %v295_v25, %v98_v20  ;;  %v6633_v25 = vor.u32 %v8550_v9, %v6632_v8  ;;  %v8542_v8 = vld [vmem:[#allocation6 + $0xac] sm:$0xf0]  ;;  %v8540_v9 = vld [vmem:[#allocation6 + $0xa4] sm:$0xf] }
  0xfc   :  { %v9679_v30 = vpack.c.bf16 %v296_v29, %v267_v28  ;;  %v1022_v46 = vpop.f32.mrf.mxu1  ;;  %v6634_v28 = vld [vmem:[#allocation6 + $0xf0] sm:$0xf0]  ;;  %1319 = vmatpush.bf16.msra.mxu0 %v6633_v25  ;;  %v6645_v29 = vor.u32 %v8549_v4, %v6642_v5  ;;  %v6609_v4 = vor.u32 %v8543_v53, %v6608_v57  ;;  %v6610_v5 = vld [vmem:[#allocation6 + $0xb8] sm:$0xf0] }
  0xfd   :  { %v6637_v31 = vor.u32 %v8548_v22, %v6634_v28  ;;  %v8547_v46 = vld [vmem:[#allocation6 + $0xd4] sm:$0xf0]  ;;  %v6602_v28 = vld [vmem:[#allocation6 + $0xb0] sm:$0xf0] }
  0xfe   :  { %1358 = vmatpush.bf16.msrb.mxu3 %v6645_v29  ;;  %v6605_v54 = vor.u32 %v8540_v9, %v6602_v28  ;;  %v8535_v28 = vld [vmem:[#allocation6 + $0x74] sm:$0xf0] }
  0xff   :  { %1332 = vmatpush.bf16.msra.mxu1 %v6637_v31 }
 0x100   :  { %v268_v33 = vpop.f32.mrf.mxu2 }
 0x101   :  { %v297_v34 = vpop.f32.mrf.mxu3  ;;  %v269_v35 = vadd.f32 %v268_v33, %v97_v19 }
 0x102   :  { %v298_v27 = vadd.f32 %v297_v34, %v98_v20  ;;  %v1009_v20 = vpop.f32.mrf.mxu0 }
 0x103   :  { %v8544_v20 = vld [vmem:[#allocation6 + $0xc4] sm:$0xf] }
 0x104   :  { %v9681_v40 = vpack.c.bf16 %v298_v27, %v269_v35  ;;  %v802_v35 = vunpack.c.l.bf16 %v462_v26  ;;  %v6616_v27 = vld [vmem:[#allocation6 + $0xc0] sm:$0xf] }
 0x106   :  { %10903 = vst [vmem:[#allocation16_spill] sm:$0xff] %v9681_v40  ;;  %v1050_v22 = vadd.f32 %v9689_v43, %v802_v35 }
 0x108   :  { %v367_v45 = vpop.f32.mrf.mxu2  ;;  %v6515_v43 = vmul.f32 -1.442695, %v1050_v22  ;;  %v6570_v22 = vld [vmem:[#allocation6 + $0x70] sm:$0xf0] }
 0x109   :  { %v396_v47 = vpop.f32.mrf.mxu3  ;;  %v368_v48 = vadd.f32 %v367_v45, %v9684_v41  ;;  %v8546_v45 = vld [vmem:[#allocation6 + $0xcc] sm:$0xf0] }
 0x10a   :  { %v397_v49 = vadd.f32 %v396_v47, %v9687_v42 }
 0x10c   :  { %v9695_v19 = vpack.c.bf16 %v397_v49, %v368_v48  ;;  %v6617_v49 = vor.u32 %v8546_v45, %v6616_v27 }
 0x10e   :  { %10904 = vst [vmem:[#allocation17_spill] sm:$0xff] %v9695_v19  ;;  %1320 = vmatpush.bf16.msra.mxu0 %v6617_v49  ;;  %v8538_v49 = vld [vmem:[#allocation6 + $0x8c] sm:$0xf0] }
 0x110   :  { %v369_v56 = vpop.f32.mrf.mxu2 }
 0x111   :  { %v398_v59 = vpop.f32.mrf.mxu3  ;;  %v370_v60 = vadd.f32 %v369_v56, %v9684_v41  ;;  %v6618_v56 = vld [vmem:[#allocation6 + $0xd0] sm:$0xf0] }
 0x112   :  { %v399_v0 = vadd.f32 %v398_v59, %v9687_v42  ;;  %v6624_v59 = vld [vmem:[#allocation6 + $0xc8] sm:$0xf] }
 0x113   :  { %v6625_v12 = vor.u32 %v8547_v46, %v6624_v59  ;;  %v6592_v59 = vld [vmem:[#allocation6 + $0x88] sm:$0xf] }
 0x114   :  { %v9699_v61 = vpack.c.bf16 %v399_v0, %v370_v60  ;;  %v9019_v60 = vpop.eup %9018  ;;  %v6621_v0 = vor.u32 %v8544_v20, %v6618_v56  ;;  %v8536_v20 = vld [vmem:[#allocation6 + $0x84] sm:$0xf] }
 0x115   :  { %v9021_v7 = vpop.eup %9020  ;;  %v9712_v31 = vadd.f32 1.0, %v9019_v60  ;;  %1346 = vmatpush.bf16.msrb.mxu2 %v6625_v12  ;;  %v8539_v60 = vld [vmem:[#allocation6 + $0x94] sm:$0xf0] }
 0x116   :  { %1333 = vmatpush.bf16.msra.mxu1 %v6621_v0  ;;  %v9714_v29 = vadd.f32 1.0, %v9021_v7  ;;  %v8537_v7 = vld [vmem:[#allocation6 + $0x8c] sm:$0xf] }
 0x117   :  { %9022 = vrcp.f32 %v9712_v31  ;;  %vm743_vm4 = vweird.f32 %v9712_v31 }
 0x118   :  { %v372_v10 = vpop.f32.mrf.mxu2  ;;  %9024 = vrcp.f32 %v9714_v29  ;;  %vm762_vm1 = vweird.f32 %v9714_v29 }
 0x119   :  { %v401_v11 = vpop.f32.mrf.mxu3  ;;  %v373_v16 = vadd.f32 %v372_v10, %v9684_v41  ;;  %1347 = vmatpush.bf16.msrb.mxu2 %v6609_v4  ;;  %9026 = vpow2.f32 %v6515_v43  ;;  %v8533_v4 = vld [vmem:[#allocation6 + $0x6c] sm:$0xf] }
 0x11a   :  { %v402_v17 = vadd.f32 %v401_v11, %v9687_v42  ;;  %v803_v11 = vunpack.c.h.bf16 %v462_v26  ;;  %v8541_v26 = vld [vmem:[#allocation6 + $0xac] sm:$0xf]  ;;  %1334 = vmatpush.bf16.msra.mxu1 %v6605_v54 }
 0x11c   :  { %v9705_v18 = vpack.c.bf16 %v402_v17, %v373_v16  ;;  %v6629_v16 = vor.u32 %v8545_v2, %v6626_v3  ;;  %v6600_v17 = vld [vmem:[#allocation6 + $0xa0] sm:$0xf]  ;;  %v6593_v3 = vor.u32 %v8539_v60, %v6592_v59 }
 0x11d   :  { %v6601_v25 = vor.u32 %v8542_v8, %v6600_v17  ;;  %v8534_v17 = vld [vmem:[#allocation6 + $0x6c] sm:$0xf0]  ;;  %v8532_v8 = vld [vmem:[#allocation6 + $0x64] sm:$0xf]  ;;  %v9723_v57 = vpop.eup %9022 }
 0x11e   :  { %1359 = vmatpush.bf16.msrb.mxu3 %v6629_v16  ;;  %1348 = vmatpush.bf16.msrb.mxu2 %v6593_v3  ;;  %v6568_v16 = vld [vmem:[#allocation6 + $0x60] sm:$0xf]  ;;  %v6573_v53 = vor.u32 %v8532_v8, %v6570_v22  ;;  %v9731_v59 = vmul.f32 %v9723_v57, %v9712_v31  ;;  %v8529_v3 = vld [vmem:[#allocation6 + $0x4c] sm:$0xf]  ;;  %v8526_v22 = vld [vmem:[#allocation6 + $0x2c] sm:$0xf0]  ;;  %vm744_vm5 = vweird.f32 %v9723_v57 }
 0x11f   :  { %1321 = vmatpush.bf16.msra.mxu0 %v6601_v25  ;;  %v6569_v9 = vor.u32 %v8534_v17, %v6568_v16  ;;  %v6576_v25 = vld [vmem:[#allocation6 + $0x68] sm:$0xf]  ;;  %vm9798_vm7 = vmor %vm743_vm4, %vm744_vm5 }
 0x120   :  { %v374_v33 = vpop.f32.mrf.mxu2  ;;  %v6577_v54 = vor.u32 %v8535_v28, %v6576_v25  ;;  %v8524_v25 = vld [vmem:[#allocation6 + $0x24] sm:$0xf] }
 0x121   :  { %v403_v34 = vpop.f32.mrf.mxu3  ;;  %v375_v47 = vadd.f32 %v374_v33, %v9684_v41  ;;  %v6613_v33 = vor.u32 %v8541_v26, %v6610_v5  ;;  %v6578_v26 = vld [vmem:[#allocation6 + $0x78] sm:$0xf0]  ;;  %v9725_v5 = vpop.eup %9024 }
 0x122   :  { %v404_v48 = vadd.f32 %v403_v34, %v9687_v42  ;;  %v1051_v34 = vadd.f32 %v9693_v55, %v803_v11  ;;  %v6586_v55 = vld [vmem:[#allocation6 + $0x90] sm:$0xf0]  ;;  %v6594_v11 = vld [vmem:[#allocation6 + $0x98] sm:$0xf0]  ;;  %1349 = vmatpush.bf16.msrb.mxu2 %v6577_v54  ;;  %v6544_v54 = vld [vmem:[#allocation6 + $0x28] sm:$0xf]  ;;  %vm763_vm2 = vweird.f32 %v9725_v5 }
 0x123   :  { %1360 = vmatpush.bf16.msrb.mxu3 %v6613_v33  ;;  %v6589_v2 = vor.u32 %v8536_v20, %v6586_v55  ;;  %v6597_v12 = vor.u32 %v8537_v7, %v6594_v11  ;;  %v6554_v20 = vld [vmem:[#allocation6 + $0x50] sm:$0xf0]  ;;  %v8531_v55 = vld [vmem:[#allocation6 + $0x54] sm:$0xf0]  ;;  %v6562_v7 = vld [vmem:[#allocation6 + $0x58] sm:$0xf0]  ;;  %v9027_v11 = vpop.eup %9026 }
 0x124   :  { %v9709_v10 = vpack.c.bf16 %v404_v48, %v375_v47  ;;  %v6584_v48 = vld [vmem:[#allocation6 + $0x80] sm:$0xf]  ;;  %v6516_v0 = vmul.f32 -1.442695, %v1051_v34  ;;  %v6565_v17 = vor.u32 %v8529_v3, %v6562_v7  ;;  %v8520_v3 = vld [vmem:[#allocation6 + $0x4] sm:$0xf]  ;;  %vm9772_vm3 = vmor %vm762_vm1, %vm763_vm2 }
 0x125   :  { %v6585_v56 = vor.u32 %v8538_v49, %v6584_v48  ;;  %1335 = vmatpush.bf16.msra.mxu1 %v6589_v2  ;;  %v8528_v48 = vld [vmem:[#allocation6 + $0x44] sm:$0xf] }
 0x126   :  { %9028 = vpow2.f32 %v6516_v0  ;;  %v6557_v0 = vor.u32 %v8528_v48, %v6554_v20 }
 0x127   :  { %1322 = vmatpush.bf16.msra.mxu0 %v6585_v56  ;;  %1361 = vmatpush.bf16.msrb.mxu3 %v6597_v12  ;;  %v6560_v56 = vld [vmem:[#allocation6 + $0x48] sm:$0xf]  ;;  %v9737_v12 = vmul.f32 %v9725_v5, %v9714_v29 }
 0x128   :  { %v377_v35 = vpop.f32.mrf.mxu2  ;;  %v6561_v2 = vor.u32 %v8531_v55, %v6560_v56 }
 0x129   :  { %v406_v27 = vpop.f32.mrf.mxu3  ;;  %v378_v45 = vadd.f32 %v377_v35, %v9684_v41  ;;  %v6581_v35 = vor.u32 %v8533_v4, %v6578_v26  ;;  %1336 = vmatpush.bf16.msra.mxu1 %v6573_v53  ;;  %v6538_v53 = vld [vmem:[#allocation6 + $0x30] sm:$0xf0]  ;;  %v8527_v4 = vld [vmem:[#allocation6 + $0x34] sm:$0xf0]  ;;  %v740_v26 = vsub.f32 1.0, %v9731_v59 }
 0x12a   :  { %v407_v47 = vadd.f32 %v406_v27, %v9687_v42  ;;  %1350 = vmatpush.bf16.msrb.mxu2 %v6561_v2  ;;  %v8522_v2 = vld [vmem:[#allocation6 + $0xc] sm:$0xf0] }
 0x12b   :  { %1323 = vmatpush.bf16.msra.mxu0 %v6569_v9  ;;  %1362 = vmatpush.bf16.msrb.mxu3 %v6581_v35  ;;  %v6536_v9 = vld [vmem:[#allocation6 + $0x20] sm:$0xf]  ;;  %v8525_v35 = vld [vmem:[#allocation6 + $0x2c] sm:$0xf] }
 0x12c   :  { %v9721_v46 = vpack.c.bf16 %v407_v47, %v378_v45  ;;  %v6552_v45 = vld [vmem:[#allocation6 + $0x40] sm:$0xf]  ;;  %v8530_v47 = vld [vmem:[#allocation6 + $0x4c] sm:$0xf0]  ;;  %v9029_v8 = vpop.eup %9028  ;;  %v6537_v28 = vor.u32 %v8526_v22, %v6536_v9 }
 0x12d   :  { %v6553_v49 = vor.u32 %v8530_v47, %v6552_v45  ;;  %1337 = vmatpush.bf16.msra.mxu1 %v6557_v0  ;;  %v9742_v45 = vadd.f32 1.0, %v9027_v11  ;;  %v9744_v47 = vadd.f32 1.0, %v9029_v8  ;;  %v6520_v0 = vld [vmem:[#allocation6] sm:$0xf]  ;;  %v6528_v11 = vld [vmem:[#allocation6 + $0x8] sm:$0xf] }
 0x12e   :  { %v6521_v7 = vor.u32 %v8522_v2, %v6520_v0  ;;  %v6747_v0 = vld [vmem:[#allocation9 + $0xc0] sm:$0xf]  ;;  %v8578_v2 = vld [vmem:[#allocation9 + $0xcc] sm:$0xf0] }
 0x12f   :  { %1324 = vmatpush.bf16.msra.mxu0 %v6553_v49  ;;  %1363 = vmatpush.bf16.msrb.mxu3 %v6565_v17  ;;  %v8523_v17 = vld [vmem:[#allocation6 + $0x14] sm:$0xf0]  ;;  %9030 = vrcp.f32 %v9744_v47  ;;  %vm1082_vm9 = vweird.f32 %v9744_v47  ;;  %vm1063_vm11 = vweird.f32 %v9742_v45 }
 0x130   :  { %v379_v33 = vpop.f32.mrf.mxu2  ;;  %v6529_v22 = vor.u32 %v8523_v17, %v6528_v11  ;;  %v6749_v11 = vld [vmem:[#allocation9 + $0xd0] sm:$0xf0]  ;;  %v6755_v17 = vld [vmem:[#allocation9 + $0xc8] sm:$0xf]  ;;  %9032 = vrcp.f32 %v9742_v45 }
 0x131   :  { %v408_v34 = vpop.f32.mrf.mxu3  ;;  %v380_v43 = vadd.f32 %v379_v33, %v9684_v41  ;;  %v6541_v33 = vor.u32 %v8524_v25, %v6538_v53  ;;  %v8521_v25 = vld [vmem:[#allocation6 + $0xc] sm:$0xf]  ;;  %v6763_v53 = vld [vmem:[#allocation9 + $0xe0] sm:$0xf] }
 0x132   :  { %v409_v27 = vadd.f32 %v408_v34, %v9687_v42  ;;  %v6545_v34 = vor.u32 %v8527_v4, %v6544_v54  ;;  %v8582_v4 = vld [vmem:[#allocation9 + $0xec] sm:$0xf0] }
 0x133   :  { %1325 = vmatpush.bf16.msra.mxu0 %v6537_v28  ;;  %1338 = vmatpush.bf16.msra.mxu1 %v6541_v33  ;;  %v6530_v28 = vld [vmem:[#allocation6 + $0x18] sm:$0xf0]  ;;  %v8580_v33 = vld [vmem:[#allocation9 + $0xe4] sm:$0xf] }
 0x134   :  { %v9733_v60 = vpack.c.bf16 %v409_v27, %v380_v43  ;;  %v6546_v43 = vld [vmem:[#allocation6 + $0x38] sm:$0xf0]  ;;  %v759_v27 = vsub.f32 1.0, %v9737_v12  ;;  %1351 = vmatpush.bf16.msrb.mxu2 %v6545_v34  ;;  %v6522_v12 = vld [vmem:[#allocation6 + $0x10] sm:$0xf0]  ;;  %v6533_v54 = vor.u32 %v8521_v25, %v6530_v28 }
 0x135   :  { %v6549_v20 = vor.u32 %v8525_v35, %v6546_v43  ;;  %v6525_v9 = vor.u32 %v8520_v3, %v6522_v12  ;;  %v6765_v34 = vld [vmem:[#allocation9 + $0xf0] sm:$0xf0]  ;;  %v6764_v35 = vor.u32 %v8582_v4, %v6763_v53  ;;  %v8576_v12 = vld [vmem:[#allocation9 + $0xc4] sm:$0xf]  ;;  %v8579_v28 = vld [vmem:[#allocation9 + $0xd4] sm:$0xf0] }
 0x136   :  { %v6768_v43 = vor.u32 %v8580_v33, %v6765_v34  ;;  %v6752_v25 = vor.u32 %v8576_v12, %v6749_v11  ;;  %v8577_v53 = vld [vmem:[#allocation9 + $0xcc] sm:$0xf]  ;;  %v760_v4 = vmul.f32 %v9725_v5, %v759_v27  ;;  %v768_v33 = vand.u32 2147483648, %v9714_v29  ;;  %v8575_v27 = vld [vmem:[#allocation9 + $0xb4] sm:$0xf0] }
 0x137   :  { %1364 = vmatpush.bf16.msrb.mxu3 %v6549_v20  ;;  %1326 = vmatpush.bf16.msra.mxu0 %v6521_v7  ;;  %v8581_v20 = vld [vmem:[#allocation9 + $0xec] sm:$0xf]  ;;  %v6748_v7 = vor.u32 %v8578_v2, %v6747_v0  ;;  %v6756_v34 = vor.u32 %v8579_v28, %v6755_v17  ;;  %v9760_v0 = vpop.eup %9030  ;;  %v741_v2 = vmul.f32 %v9723_v57, %v740_v26  ;;  %v6741_v28 = vld [vmem:[#allocation9 + $0xb8] sm:$0xf0] }
 0x138   :  { %v382_v48 = vpop.f32.mrf.mxu2  ;;  %1339 = vmatpush.bf16.msra.mxu1 %v6525_v9  ;;  %1352 = vmatpush.bf16.msrb.mxu2 %v6529_v22  ;;  %v8573_v17 = vld [vmem:[#allocation9 + $0xac] sm:$0xf]  ;;  %vm1083_vm10 = vweird.f32 %v9760_v0 }
 0x139   :  { %v411_v49 = vpop.f32.mrf.mxu3  ;;  %v383_v56 = vadd.f32 %v382_v48, %v9684_v41  ;;  %v6771_v48 = vld [vmem:[#allocation9 + $0xe8] sm:$0xf]  ;;  %v6744_v26 = vor.u32 %v8573_v17, %v6741_v28  ;;  %vm9843_vm13 = vmor %vm1082_vm9, %vm1083_vm10 }
 0x13a   :  { %v412_v55 = vadd.f32 %v411_v49, %v9687_v42  ;;  %v8583_v49 = vld [vmem:[#allocation9 + $0xf4] sm:$0xf0] }
 0x13b   :  { %1365 = vmatpush.bf16.msrb.mxu3 %v6533_v54  ;;  %1640 = vmatpush.bf16.msrb.mxu0 %v6764_v35  ;;  %v6757_v54 = vld [vmem:[#allocation9 + $0xd8] sm:$0xf0] }
 0x13c   :  { %v9748_v8 = vpack.c.bf16 %v412_v55, %v383_v56  ;;  %v6772_v56 = vor.u32 %v8583_v49, %v6771_v48  ;;  %v6773_v55 = vld [vmem:[#allocation9 + $0xf8] sm:$0xf0]  ;;  %1653 = vmatpush.bf16.msrb.mxu1 %v6768_v43  ;;  %v6760_v35 = vor.u32 %v8577_v53, %v6757_v54  ;;  %v6731_v43 = vld [vmem:[#allocation9 + $0xa0] sm:$0xf]  ;;  %v8574_v48 = vld [vmem:[#allocation9 + $0xac] sm:$0xf0]  ;;  %v484_v54 = vunpack.c.l.bf16 %v9655_v23 }
 0x13d   :  { %v6776_v3 = vor.u32 %v8581_v20, %v6773_v55  ;;  %v8572_v49 = vld [vmem:[#allocation9 + $0xa4] sm:$0xf]  ;;  %v6732_v20 = vor.u32 %v8574_v48, %v6731_v43  ;;  %v6739_v55 = vld [vmem:[#allocation9 + $0xa8] sm:$0xf]  ;;  %v769_v53 = vor.u32 1.1754944e-38, %v768_v33 }
 0x13e   :  { %1666 = vmatpush.bf16.msra.mxu2 %v6772_v56  ;;  %v6733_v56 = vld [vmem:[#allocation9 + $0xb0] sm:$0xf0]  ;;  %v6740_v11 = vor.u32 %v8575_v27, %v6739_v55  ;;  %v6715_v43 = vld [vmem:[#allocation9 + $0x80] sm:$0xf]  ;;  %v8570_v33 = vld [vmem:[#allocation9 + $0x8c] sm:$0xf0]  ;;  %v9784_v55 = vpop.eup %9032  ;;  %v742_v27 = vadd.f32 %v9723_v57, %v741_v2 }
 0x13f   :  { %1679 = vmatpush.bf16.msra.mxu3 %v6776_v3  ;;  %1641 = vmatpush.bf16.msrb.mxu0 %v6748_v7  ;;  %v766_v3 = vand.u32 2147483647, %v9714_v29  ;;  %v6736_v12 = vor.u32 %v8572_v49, %v6733_v56  ;;  %v749_v7 = vand.u32 2147483648, %v9712_v31  ;;  %v8568_v48 = vld [vmem:[#allocation9 + $0x84] sm:$0xf]  ;;  %v6716_v29 = vor.u32 %v8570_v33, %v6715_v43 }
 0x140   :  { %v9751_v9 = vpop.f32.mrf.mxu2  ;;  %1654 = vmatpush.bf16.msrb.mxu1 %v6752_v25  ;;  %v761_v25 = vadd.f32 %v9725_v5, %v760_v4  ;;  %v9780_v4 = vmul.f32 %v9760_v0, %v9744_v47  ;;  %v6723_v49 = vld [vmem:[#allocation9 + $0x88] sm:$0xf]  ;;  %v8571_v56 = vld [vmem:[#allocation9 + $0x94] sm:$0xf0]  ;;  %v6685_v2 = vld [vmem:[#allocation9 + $0x50] sm:$0xf0]  ;;  %vm1064_vm12 = vweird.f32 %v9784_v55 }
 0x141   :  { %v9753_v22 = vpop.f32.mrf.mxu3  ;;  %vm9787_vm6 = vcmp.eq.f32.partialorder %v766_v3, 8.507059e+37  ;;  %v6724_v19 = vor.u32 %v8571_v56, %v6723_v49  ;;  %v10911_v3 = vand.u32 2147483647, %v9712_v31  ;;  %v6699_v31 = vld [vmem:[#allocation9 + $0x60] sm:$0xf]  ;;  %vm9856_vm14 = vmor %vm1063_vm11, %vm1064_vm12 }
 0x142   :  { %1667 = vmatpush.bf16.msra.mxu2 %v6756_v34  ;;  %v485_v34 = vunpack.c.h.bf16 %v9655_v23  ;;  %v765_v43 = vsel %vm9772_vm3, %v9725_v5, %v761_v25  ;;  %v9810_v5 = vmul.f32 %v9784_v55, %v9742_v45  ;;  %v8567_v49 = vld [vmem:[#allocation9 + $0x74] sm:$0xf0]  ;;  %v8565_v56 = vld [vmem:[#allocation9 + $0x6c] sm:$0xf] }
 0x143   :  { %1680 = vmatpush.bf16.msra.mxu3 %v6760_v35  ;;  %1642 = vmatpush.bf16.msrb.mxu0 %v6732_v20  ;;  %v6717_v35 = vld [vmem:[#allocation9 + $0x90] sm:$0xf0]  ;;  %v6725_v20 = vld [vmem:[#allocation9 + $0x98] sm:$0xf0]  ;;  %vm9804_vm8 = vcmp.eq.f32.partialorder %v10911_v3, 8.507059e+37  ;;  %v770_v59 = vsel %vm9787_vm6, %v769_v53, %v765_v43  ;;  %v414_v53 = vadd.f32 %v9753_v22, %v9687_v42 }
 0x144   :  { %1655 = vmatpush.bf16.msrb.mxu1 %v6736_v12  ;;  %v6720_v16 = vor.u32 %v8568_v48, %v6717_v35  ;;  %v6728_v40 = vor.u32 %v8569_v14, %v6725_v20  ;;  %v1079_v14 = vsub.f32 1.0, %v9780_v4  ;;  %v6701_v35 = vld [vmem:[#allocation9 + $0x70] sm:$0xf0]  ;;  %v6707_v4 = vld [vmem:[#allocation9 + $0x68] sm:$0xf]  ;;  %v1060_v17 = vsub.f32 1.0, %v9810_v5 }
 0x145   :  { %v6691_v3 = vld [vmem:[#allocation9 + $0x48] sm:$0xf]  ;;  %v8563_v5 = vld [vmem:[#allocation9 + $0x54] sm:$0xf0] }
 0x146   :  { %1668 = vmatpush.bf16.msra.mxu2 %v6740_v11  ;;  %v1080_v42 = vmul.f32 %v9760_v0, %v1079_v14  ;;  %v8556_v14 = vld [vmem:[#allocation9 + $0x24] sm:$0xf] }
 0x147   :  { %1681 = vmatpush.bf16.msra.mxu3 %v6744_v26  ;;  %1643 = vmatpush.bf16.msrb.mxu0 %v6716_v29  ;;  %v8566_v26 = vld [vmem:[#allocation9 + $0x6c] sm:$0xf0]  ;;  %v6708_v29 = vor.u32 %v8567_v49, %v6707_v4 }
 0x148   :  { %v713_v23 = vpop.f32.mrf.mxu2  ;;  %1656 = vmatpush.bf16.msrb.mxu1 %v6720_v16  ;;  %v6700_v48 = vor.u32 %v8566_v26, %v6699_v31  ;;  %v385_v16 = vadd.f32 %v9751_v9, %v9684_v41  ;;  %v8562_v41 = vld [vmem:[#allocation9 + $0x4c] sm:$0xf0]  ;;  %v8560_v9 = vld [vmem:[#allocation9 + $0x44] sm:$0xf]  ;;  %v6692_v26 = vor.u32 %v8563_v5, %v6691_v3  ;;  %v6653_v5 = vld [vmem:[#allocation9 + $0x10] sm:$0xf0] }
 0x149   :  { %v726_v28 = vpop.f32.mrf.mxu3  ;;  %v732_v12 = vadd.f32 %v713_v23, %v484_v54  ;;  %v750_v54 = vor.u32 1.1754944e-38, %v749_v7  ;;  %v746_v7 = vsel %vm9798_vm7, %v9723_v57, %v742_v27  ;;  %v6709_v23 = vld [vmem:[#allocation9 + $0x78] sm:$0xf0]  ;;  %v1088_v57 = vand.u32 2147483648, %v9744_v47  ;;  %v8552_v3 = vld [vmem:[#allocation9 + $0x4] sm:$0xf] }
 0x14a   :  { %v733_v33 = vadd.f32 %v726_v28, %v485_v34  ;;  %1669 = vmatpush.bf16.msra.mxu2 %v6724_v19  ;;  %v8564_v34 = vld [vmem:[#allocation9 + $0x64] sm:$0xf]  ;;  %v792_v27 = vmul.f32 0.0, %v770_v59  ;;  %v6688_v31 = vor.u32 %v8560_v9, %v6685_v2  ;;  %v1086_v9 = vand.u32 2147483647, %v9744_v47 }
 0x14b   :  { %9034 = vtanh.f32 %v732_v12  ;;  %1682 = vmatpush.bf16.msra.mxu3 %v6728_v40  ;;  %v6704_v19 = vor.u32 %v8564_v34, %v6701_v35  ;;  %1644 = vmatpush.bf16.msrb.mxu0 %v6700_v48  ;;  %v6712_v40 = vor.u32 %v8565_v56, %v6709_v23  ;;  %v6683_v12 = vld [vmem:[#allocation9 + $0x40] sm:$0xf]  ;;  %v751_v22 = vsel %vm9804_vm8, %v750_v54, %v746_v7  ;;  %v8561_v34 = vld [vmem:[#allocation9 + $0x4c] sm:$0xf]  ;;  %v6693_v48 = vld [vmem:[#allocation9 + $0x58] sm:$0xf0] }
 0x14c   :  { %v6386_v25 = vmul.f32 -1.442695, %v733_v33  ;;  %v6684_v33 = vor.u32 %v8562_v41, %v6683_v12  ;;  %v6667_v35 = vld [vmem:[#allocation9 + $0x20] sm:$0xf]  ;;  %v6696_v49 = vor.u32 %v8561_v34, %v6693_v48  ;;  %v8559_v56 = vld [vmem:[#allocation9 + $0x34] sm:$0xf0]  ;;  %v1081_v41 = vadd.f32 %v9760_v0, %v1080_v42 }
 0x14d   :  { %1657 = vmatpush.bf16.msrb.mxu1 %v6704_v19  ;;  %v8558_v19 = vld [vmem:[#allocation9 + $0x2c] sm:$0xf0]  ;;  %v8553_v34 = vld [vmem:[#allocation9 + $0xc] sm:$0xf]  ;;  %vm1087_vm15 = vcmp.eq.f32.partialorder %v1086_v9, 8.507059e+37 }
 0x14e   :  { %9036 = vpow2.f32 %v6386_v25  ;;  %1670 = vmatpush.bf16.msra.mxu2 %v6708_v29  ;;  %v463_v25 = vpack.c.bf16 %v414_v53, %v385_v16  ;;  %v6669_v29 = vld [vmem:[#allocation9 + $0x30] sm:$0xf0]  ;;  %v6668_v7 = vor.u32 %v8558_v19, %v6667_v35  ;;  %v6675_v53 = vld [vmem:[#allocation9 + $0x28] sm:$0xf]  ;;  %v1069_v35 = vand.u32 2147483648, %v9742_v45 }
 0x14f   :  { %1683 = vmatpush.bf16.msra.mxu3 %v6712_v40  ;;  %1645 = vmatpush.bf16.msrb.mxu0 %v6684_v33  ;;  %v6672_v16 = vor.u32 %v8556_v14, %v6669_v29  ;;  %v6676_v23 = vor.u32 %v8559_v56, %v6675_v53  ;;  %v8557_v40 = vld [vmem:[#allocation9 + $0x2c] sm:$0xf]  ;;  %v6661_v19 = vld [vmem:[#allocation9 + $0x18] sm:$0xf0]  ;;  %v1089_v14 = vor.u32 1.1754944e-38, %v1088_v57  ;;  %v1085_v56 = vsel %vm9843_vm13, %v9760_v0, %v1081_v41 }
 0x150   :  { %v715_v28 = vpop.f32.mrf.mxu2  ;;  %v804_v12 = vunpack.c.l.bf16 %v463_v25  ;;  %v6664_v53 = vor.u32 %v8553_v34, %v6661_v19 }
 0x151   :  { %v728_v20 = vpop.f32.mrf.mxu3  ;;  %v9035_v43 = vpop.eup %9034  ;;  %1658 = vmatpush.bf16.msrb.mxu1 %v6688_v31  ;;  %v6677_v28 = vld [vmem:[#allocation9 + $0x38] sm:$0xf0] }
 0x152   :  { %v793_v59 = vmul.f32 %v9035_v43, %v751_v22  ;;  %1671 = vmatpush.bf16.msra.mxu2 %v6692_v26  ;;  %v6651_v20 = vld [vmem:[#allocation9] sm:$0xf]  ;;  %v8554_v43 = vld [vmem:[#allocation9 + $0xc] sm:$0xf0]  ;;  %v805_v22 = vunpack.c.h.bf16 %v463_v25  ;;  %v6680_v33 = vor.u32 %v8557_v40, %v6677_v28  ;;  %v6656_v25 = vor.u32 %v8552_v3, %v6653_v5  ;;  %v8555_v26 = vld [vmem:[#allocation9 + $0x14] sm:$0xf0] }
 0x153   :  { %1684 = vmatpush.bf16.msra.mxu3 %v6696_v49  ;;  %1646 = vmatpush.bf16.msrb.mxu0 %v6668_v7  ;;  %v6652_v2 = vor.u32 %v8554_v43, %v6651_v20  ;;  %v1067_v7 = vand.u32 2147483647, %v9742_v45  ;;  %v1090_v28 = vsel %vm1087_vm15, %v1089_v14, %v1085_v56 }
 0x154   :  { %v9037_v4 = vpop.eup %9036  ;;  %v9827_v11 = vadd.f32 %v793_v59, %v792_v27  ;;  %v1061_v27 = vmul.f32 %v9784_v55, %v1060_v17  ;;  %v6659_v59 = vld [vmem:[#allocation9 + $0x8] sm:$0xf]  ;;  %v1112_v9 = vmul.f32 0.0, %v1090_v28  ;;  %v6896_v28 = vld [vmem:[#allocation6 + $0xf0] sm:$0xf0] }
 0x155   :  { %v9829_v54 = vadd.f32 1.0, %v9037_v4  ;;  %1659 = vmatpush.bf16.msrb.mxu1 %v6672_v16  ;;  %v6660_v49 = vor.u32 %v8555_v26, %v6659_v59  ;;  %vm1068_vm0 = vcmp.eq.f32.partialorder %v1067_v7, 8.507059e+37 }
 0x156   :  { %1672 = vmatpush.bf16.msra.mxu2 %v6676_v23  ;;  %v1062_v29 = vadd.f32 %v9784_v55, %v1061_v27  ;;  %v1070_v23 = vor.u32 1.1754944e-38, %v1069_v35 }
 0x157   :  { %9038 = vrcp.f32 %v9829_v54  ;;  %1685 = vmatpush.bf16.msra.mxu3 %v6680_v33  ;;  %1647 = vmatpush.bf16.msrb.mxu0 %v6652_v2  ;;  %v786_v3 = vand.u32 2147483647, %v9829_v54  ;;  %vm782_vm2 = vweird.f32 %v9829_v54 }
 0x158   :  { %v1033_v31 = vpop.f32.mrf.mxu2  ;;  %v1066_v40 = vsel %vm9856_vm14, %v9784_v55, %v1062_v29 }
 0x159   :  { %v1046_v42 = vpop.f32.mrf.mxu3  ;;  %v1052_v48 = vadd.f32 %v1033_v31, %v804_v12  ;;  %1660 = vmatpush.bf16.msrb.mxu1 %v6656_v25  ;;  %v1071_v41 = vsel %vm1068_vm0, %v1070_v23, %v1066_v40  ;;  %vm787_vm4 = vcmp.eq.f32.partialorder %v786_v3, 8.507059e+37  ;;  %v8614_v23 = vld [vmem:[#allocation6 + $0xec] sm:$0xf0] }
 0x15a   :  { %v1053_v4 = vadd.f32 %v1046_v42, %v805_v22  ;;  %1673 = vmatpush.bf16.msra.mxu2 %v6660_v49  ;;  %v788_v22 = vand.u32 2147483648, %v9829_v54 }
 0x15b   :  { %9040 = vtanh.f32 %v1052_v48  ;;  %1686 = vmatpush.bf16.msra.mxu3 %v6664_v53 }
 0x15c   :  { %v6517_v47 = vmul.f32 -1.442695, %v1053_v4  ;;  %v789_v31 = vor.u32 1.1754944e-38, %v788_v22  ;;  %v6878_v22 = vld [vmem:[#allocation6 + $0xc0] sm:$0xf] }
 0x15d   :  { %v9039_v57 = vpop.eup %9038 }
 0x15e   :  { %9042 = vpow2.f32 %v6517_v47  ;;  %v778_v45 = vmul.f32 %v9039_v57, %v9829_v54  ;;  %vm783_vm1 = vweird.f32 %v9039_v57 }
 0x15f   :  { %9044 = vtanh.f32 %v9827_v11  ;;  %vm784_vm3 = vmor %vm782_vm2, %vm783_vm1 }
 0x160   :  { %v779_v20 = vsub.f32 1.0, %v778_v45  ;;  %v1035_v12 = vpop.f32.mrf.mxu2  ;;  %v8612_v45 = vld [vmem:[#allocation6 + $0xe4] sm:$0xf] }
 0x161   :  { %v1048_v0 = vpop.f32.mrf.mxu3  ;;  %v9041_v27 = vpop.eup %9040  ;;  %v6899_v12 = vor.u32 %v8612_v45, %v6896_v28  ;;  %v6854_v28 = vld [vmem:[#allocation6 + $0x88] sm:$0xf] }
 0x162   :  { %v780_v43 = vmul.f32 %v9039_v57, %v779_v20  ;;  %v1113_v33 = vmul.f32 %v9041_v27, %v1071_v41  ;;  %v6902_v20 = vld [vmem:[#allocation6 + $0xe8] sm:$0xf]  ;;  %v8615_v0 = vld [vmem:[#allocation6 + $0xf4] sm:$0xf0]  ;;  %v8613_v41 = vld [vmem:[#allocation6 + $0xec] sm:$0xf] }
 0x163   :  { %v6903_v27 = vor.u32 %v8615_v0, %v6902_v20  ;;  %v8603_v20 = vld [vmem:[#allocation6 + $0x94] sm:$0xf0] }
 0x164   :  { %v9043_v2 = vpop.eup %9042  ;;  %v9870_v5 = vadd.f32 %v1113_v33, %v1112_v9  ;;  %v781_v59 = vadd.f32 %v9039_v57, %v780_v43  ;;  %v6904_v9 = vld [vmem:[#allocation6 + $0xf8] sm:$0xf0]  ;;  %v8610_v33 = vld [vmem:[#allocation6 + $0xcc] sm:$0xf0] }
 0x165   :  { %v1096_v55 = vadd.f32 1.0, %v9043_v2  ;;  %v9045_v42 = vpop.eup %9044  ;;  %v6907_v43 = vor.u32 %v8613_v41, %v6904_v9  ;;  %v8608_v2 = vld [vmem:[#allocation6 + $0xc4] sm:$0xf]  ;;  %v6879_v3 = vor.u32 %v8610_v33, %v6878_v22  ;;  %v6856_v41 = vld [vmem:[#allocation6 + $0x98] sm:$0xf0] }
 0x166   :  { %v785_v17 = vsel %vm784_vm3, %v9039_v57, %v781_v59  ;;  %v6894_v57 = vld [vmem:[#allocation6 + $0xe0] sm:$0xf]  ;;  %v6886_v59 = vld [vmem:[#allocation6 + $0xc8] sm:$0xf]  ;;  %v8598_v22 = vld [vmem:[#allocation6 + $0x6c] sm:$0xf0] }
 0x167   :  { %9046 = vrcp.f32 %v1096_v55  ;;  %v790_v25 = vsel %vm787_vm4, %v789_v31, %v785_v17  ;;  %v1108_v54 = vand.u32 2147483648, %v1096_v55  ;;  %v1106_v19 = vand.u32 2147483647, %v1096_v55  ;;  %v8611_v31 = vld [vmem:[#allocation6 + $0xd4] sm:$0xf0] }
 0x168   :  { %v796_v26 = vmul.f32 %v9045_v42, %v790_v25  ;;  %9048 = vtanh.f32 %v9870_v5  ;;  %vm1102_vm6 = vweird.f32 %v1096_v55  ;;  %v6895_v40 = vor.u32 %v8614_v23, %v6894_v57  ;;  %v8609_v25 = vld [vmem:[#allocation6 + $0xcc] sm:$0xf]  ;;  %v8602_v57 = vld [vmem:[#allocation6 + $0x8c] sm:$0xf0]  ;;  %v8600_v23 = vld [vmem:[#allocation6 + $0x84] sm:$0xf] }
 0x169   :  { %v1109_v29 = vor.u32 1.1754944e-38, %v1108_v54  ;;  %vm1107_vm8 = vcmp.eq.f32.partialorder %v1106_v19, 8.507059e+37  ;;  %v6887_v42 = vor.u32 %v8611_v31, %v6886_v59  ;;  %v6870_v19 = vld [vmem:[#allocation6 + $0xa8] sm:$0xf]  ;;  %v8596_v33 = vld [vmem:[#allocation6 + $0x64] sm:$0xf] }
 0x16a   :  { %v797_v34 = vpack.c.bf16 %v796_v26, %v796_v26  ;;  %v6888_v26 = vld [vmem:[#allocation6 + $0xd8] sm:$0xf0]  ;;  %v8599_v59 = vld [vmem:[#allocation6 + $0x74] sm:$0xf0] }
 0x16c   :  { %798 = vst [vmem:[#allocation4] sm:$0xf] %v797_v34  ;;  %1327 = vmatmul.bf16.vlgmr.msra.gmra.mxu0 %v797_v34  ;;  %1340 = vmatmul.bf16.vlgmr.msra.gmra.mxu1 %v797_v34 }
 0x16d   :  { %v9047_v48 = vpop.eup %9046  ;;  %1353 = vmatmul.bf16.vlgmr.msrb.gmra.mxu2 %v797_v34  ;;  %1366 = vmatmul.bf16.vlgmr.msrb.gmra.mxu3 %v797_v34  ;;  %v6891_v34 = vor.u32 %v8609_v25, %v6888_v26  ;;  %v6840_v25 = vld [vmem:[#allocation6 + $0x78] sm:$0xf0] }
 0x16e   :  { %v1098_v35 = vmul.f32 %v9047_v48, %v1096_v55  ;;  %vm1103_vm5 = vweird.f32 %v9047_v48  ;;  %v9049_v53 = vpop.eup %9048  ;;  %1961 = vmatpush.bf16.msra.mxu0 %v6895_v40  ;;  %1974 = vmatpush.bf16.msra.mxu1 %v6899_v12  ;;  %v6880_v55 = vld [vmem:[#allocation6 + $0xd0] sm:$0xf0]  ;;  %v6855_v12 = vor.u32 %v8603_v20, %v6854_v28  ;;  %v8591_v28 = vld [vmem:[#allocation6 + $0x34] sm:$0xf0] }
 0x16f   :  { %vm1104_vm7 = vmor %vm1102_vm6, %vm1103_vm5  ;;  %1987 = vmatpush.bf16.msrb.mxu2 %v6903_v27  ;;  %2000 = vmatpush.bf16.msrb.mxu3 %v6907_v43  ;;  %v6883_v17 = vor.u32 %v8608_v2, %v6880_v55  ;;  %v6848_v40 = vld [vmem:[#allocation6 + $0x90] sm:$0xf0]  ;;  %v8601_v27 = vld [vmem:[#allocation6 + $0x8c] sm:$0xf] }
 0x170   :  { %v1099_v4 = vsub.f32 1.0, %v1098_v35  ;;  %v8606_v35 = vld [vmem:[#allocation6 + $0xac] sm:$0xf0]  ;;  %v6851_v0 = vor.u32 %v8600_v23, %v6848_v40  ;;  %v6859_v9 = vor.u32 %v8601_v27, %v6856_v41  ;;  %v6830_v43 = vld [vmem:[#allocation6 + $0x60] sm:$0xf] }
 0x171   :  { %v6831_v2 = vor.u32 %v8598_v22, %v6830_v43  ;;  %v6838_v55 = vld [vmem:[#allocation6 + $0x68] sm:$0xf]  ;;  %v6808_v27 = vld [vmem:[#allocation6 + $0x38] sm:$0xf0]  ;;  %v1124_v43 = vunpack.c.h.bf16 %v9595_v51  ;;  %v6782_v22 = vld [vmem:[#allocation6] sm:$0xf] }
 0x172   :  { %v1100_v49 = vmul.f32 %v9047_v48, %v1099_v4  ;;  %1962 = vmatpush.bf16.msra.mxu0 %v6879_v3  ;;  %1975 = vmatpush.bf16.msra.mxu1 %v6883_v17  ;;  %v8604_v4 = vld [vmem:[#allocation6 + $0xa4] sm:$0xf]  ;;  %v6832_v3 = vld [vmem:[#allocation6 + $0x70] sm:$0xf0]  ;;  %v6839_v17 = vor.u32 %v8599_v59, %v6838_v55  ;;  %v6806_v40 = vld [vmem:[#allocation6 + $0x28] sm:$0xf] }
 0x173   :  { %1988 = vmatpush.bf16.msrb.mxu2 %v6887_v42  ;;  %2001 = vmatpush.bf16.msrb.mxu3 %v6891_v34  ;;  %v6835_v31 = vor.u32 %v8596_v33, %v6832_v3  ;;  %v8597_v42 = vld [vmem:[#allocation6 + $0x6c] sm:$0xf]  ;;  %v6814_v34 = vld [vmem:[#allocation6 + $0x40] sm:$0xf]  ;;  %v8586_v33 = vld [vmem:[#allocation6 + $0xc] sm:$0xf0] }
 0x174   :  { %v1101_v14 = vadd.f32 %v9047_v48, %v1100_v49  ;;  %v6864_v49 = vld [vmem:[#allocation6 + $0xb0] sm:$0xf0]  ;;  %v6843_v26 = vor.u32 %v8597_v42, %v6840_v25  ;;  %v6783_v59 = vor.u32 %v8586_v33, %v6782_v22  ;;  %v8587_v42 = vld [vmem:[#allocation6 + $0x14] sm:$0xf0] }
 0x176   :  { %v1105_v7 = vsel %vm1104_vm7, %v9047_v48, %v1101_v14  ;;  %v6862_v48 = vld [vmem:[#allocation6 + $0xa0] sm:$0xf]  ;;  %v8607_v14 = vld [vmem:[#allocation6 + $0xb4] sm:$0xf0] }
 0x177   :  { %v1110_v16 = vsel %vm1107_vm8, %v1109_v29, %v1105_v7  ;;  %v6863_v54 = vor.u32 %v8606_v35, %v6862_v48  ;;  %v6867_v29 = vor.u32 %v8604_v4, %v6864_v49  ;;  %v6871_v7 = vor.u32 %v8607_v14, %v6870_v19  ;;  %v8594_v48 = vld [vmem:[#allocation6 + $0x4c] sm:$0xf0]  ;;  %v8592_v35 = vld [vmem:[#allocation6 + $0x44] sm:$0xf]  ;;  %v6822_v49 = vld [vmem:[#allocation6 + $0x48] sm:$0xf] }
 0x178   :  { %v1116_v56 = vmul.f32 %v9049_v53, %v1110_v16  ;;  %v8605_v53 = vld [vmem:[#allocation6 + $0xac] sm:$0xf]  ;;  %v6872_v16 = vld [vmem:[#allocation6 + $0xb8] sm:$0xf0]  ;;  %v6815_v4 = vor.u32 %v8594_v48, %v6814_v34  ;;  %v8595_v19 = vld [vmem:[#allocation6 + $0x54] sm:$0xf0] }
 0x179   :  { %1963 = vmatpush.bf16.msra.mxu0 %v6863_v54  ;;  %1976 = vmatpush.bf16.msra.mxu1 %v6867_v29  ;;  %v6816_v54 = vld [vmem:[#allocation6 + $0x50] sm:$0xf0]  ;;  %v6823_v29 = vor.u32 %v8595_v19, %v6822_v49  ;;  %v8646_v49 = vld [vmem:[#allocation9 + $0xec] sm:$0xf0]  ;;  %v8644_v19 = vld [vmem:[#allocation9 + $0xe4] sm:$0xf] }
 0x17a   :  { %v1117_v47 = vpack.c.bf16 %v1116_v56, %v1116_v56  ;;  %v6875_v56 = vor.u32 %v8605_v53, %v6872_v16  ;;  %1989 = vmatpush.bf16.msrb.mxu2 %v6871_v7  ;;  %v6819_v14 = vor.u32 %v8592_v35, %v6816_v54  ;;  %v8593_v7 = vld [vmem:[#allocation6 + $0x4c] sm:$0xf]  ;;  %v6824_v53 = vld [vmem:[#allocation6 + $0x58] sm:$0xf0]  ;;  %v7025_v54 = vld [vmem:[#allocation9 + $0xe0] sm:$0xf] }
 0x17b   :  { %v6827_v16 = vor.u32 %v8593_v7, %v6824_v53  ;;  %v8585_v35 = vld [vmem:[#allocation6 + $0xc] sm:$0xf]  ;;  %v7026_v53 = vor.u32 %v8646_v49, %v7025_v54  ;;  %v7001_v54 = vld [vmem:[#allocation9 + $0xa8] sm:$0xf] }
 0x17c   :  { %1119 = vst [vmem:[#allocation5 + $0x1c] sm:$0xf] %v1117_v47  ;;  %1648 = vmatmul.bf16.vlgmr.msrb.gmra.mxu0 %v1117_v47  ;;  %1661 = vmatmul.bf16.vlgmr.msrb.gmra.mxu1 %v1117_v47 }
 0x17d   :  { %1674 = vmatmul.bf16.vlgmr.msra.gmra.mxu2 %v1117_v47  ;;  %1687 = vmatmul.bf16.vlgmr.msra.gmra.mxu3 %v1117_v47  ;;  %v6846_v47 = vld [vmem:[#allocation6 + $0x80] sm:$0xf] }
 0x17e   :  { %2002 = vmatpush.bf16.msrb.mxu3 %v6875_v56  ;;  %v6847_v45 = vor.u32 %v8602_v57, %v6846_v47  ;;  %1977 = vmatpush.bf16.msra.mxu1 %v6851_v0  ;;  %v6798_v56 = vld [vmem:[#allocation6 + $0x20] sm:$0xf]  ;;  %v8590_v47 = vld [vmem:[#allocation6 + $0x2c] sm:$0xf0]  ;;  %v8588_v57 = vld [vmem:[#allocation6 + $0x24] sm:$0xf]  ;;  %v6807_v0 = vor.u32 %v8591_v28, %v6806_v40 }
 0x17f   :  { %1990 = vmatpush.bf16.msrb.mxu2 %v6855_v12  ;;  %v6799_v23 = vor.u32 %v8590_v47, %v6798_v56  ;;  %v8589_v12 = vld [vmem:[#allocation6 + $0x2c] sm:$0xf]  ;;  %v7033_v56 = vld [vmem:[#allocation9 + $0xe8] sm:$0xf]  ;;  %v8647_v47 = vld [vmem:[#allocation9 + $0xf4] sm:$0xf0] }
 0x180   :  { %1964 = vmatpush.bf16.msra.mxu0 %v6847_v45  ;;  %v6800_v45 = vld [vmem:[#allocation6 + $0x30] sm:$0xf0]  ;;  %v6811_v41 = vor.u32 %v8589_v12, %v6808_v27  ;;  %v7009_v28 = vld [vmem:[#allocation9 + $0xc0] sm:$0xf]  ;;  %v1126_v12 = vunpack.c.h.bf16 %v9661_v36 }
 0x181   :  { %v6803_v20 = vor.u32 %v8588_v57, %v6800_v45  ;;  %v8645_v57 = vld [vmem:[#allocation9 + $0xec] sm:$0xf]  ;;  %v7034_v45 = vor.u32 %v8647_v47, %v7033_v56 }
 0x182   :  { %2003 = vmatpush.bf16.msrb.mxu3 %v6859_v9  ;;  %1978 = vmatpush.bf16.msra.mxu1 %v6835_v31  ;;  %v1123_v9 = vunpack.c.l.bf16 %v9595_v51  ;;  %v6784_v31 = vld [vmem:[#allocation6 + $0x10] sm:$0xf0] }
 0x183   :  { %1991 = vmatpush.bf16.msrb.mxu2 %v6839_v17  ;;  %v6790_v17 = vld [vmem:[#allocation6 + $0x8] sm:$0xf] }
 0x184   :  { %1965 = vmatpush.bf16.msra.mxu0 %v6831_v2  ;;  %v8584_v2 = vld [vmem:[#allocation6 + $0x4] sm:$0xf]  ;;  %v6791_v48 = vor.u32 %v8587_v42, %v6790_v17 }
 0x185   :  { %v6787_v34 = vor.u32 %v8584_v2, %v6784_v31 }
 0x186   :  { %2004 = vmatpush.bf16.msrb.mxu3 %v6843_v26  ;;  %1979 = vmatpush.bf16.msra.mxu1 %v6819_v14  ;;  %v7027_v14 = vld [vmem:[#allocation9 + $0xf0] sm:$0xf0] }
 0x187   :  { %1992 = vmatpush.bf16.msrb.mxu2 %v6823_v29 }
 0x188   :  { %1966 = vmatpush.bf16.msra.mxu0 %v6815_v4  ;;  %v6792_v4 = vld [vmem:[#allocation6 + $0x18] sm:$0xf0] }
 0x189   :  { %v6795_v51 = vor.u32 %v8585_v35, %v6792_v4  ;;  %v6995_v4 = vld [vmem:[#allocation9 + $0xb0] sm:$0xf0] }
 0x18a   :  { %2005 = vmatpush.bf16.msrb.mxu3 %v6827_v16  ;;  %1980 = vmatpush.bf16.msra.mxu1 %v6803_v20  ;;  %v7030_v16 = vor.u32 %v8644_v19, %v7027_v14  ;;  %v8642_v20 = vld [vmem:[#allocation9 + $0xcc] sm:$0xf0]  ;;  %v8637_v14 = vld [vmem:[#allocation9 + $0xac] sm:$0xf] }
 0x18b   :  { %1993 = vmatpush.bf16.msrb.mxu2 %v6807_v0  ;;  %v8640_v0 = vld [vmem:[#allocation9 + $0xc4] sm:$0xf]  ;;  %v7010_v27 = vor.u32 %v8642_v20, %v7009_v28  ;;  %v6979_v20 = vld [vmem:[#allocation9 + $0x90] sm:$0xf0] }
 0x18c   :  { %1967 = vmatpush.bf16.msra.mxu0 %v6799_v23  ;;  %v7035_v23 = vld [vmem:[#allocation9 + $0xf8] sm:$0xf0]  ;;  %v8632_v28 = vld [vmem:[#allocation9 + $0x84] sm:$0xf] }
 0x18d   :  { %v7038_v40 = vor.u32 %v8645_v57, %v7035_v23  ;;  %v6977_v57 = vld [vmem:[#allocation9 + $0x80] sm:$0xf]  ;;  %v8634_v23 = vld [vmem:[#allocation9 + $0x8c] sm:$0xf0] }
 0x18e   :  { %2006 = vmatpush.bf16.msrb.mxu3 %v6811_v41  ;;  %1981 = vmatpush.bf16.msra.mxu1 %v6787_v34  ;;  %v7011_v41 = vld [vmem:[#allocation9 + $0xd0] sm:$0xf0]  ;;  %v8638_v34 = vld [vmem:[#allocation9 + $0xac] sm:$0xf0] }
 0x18f   :  { %1994 = vmatpush.bf16.msrb.mxu2 %v6791_v48  ;;  %v7014_v2 = vor.u32 %v8640_v0, %v7011_v41  ;;  %v8636_v48 = vld [vmem:[#allocation9 + $0xa4] sm:$0xf]  ;;  %v1125_v0 = vunpack.c.l.bf16 %v9661_v36 }
 0x190   :  { %1968 = vmatpush.bf16.msra.mxu0 %v6783_v59  ;;  %v7019_v59 = vld [vmem:[#allocation9 + $0xd8] sm:$0xf0]  ;;  %v6998_v19 = vor.u32 %v8636_v48, %v6995_v4 }
 0x192   :  { %2007 = vmatpush.bf16.msrb.mxu3 %v6795_v51  ;;  %2295 = vmatpush.bf16.msrb.mxu1 %v7030_v16  ;;  %v8639_v51 = vld [vmem:[#allocation9 + $0xb4] sm:$0xf0] }
 0x193   :  { %2308 = vmatpush.bf16.msra.mxu2 %v7034_v45 }
 0x194   :  { %2282 = vmatpush.bf16.msrb.mxu0 %v7026_v53  ;;  %v7002_v53 = vor.u32 %v8639_v51, %v7001_v54 }
 0x196   :  { %2321 = vmatpush.bf16.msra.mxu3 %v7038_v40  ;;  %2296 = vmatpush.bf16.msrb.mxu1 %v7014_v2  ;;  %v6978_v40 = vor.u32 %v8634_v23, %v6977_v57  ;;  %v8635_v2 = vld [vmem:[#allocation9 + $0x94] sm:$0xf0] }
 0x197   :  { %v8631_v23 = vld [vmem:[#allocation9 + $0x74] sm:$0xf0] }
 0x198   :  { %2283 = vmatpush.bf16.msrb.mxu0 %v7010_v27 }
 0x19a   :  { %2297 = vmatpush.bf16.msrb.mxu1 %v6998_v19  ;;  %v8628_v19 = vld [vmem:[#allocation9 + $0x64] sm:$0xf] }
 0x1e9   :  { %v1328_v3 = vpop.f32.mrf.mxu0  ;;  %v1341_v55 = vpop.f32.mrf.mxu1 }
 0x1ea   :  { %v1371_v25 = vadd.f32 %v1328_v3, %v1123_v9  ;;  %v1372_v26 = vadd.f32 %v1341_v55, %v1124_v43  ;;  %v7017_v9 = vld [vmem:[#allocation9 + $0xc8] sm:$0xf]  ;;  %v8643_v43 = vld [vmem:[#allocation9 + $0xd4] sm:$0xf0]  ;;  %v8641_v55 = vld [vmem:[#allocation9 + $0xcc] sm:$0xf] }
 0x1eb   :  { %v7018_v3 = vor.u32 %v8643_v43, %v7017_v9  ;;  %v1444_v43 = vunpack.c.l.bf16 %v9667_v44 }
 0x1ec   :  { %v6646_v29 = vmul.f32 -1.442695, %v1371_v25  ;;  %v6647_v7 = vmul.f32 -1.442695, %v1372_v26  ;;  %v7022_v25 = vor.u32 %v8641_v55, %v7019_v59  ;;  %v6993_v26 = vld [vmem:[#allocation9 + $0xa0] sm:$0xf] }
 0x1ed   :  { %v6994_v35 = vor.u32 %v8638_v34, %v6993_v26  ;;  %2309 = vmatpush.bf16.msra.mxu2 %v7018_v3 }
 0x1ee   :  { %9050 = vpow2.f32 %v6646_v29  ;;  %v7003_v29 = vld [vmem:[#allocation9 + $0xb8] sm:$0xf0]  ;;  %2322 = vmatpush.bf16.msra.mxu3 %v7022_v25 }
 0x1ef   :  { %9052 = vpow2.f32 %v6647_v7  ;;  %v7006_v16 = vor.u32 %v8637_v14, %v7003_v29  ;;  %2284 = vmatpush.bf16.msrb.mxu0 %v6994_v35  ;;  %v6987_v25 = vld [vmem:[#allocation9 + $0x98] sm:$0xf0]  ;;  %v6961_v35 = vld [vmem:[#allocation9 + $0x60] sm:$0xf]  ;;  %v6963_v14 = vld [vmem:[#allocation9 + $0x70] sm:$0xf0] }
 0x1f0   :  { %v9877_v22 = vpop.f32.mrf.mxu2  ;;  %v1367_v33 = vpop.f32.mrf.mxu3  ;;  %v6969_v29 = vld [vmem:[#allocation9 + $0x68] sm:$0xf] }
 0x1f1   :  { %v1374_v31 = vadd.f32 %v1367_v33, %v1126_v12  ;;  %v1330_v17 = vpop.f32.mrf.mxu0  ;;  %v1343_v42 = vpop.f32.mrf.mxu1  ;;  %v6985_v12 = vld [vmem:[#allocation9 + $0x88] sm:$0xf]  ;;  %v1445_v33 = vunpack.c.h.bf16 %v9667_v44  ;;  %2310 = vmatpush.bf16.msra.mxu2 %v7002_v53  ;;  %v8630_v44 = vld [vmem:[#allocation9 + $0x6c] sm:$0xf0]  ;;  %v1373_v54 = vadd.f32 %v9877_v22, %v1125_v0 }
 0x1f2   :  { %2323 = vmatpush.bf16.msra.mxu3 %v7006_v16  ;;  %v6986_v17 = vor.u32 %v8635_v2, %v6985_v12  ;;  %v8633_v42 = vld [vmem:[#allocation9 + $0x8c] sm:$0xf]  ;;  %v6947_v2 = vld [vmem:[#allocation9 + $0x50] sm:$0xf0] }
 0x1f3   :  { %v6648_v49 = vmul.f32 -1.442695, %v1374_v31  ;;  %v6982_v31 = vor.u32 %v8632_v28, %v6979_v20  ;;  %2285 = vmatpush.bf16.msrb.mxu0 %v6978_v40  ;;  %v6990_v51 = vor.u32 %v8633_v42, %v6987_v25  ;;  %v8629_v40 = vld [vmem:[#allocation9 + $0x6c] sm:$0xf]  ;;  %v6971_v28 = vld [vmem:[#allocation9 + $0x78] sm:$0xf0] }
 0x1f4   :  { %v9051_v7 = vpop.eup %9050  ;;  %v6953_v42 = vld [vmem:[#allocation9 + $0x48] sm:$0xf]  ;;  %v8627_v25 = vld [vmem:[#allocation9 + $0x54] sm:$0xf0] }
 0x1f5   :  { %v9053_v56 = vpop.eup %9052  ;;  %v9879_v47 = vadd.f32 1.0, %v9051_v7  ;;  %9054 = vpow2.f32 %v6648_v49  ;;  %2298 = vmatpush.bf16.msrb.mxu1 %v6982_v31  ;;  %v6962_v49 = vor.u32 %v8630_v44, %v6961_v35  ;;  %2311 = vmatpush.bf16.msra.mxu2 %v6986_v17  ;;  %v6970_v31 = vor.u32 %v8631_v23, %v6969_v29  ;;  %v6929_v29 = vld [vmem:[#allocation9 + $0x20] sm:$0xf]  ;;  %v8620_v23 = vld [vmem:[#allocation9 + $0x24] sm:$0xf] }
 0x1f6   :  { %v9881_v45 = vadd.f32 1.0, %v9053_v56  ;;  %v6966_v56 = vor.u32 %v8628_v19, %v6963_v14  ;;  %2324 = vmatpush.bf16.msra.mxu3 %v6990_v51  ;;  %v6974_v17 = vor.u32 %v8629_v40, %v6971_v28  ;;  %v6931_v40 = vld [vmem:[#allocation9 + $0x30] sm:$0xf0]  ;;  %v6937_v28 = vld [vmem:[#allocation9 + $0x28] sm:$0xf] }
 0x1f7   :  { %9056 = vrcp.f32 %v9879_v47  ;;  %v1388_v27 = vand.u32 2147483647, %v9879_v47  ;;  %v1390_v55 = vand.u32 2147483648, %v9879_v47  ;;  %2286 = vmatpush.bf16.msrb.mxu0 %v6962_v49  ;;  %vm1384_vm10 = vweird.f32 %v9879_v47 }
 0x1f8   :  { %9058 = vrcp.f32 %v9881_v45  ;;  %v1356_v41 = vpop.f32.mrf.mxu2  ;;  %v1369_v9 = vpop.f32.mrf.mxu3  ;;  %v1409_v3 = vand.u32 2147483648, %v9881_v45  ;;  %v1407_v26 = vand.u32 2147483647, %v9881_v45  ;;  %vm1403_vm15 = vweird.f32 %v9881_v45 }
 0x1f9   :  { %v1649_v59 = vpop.f32.mrf.mxu0  ;;  %v1662_v36 = vpop.f32.mrf.mxu1  ;;  %vm9901_vm9 = vcmp.eq.f32.partialorder %v1388_v27, 8.507059e+37  ;;  %v9905_v12 = vor.u32 1.1754944e-38, %v1390_v55  ;;  %v6945_v41 = vld [vmem:[#allocation9 + $0x40] sm:$0xf]  ;;  %2299 = vmatpush.bf16.msrb.mxu1 %v6966_v56  ;;  %v8624_v27 = vld [vmem:[#allocation9 + $0x44] sm:$0xf]  ;;  %2312 = vmatpush.bf16.msra.mxu2 %v6970_v31  ;;  %v6954_v56 = vor.u32 %v8627_v25, %v6953_v42  ;;  %v1446_v49 = vunpack.c.l.bf16 %v9748_v8 }
 0x1fa   :  { %v1692_v34 = vadd.f32 %v1649_v59, %v1444_v43  ;;  %v1693_v48 = vadd.f32 %v1662_v36, %v1445_v33  ;;  %v1447_v43 = vunpack.c.h.bf16 %v9748_v8  ;;  %v8626_v33 = vld [vmem:[#allocation9 + $0x4c] sm:$0xf0]  ;;  %vm9916_vm12 = vcmp.eq.f32.partialorder %v1407_v26, 8.507059e+37  ;;  %2325 = vmatpush.bf16.msra.mxu3 %v6974_v17  ;;  %v6939_v17 = vld [vmem:[#allocation9 + $0x38] sm:$0xf0] }
 0x1fb   :  { %v9055_v4 = vpop.eup %9054  ;;  %v6946_v14 = vor.u32 %v8626_v33, %v6945_v41  ;;  %v6913_v42 = vld [vmem:[#allocation9] sm:$0xf]  ;;  %v8618_v25 = vld [vmem:[#allocation9 + $0xc] sm:$0xf0]  ;;  %v6923_v41 = vld [vmem:[#allocation9 + $0x18] sm:$0xf0] }
 0x1fc   :  { %v9893_v7 = vadd.f32 1.0, %v9055_v4  ;;  %v6777_v53 = vmul.f32 -1.442695, %v1692_v34  ;;  %v6778_v16 = vmul.f32 -1.442695, %v1693_v48  ;;  %v1410_v48 = vor.u32 1.1754944e-38, %v1409_v3 }
 0x1fd   :  { %v9895_v57 = vpop.eup %9056  ;;  %v8625_v4 = vld [vmem:[#allocation9 + $0x4c] sm:$0xf]  ;;  %2287 = vmatpush.bf16.msrb.mxu0 %v6946_v14  ;;  %2313 = vmatpush.bf16.msra.mxu2 %v6954_v56  ;;  %v6914_v56 = vor.u32 %v8618_v25, %v6913_v42 }
 0x1fe   :  { %v9897_v20 = vpop.eup %9058  ;;  %v1380_v22 = vmul.f32 %v9895_v57, %v9879_v47  ;;  %9060 = vrcp.f32 %v9893_v7  ;;  %vm1385_vm11 = vweird.f32 %v9895_v57  ;;  %v6934_v47 = vor.u32 %v8620_v23, %v6931_v40  ;;  %v8616_v23 = vld [vmem:[#allocation9 + $0x4] sm:$0xf] }
 0x1ff   :  { %v1399_v9 = vmul.f32 %v9897_v20, %v9881_v45  ;;  %9062 = vtanh.f32 %v1373_v54  ;;  %v6955_v54 = vld [vmem:[#allocation9 + $0x58] sm:$0xf0]  ;;  %vm1404_vm13 = vweird.f32 %v9897_v20  ;;  %vm9929_vm14 = vmor %vm1384_vm10, %vm1385_vm11  ;;  %vm1423_vm2 = vweird.f32 %v9893_v7 }
 0x200   :  { %v1381_v59 = vsub.f32 1.0, %v1380_v22  ;;  %9064 = vpow2.f32 %v6777_v53  ;;  %v9912_v55 = vpop.f32.mrf.mxu2  ;;  %v1688_v36 = vpop.f32.mrf.mxu3  ;;  %v8622_v53 = vld [vmem:[#allocation9 + $0x2c] sm:$0xf0]  ;;  %vm1405_vm0 = vmor %vm1403_vm15, %vm1404_vm13  ;;  %v1427_v8 = vand.u32 2147483647, %v9893_v7 }
 0x201   :  { %v1400_v34 = vsub.f32 1.0, %v1399_v9  ;;  %9066 = vpow2.f32 %v6778_v16  ;;  %v1651_v35 = vpop.f32.mrf.mxu0  ;;  %v1664_v44 = vpop.f32.mrf.mxu1  ;;  %v1695_v19 = vadd.f32 %v1688_v36, %v1447_v43  ;;  %v6950_v16 = vor.u32 %v8624_v27, %v6947_v2  ;;  %v8623_v27 = vld [vmem:[#allocation9 + $0x34] sm:$0xf0]  ;;  %v8621_v2 = vld [vmem:[#allocation9 + $0x2c] sm:$0xf] }
 0x202   :  { %v1382_v51 = vmul.f32 %v9895_v57, %v1381_v59  ;;  %v6958_v43 = vor.u32 %v8625_v4, %v6955_v54  ;;  %v6930_v33 = vor.u32 %v8622_v53, %v6929_v29  ;;  %v6938_v45 = vor.u32 %v8623_v27, %v6937_v28  ;;  %v8619_v28 = vld [vmem:[#allocation9 + $0x14] sm:$0xf0] }
 0x203   :  { %v1401_v3 = vmul.f32 %v9897_v20, %v1400_v34  ;;  %v6779_v9 = vmul.f32 -1.442695, %v1695_v19  ;;  %2300 = vmatpush.bf16.msrb.mxu1 %v6950_v16  ;;  %v6942_v44 = vor.u32 %v8621_v2, %v6939_v17  ;;  %v1429_v27 = vand.u32 2147483648, %v9893_v7 }
 0x204   :  { %v9922_v22 = vpop.eup %9060  ;;  %v1383_v26 = vadd.f32 %v9895_v57, %v1382_v51  ;;  %2326 = vmatpush.bf16.msra.mxu3 %v6958_v43  ;;  %2288 = vmatpush.bf16.msrb.mxu0 %v6930_v33  ;;  %vm1428_vm4 = vcmp.eq.f32.partialorder %v1427_v8, 8.507059e+37 }
 0x205   :  { %v9063_v59 = vpop.eup %9062  ;;  %v1402_v36 = vadd.f32 %v9897_v20, %v1401_v3  ;;  %v1419_v31 = vmul.f32 %v9922_v22, %v9893_v7  ;;  %9068 = vpow2.f32 %v6779_v9  ;;  %2314 = vmatpush.bf16.msra.mxu2 %v6938_v45  ;;  %vm1424_vm1 = vweird.f32 %v9922_v22 }
 0x206   :  { %v9065_v34 = vpop.eup %9064  ;;  %v1387_v35 = vsel %vm9929_vm14, %v9895_v57, %v1383_v26  ;;  %v8617_v26 = vld [vmem:[#allocation9 + $0xc] sm:$0xf]  ;;  %vm9970_vm3 = vmor %vm1423_vm2, %vm1424_vm1 }
 0x207   :  { %v9067_v4 = vpop.eup %9066  ;;  %v1392_v54 = vsel %vm9901_vm9, %v9905_v12, %v1387_v35  ;;  %v1406_v51 = vsel %vm1405_vm0, %v9897_v20, %v1402_v36  ;;  %v1420_v19 = vsub.f32 1.0, %v1419_v31  ;;  %v9946_v14 = vadd.f32 1.0, %v9065_v34  ;;  %2301 = vmatpush.bf16.msrb.mxu1 %v6934_v47  ;;  %v6915_v20 = vld [vmem:[#allocation9 + $0x10] sm:$0xf0]  ;;  %v6921_v12 = vld [vmem:[#allocation9 + $0x8] sm:$0xf] }
 0x208   :  { %v1411_v29 = vsel %vm9916_vm12, %v1410_v48, %v1406_v51  ;;  %v1434_v53 = vmul.f32 %v9063_v59, %v1392_v54  ;;  %v9950_v57 = vadd.f32 1.0, %v9067_v4  ;;  %v1677_v3 = vpop.f32.mrf.mxu2  ;;  %v1690_v16 = vpop.f32.mrf.mxu3  ;;  %2327 = vmatpush.bf16.msra.mxu3 %v6942_v44  ;;  %2289 = vmatpush.bf16.msrb.mxu0 %v6914_v56  ;;  %v6918_v43 = vor.u32 %v8616_v23, %v6915_v20 }
 0x209   :  { %v1433_v40 = vmul.f32 %v1411_v29, %v9827_v11  ;;  %v1421_v0 = vmul.f32 %v9922_v22, %v1420_v19  ;;  %9070 = vrcp.f32 %v9946_v14  ;;  %v6922_v33 = vor.u32 %v8619_v28, %v6921_v12 }
 0x20a   :  { %9072 = vrcp.f32 %v9950_v57  ;;  %v1694_v59 = vadd.f32 %v9912_v55, %v1446_v49  ;;  %v6926_v36 = vor.u32 %v8617_v26, %v6923_v41  ;;  %v1430_v55 = vor.u32 1.1754944e-38, %v1429_v27 }
 0x20b   :  { %v9956_v48 = vadd.f32 %v1434_v53, %v1433_v40  ;;  %v9069_v9 = vpop.eup %9068  ;;  %v1422_v11 = vadd.f32 %v9922_v22, %v1421_v0  ;;  %2302 = vmatpush.bf16.msrb.mxu1 %v6918_v43  ;;  %2315 = vmatpush.bf16.msra.mxu2 %v6922_v33  ;;  %v1730_v44 = vand.u32 2147483648, %v9950_v57  ;;  %v1711_v4 = vand.u32 2147483648, %v9946_v14 }
 0x20c   :  { %v9963_v2 = vadd.f32 1.0, %v9069_v9  ;;  %2328 = vmatpush.bf16.msra.mxu3 %v6926_v36  ;;  %v1709_v19 = vand.u32 2147483647, %v9946_v14  ;;  %v1728_v3 = vand.u32 2147483647, %v9950_v57  ;;  %vm1705_vm7 = vweird.f32 %v9946_v14 }
 0x20d   :  { %9074 = vtanh.f32 %v9956_v48  ;;  %v1426_v7 = vsel %vm9970_vm3, %v9922_v22, %v1422_v11  ;;  %vm1724_vm8 = vweird.f32 %v9950_v57  ;;  %v1712_v40 = vor.u32 1.1754944e-38, %v1711_v4  ;;  %v8677_v4 = vld [vmem:[#allocation6 + $0xec] sm:$0xf] }
 0x20e   :  { %9076 = vrcp.f32 %v9963_v2  ;;  %v1431_v54 = vsel %vm1428_vm4, %v1430_v55, %v1426_v7  ;;  %v1731_v12 = vor.u32 1.1754944e-38, %v1730_v44  ;;  %vm1710_vm11 = vcmp.eq.f32.partialorder %v1709_v19, 8.507059e+37  ;;  %v8678_v7 = vld [vmem:[#allocation6 + $0xec] sm:$0xf0]  ;;  %v8676_v55 = vld [vmem:[#allocation6 + $0xe4] sm:$0xf] }
 0x20f   :  { %v9071_v31 = vpop.eup %9070  ;;  %9078 = vtanh.f32 %v1694_v59  ;;  %vm1729_vm12 = vcmp.eq.f32.partialorder %v1728_v3, 8.507059e+37  ;;  %v1750_v27 = vand.u32 2147483648, %v9963_v2  ;;  %vm1744_vm14 = vweird.f32 %v9963_v2  ;;  %v7140_v19 = vld [vmem:[#allocation6 + $0xc0] sm:$0xf]  ;;  %v7142_v3 = vld [vmem:[#allocation6 + $0xd0] sm:$0xf0] }
 0x210   :  { %v9073_v17 = vpop.eup %9072  ;;  %v1701_v42 = vmul.f32 %v9071_v31, %v9946_v14  ;;  %vm1706_vm5 = vweird.f32 %v9071_v31  ;;  %v1748_v8 = vand.u32 2147483647, %v9963_v2 }
 0x211   :  { %v1720_v25 = vmul.f32 %v9073_v17, %v9950_v57  ;;  %vm1725_vm6 = vweird.f32 %v9073_v17  ;;  %vm1707_vm9 = vmor %vm1705_vm7, %vm1706_vm5  ;;  %v1751_v36 = vor.u32 1.1754944e-38, %v1750_v27  ;;  %v8669_v27 = vld [vmem:[#allocation6 + $0xac] sm:$0xf] }
 0x212   :  { %v1702_v34 = vsub.f32 1.0, %v1701_v42  ;;  %vm1726_vm10 = vmor %vm1724_vm8, %vm1725_vm6  ;;  %vm1749_vm0 = vcmp.eq.f32.partialorder %v1748_v8, 8.507059e+37  ;;  %v7156_v42 = vld [vmem:[#allocation6 + $0xe0] sm:$0xf]  ;;  %v7134_v8 = vld [vmem:[#allocation6 + $0xb8] sm:$0xf0] }
 0x213   :  { %v9075_v35 = vpop.eup %9074  ;;  %v1721_v45 = vsub.f32 1.0, %v1720_v25  ;;  %v7157_v25 = vor.u32 %v8678_v7, %v7156_v42  ;;  %v7116_v42 = vld [vmem:[#allocation6 + $0x88] sm:$0xf]  ;;  %v8667_v7 = vld [vmem:[#allocation6 + $0x94] sm:$0xf0] }
 0x214   :  { %v1703_v51 = vmul.f32 %v9071_v31, %v1702_v34  ;;  %v1437_v29 = vmul.f32 %v9075_v35, %v1431_v54  ;;  %v9077_v22 = vpop.eup %9076  ;;  %v7158_v34 = vld [vmem:[#allocation6 + $0xf0] sm:$0xf0]  ;;  %v7164_v35 = vld [vmem:[#allocation6 + $0xe8] sm:$0xf]  ;;  %v7166_v54 = vld [vmem:[#allocation6 + $0xf8] sm:$0xf0] }
 0x215   :  { %v1722_v53 = vmul.f32 %v9073_v17, %v1721_v45  ;;  %v1740_v56 = vmul.f32 %v9077_v22, %v9963_v2  ;;  %v9079_v20 = vpop.eup %9078  ;;  %vm1745_vm13 = vweird.f32 %v9077_v22  ;;  %v8679_v2 = vld [vmem:[#allocation6 + $0xf4] sm:$0xf0]  ;;  %v7161_v45 = vor.u32 %v8676_v55, %v7158_v34  ;;  %v8665_v34 = vld [vmem:[#allocation6 + $0x8c] sm:$0xf] }
 0x216   :  { %v1704_v16 = vadd.f32 %v9071_v31, %v1703_v51  ;;  %v1438_v23 = vpack.c.bf16 %v1437_v29, %v1437_v29  ;;  %vm1746_vm15 = vmor %vm1744_vm14, %vm1745_vm13  ;;  %v7165_v44 = vor.u32 %v8679_v2, %v7164_v35  ;;  %v7169_v51 = vor.u32 %v8677_v4, %v7166_v54  ;;  %v8674_v29 = vld [vmem:[#allocation6 + $0xcc] sm:$0xf0]  ;;  %v7118_v35 = vld [vmem:[#allocation6 + $0x98] sm:$0xf0] }
 0x217   :  { %v1723_v0 = vadd.f32 %v9073_v17, %v1722_v53  ;;  %v1741_v49 = vsub.f32 1.0, %v1740_v56  ;;  %v7141_v53 = vor.u32 %v8674_v29, %v7140_v19  ;;  %v8675_v56 = vld [vmem:[#allocation6 + $0xd4] sm:$0xf0]  ;;  %v7121_v2 = vor.u32 %v8665_v34, %v7118_v35  ;;  %v8660_v4 = vld [vmem:[#allocation6 + $0x64] sm:$0xf] }
 0x218   :  { %v1708_v28 = vsel %vm1707_vm9, %v9071_v31, %v1704_v16  ;;  %1440 = vst [vmem:[#allocation4 + $0x4] sm:$0xf] %v1438_v23  ;;  %1969 = vmatmul.bf16.vlgmr.msra.gmra.mxu0 %v1438_v23  ;;  %1982 = vmatmul.bf16.vlgmr.msra.gmra.mxu1 %v1438_v23  ;;  %v7148_v16 = vld [vmem:[#allocation6 + $0xc8] sm:$0xf]  ;;  %v8663_v29 = vld [vmem:[#allocation6 + $0x74] sm:$0xf0] }
 0x219   :  { %v1713_v26 = vsel %vm1710_vm11, %v1712_v40, %v1708_v28  ;;  %v1727_v41 = vsel %vm1726_vm10, %v9073_v17, %v1723_v0  ;;  %1995 = vmatmul.bf16.vlgmr.msrb.gmra.mxu2 %v1438_v23  ;;  %2008 = vmatmul.bf16.vlgmr.msrb.gmra.mxu3 %v1438_v23  ;;  %v1742_v57 = vmul.f32 %v9077_v22, %v1741_v49  ;;  %v8673_v0 = vld [vmem:[#allocation6 + $0xcc] sm:$0xf]  ;;  %v7124_v28 = vld [vmem:[#allocation6 + $0xa0] sm:$0xf]  ;;  %v8670_v49 = vld [vmem:[#allocation6 + $0xac] sm:$0xf0] }
 0x21a   :  { %v1732_v14 = vsel %vm1729_vm12, %v1731_v12, %v1727_v41  ;;  %v1755_v9 = vmul.f32 %v9079_v20, %v1713_v26  ;;  %2603 = vmatpush.bf16.msra.mxu0 %v7157_v25  ;;  %2616 = vmatpush.bf16.msra.mxu1 %v7161_v45  ;;  %v7149_v40 = vor.u32 %v8675_v56, %v7148_v16  ;;  %v7150_v20 = vld [vmem:[#allocation6 + $0xd8] sm:$0xf0]  ;;  %v8668_v26 = vld [vmem:[#allocation6 + $0xa4] sm:$0xf]  ;;  %v7092_v45 = vld [vmem:[#allocation6 + $0x60] sm:$0xf] }
 0x21b   :  { %v1754_v11 = vmul.f32 %v1732_v14, %v9870_v5  ;;  %v1743_v33 = vadd.f32 %v9077_v22, %v1742_v57  ;;  %2629 = vmatpush.bf16.msrb.mxu2 %v7165_v44  ;;  %2642 = vmatpush.bf16.msrb.mxu3 %v7169_v51  ;;  %v7153_v12 = vor.u32 %v8673_v0, %v7150_v20  ;;  %v7126_v14 = vld [vmem:[#allocation6 + $0xb0] sm:$0xf0]  ;;  %v8671_v57 = vld [vmem:[#allocation6 + $0xb4] sm:$0xf0]  ;;  %v8662_v44 = vld [vmem:[#allocation6 + $0x6c] sm:$0xf0] }
 0x21c   :  { %v7125_v41 = vor.u32 %v8670_v49, %v7124_v28  ;;  %v7117_v25 = vor.u32 %v8667_v7, %v7116_v42  ;;  %v7093_v54 = vor.u32 %v8662_v44, %v7092_v45  ;;  %v7094_v51 = vld [vmem:[#allocation6 + $0x70] sm:$0xf0]  ;;  %v7100_v19 = vld [vmem:[#allocation6 + $0x68] sm:$0xf]  ;;  %v7102_v16 = vld [vmem:[#allocation6 + $0x78] sm:$0xf0] }
 0x21d   :  { %v9988_v43 = vadd.f32 %v1755_v9, %v1754_v11  ;;  %v1747_v59 = vsel %vm1746_vm15, %v9077_v22, %v1743_v33  ;;  %v8672_v22 = vld [vmem:[#allocation6 + $0xc4] sm:$0xf]  ;;  %v7132_v9 = vld [vmem:[#allocation6 + $0xa8] sm:$0xf]  ;;  %v7129_v11 = vor.u32 %v8668_v26, %v7126_v14  ;;  %v8659_v49 = vld [vmem:[#allocation6 + $0x54] sm:$0xf0] }
 0x21e   :  { %v1752_v47 = vsel %vm1749_vm0, %v1751_v36, %v1747_v59  ;;  %v7145_v23 = vor.u32 %v8672_v22, %v7142_v3  ;;  %2604 = vmatpush.bf16.msra.mxu0 %v7141_v53  ;;  %v7133_v33 = vor.u32 %v8671_v57, %v7132_v9  ;;  %v7137_v59 = vor.u32 %v8669_v27, %v7134_v8  ;;  %v7108_v36 = vld [vmem:[#allocation6 + $0x80] sm:$0xf]  ;;  %v8661_v3 = vld [vmem:[#allocation6 + $0x6c] sm:$0xf]  ;;  %v8656_v0 = vld [vmem:[#allocation6 + $0x44] sm:$0xf] }
 0x21f   :  { %9080 = vtanh.f32 %v9988_v43  ;;  %2630 = vmatpush.bf16.msrb.mxu2 %v7149_v40  ;;  %2643 = vmatpush.bf16.msrb.mxu3 %v7153_v12  ;;  %v7097_v22 = vor.u32 %v8660_v4, %v7094_v51  ;;  %v7101_v53 = vor.u32 %v8663_v29, %v7100_v19  ;;  %v7105_v56 = vor.u32 %v8661_v3, %v7102_v16  ;;  %v8658_v40 = vld [vmem:[#allocation6 + $0x4c] sm:$0xf0]  ;;  %v7078_v12 = vld [vmem:[#allocation6 + $0x50] sm:$0xf0]  ;;  %v7084_v28 = vld [vmem:[#allocation6 + $0x48] sm:$0xf] }
 0x220   :  { %2617 = vmatpush.bf16.msra.mxu1 %v7145_v23  ;;  %v7076_v23 = vld [vmem:[#allocation6 + $0x40] sm:$0xf]  ;;  %v7081_v26 = vor.u32 %v8656_v0, %v7078_v12  ;;  %v8657_v14 = vld [vmem:[#allocation6 + $0x4c] sm:$0xf]  ;;  %v7086_v9 = vld [vmem:[#allocation6 + $0x58] sm:$0xf0] }
 0x221   :  { %v7077_v20 = vor.u32 %v8658_v40, %v7076_v23  ;;  %v7089_v57 = vor.u32 %v8657_v14, %v7086_v9  ;;  %v8652_v27 = vld [vmem:[#allocation6 + $0x24] sm:$0xf]  ;;  %v8653_v7 = vld [vmem:[#allocation6 + $0x2c] sm:$0xf]  ;;  %v7044_v44 = vld [vmem:[#allocation6] sm:$0xf] }
 0x222   :  { %2605 = vmatpush.bf16.msra.mxu0 %v7125_v41  ;;  %v7085_v41 = vor.u32 %v8659_v49, %v7084_v28  ;;  %v8650_v4 = vld [vmem:[#allocation6 + $0xc] sm:$0xf0]  ;;  %v7046_v19 = vld [vmem:[#allocation6 + $0x10] sm:$0xf0]  ;;  %v7052_v29 = vld [vmem:[#allocation6 + $0x8] sm:$0xf] }
 0x223   :  { %2631 = vmatpush.bf16.msrb.mxu2 %v7133_v33  ;;  %2644 = vmatpush.bf16.msrb.mxu3 %v7137_v59  ;;  %v8654_v33 = vld [vmem:[#allocation6 + $0x2c] sm:$0xf0]  ;;  %v7062_v59 = vld [vmem:[#allocation6 + $0x30] sm:$0xf0]  ;;  %v7045_v51 = vor.u32 %v8650_v4, %v7044_v44  ;;  %v7054_v23 = vld [vmem:[#allocation6 + $0x18] sm:$0xf0] }
 0x224   :  { %2618 = vmatpush.bf16.msra.mxu1 %v7129_v11  ;;  %v7060_v11 = vld [vmem:[#allocation6 + $0x20] sm:$0xf]  ;;  %v8710_v0 = vld [vmem:[#allocation9 + $0xec] sm:$0xf0]  ;;  %v8708_v28 = vld [vmem:[#allocation9 + $0xe4] sm:$0xf] }
 0x225   :  { %v9081_v31 = vpop.eup %9080  ;;  %v7061_v8 = vor.u32 %v8654_v33, %v7060_v11  ;;  %v7287_v40 = vld [vmem:[#allocation9 + $0xe0] sm:$0xf]  ;;  %v7289_v49 = vld [vmem:[#allocation9 + $0xf0] sm:$0xf0]  ;;  %v8711_v9 = vld [vmem:[#allocation9 + $0xf4] sm:$0xf0] }
 0x226   :  { %v1758_v17 = vmul.f32 %v9081_v31, %v1752_v47  ;;  %v8666_v31 = vld [vmem:[#allocation6 + $0x8c] sm:$0xf0]  ;;  %v8664_v47 = vld [vmem:[#allocation6 + $0x84] sm:$0xf]  ;;  %v7288_v12 = vor.u32 %v8710_v0, %v7287_v40  ;;  %v7292_v14 = vor.u32 %v8708_v28, %v7289_v49  ;;  %v7297_v11 = vld [vmem:[#allocation9 + $0xf8] sm:$0xf0] }
 0x227   :  { %2632 = vmatpush.bf16.msrb.mxu2 %v7117_v25  ;;  %2645 = vmatpush.bf16.msrb.mxu3 %v7121_v2  ;;  %v7281_v44 = vld [vmem:[#allocation9 + $0xd8] sm:$0xf0]  ;;  %v8703_v40 = vld [vmem:[#allocation9 + $0xb4] sm:$0xf0]  ;;  %v7239_v49 = vld [vmem:[#allocation9 + $0x80] sm:$0xf] }
 0x228   :  { %v1759_v5 = vpack.c.bf16 %v1758_v17, %v1758_v17  ;;  %v7109_v17 = vor.u32 %v8666_v31, %v7108_v36  ;;  %v7068_v36 = vld [vmem:[#allocation6 + $0x28] sm:$0xf]  ;;  %v8655_v31 = vld [vmem:[#allocation6 + $0x34] sm:$0xf0]  ;;  %v7265_v28 = vld [vmem:[#allocation9 + $0xb8] sm:$0xf0] }
 0x229   :  { %v7069_v42 = vor.u32 %v8655_v31, %v7068_v36  ;;  %v7271_v36 = vld [vmem:[#allocation9 + $0xc0] sm:$0xf]  ;;  %v8706_v31 = vld [vmem:[#allocation9 + $0xcc] sm:$0xf0] }
 0x22a   :  { %1761 = vst [vmem:[#allocation5 + $0x18] sm:$0xf] %v1759_v5  ;;  %2290 = vmatmul.bf16.vlgmr.msrb.gmra.mxu0 %v1759_v5  ;;  %2303 = vmatmul.bf16.vlgmr.msrb.gmra.mxu1 %v1759_v5 }
 0x22b   :  { %2316 = vmatmul.bf16.vlgmr.msra.gmra.mxu2 %v1759_v5  ;;  %2329 = vmatmul.bf16.vlgmr.msra.gmra.mxu3 %v1759_v5  ;;  %v7110_v5 = vld [vmem:[#allocation6 + $0x90] sm:$0xf0] }
 0x22c   :  { %v7113_v55 = vor.u32 %v8664_v47, %v7110_v5  ;;  %2606 = vmatpush.bf16.msra.mxu0 %v7109_v17  ;;  %2633 = vmatpush.bf16.msrb.mxu2 %v7101_v53  ;;  %v1765_v47 = vunpack.c.l.bf16 %v9591_v39  ;;  %v1766_v17 = vunpack.c.h.bf16 %v9591_v39  ;;  %v7065_v5 = vor.u32 %v8652_v27, %v7062_v59  ;;  %v8651_v39 = vld [vmem:[#allocation6 + $0x14] sm:$0xf0] }
 0x22d   :  { %2646 = vmatpush.bf16.msrb.mxu3 %v7105_v56  ;;  %v7053_v16 = vor.u32 %v8651_v39, %v7052_v29  ;;  %v8649_v56 = vld [vmem:[#allocation6 + $0xc] sm:$0xf] }
 0x22e   :  { %2619 = vmatpush.bf16.msra.mxu1 %v7113_v55  ;;  %v7070_v55 = vld [vmem:[#allocation6 + $0x38] sm:$0xf0] }
 0x22f   :  { %v7073_v35 = vor.u32 %v8653_v7, %v7070_v55  ;;  %v7272_v7 = vor.u32 %v8706_v31, %v7271_v36  ;;  %v7273_v55 = vld [vmem:[#allocation9 + $0xd0] sm:$0xf0] }
 0x230   :  { %2607 = vmatpush.bf16.msra.mxu0 %v7093_v54  ;;  %2634 = vmatpush.bf16.msrb.mxu2 %v7085_v41  ;;  %v8648_v54 = vld [vmem:[#allocation6 + $0x4] sm:$0xf]  ;;  %v1768_v41 = vunpack.c.h.bf16 %v9669_v50  ;;  %v7241_v36 = vld [vmem:[#allocation9 + $0x90] sm:$0xf0] }
 0x231   :  { %2647 = vmatpush.bf16.msrb.mxu3 %v7089_v57  ;;  %v7049_v3 = vor.u32 %v8648_v54, %v7046_v19  ;;  %v8709_v57 = vld [vmem:[#allocation9 + $0xec] sm:$0xf]  ;;  %v8702_v19 = vld [vmem:[#allocation9 + $0xac] sm:$0xf0] }
 0x232   :  { %2620 = vmatpush.bf16.msra.mxu1 %v7097_v22  ;;  %v7300_v59 = vor.u32 %v8709_v57, %v7297_v11  ;;  %v2086_v11 = vunpack.c.l.bf16 %v9659_v32 }
 0x234   :  { %2608 = vmatpush.bf16.msra.mxu0 %v7077_v20  ;;  %2635 = vmatpush.bf16.msrb.mxu2 %v7069_v42  ;;  %v7057_v20 = vor.u32 %v8649_v56, %v7054_v23 }
 0x235   :  { %2648 = vmatpush.bf16.msrb.mxu3 %v7073_v35 }
 0x236   :  { %2621 = vmatpush.bf16.msra.mxu1 %v7081_v26  ;;  %v7295_v26 = vld [vmem:[#allocation9 + $0xe8] sm:$0xf] }
 0x238   :  { %2609 = vmatpush.bf16.msra.mxu0 %v7061_v8  ;;  %2636 = vmatpush.bf16.msrb.mxu2 %v7053_v16  ;;  %v7296_v8 = vor.u32 %v8711_v9, %v7295_v26  ;;  %v1767_v26 = vunpack.c.l.bf16 %v9669_v50  ;;  %v8698_v9 = vld [vmem:[#allocation9 + $0x8c] sm:$0xf0] }
 0x239   :  { %2649 = vmatpush.bf16.msrb.mxu3 %v7057_v20 }
 0x23a   :  { %2622 = vmatpush.bf16.msra.mxu1 %v7065_v5 }
 0x23c   :  { %2610 = vmatpush.bf16.msra.mxu0 %v7045_v51  ;;  %2950 = vmatpush.bf16.msra.mxu2 %v7296_v8  ;;  %v7255_v51 = vld [vmem:[#allocation9 + $0xa0] sm:$0xf]  ;;  %v7240_v8 = vor.u32 %v8698_v9, %v7239_v49  ;;  %v2089_v49 = vunpack.c.h.bf16 %v9733_v60 }
 0x23d   :  { %2963 = vmatpush.bf16.msra.mxu3 %v7300_v59  ;;  %v7256_v39 = vor.u32 %v8702_v19, %v7255_v51  ;;  %v8696_v59 = vld [vmem:[#allocation9 + $0x84] sm:$0xf]  ;;  %v8694_v19 = vld [vmem:[#allocation9 + $0x6c] sm:$0xf0] }
 0x23e   :  { %2623 = vmatpush.bf16.msra.mxu1 %v7049_v3  ;;  %v7263_v3 = vld [vmem:[#allocation9 + $0xa8] sm:$0xf]  ;;  %v7244_v50 = vor.u32 %v8696_v59, %v7241_v36  ;;  %v8682_v36 = vld [vmem:[#allocation9 + $0xc] sm:$0xf0] }
 0x23f   :  { %v7264_v20 = vor.u32 %v8703_v40, %v7263_v3 }
 0x240   :  { %2924 = vmatpush.bf16.msrb.mxu0 %v7288_v12  ;;  %v8701_v12 = vld [vmem:[#allocation9 + $0xac] sm:$0xf] }
 0x242   :  { %2937 = vmatpush.bf16.msrb.mxu1 %v7292_v14 }
 0x244   :  { %2925 = vmatpush.bf16.msrb.mxu0 %v7272_v7 }
 0x248   :  { %2926 = vmatpush.bf16.msrb.mxu0 %v7256_v39 }
 0x24c   :  { %2927 = vmatpush.bf16.msrb.mxu0 %v7240_v8 }
 0x295   :  { %v1970_v25 = vpop.f32.mrf.mxu0  ;;  %v1983_v34 = vpop.f32.mrf.mxu1 }
 0x296   :  { %v2013_v2 = vadd.f32 %v1970_v25, %v1765_v47  ;;  %v2014_v45 = vadd.f32 %v1983_v34, %v1766_v17  ;;  %v8704_v47 = vld [vmem:[#allocation9 + $0xc4] sm:$0xf]  ;;  %v7279_v25 = vld [vmem:[#allocation9 + $0xc8] sm:$0xf]  ;;  %v8707_v34 = vld [vmem:[#allocation9 + $0xd4] sm:$0xf0] }
 0x297   :  { %v7276_v35 = vor.u32 %v8704_v47, %v7273_v55 }
 0x298   :  { %v6908_v22 = vmul.f32 -1.442695, %v2013_v2  ;;  %v6909_v53 = vmul.f32 -1.442695, %v2014_v45  ;;  %v7280_v2 = vor.u32 %v8707_v34, %v7279_v25  ;;  %v8705_v45 = vld [vmem:[#allocation9 + $0xcc] sm:$0xf] }
 0x299   :  { %v7284_v54 = vor.u32 %v8705_v45, %v7281_v44  ;;  %2938 = vmatpush.bf16.msrb.mxu1 %v7276_v35  ;;  %v7249_v45 = vld [vmem:[#allocation9 + $0x98] sm:$0xf0]  ;;  %v7223_v44 = vld [vmem:[#allocation9 + $0x60] sm:$0xf] }
 0x29a   :  { %9082 = vpow2.f32 %v6908_v22  ;;  %v8700_v22 = vld [vmem:[#allocation9 + $0xa4] sm:$0xf]  ;;  %2951 = vmatpush.bf16.msra.mxu2 %v7280_v2  ;;  %v8697_v2 = vld [vmem:[#allocation9 + $0x8c] sm:$0xf] }
 0x29b   :  { %9084 = vpow2.f32 %v6909_v53  ;;  %v7257_v53 = vld [vmem:[#allocation9 + $0xb0] sm:$0xf0]  ;;  %2964 = vmatpush.bf16.msra.mxu3 %v7284_v54 }
 0x29c   :  { %v9997_v33 = vpop.f32.mrf.mxu2  ;;  %v2009_v27 = vpop.f32.mrf.mxu3  ;;  %v7260_v23 = vor.u32 %v8700_v22, %v7257_v53  ;;  %v8692_v22 = vld [vmem:[#allocation9 + $0x64] sm:$0xf]  ;;  %v7225_v53 = vld [vmem:[#allocation9 + $0x70] sm:$0xf0] }
 0x29d   :  { %v2016_v17 = vadd.f32 %v2009_v27, %v1768_v41  ;;  %v1972_v5 = vpop.f32.mrf.mxu0  ;;  %v1985_v42 = vpop.f32.mrf.mxu1  ;;  %v7268_v27 = vor.u32 %v8701_v12, %v7265_v28  ;;  %v2015_v55 = vadd.f32 %v9997_v33, %v1767_v26  ;;  %v7224_v33 = vor.u32 %v8694_v19, %v7223_v44  ;;  %v8695_v12 = vld [vmem:[#allocation9 + $0x74] sm:$0xf0]  ;;  %v8693_v26 = vld [vmem:[#allocation9 + $0x6c] sm:$0xf] }
 0x29e   :  { %2939 = vmatpush.bf16.msrb.mxu1 %v7260_v23  ;;  %2952 = vmatpush.bf16.msra.mxu2 %v7264_v20  ;;  %v7247_v5 = vld [vmem:[#allocation9 + $0x88] sm:$0xf]  ;;  %v8699_v42 = vld [vmem:[#allocation9 + $0x94] sm:$0xf0]  ;;  %v8680_v23 = vld [vmem:[#allocation9 + $0x4] sm:$0xf] }
 0x29f   :  { %v6910_v4 = vmul.f32 -1.442695, %v2016_v17  ;;  %v2087_v17 = vunpack.c.h.bf16 %v9659_v32  ;;  %2965 = vmatpush.bf16.msra.mxu3 %v7268_v27  ;;  %v7248_v35 = vor.u32 %v8699_v42, %v7247_v5  ;;  %v7252_v32 = vor.u32 %v8697_v2, %v7249_v45  ;;  %v7231_v20 = vld [vmem:[#allocation9 + $0x68] sm:$0xf]  ;;  %2928 = vmatpush.bf16.msrb.mxu0 %v7224_v33 }
 0x2a0   :  { %v9083_v29 = vpop.eup %9082  ;;  %v7228_v27 = vor.u32 %v8692_v22, %v7225_v53  ;;  %v7191_v53 = vld [vmem:[#allocation9 + $0x20] sm:$0xf] }
 0x2a1   :  { %v9085_v16 = vpop.eup %9084  ;;  %v9999_v56 = vadd.f32 1.0, %v9083_v29  ;;  %9086 = vpow2.f32 %v6910_v4 }
 0x2a2   :  { %v10001_v0 = vadd.f32 1.0, %v9085_v16  ;;  %2940 = vmatpush.bf16.msrb.mxu1 %v7244_v50  ;;  %2953 = vmatpush.bf16.msra.mxu2 %v7248_v35 }
 0x2a3   :  { %9088 = vrcp.f32 %v9999_v56  ;;  %v2030_v57 = vand.u32 2147483647, %v9999_v56  ;;  %v2032_v47 = vand.u32 2147483648, %v9999_v56  ;;  %vm2026_vm3 = vweird.f32 %v9999_v56  ;;  %2966 = vmatpush.bf16.msra.mxu3 %v7252_v32  ;;  %v7217_v32 = vld [vmem:[#allocation9 + $0x58] sm:$0xf0] }
 0x2a4   :  { %9090 = vrcp.f32 %v10001_v0  ;;  %v1998_v41 = vpop.f32.mrf.mxu2  ;;  %v2011_v14 = vpop.f32.mrf.mxu3  ;;  %v2051_v31 = vand.u32 2147483648, %v10001_v0  ;;  %v2049_v39 = vand.u32 2147483647, %v10001_v0  ;;  %vm2045_vm7 = vweird.f32 %v10001_v0 }
 0x2a5   :  { %vm10022_vm2 = vcmp.eq.f32.partialorder %v2030_v57, 8.507059e+37  ;;  %v10026_v40 = vor.u32 1.1754944e-38, %v2032_v47  ;;  %v7233_v41 = vld [vmem:[#allocation9 + $0x78] sm:$0xf0]  ;;  %v7207_v14 = vld [vmem:[#allocation9 + $0x40] sm:$0xf]  ;;  %v7232_v47 = vor.u32 %v8695_v12, %v7231_v20 }
 0x2a6   :  { %v2052_v59 = vor.u32 1.1754944e-38, %v2051_v31  ;;  %vm10039_vm5 = vcmp.eq.f32.partialorder %v2049_v39, 8.507059e+37  ;;  %2941 = vmatpush.bf16.msrb.mxu1 %v7228_v27  ;;  %v7236_v31 = vor.u32 %v8693_v26, %v7233_v41  ;;  %v8684_v20 = vld [vmem:[#allocation9 + $0x24] sm:$0xf]  ;;  %v7193_v26 = vld [vmem:[#allocation9 + $0x30] sm:$0xf0] }
 0x2a7   :  { %v9087_v7 = vpop.eup %9086  ;;  %v2291_v25 = vpop.f32.mrf.mxu0  ;;  %2954 = vmatpush.bf16.msra.mxu2 %v7232_v47  ;;  %v7199_v41 = vld [vmem:[#allocation9 + $0x28] sm:$0xf]  ;;  %v7201_v47 = vld [vmem:[#allocation9 + $0x38] sm:$0xf0] }
 0x2a8   :  { %v2304_v34 = vpop.f32.mrf.mxu1  ;;  %v10012_v4 = vadd.f32 1.0, %v9087_v7  ;;  %v2334_v54 = vadd.f32 %v2291_v25, %v2086_v11  ;;  %v7209_v25 = vld [vmem:[#allocation9 + $0x50] sm:$0xf0]  ;;  %2967 = vmatpush.bf16.msra.mxu3 %v7236_v31  ;;  %v7196_v31 = vor.u32 %v8684_v20, %v7193_v26 }
 0x2a9   :  { %v2335_v51 = vadd.f32 %v2304_v34, %v2087_v17  ;;  %v10014_v29 = vpop.eup %9088  ;;  %v8690_v17 = vld [vmem:[#allocation9 + $0x4c] sm:$0xf0]  ;;  %v7215_v34 = vld [vmem:[#allocation9 + $0x48] sm:$0xf] }
 0x2aa   :  { %v10017_v3 = vpop.eup %9090  ;;  %v2022_v16 = vmul.f32 %v10014_v29, %v9999_v56  ;;  %vm2027_vm1 = vweird.f32 %v10014_v29  ;;  %9092 = vrcp.f32 %v10012_v4  ;;  %v7039_v57 = vmul.f32 -1.442695, %v2334_v54  ;;  %v8691_v54 = vld [vmem:[#allocation9 + $0x54] sm:$0xf0] }
 0x2ab   :  { %v2041_v28 = vmul.f32 %v10017_v3, %v10001_v0  ;;  %9094 = vtanh.f32 %v2015_v55  ;;  %v7040_v11 = vmul.f32 -1.442695, %v2335_v51  ;;  %vm10035_vm4 = vmor %vm2026_vm3, %vm2027_vm1  ;;  %v7208_v7 = vor.u32 %v8690_v17, %v7207_v14  ;;  %v8688_v55 = vld [vmem:[#allocation9 + $0x44] sm:$0xf]  ;;  %v8689_v51 = vld [vmem:[#allocation9 + $0x4c] sm:$0xf] }
 0x2ac   :  { %v2023_v9 = vsub.f32 1.0, %v2022_v16  ;;  %9096 = vpow2.f32 %v7039_v57  ;;  %vm2046_vm6 = vweird.f32 %v10017_v3  ;;  %v7212_v33 = vor.u32 %v8688_v55, %v7209_v25  ;;  %v8686_v16 = vld [vmem:[#allocation9 + $0x2c] sm:$0xf0]  ;;  %v8687_v14 = vld [vmem:[#allocation9 + $0x34] sm:$0xf0] }
 0x2ad   :  { %v2042_v8 = vsub.f32 1.0, %v2041_v28  ;;  %9098 = vpow2.f32 %v7040_v11  ;;  %2929 = vmatpush.bf16.msrb.mxu0 %v7208_v7  ;;  %v7216_v22 = vor.u32 %v8691_v54, %v7215_v34  ;;  %vm10057_vm8 = vmor %vm2045_vm7, %vm2046_vm6  ;;  %v7220_v0 = vor.u32 %v8689_v51, %v7217_v32  ;;  %v7175_v7 = vld [vmem:[#allocation9] sm:$0xf]  ;;  %v8683_v51 = vld [vmem:[#allocation9 + $0x14] sm:$0xf0] }
 0x2ae   :  { %v2024_v50 = vmul.f32 %v10014_v29, %v2023_v9  ;;  %v10044_v5 = vpop.f32.mrf.mxu2  ;;  %v2330_v42 = vpop.f32.mrf.mxu3  ;;  %2942 = vmatpush.bf16.msrb.mxu1 %v7212_v33  ;;  %v7192_v27 = vor.u32 %v8686_v16, %v7191_v53  ;;  %v7200_v34 = vor.u32 %v8687_v14, %v7199_v41  ;;  %v7185_v16 = vld [vmem:[#allocation9 + $0x18] sm:$0xf0]  ;;  %v2071_v20 = vand.u32 2147483648, %v10012_v4 }
 0x2af   :  { %v2043_v35 = vmul.f32 %v10017_v3, %v2042_v8  ;;  %v2337_v2 = vadd.f32 %v2330_v42, %v2089_v49  ;;  %v2293_v45 = vpop.f32.mrf.mxu0  ;;  %v8685_v8 = vld [vmem:[#allocation9 + $0x2c] sm:$0xf]  ;;  %2955 = vmatpush.bf16.msra.mxu2 %v7216_v22  ;;  %2968 = vmatpush.bf16.msra.mxu3 %v7220_v0  ;;  %vm2065_vm10 = vweird.f32 %v10012_v4  ;;  %v2088_v14 = vunpack.c.l.bf16 %v9733_v60 }
 0x2b0   :  { %v2306_v44 = vpop.f32.mrf.mxu1  ;;  %v10048_v19 = vpop.eup %9092  ;;  %v2025_v39 = vadd.f32 %v10014_v29, %v2024_v50  ;;  %v7204_v54 = vor.u32 %v8685_v8, %v7201_v47  ;;  %v2072_v0 = vor.u32 1.1754944e-38, %v2071_v20 }
 0x2b1   :  { %v9095_v12 = vpop.eup %9094  ;;  %v2044_v28 = vadd.f32 %v10017_v3, %v2043_v35  ;;  %v2061_v49 = vmul.f32 %v10048_v19, %v10012_v4  ;;  %v7041_v11 = vmul.f32 -1.442695, %v2337_v2  ;;  %2930 = vmatpush.bf16.msrb.mxu0 %v7192_v27  ;;  %v7183_v35 = vld [vmem:[#allocation9 + $0x8] sm:$0xf]  ;;  %vm2066_vm9 = vweird.f32 %v10048_v19 }
 0x2b2   :  { %v2029_v57 = vsel %vm10035_vm4, %v10014_v29, %v2025_v39  ;;  %v9097_v29 = vpop.eup %9096  ;;  %2943 = vmatpush.bf16.msrb.mxu1 %v7196_v31  ;;  %v7176_v39 = vor.u32 %v8682_v36, %v7175_v7  ;;  %v7184_v53 = vor.u32 %v8683_v51, %v7183_v35  ;;  %vm10088_vm11 = vmor %vm2065_vm10, %vm2066_vm9 }
 0x2b3   :  { %v2034_v17 = vsel %vm10022_vm2, %v10026_v40, %v2029_v57  ;;  %v2048_v50 = vsel %vm10057_vm8, %v10017_v3, %v2044_v28  ;;  %v2062_v42 = vsub.f32 1.0, %v2061_v49  ;;  %9100 = vpow2.f32 %v7041_v11  ;;  %v7177_v40 = vld [vmem:[#allocation9 + $0x10] sm:$0xf0]  ;;  %v9099_v2 = vpop.eup %9098  ;;  %2956 = vmatpush.bf16.msra.mxu2 %v7200_v34  ;;  %2969 = vmatpush.bf16.msra.mxu3 %v7204_v54 }
 0x2b4   :  { %v2053_v55 = vsel %vm10039_vm5, %v2052_v59, %v2048_v50  ;;  %v2076_v25 = vmul.f32 %v9095_v12, %v2034_v17  ;;  %v10074_v44 = vadd.f32 1.0, %v9097_v29  ;;  %v10076_v32 = vadd.f32 1.0, %v9099_v2 }
 0x2b5   :  { %v2075_v3 = vmul.f32 %v2053_v55, %v9956_v48  ;;  %v2063_v45 = vmul.f32 %v10048_v19, %v2062_v42  ;;  %v7180_v33 = vor.u32 %v8680_v23, %v7177_v40  ;;  %v8681_v48 = vld [vmem:[#allocation9 + $0xc] sm:$0xf]  ;;  %2931 = vmatpush.bf16.msrb.mxu0 %v7176_v39  ;;  %v2069_v49 = vand.u32 2147483647, %v10012_v4 }
 0x2b6   :  { %v2319_v59 = vpop.f32.mrf.mxu2  ;;  %v2332_v56 = vpop.f32.mrf.mxu3  ;;  %9102 = vrcp.f32 %v10074_v44  ;;  %v7188_v26 = vor.u32 %v8681_v48, %v7185_v16  ;;  %v2336_v4 = vadd.f32 %v10044_v5, %v2088_v14  ;;  %v2353_v7 = vand.u32 2147483648, %v10074_v44  ;;  %v7418_v14 = vld [vmem:[#allocation6 + $0xe0] sm:$0xf] }
 0x2b7   :  { %v10078_v22 = vadd.f32 %v2076_v25, %v2075_v3  ;;  %9104 = vrcp.f32 %v10076_v32  ;;  %v2064_v12 = vadd.f32 %v10048_v19, %v2063_v45  ;;  %2944 = vmatpush.bf16.msrb.mxu1 %v7180_v33  ;;  %2957 = vmatpush.bf16.msra.mxu2 %v7184_v53  ;;  %vm2070_vm12 = vcmp.eq.f32.partialorder %v2069_v49, 8.507059e+37 }
 0x2b8   :  { %2970 = vmatpush.bf16.msra.mxu3 %v7188_v26  ;;  %v2372_v5 = vand.u32 2147483648, %v10076_v32  ;;  %v2370_v34 = vand.u32 2147483647, %v10076_v32  ;;  %vm2347_vm15 = vweird.f32 %v10074_v44  ;;  %vm2366_vm0 = vweird.f32 %v10076_v32 }
 0x2b9   :  { %9106 = vtanh.f32 %v10078_v22  ;;  %v9101_v28 = vpop.eup %9100  ;;  %v2068_v57 = vsel %vm10088_vm11, %v10048_v19, %v2064_v12  ;;  %v2351_v19 = vand.u32 2147483647, %v10074_v44  ;;  %v2354_v35 = vor.u32 1.1754944e-38, %v2353_v7 }
 0x2ba   :  { %v10093_v9 = vadd.f32 1.0, %v9101_v28  ;;  %v2073_v17 = vsel %vm2070_vm12, %v2072_v0, %v2068_v57  ;;  %v2373_v3 = vor.u32 1.1754944e-38, %v2372_v5  ;;  %vm2371_vm4 = vcmp.eq.f32.partialorder %v2370_v34, 8.507059e+37  ;;  %v8742_v57 = vld [vmem:[#allocation6 + $0xec] sm:$0xf0] }
 0x2bb   :  { %vm2352_vm3 = vcmp.eq.f32.partialorder %v2351_v19, 8.507059e+37  ;;  %v7419_v0 = vor.u32 %v8742_v57, %v7418_v14  ;;  %v8736_v19 = vld [vmem:[#allocation6 + $0xc4] sm:$0xf]  ;;  %v7404_v5 = vld [vmem:[#allocation6 + $0xd0] sm:$0xf0] }
 0x2bc   :  { %v9103_v11 = vpop.eup %9102  ;;  %9108 = vrcp.f32 %v10093_v9  ;;  %v2392_v16 = vand.u32 2147483648, %v10093_v9  ;;  %vm2386_vm6 = vweird.f32 %v10093_v9  ;;  %v2390_v20 = vand.u32 2147483647, %v10093_v9  ;;  %v8737_v34 = vld [vmem:[#allocation6 + $0xcc] sm:$0xf] }
 0x2bd   :  { %v9105_v27 = vpop.eup %9104  ;;  %v2343_v8 = vmul.f32 %v9103_v11, %v10074_v44  ;;  %9110 = vtanh.f32 %v2336_v4  ;;  %vm2348_vm13 = vweird.f32 %v9103_v11  ;;  %v7420_v4 = vld [vmem:[#allocation6 + $0xf0] sm:$0xf0]  ;;  %v8729_v14 = vld [vmem:[#allocation6 + $0x8c] sm:$0xf]  ;;  %v7380_v57 = vld [vmem:[#allocation6 + $0x98] sm:$0xf0] }
 0x2be   :  { %v2362_v60 = vmul.f32 %v9105_v27, %v10076_v32  ;;  %vm2367_vm14 = vweird.f32 %v9105_v27  ;;  %vm2349_vm1 = vmor %vm2347_vm15, %vm2348_vm13  ;;  %v2393_v28 = vor.u32 1.1754944e-38, %v2392_v16  ;;  %vm2391_vm8 = vcmp.eq.f32.partialorder %v2390_v20, 8.507059e+37  ;;  %v8730_v16 = vld [vmem:[#allocation6 + $0x8c] sm:$0xf0]  ;;  %v8728_v20 = vld [vmem:[#allocation6 + $0x84] sm:$0xf] }
 0x2bf   :  { %v9107_v47 = vpop.eup %9106  ;;  %v2344_v50 = vsub.f32 1.0, %v2343_v8  ;;  %vm2368_vm2 = vmor %vm2366_vm0, %vm2367_vm14 }
 0x2c0   :  { %v2079_v42 = vmul.f32 %v9107_v47, %v2073_v17  ;;  %v2363_v31 = vsub.f32 1.0, %v2362_v60  ;;  %v8741_v60 = vld [vmem:[#allocation6 + $0xec] sm:$0xf]  ;;  %v7428_v17 = vld [vmem:[#allocation6 + $0xf8] sm:$0xf0] }
 0x2c1   :  { %v2345_v36 = vmul.f32 %v9103_v11, %v2344_v50  ;;  %v7431_v50 = vor.u32 %v8741_v60, %v7428_v17  ;;  %v8727_v60 = vld [vmem:[#allocation6 + $0x74] sm:$0xf0] }
 0x2c2   :  { %v2080_v29 = vpack.c.bf16 %v2079_v42, %v2079_v42  ;;  %v9109_v55 = vpop.eup %9108  ;;  %v2364_v25 = vmul.f32 %v9105_v27, %v2363_v31  ;;  %v7402_v42 = vld [vmem:[#allocation6 + $0xc0] sm:$0xf]  ;;  %v8738_v31 = vld [vmem:[#allocation6 + $0xcc] sm:$0xf0] }
 0x2c3   :  { %v2346_v23 = vadd.f32 %v9103_v11, %v2345_v36  ;;  %v2382_v40 = vmul.f32 %v9109_v55, %v10093_v9  ;;  %v9111_v51 = vpop.eup %9110  ;;  %vm2387_vm5 = vweird.f32 %v9109_v55  ;;  %v8743_v9 = vld [vmem:[#allocation6 + $0xf4] sm:$0xf0]  ;;  %v7403_v7 = vor.u32 %v8738_v31, %v7402_v42  ;;  %v7410_v36 = vld [vmem:[#allocation6 + $0xc8] sm:$0xf]  ;;  %v8725_v42 = vld [vmem:[#allocation6 + $0x6c] sm:$0xf] }
 0x2c4   :  { %2082 = vst [vmem:[#allocation4 + $0x8] sm:$0xf] %v2080_v29  ;;  %2611 = vmatmul.bf16.vlgmr.msra.gmra.mxu0 %v2080_v29  ;;  %2624 = vmatmul.bf16.vlgmr.msra.gmra.mxu1 %v2080_v29  ;;  %v2365_v2 = vadd.f32 %v9105_v27, %v2364_v25  ;;  %vm2388_vm7 = vmor %vm2386_vm6, %vm2387_vm5  ;;  %v7364_v31 = vld [vmem:[#allocation6 + $0x78] sm:$0xf0] }
 0x2c5   :  { %2637 = vmatmul.bf16.vlgmr.msrb.gmra.mxu2 %v2080_v29  ;;  %2650 = vmatmul.bf16.vlgmr.msrb.gmra.mxu3 %v2080_v29  ;;  %v2350_v45 = vsel %vm2349_vm1, %v9103_v11, %v2346_v23  ;;  %v2383_v54 = vsub.f32 1.0, %v2382_v40  ;;  %v8740_v11 = vld [vmem:[#allocation6 + $0xe4] sm:$0xf]  ;;  %v8739_v29 = vld [vmem:[#allocation6 + $0xd4] sm:$0xf0] }
 0x2c6   :  { %v2355_v59 = vsel %vm2352_vm3, %v2354_v35, %v2350_v45  ;;  %v2369_v44 = vsel %vm2368_vm2, %v9105_v27, %v2365_v2  ;;  %v7426_v27 = vld [vmem:[#allocation6 + $0xe8] sm:$0xf]  ;;  %v7423_v8 = vor.u32 %v8740_v11, %v7420_v4  ;;  %3245 = vmatpush.bf16.msra.mxu0 %v7419_v0  ;;  %3284 = vmatpush.bf16.msrb.mxu3 %v7431_v50  ;;  %v7412_v23 = vld [vmem:[#allocation6 + $0xd8] sm:$0xf0]  ;;  %v7386_v35 = vld [vmem:[#allocation6 + $0xa0] sm:$0xf] }
 0x2c7   :  { %v2374_v56 = vsel %vm2371_vm4, %v2373_v3, %v2369_v44  ;;  %v2397_v39 = vmul.f32 %v9111_v51, %v2355_v59  ;;  %v2384_v33 = vmul.f32 %v9109_v55, %v2383_v54  ;;  %v7427_v47 = vor.u32 %v8743_v9, %v7426_v27  ;;  %v8734_v2 = vld [vmem:[#allocation6 + $0xac] sm:$0xf0]  ;;  %v8732_v3 = vld [vmem:[#allocation6 + $0xa4] sm:$0xf]  ;;  %v7388_v54 = vld [vmem:[#allocation6 + $0xb0] sm:$0xf0] }
 0x2c8   :  { %v2396_v53 = vmul.f32 %v2374_v56, %v9988_v43  ;;  %3258 = vmatpush.bf16.msra.mxu1 %v7423_v8  ;;  %v7411_v25 = vor.u32 %v8739_v29, %v7410_v36  ;;  %v7415_v40 = vor.u32 %v8737_v34, %v7412_v23  ;;  %v7387_v45 = vor.u32 %v8734_v2, %v7386_v35  ;;  %v7394_v51 = vld [vmem:[#allocation6 + $0xa8] sm:$0xf]  ;;  %v8735_v59 = vld [vmem:[#allocation6 + $0xb4] sm:$0xf0]  ;;  %v7354_v0 = vld [vmem:[#allocation6 + $0x60] sm:$0xf] }
 0x2c9   :  { %v2385_v48 = vadd.f32 %v9109_v55, %v2384_v33  ;;  %3271 = vmatpush.bf16.msrb.mxu2 %v7427_v47  ;;  %v7391_v44 = vor.u32 %v8732_v3, %v7388_v54  ;;  %v7395_v56 = vor.u32 %v8735_v59, %v7394_v51  ;;  %v7396_v33 = vld [vmem:[#allocation6 + $0xb8] sm:$0xf0]  ;;  %v7383_v11 = vor.u32 %v8729_v14, %v7380_v57  ;;  %v8726_v4 = vld [vmem:[#allocation6 + $0x6c] sm:$0xf0]  ;;  %v8724_v27 = vld [vmem:[#allocation6 + $0x64] sm:$0xf] }
 0x2ca   :  { %v10110_v32 = vadd.f32 %v2397_v39, %v2396_v53  ;;  %3246 = vmatpush.bf16.msra.mxu0 %v7403_v7  ;;  %3285 = vmatpush.bf16.msrb.mxu3 %v7415_v40  ;;  %v8733_v39 = vld [vmem:[#allocation6 + $0xac] sm:$0xf]  ;;  %v7355_v9 = vor.u32 %v8726_v4, %v7354_v0  ;;  %v7356_v8 = vld [vmem:[#allocation6 + $0x70] sm:$0xf0]  ;;  %v7362_v47 = vld [vmem:[#allocation6 + $0x68] sm:$0xf]  ;;  %v2408_v54 = vunpack.c.h.bf16 %v9605_v63 }
 0x2cb   :  { %v2389_v12 = vsel %vm2388_vm7, %v9109_v55, %v2385_v48  ;;  %v7407_v55 = vor.u32 %v8736_v19, %v7404_v5  ;;  %v7399_v53 = vor.u32 %v8733_v39, %v7396_v33  ;;  %v7370_v48 = vld [vmem:[#allocation6 + $0x80] sm:$0xf]  ;;  %v7359_v17 = vor.u32 %v8724_v27, %v7356_v8  ;;  %v8722_v5 = vld [vmem:[#allocation6 + $0x4c] sm:$0xf0]  ;;  %v8720_v36 = vld [vmem:[#allocation6 + $0x44] sm:$0xf] }
 0x2cc   :  { %9112 = vtanh.f32 %v10110_v32  ;;  %v2394_v26 = vsel %vm2391_vm8, %v2393_v28, %v2389_v12  ;;  %v7371_v12 = vor.u32 %v8730_v16, %v7370_v48  ;;  %v7372_v28 = vld [vmem:[#allocation6 + $0x90] sm:$0xf0]  ;;  %v7363_v50 = vor.u32 %v8727_v60, %v7362_v47  ;;  %v7338_v7 = vld [vmem:[#allocation6 + $0x40] sm:$0xf]  ;;  %v8723_v34 = vld [vmem:[#allocation6 + $0x54] sm:$0xf0] }
 0x2cd   :  { %3259 = vmatpush.bf16.msra.mxu1 %v7407_v55  ;;  %3272 = vmatpush.bf16.msrb.mxu2 %v7411_v25  ;;  %v7367_v19 = vor.u32 %v8725_v42, %v7364_v31  ;;  %v7339_v29 = vor.u32 %v8722_v5, %v7338_v7  ;;  %v7340_v55 = vld [vmem:[#allocation6 + $0x50] sm:$0xf0]  ;;  %v7346_v25 = vld [vmem:[#allocation6 + $0x48] sm:$0xf]  ;;  %v8721_v35 = vld [vmem:[#allocation6 + $0x4c] sm:$0xf] }
 0x2ce   :  { %3247 = vmatpush.bf16.msra.mxu0 %v7387_v45  ;;  %3286 = vmatpush.bf16.msrb.mxu3 %v7399_v53  ;;  %v7343_v23 = vor.u32 %v8720_v36, %v7340_v55  ;;  %v7347_v40 = vor.u32 %v8723_v34, %v7346_v25  ;;  %v7348_v2 = vld [vmem:[#allocation6 + $0x58] sm:$0xf0]  ;;  %v2407_v45 = vunpack.c.l.bf16 %v9605_v63  ;;  %v7322_v51 = vld [vmem:[#allocation6 + $0x20] sm:$0xf]  ;;  %v8718_v59 = vld [vmem:[#allocation6 + $0x2c] sm:$0xf0] }
 0x2cf   :  { %v7351_v3 = vor.u32 %v8721_v35, %v7348_v2  ;;  %v7323_v33 = vor.u32 %v8718_v59, %v7322_v51  ;;  %v7324_v53 = vld [vmem:[#allocation6 + $0x30] sm:$0xf0]  ;;  %v7330_v48 = vld [vmem:[#allocation6 + $0x28] sm:$0xf]  ;;  %v8719_v16 = vld [vmem:[#allocation6 + $0x34] sm:$0xf0] }
 0x2d0   :  { %v7306_v57 = vld [vmem:[#allocation6] sm:$0xf]  ;;  %v8712_v0 = vld [vmem:[#allocation6 + $0x4] sm:$0xf]  ;;  %v7308_v4 = vld [vmem:[#allocation6 + $0x10] sm:$0xf0] }
 0x2d1   :  { %3260 = vmatpush.bf16.msra.mxu1 %v7391_v44  ;;  %3273 = vmatpush.bf16.msrb.mxu2 %v7395_v56  ;;  %v8716_v44 = vld [vmem:[#allocation6 + $0x24] sm:$0xf]  ;;  %v7314_v8 = vld [vmem:[#allocation6 + $0x8] sm:$0xf]  ;;  %v8715_v47 = vld [vmem:[#allocation6 + $0x14] sm:$0xf0] }
 0x2d2   :  { %v9113_v49 = vpop.eup %9112  ;;  %3248 = vmatpush.bf16.msra.mxu0 %v7371_v12  ;;  %3287 = vmatpush.bf16.msrb.mxu3 %v7383_v11  ;;  %v8714_v11 = vld [vmem:[#allocation6 + $0xc] sm:$0xf0]  ;;  %v8713_v60 = vld [vmem:[#allocation6 + $0xc] sm:$0xf]  ;;  %v7316_v42 = vld [vmem:[#allocation6 + $0x18] sm:$0xf0] }
 0x2d3   :  { %v2400_v41 = vmul.f32 %v9113_v49, %v2394_v26  ;;  %v7378_v49 = vld [vmem:[#allocation6 + $0x88] sm:$0xf]  ;;  %v8731_v26 = vld [vmem:[#allocation6 + $0x94] sm:$0xf0]  ;;  %v7307_v27 = vor.u32 %v8714_v11, %v7306_v57  ;;  %v7549_v31 = vld [vmem:[#allocation9 + $0xe0] sm:$0xf]  ;;  %v7319_v36 = vor.u32 %v8713_v60, %v7316_v42 }
 0x2d4   :  { %v8772_v55 = vld [vmem:[#allocation9 + $0xe4] sm:$0xf]  ;;  %v7551_v25 = vld [vmem:[#allocation9 + $0xf0] sm:$0xf0]  ;;  %v7557_v34 = vld [vmem:[#allocation9 + $0xe8] sm:$0xf] }
 0x2d5   :  { %v2401_v43 = vpack.c.bf16 %v2400_v41, %v2400_v41  ;;  %v7375_v41 = vor.u32 %v8728_v20, %v7372_v28  ;;  %v7327_v28 = vor.u32 %v8716_v44, %v7324_v53  ;;  %v7554_v2 = vor.u32 %v8772_v55, %v7551_v25  ;;  %v7533_v44 = vld [vmem:[#allocation9 + $0xc0] sm:$0xf]  ;;  %v8766_v11 = vld [vmem:[#allocation9 + $0xac] sm:$0xf0] }
 0x2d6   :  { %3249 = vmatpush.bf16.msra.mxu0 %v7355_v9  ;;  %3288 = vmatpush.bf16.msrb.mxu3 %v7367_v19  ;;  %v7311_v9 = vor.u32 %v8712_v0, %v7308_v4  ;;  %v8774_v19 = vld [vmem:[#allocation9 + $0xec] sm:$0xf0]  ;;  %v7517_v57 = vld [vmem:[#allocation9 + $0xa0] sm:$0xf] }
 0x2d7   :  { %2403 = vst [vmem:[#allocation5 + $0x14] sm:$0xf] %v2401_v43  ;;  %2932 = vmatmul.bf16.vlgmr.msrb.gmra.mxu0 %v2401_v43  ;;  %2945 = vmatmul.bf16.vlgmr.msrb.gmra.mxu1 %v2401_v43  ;;  %v7518_v4 = vor.u32 %v8766_v11, %v7517_v57  ;;  %v7501_v25 = vld [vmem:[#allocation9 + $0x80] sm:$0xf]  ;;  %v8756_v57 = vld [vmem:[#allocation9 + $0x64] sm:$0xf] }
 0x2d8   :  { %2958 = vmatmul.bf16.vlgmr.msra.gmra.mxu2 %v2401_v43  ;;  %2971 = vmatmul.bf16.vlgmr.msra.gmra.mxu3 %v2401_v43  ;;  %v7379_v43 = vor.u32 %v8731_v26, %v7378_v49  ;;  %v7331_v49 = vor.u32 %v8719_v16, %v7330_v48  ;;  %v8717_v26 = vld [vmem:[#allocation6 + $0x2c] sm:$0xf]  ;;  %v7535_v48 = vld [vmem:[#allocation9 + $0xd0] sm:$0xf0]  ;;  %v7541_v16 = vld [vmem:[#allocation9 + $0xc8] sm:$0xf] }
 0x2d9   :  { %3261 = vmatpush.bf16.msra.mxu1 %v7375_v41  ;;  %v7332_v41 = vld [vmem:[#allocation6 + $0x38] sm:$0xf0] }
 0x2da   :  { %3274 = vmatpush.bf16.msrb.mxu2 %v7379_v43  ;;  %3250 = vmatpush.bf16.msra.mxu0 %v7339_v29  ;;  %v7335_v63 = vor.u32 %v8717_v26, %v7332_v41  ;;  %v7550_v29 = vor.u32 %v8774_v19, %v7549_v31  ;;  %v7543_v26 = vld [vmem:[#allocation9 + $0xd8] sm:$0xf0] }
 0x2db   :  { %3289 = vmatpush.bf16.msrb.mxu3 %v7351_v3  ;;  %v8775_v3 = vld [vmem:[#allocation9 + $0xf4] sm:$0xf0] }
 0x2dc   :  { %v7558_v51 = vor.u32 %v8775_v3, %v7557_v34  ;;  %v8762_v34 = vld [vmem:[#allocation9 + $0x8c] sm:$0xf0]  ;;  %v7503_v3 = vld [vmem:[#allocation9 + $0x90] sm:$0xf0] }
 0x2dd   :  { %3262 = vmatpush.bf16.msra.mxu1 %v7359_v17  ;;  %v2410_v17 = vunpack.c.h.bf16 %v9673_v62 }
 0x2de   :  { %3275 = vmatpush.bf16.msrb.mxu2 %v7363_v50  ;;  %3251 = vmatpush.bf16.msra.mxu0 %v7323_v33  ;;  %v7315_v50 = vor.u32 %v8715_v47, %v7314_v8  ;;  %v7525_v8 = vld [vmem:[#allocation9 + $0xa8] sm:$0xf] }
 0x2df   :  { %3290 = vmatpush.bf16.msrb.mxu3 %v7335_v63 }
 0x2e1   :  { %3263 = vmatpush.bf16.msra.mxu1 %v7343_v23 }
 0x2e2   :  { %3276 = vmatpush.bf16.msrb.mxu2 %v7347_v40  ;;  %3252 = vmatpush.bf16.msra.mxu0 %v7307_v27  ;;  %v8764_v27 = vld [vmem:[#allocation9 + $0xa4] sm:$0xf] }
 0x2e3   :  { %3291 = vmatpush.bf16.msrb.mxu3 %v7319_v36  ;;  %v7527_v36 = vld [vmem:[#allocation9 + $0xb8] sm:$0xf0] }
 0x2e5   :  { %3264 = vmatpush.bf16.msra.mxu1 %v7327_v28  ;;  %v8771_v28 = vld [vmem:[#allocation9 + $0xd4] sm:$0xf0] }
 0x2e6   :  { %3277 = vmatpush.bf16.msrb.mxu2 %v7331_v49  ;;  %3566 = vmatpush.bf16.msrb.mxu0 %v7550_v29  ;;  %v8769_v49 = vld [vmem:[#allocation9 + $0xcc] sm:$0xf] }
 0x2e9   :  { %3265 = vmatpush.bf16.msra.mxu1 %v7311_v9  ;;  %v7519_v9 = vld [vmem:[#allocation9 + $0xb0] sm:$0xf0] }
 0x2ea   :  { %3278 = vmatpush.bf16.msrb.mxu2 %v7315_v50  ;;  %v2409_v50 = vunpack.c.l.bf16 %v9673_v62  ;;  %v7522_v31 = vor.u32 %v8764_v27, %v7519_v9  ;;  %v7509_v62 = vld [vmem:[#allocation9 + $0x88] sm:$0xf]  ;;  %v8759_v9 = vld [vmem:[#allocation9 + $0x74] sm:$0xf0] }
 0x2eb   :  { %v7493_v27 = vld [vmem:[#allocation9 + $0x68] sm:$0xf] }
 0x2ed   :  { %3579 = vmatpush.bf16.msrb.mxu1 %v7554_v2  ;;  %v8760_v2 = vld [vmem:[#allocation9 + $0x84] sm:$0xf] }
 0x2ee   :  { %3592 = vmatpush.bf16.msra.mxu2 %v7558_v51  ;;  %v7506_v51 = vor.u32 %v8760_v2, %v7503_v3 }
 0x341   :  { %v2612_v56 = vpop.f32.mrf.mxu0  ;;  %v2625_v39 = vpop.f32.mrf.mxu1 }
 0x342   :  { %v2655_v20 = vadd.f32 %v2612_v56, %v2407_v45  ;;  %v2656_v12 = vadd.f32 %v2625_v39, %v2408_v54  ;;  %v8773_v45 = vld [vmem:[#allocation9 + $0xec] sm:$0xf]  ;;  %v7559_v54 = vld [vmem:[#allocation9 + $0xf8] sm:$0xf0]  ;;  %v8770_v56 = vld [vmem:[#allocation9 + $0xcc] sm:$0xf0] }
 0x343   :  { %v7562_v59 = vor.u32 %v8773_v45, %v7559_v54  ;;  %v8768_v39 = vld [vmem:[#allocation9 + $0xc4] sm:$0xf]  ;;  %v7534_v53 = vor.u32 %v8770_v56, %v7533_v44 }
 0x344   :  { %v7170_v43 = vmul.f32 -1.442695, %v2655_v20  ;;  %v7171_v14 = vmul.f32 -1.442695, %v2656_v12  ;;  %v7538_v12 = vor.u32 %v8768_v39, %v7535_v48 }
 0x345   :  { %3605 = vmatpush.bf16.msra.mxu3 %v7562_v59  ;;  %3567 = vmatpush.bf16.msrb.mxu0 %v7534_v53  ;;  %v8763_v59 = vld [vmem:[#allocation9 + $0x94] sm:$0xf0] }
 0x346   :  { %9114 = vpow2.f32 %v7170_v43  ;;  %v7542_v43 = vor.u32 %v8771_v28, %v7541_v16  ;;  %3580 = vmatpush.bf16.msrb.mxu1 %v7538_v12  ;;  %v7510_v48 = vor.u32 %v8763_v59, %v7509_v62  ;;  %v8761_v16 = vld [vmem:[#allocation9 + $0x8c] sm:$0xf]  ;;  %v8752_v62 = vld [vmem:[#allocation9 + $0x44] sm:$0xf]  ;;  %v7477_v59 = vld [vmem:[#allocation9 + $0x48] sm:$0xf] }
 0x347   :  { %9116 = vpow2.f32 %v7171_v14  ;;  %v7546_v14 = vor.u32 %v8769_v49, %v7543_v26  ;;  %v2729_v26 = vunpack.c.h.bf16 %v9653_v21 }
 0x348   :  { %v10119_v7 = vpop.f32.mrf.mxu2  ;;  %v2651_v5 = vpop.f32.mrf.mxu3  ;;  %3593 = vmatpush.bf16.msra.mxu2 %v7542_v43  ;;  %v7485_v43 = vld [vmem:[#allocation9 + $0x60] sm:$0xf] }
 0x349   :  { %v2658_v23 = vadd.f32 %v2651_v5, %v2410_v17  ;;  %v2614_v40 = vpop.f32.mrf.mxu0  ;;  %v2627_v35 = vpop.f32.mrf.mxu1  ;;  %3606 = vmatpush.bf16.msra.mxu3 %v7546_v14  ;;  %v8767_v17 = vld [vmem:[#allocation9 + $0xb4] sm:$0xf0]  ;;  %v8765_v5 = vld [vmem:[#allocation9 + $0xac] sm:$0xf]  ;;  %3568 = vmatpush.bf16.msrb.mxu0 %v7518_v4  ;;  %v8758_v14 = vld [vmem:[#allocation9 + $0x6c] sm:$0xf0] }
 0x34a   :  { %v7526_v19 = vor.u32 %v8767_v17, %v7525_v8  ;;  %v7530_v55 = vor.u32 %v8765_v5, %v7527_v36  ;;  %v2657_v40 = vadd.f32 %v10119_v7, %v2409_v50  ;;  %3581 = vmatpush.bf16.msrb.mxu1 %v7522_v31  ;;  %v7502_v35 = vor.u32 %v8762_v34, %v7501_v25  ;;  %v7487_v4 = vld [vmem:[#allocation9 + $0x70] sm:$0xf0]  ;;  %v8757_v17 = vld [vmem:[#allocation9 + $0x6c] sm:$0xf]  ;;  %v7495_v50 = vld [vmem:[#allocation9 + $0x78] sm:$0xf0] }
 0x34b   :  { %v7172_v33 = vmul.f32 -1.442695, %v2658_v23  ;;  %v2728_v7 = vunpack.c.l.bf16 %v9653_v21  ;;  %v7469_v5 = vld [vmem:[#allocation9 + $0x40] sm:$0xf]  ;;  %v7490_v34 = vor.u32 %v8756_v57, %v7487_v4  ;;  %v7498_v2 = vor.u32 %v8757_v17, %v7495_v50 }
 0x34c   :  { %v9115_v20 = vpop.eup %9114  ;;  %3594 = vmatpush.bf16.msra.mxu2 %v7526_v19  ;;  %v7486_v19 = vor.u32 %v8758_v14, %v7485_v43 }
 0x34d   :  { %v9117_v41 = vpop.eup %9116  ;;  %v10121_v63 = vadd.f32 1.0, %v9115_v20  ;;  %9118 = vpow2.f32 %v7172_v33  ;;  %3607 = vmatpush.bf16.msra.mxu3 %v7530_v55  ;;  %v7511_v20 = vld [vmem:[#allocation9 + $0x98] sm:$0xf0]  ;;  %3569 = vmatpush.bf16.msrb.mxu0 %v7502_v35  ;;  %v7494_v35 = vor.u32 %v8759_v9, %v7493_v27  ;;  %v7453_v27 = vld [vmem:[#allocation9 + $0x20] sm:$0xf] }
 0x34e   :  { %v10123_v0 = vadd.f32 1.0, %v9117_v41  ;;  %v2731_v41 = vunpack.c.h.bf16 %v9721_v46  ;;  %3582 = vmatpush.bf16.msrb.mxu1 %v7506_v51  ;;  %v7471_v51 = vld [vmem:[#allocation9 + $0x50] sm:$0xf0]  ;;  %v8750_v9 = vld [vmem:[#allocation9 + $0x2c] sm:$0xf0] }
 0x34f   :  { %9120 = vrcp.f32 %v10121_v63  ;;  %v2674_v42 = vand.u32 2147483648, %v10121_v63  ;;  %v2672_v29 = vand.u32 2147483647, %v10121_v63  ;;  %vm2668_vm10 = vweird.f32 %v10121_v63 }
 0x350   :  { %9122 = vrcp.f32 %v10123_v0  ;;  %v2640_v47 = vpop.f32.mrf.mxu2  ;;  %v2653_v60 = vpop.f32.mrf.mxu3  ;;  %v2691_v45 = vand.u32 2147483647, %v10123_v0  ;;  %v2693_v56 = vand.u32 2147483648, %v10123_v0  ;;  %3595 = vmatpush.bf16.msra.mxu2 %v7510_v48  ;;  %vm2687_vm14 = vweird.f32 %v10123_v0  ;;  %v8755_v48 = vld [vmem:[#allocation9 + $0x54] sm:$0xf0] }
 0x351   :  { %v10137_v39 = vor.u32 1.1754944e-38, %v2674_v42  ;;  %vm10144_vm9 = vcmp.eq.f32.partialorder %v2672_v29, 8.507059e+37  ;;  %v7514_v60 = vor.u32 %v8761_v16, %v7511_v20  ;;  %3570 = vmatpush.bf16.msrb.mxu0 %v7486_v19  ;;  %v8753_v16 = vld [vmem:[#allocation9 + $0x4c] sm:$0xf]  ;;  %v7479_v20 = vld [vmem:[#allocation9 + $0x58] sm:$0xf0] }
 0x352   :  { %v2694_v31 = vor.u32 1.1754944e-38, %v2693_v56  ;;  %3583 = vmatpush.bf16.msrb.mxu1 %v7490_v34  ;;  %vm10181_vm0 = vcmp.eq.f32.partialorder %v2691_v45, 8.507059e+37  ;;  %v7478_v45 = vor.u32 %v8755_v48, %v7477_v59  ;;  %v7482_v19 = vor.u32 %v8753_v16, %v7479_v20  ;;  %v7447_v48 = vld [vmem:[#allocation9 + $0x18] sm:$0xf0] }
 0x353   :  { %v9119_v23 = vpop.eup %9118  ;;  %3608 = vmatpush.bf16.msra.mxu3 %v7514_v60  ;;  %v7461_v60 = vld [vmem:[#allocation9 + $0x28] sm:$0xf]  ;;  %v7454_v34 = vor.u32 %v8750_v9, %v7453_v27 }
 0x354   :  { %v10132_v54 = vadd.f32 1.0, %v9119_v23  ;;  %v2933_v33 = vpop.f32.mrf.mxu0  ;;  %v2946_v53 = vpop.f32.mrf.mxu1  ;;  %v8754_v23 = vld [vmem:[#allocation9 + $0x4c] sm:$0xf0]  ;;  %3596 = vmatpush.bf16.msra.mxu2 %v7494_v35  ;;  %v7439_v35 = vld [vmem:[#allocation9 + $0x10] sm:$0xf0] }
 0x355   :  { %v10134_v44 = vpop.eup %9120  ;;  %v2976_v21 = vadd.f32 %v2933_v33, %v2728_v7  ;;  %v2977_v47 = vadd.f32 %v2946_v53, %v2729_v26  ;;  %v7470_v3 = vor.u32 %v8754_v23, %v7469_v5  ;;  %v7474_v53 = vor.u32 %v8752_v62, %v7471_v51  ;;  %v8749_v5 = vld [vmem:[#allocation9 + $0x2c] sm:$0xf]  ;;  %v8746_v23 = vld [vmem:[#allocation9 + $0xc] sm:$0xf0]  ;;  %v7445_v62 = vld [vmem:[#allocation9 + $0x8] sm:$0xf] }
 0x356   :  { %v10140_v12 = vpop.eup %9122  ;;  %v2664_v28 = vmul.f32 %v10134_v44, %v10121_v63  ;;  %9124 = vrcp.f32 %v10132_v54  ;;  %vm2669_vm11 = vweird.f32 %v10134_v44  ;;  %v8747_v51 = vld [vmem:[#allocation9 + $0x14] sm:$0xf0]  ;;  %v2713_v14 = vand.u32 2147483648, %v10132_v54 }
 0x357   :  { %v2683_v11 = vmul.f32 %v10140_v12, %v10123_v0  ;;  %9126 = vtanh.f32 %v2657_v40  ;;  %vm2688_vm12 = vweird.f32 %v10140_v12  ;;  %vm10161_vm13 = vmor %vm2668_vm10, %vm2669_vm11  ;;  %v7301_v55 = vmul.f32 -1.442695, %v2976_v21  ;;  %3609 = vmatpush.bf16.msra.mxu3 %v7498_v2  ;;  %v8748_v21 = vld [vmem:[#allocation9 + $0x24] sm:$0xf]  ;;  %3571 = vmatpush.bf16.msrb.mxu0 %v7470_v3 }
 0x358   :  { %v2665_v8 = vsub.f32 1.0, %v2664_v28  ;;  %v7302_v25 = vmul.f32 -1.442695, %v2977_v47  ;;  %vm10174_vm15 = vmor %vm2687_vm14, %vm2688_vm12  ;;  %v7455_v47 = vld [vmem:[#allocation9 + $0x30] sm:$0xf0]  ;;  %3584 = vmatpush.bf16.msrb.mxu1 %v7474_v53  ;;  %3597 = vmatpush.bf16.msra.mxu2 %v7478_v45  ;;  %vm2707_vm2 = vweird.f32 %v10132_v54  ;;  %v2730_v45 = vunpack.c.l.bf16 %v9721_v46 }
 0x359   :  { %v2684_v42 = vsub.f32 1.0, %v2683_v11  ;;  %9128 = vpow2.f32 %v7301_v55  ;;  %v7463_v55 = vld [vmem:[#allocation9 + $0x38] sm:$0xf0]  ;;  %v8745_v53 = vld [vmem:[#allocation9 + $0xc] sm:$0xf] }
 0x35a   :  { %v2666_v36 = vmul.f32 %v10134_v44, %v2665_v8  ;;  %9130 = vpow2.f32 %v7302_v25  ;;  %v7437_v25 = vld [vmem:[#allocation9] sm:$0xf] }
 0x35b   :  { %v2685_v40 = vmul.f32 %v10140_v12, %v2684_v42  ;;  %v10170_v7 = vpop.f32.mrf.mxu2  ;;  %v2972_v33 = vpop.f32.mrf.mxu3  ;;  %3610 = vmatpush.bf16.msra.mxu3 %v7482_v19  ;;  %3572 = vmatpush.bf16.msrb.mxu0 %v7454_v34 }
 0x35c   :  { %v10166_v56 = vpop.eup %9124  ;;  %v2667_v63 = vadd.f32 %v10134_v44, %v2666_v36  ;;  %v2935_v11 = vpop.f32.mrf.mxu0  ;;  %v2979_v0 = vadd.f32 %v2972_v33, %v2731_v41 }
 0x35d   :  { %v9127_v28 = vpop.eup %9126  ;;  %v2686_v43 = vadd.f32 %v10140_v12, %v2685_v40  ;;  %v2703_v57 = vmul.f32 %v10166_v56, %v10132_v54  ;;  %v2948_v4 = vpop.f32.mrf.mxu1  ;;  %v8744_v40 = vld [vmem:[#allocation9 + $0x4] sm:$0xf]  ;;  %vm2708_vm1 = vweird.f32 %v10166_v56  ;;  %v2711_v11 = vand.u32 2147483647, %v10132_v54 }
 0x35e   :  { %v2671_v8 = vsel %vm10161_vm13, %v10134_v44, %v2667_v63  ;;  %v8751_v44 = vld [vmem:[#allocation9 + $0x34] sm:$0xf0]  ;;  %v7303_v29 = vmul.f32 -1.442695, %v2979_v0  ;;  %v7450_v4 = vor.u32 %v8745_v53, %v7447_v48  ;;  %vm2709_vm3 = vmor %vm2707_vm2, %vm2708_vm1 }
 0x35f   :  { %v2676_v17 = vsel %vm10144_vm9, %v10137_v39, %v2671_v8  ;;  %v2690_v50 = vsel %vm10174_vm15, %v10140_v12, %v2686_v43  ;;  %v2704_v42 = vsub.f32 1.0, %v2703_v57  ;;  %v7458_v12 = vor.u32 %v8748_v21, %v7455_v47  ;;  %v9129_v2 = vpop.eup %9128 }
 0x360   :  { %v2695_v41 = vsel %vm10181_vm0, %v2694_v31, %v2690_v50  ;;  %v2718_v36 = vmul.f32 %v9127_v28, %v2676_v17  ;;  %9132 = vpow2.f32 %v7303_v29  ;;  %v7462_v3 = vor.u32 %v8751_v44, %v7461_v60  ;;  %v9131_v59 = vpop.eup %9130 }
 0x361   :  { %v2717_v49 = vmul.f32 %v2695_v41, %v10078_v22  ;;  %v2705_v39 = vmul.f32 %v10166_v56, %v2704_v42  ;;  %v7466_v31 = vor.u32 %v8749_v5, %v7463_v55  ;;  %v10204_v33 = vadd.f32 1.0, %v9129_v2  ;;  %3585 = vmatpush.bf16.msrb.mxu1 %v7458_v12 }
 0x362   :  { %v7438_v22 = vor.u32 %v8746_v23, %v7437_v25  ;;  %v10207_v16 = vadd.f32 1.0, %v9131_v59  ;;  %v7442_v43 = vor.u32 %v8744_v40, %v7439_v35  ;;  %3598 = vmatpush.bf16.msra.mxu2 %v7462_v3  ;;  %v7446_v57 = vor.u32 %v8747_v51, %v7445_v62 }
 0x363   :  { %v10202_v63 = vadd.f32 %v2718_v36, %v2717_v49  ;;  %v2961_v20 = vpop.f32.mrf.mxu2  ;;  %v2974_v28 = vpop.f32.mrf.mxu3  ;;  %v2706_v26 = vadd.f32 %v10166_v56, %v2705_v39  ;;  %3611 = vmatpush.bf16.msra.mxu3 %v7466_v31  ;;  %v2714_v8 = vor.u32 1.1754944e-38, %v2713_v14  ;;  %vm2712_vm4 = vcmp.eq.f32.partialorder %v2711_v11, 8.507059e+37  ;;  %v8806_v11 = vld [vmem:[#allocation6 + $0xec] sm:$0xf0] }
 0x364   :  { %3573 = vmatpush.bf16.msrb.mxu0 %v7438_v22  ;;  %v2978_v60 = vadd.f32 %v10170_v7, %v2730_v45  ;;  %v2995_v41 = vand.u32 2147483648, %v10204_v33  ;;  %v3014_v36 = vand.u32 2147483648, %v10207_v16  ;;  %v2993_v7 = vand.u32 2147483647, %v10204_v33 }
 0x365   :  { %9134 = vtanh.f32 %v10202_v63  ;;  %v2710_v9 = vsel %vm2709_vm3, %v10166_v56, %v2706_v26  ;;  %3586 = vmatpush.bf16.msrb.mxu1 %v7442_v43  ;;  %v3012_v25 = vand.u32 2147483647, %v10207_v16  ;;  %vm2989_vm7 = vweird.f32 %v10204_v33 }
 0x366   :  { %9136 = vrcp.f32 %v10204_v33  ;;  %v9133_v27 = vpop.eup %9132  ;;  %3599 = vmatpush.bf16.msra.mxu2 %v7446_v57  ;;  %v2715_v21 = vsel %vm2712_vm4, %v2714_v8, %v2710_v9  ;;  %vm3008_vm8 = vweird.f32 %v10207_v16  ;;  %v2996_v34 = vor.u32 1.1754944e-38, %v2995_v41  ;;  %v7682_v9 = vld [vmem:[#allocation6 + $0xf0] sm:$0xf0]  ;;  %v7688_v8 = vld [vmem:[#allocation6 + $0xe8] sm:$0xf] }
 0x367   :  { %9138 = vrcp.f32 %v10207_v16  ;;  %v3022_v0 = vadd.f32 1.0, %v9133_v27  ;;  %3612 = vmatpush.bf16.msra.mxu3 %v7450_v4  ;;  %v3015_v40 = vor.u32 1.1754944e-38, %v3014_v36  ;;  %vm2994_vm11 = vcmp.eq.f32.partialorder %v2993_v7, 8.507059e+37  ;;  %v8804_v4 = vld [vmem:[#allocation6 + $0xe4] sm:$0xf] }
 0x368   :  { %vm3013_vm12 = vcmp.eq.f32.partialorder %v3012_v25, 8.507059e+37  ;;  %v7685_v45 = vor.u32 %v8804_v4, %v7682_v9  ;;  %v8801_v36 = vld [vmem:[#allocation6 + $0xcc] sm:$0xf]  ;;  %v8798_v25 = vld [vmem:[#allocation6 + $0xac] sm:$0xf0] }
 0x369   :  { %9140 = vrcp.f32 %v3022_v0  ;;  %v3034_v48 = vand.u32 2147483648, %v3022_v0  ;;  %vm3028_vm14 = vweird.f32 %v3022_v0  ;;  %v7624_v9 = vld [vmem:[#allocation6 + $0x68] sm:$0xf] }
 0x36a   :  { %9142 = vtanh.f32 %v2978_v60 }
 0x36b   :  { %v9135_v54 = vpop.eup %9134  ;;  %v3035_v28 = vor.u32 1.1754944e-38, %v3034_v48  ;;  %v7640_v48 = vld [vmem:[#allocation6 + $0x88] sm:$0xf] }
 0x36c   :  { %v9137_v47 = vpop.eup %9136  ;;  %v2721_v17 = vmul.f32 %v9135_v54, %v2715_v21  ;;  %v8805_v21 = vld [vmem:[#allocation6 + $0xec] sm:$0xf] }
 0x36d   :  { %v9139_v50 = vpop.eup %9138  ;;  %v2985_v42 = vmul.f32 %v9137_v47, %v10204_v33  ;;  %vm2990_vm5 = vweird.f32 %v9137_v47 }
 0x36e   :  { %v3004_v56 = vmul.f32 %v9139_v50, %v10207_v16  ;;  %v2722_v19 = vpack.c.bf16 %v2721_v17, %v2721_v17  ;;  %vm3009_vm6 = vweird.f32 %v9139_v50  ;;  %vm2991_vm9 = vmor %vm2989_vm7, %vm2990_vm5  ;;  %v3032_v16 = vand.u32 2147483647, %v3022_v0  ;;  %v7664_v17 = vld [vmem:[#allocation6 + $0xc0] sm:$0xf] }
 0x36f   :  { %v2986_v44 = vsub.f32 1.0, %v2985_v42  ;;  %v9141_v46 = vpop.eup %9140  ;;  %vm3010_vm10 = vmor %vm3008_vm8, %vm3009_vm6  ;;  %v8800_v42 = vld [vmem:[#allocation6 + $0xc4] sm:$0xf] }
 0x370   :  { %v3005_v5 = vsub.f32 1.0, %v3004_v56  ;;  %2724 = vst [vmem:[#allocation4 + $0xc] sm:$0xf] %v2722_v19  ;;  %3253 = vmatmul.bf16.vlgmr.msra.gmra.mxu0 %v2722_v19  ;;  %3266 = vmatmul.bf16.vlgmr.msra.gmra.mxu1 %v2722_v19  ;;  %v3024_v49 = vmul.f32 %v9141_v46, %v3022_v0  ;;  %v9143_v2 = vpop.eup %9142  ;;  %vm3029_vm13 = vweird.f32 %v9141_v46  ;;  %vm3033_vm0 = vcmp.eq.f32.partialorder %v3032_v16, 8.507059e+37  ;;  %v8807_v0 = vld [vmem:[#allocation6 + $0xf4] sm:$0xf0] }
 0x371   :  { %v2987_v29 = vmul.f32 %v9137_v47, %v2986_v44  ;;  %3279 = vmatmul.bf16.vlgmr.msrb.gmra.mxu2 %v2722_v19  ;;  %3292 = vmatmul.bf16.vlgmr.msrb.gmra.mxu3 %v2722_v19  ;;  %vm3030_vm15 = vmor %vm3028_vm14, %vm3029_vm13  ;;  %v7689_v54 = vor.u32 %v8807_v0, %v7688_v8  ;;  %v7666_v19 = vld [vmem:[#allocation6 + $0xd0] sm:$0xf0]  ;;  %v7672_v44 = vld [vmem:[#allocation6 + $0xc8] sm:$0xf] }
 0x372   :  { %v3006_v55 = vmul.f32 %v9139_v50, %v3005_v5  ;;  %v3025_v23 = vsub.f32 1.0, %v3024_v49  ;;  %3900 = vmatpush.bf16.msra.mxu1 %v7685_v45  ;;  %v8803_v5 = vld [vmem:[#allocation6 + $0xd4] sm:$0xf0]  ;;  %v7669_v41 = vor.u32 %v8800_v42, %v7666_v19  ;;  %v8796_v49 = vld [vmem:[#allocation6 + $0xa4] sm:$0xf] }
 0x373   :  { %v2988_v39 = vadd.f32 %v9137_v47, %v2987_v29  ;;  %3913 = vmatpush.bf16.msrb.mxu2 %v7689_v54  ;;  %v7674_v29 = vld [vmem:[#allocation6 + $0xd8] sm:$0xf0]  ;;  %v8795_v16 = vld [vmem:[#allocation6 + $0x94] sm:$0xf0]  ;;  %v8789_v54 = vld [vmem:[#allocation6 + $0x6c] sm:$0xf] }
 0x374   :  { %v3007_v12 = vadd.f32 %v9139_v50, %v3006_v55  ;;  %v3026_v59 = vmul.f32 %v9141_v46, %v3025_v23  ;;  %v7677_v7 = vor.u32 %v8801_v36, %v7674_v29  ;;  %v7648_v55 = vld [vmem:[#allocation6 + $0xa0] sm:$0xf]  ;;  %v8799_v23 = vld [vmem:[#allocation6 + $0xb4] sm:$0xf0]  ;;  %v7608_v19 = vld [vmem:[#allocation6 + $0x48] sm:$0xf]  ;;  %v3049_v29 = vunpack.c.l.bf16 %v9617_v24 }
 0x375   :  { %v2992_v35 = vsel %vm2991_vm9, %v9137_v47, %v2988_v39  ;;  %v7690_v47 = vld [vmem:[#allocation6 + $0xf8] sm:$0xf0]  ;;  %v7649_v39 = vor.u32 %v8798_v25, %v7648_v55  ;;  %v8791_v8 = vld [vmem:[#allocation6 + $0x74] sm:$0xf0] }
 0x376   :  { %v2997_v3 = vsel %vm2994_vm11, %v2996_v34, %v2992_v35  ;;  %v3011_v31 = vsel %vm3010_vm10, %v9139_v50, %v3007_v12  ;;  %v3027_v53 = vadd.f32 %v9141_v46, %v3026_v59  ;;  %v7693_v60 = vor.u32 %v8805_v21, %v7690_v47  ;;  %v8802_v50 = vld [vmem:[#allocation6 + $0xcc] sm:$0xf0]  ;;  %3901 = vmatpush.bf16.msra.mxu1 %v7669_v41  ;;  %v7650_v34 = vld [vmem:[#allocation6 + $0xb0] sm:$0xf0]  ;;  %v7656_v12 = vld [vmem:[#allocation6 + $0xa8] sm:$0xf] }
 0x377   :  { %v3016_v62 = vsel %vm3013_vm12, %v3015_v40, %v3011_v31  ;;  %v3039_v51 = vmul.f32 %v9143_v2, %v2997_v3  ;;  %v7665_v56 = vor.u32 %v8802_v50, %v7664_v17  ;;  %v7653_v40 = vor.u32 %v8796_v49, %v7650_v34  ;;  %v8797_v2 = vld [vmem:[#allocation6 + $0xac] sm:$0xf]  ;;  %v7658_v3 = vld [vmem:[#allocation6 + $0xb8] sm:$0xf0]  ;;  %v8792_v59 = vld [vmem:[#allocation6 + $0x84] sm:$0xf] }
 0x378   :  { %v3038_v22 = vmul.f32 %v3016_v62, %v10110_v32  ;;  %v3031_v20 = vsel %vm3030_vm15, %v9141_v46, %v3027_v53  ;;  %v7680_v32 = vld [vmem:[#allocation6 + $0xe0] sm:$0xf]  ;;  %3926 = vmatpush.bf16.msrb.mxu3 %v7693_v60  ;;  %v7673_v46 = vor.u32 %v8803_v5, %v7672_v44  ;;  %v7657_v35 = vor.u32 %v8799_v23, %v7656_v12  ;;  %v7634_v53 = vld [vmem:[#allocation6 + $0x90] sm:$0xf0]  ;;  %v7626_v21 = vld [vmem:[#allocation6 + $0x78] sm:$0xf0] }
 0x379   :  { %v3036_v43 = vsel %vm3033_vm0, %v3035_v28, %v3031_v20  ;;  %v7681_v27 = vor.u32 %v8806_v11, %v7680_v32  ;;  %v7661_v31 = vor.u32 %v8797_v2, %v7658_v3  ;;  %v7632_v62 = vld [vmem:[#allocation6 + $0x80] sm:$0xf]  ;;  %v7637_v20 = vor.u32 %v8792_v59, %v7634_v53  ;;  %v8790_v32 = vld [vmem:[#allocation6 + $0x6c] sm:$0xf0]  ;;  %v8788_v11 = vld [vmem:[#allocation6 + $0x64] sm:$0xf] }
 0x37a   :  { %v10230_v33 = vadd.f32 %v3039_v51, %v3038_v22  ;;  %3914 = vmatpush.bf16.msrb.mxu2 %v7673_v46  ;;  %3902 = vmatpush.bf16.msra.mxu1 %v7653_v40  ;;  %v8794_v51 = vld [vmem:[#allocation6 + $0x8c] sm:$0xf0]  ;;  %v7641_v28 = vor.u32 %v8795_v16, %v7640_v48  ;;  %v7625_v45 = vor.u32 %v8791_v8, %v7624_v9  ;;  %v7600_v60 = vld [vmem:[#allocation6 + $0x40] sm:$0xf]  ;;  %v8784_v50 = vld [vmem:[#allocation6 + $0x44] sm:$0xf] }
 0x37b   :  { %3887 = vmatpush.bf16.msra.mxu0 %v7681_v27  ;;  %v7633_v22 = vor.u32 %v8794_v51, %v7632_v62  ;;  %v7618_v27 = vld [vmem:[#allocation6 + $0x70] sm:$0xf0]  ;;  %v7629_v47 = vor.u32 %v8789_v54, %v7626_v21  ;;  %v8786_v17 = vld [vmem:[#allocation6 + $0x4c] sm:$0xf0]  ;;  %v8787_v44 = vld [vmem:[#allocation6 + $0x54] sm:$0xf0] }
 0x37c   :  { %9144 = vtanh.f32 %v10230_v33  ;;  %3927 = vmatpush.bf16.msrb.mxu3 %v7677_v7  ;;  %v7621_v0 = vor.u32 %v8788_v11, %v7618_v27  ;;  %v7601_v42 = vor.u32 %v8786_v17, %v7600_v60  ;;  %v7609_v41 = vor.u32 %v8787_v44, %v7608_v19  ;;  %v8785_v46 = vld [vmem:[#allocation6 + $0x4c] sm:$0xf]  ;;  %v7610_v36 = vld [vmem:[#allocation6 + $0x58] sm:$0xf0]  ;;  %v8782_v34 = vld [vmem:[#allocation6 + $0x2c] sm:$0xf0] }
 0x37d   :  { %v3050_v7 = vunpack.c.h.bf16 %v9617_v24  ;;  %v7613_v55 = vor.u32 %v8785_v46, %v7610_v36  ;;  %v8780_v12 = vld [vmem:[#allocation6 + $0x24] sm:$0xf]  ;;  %v7586_v2 = vld [vmem:[#allocation6 + $0x30] sm:$0xf0]  ;;  %v7592_v3 = vld [vmem:[#allocation6 + $0x28] sm:$0xf] }
 0x37e   :  { %3915 = vmatpush.bf16.msrb.mxu2 %v7657_v35  ;;  %3903 = vmatpush.bf16.msra.mxu1 %v7637_v20  ;;  %v7589_v62 = vor.u32 %v8780_v12, %v7586_v2  ;;  %v8781_v59 = vld [vmem:[#allocation6 + $0x2c] sm:$0xf]  ;;  %v7594_v24 = vld [vmem:[#allocation6 + $0x38] sm:$0xf0]  ;;  %v7568_v16 = vld [vmem:[#allocation6] sm:$0xf] }
 0x37f   :  { %3888 = vmatpush.bf16.msra.mxu0 %v7665_v56  ;;  %v7602_v56 = vld [vmem:[#allocation6 + $0x50] sm:$0xf0]  ;;  %v7597_v48 = vor.u32 %v8781_v59, %v7594_v24  ;;  %v8778_v20 = vld [vmem:[#allocation6 + $0xc] sm:$0xf0]  ;;  %v8777_v27 = vld [vmem:[#allocation6 + $0xc] sm:$0xf] }
 0x380   :  { %3928 = vmatpush.bf16.msrb.mxu3 %v7661_v31  ;;  %v7605_v5 = vor.u32 %v8784_v50, %v7602_v56  ;;  %v8783_v31 = vld [vmem:[#allocation6 + $0x34] sm:$0xf0]  ;;  %v7578_v9 = vld [vmem:[#allocation6 + $0x18] sm:$0xf0]  ;;  %v7811_v8 = vld [vmem:[#allocation9 + $0xe0] sm:$0xf] }
 0x381   :  { %v7593_v51 = vor.u32 %v8783_v31, %v7592_v3  ;;  %v7581_v54 = vor.u32 %v8777_v27, %v7578_v9  ;;  %v8838_v21 = vld [vmem:[#allocation9 + $0xec] sm:$0xf0]  ;;  %v7813_v60 = vld [vmem:[#allocation9 + $0xf0] sm:$0xf0]  ;;  %v7819_v19 = vld [vmem:[#allocation9 + $0xe8] sm:$0xf] }
 0x382   :  { %v9145_v26 = vpop.eup %9144  ;;  %3916 = vmatpush.bf16.msrb.mxu2 %v7641_v28  ;;  %3904 = vmatpush.bf16.msra.mxu1 %v7621_v0  ;;  %v8776_v28 = vld [vmem:[#allocation6 + $0x4] sm:$0xf]  ;;  %v7812_v56 = vor.u32 %v8838_v21, %v7811_v8  ;;  %v8839_v44 = vld [vmem:[#allocation9 + $0xf4] sm:$0xf0]  ;;  %v7821_v36 = vld [vmem:[#allocation9 + $0xf8] sm:$0xf0] }
 0x383   :  { %v3042_v14 = vmul.f32 %v9145_v26, %v3036_v43  ;;  %3889 = vmatpush.bf16.msra.mxu0 %v7649_v39  ;;  %v8793_v26 = vld [vmem:[#allocation6 + $0x8c] sm:$0xf]  ;;  %v7642_v43 = vld [vmem:[#allocation6 + $0x98] sm:$0xf0]  ;;  %v7584_v39 = vld [vmem:[#allocation6 + $0x20] sm:$0xf]  ;;  %v7820_v46 = vor.u32 %v8839_v44, %v7819_v19  ;;  %v3370_v44 = vunpack.c.l.bf16 %v9641_v6 }
 0x384   :  { %v7585_v35 = vor.u32 %v8782_v34, %v7584_v39  ;;  %v8832_v39 = vld [vmem:[#allocation9 + $0xc4] sm:$0xf]  ;;  %v7797_v34 = vld [vmem:[#allocation9 + $0xd0] sm:$0xf0]  ;;  %v8833_v2 = vld [vmem:[#allocation9 + $0xcc] sm:$0xf] }
 0x385   :  { %v3043_v57 = vpack.c.bf16 %v3042_v14, %v3042_v14  ;;  %v7645_v14 = vor.u32 %v8793_v26, %v7642_v43  ;;  %v7569_v26 = vor.u32 %v8778_v20, %v7568_v16  ;;  %v7570_v43 = vld [vmem:[#allocation6 + $0x10] sm:$0xf0]  ;;  %v8828_v16 = vld [vmem:[#allocation9 + $0xa4] sm:$0xf]  ;;  %v8829_v9 = vld [vmem:[#allocation9 + $0xac] sm:$0xf] }
 0x386   :  { %3917 = vmatpush.bf16.msrb.mxu2 %v7625_v45  ;;  %3905 = vmatpush.bf16.msra.mxu1 %v7605_v5  ;;  %v7573_v11 = vor.u32 %v8776_v28, %v7570_v43  ;;  %v8837_v5 = vld [vmem:[#allocation9 + $0xec] sm:$0xf]  ;;  %v7789_v8 = vld [vmem:[#allocation9 + $0xb8] sm:$0xf0]  ;;  %v7763_v21 = vld [vmem:[#allocation9 + $0x80] sm:$0xf] }
 0x387   :  { %3045 = vst [vmem:[#allocation5 + $0x10] sm:$0xf] %v3043_v57  ;;  %3574 = vmatmul.bf16.vlgmr.msrb.gmra.mxu0 %v3043_v57  ;;  %3587 = vmatmul.bf16.vlgmr.msrb.gmra.mxu1 %v3043_v57 }
 0x388   :  { %3600 = vmatmul.bf16.vlgmr.msra.gmra.mxu2 %v3043_v57  ;;  %3613 = vmatmul.bf16.vlgmr.msra.gmra.mxu3 %v3043_v57  ;;  %v7616_v57 = vld [vmem:[#allocation6 + $0x60] sm:$0xf] }
 0x389   :  { %3890 = vmatpush.bf16.msra.mxu0 %v7633_v22  ;;  %3929 = vmatpush.bf16.msrb.mxu3 %v7645_v14  ;;  %v7617_v4 = vor.u32 %v8790_v32, %v7616_v57  ;;  %v7576_v14 = vld [vmem:[#allocation6 + $0x8] sm:$0xf]  ;;  %v8779_v57 = vld [vmem:[#allocation6 + $0x14] sm:$0xf0]  ;;  %v3052_v32 = vunpack.c.h.bf16 %v9675_v15 }
 0x38a   :  { %3918 = vmatpush.bf16.msrb.mxu2 %v7609_v41  ;;  %3906 = vmatpush.bf16.msra.mxu1 %v7589_v62 }
 0x38d   :  { %3891 = vmatpush.bf16.msra.mxu0 %v7617_v4  ;;  %3930 = vmatpush.bf16.msrb.mxu3 %v7629_v47  ;;  %v7577_v4 = vor.u32 %v8779_v57, %v7576_v14  ;;  %v8836_v47 = vld [vmem:[#allocation9 + $0xe4] sm:$0xf] }
 0x38e   :  { %3919 = vmatpush.bf16.msrb.mxu2 %v7593_v51  ;;  %3907 = vmatpush.bf16.msra.mxu1 %v7573_v11  ;;  %v7816_v41 = vor.u32 %v8836_v47, %v7813_v60  ;;  %v7805_v51 = vld [vmem:[#allocation9 + $0xd8] sm:$0xf0]  ;;  %v7787_v11 = vld [vmem:[#allocation9 + $0xa8] sm:$0xf]  ;;  %v8826_v47 = vld [vmem:[#allocation9 + $0x8c] sm:$0xf0] }
 0x38f   :  { %v7808_v24 = vor.u32 %v8833_v2, %v7805_v51  ;;  %v8824_v60 = vld [vmem:[#allocation9 + $0x84] sm:$0xf] }
 0x391   :  { %3892 = vmatpush.bf16.msra.mxu0 %v7601_v42  ;;  %3931 = vmatpush.bf16.msrb.mxu3 %v7613_v55 }
 0x392   :  { %3920 = vmatpush.bf16.msrb.mxu2 %v7577_v4  ;;  %4221 = vmatpush.bf16.msrb.mxu1 %v7816_v41  ;;  %v8831_v4 = vld [vmem:[#allocation9 + $0xb4] sm:$0xf0] }
 0x395   :  { %3893 = vmatpush.bf16.msra.mxu0 %v7585_v35  ;;  %3932 = vmatpush.bf16.msrb.mxu3 %v7597_v48  ;;  %v8835_v35 = vld [vmem:[#allocation9 + $0xd4] sm:$0xf0]  ;;  %v3051_v48 = vunpack.c.l.bf16 %v9675_v15  ;;  %v7788_v15 = vor.u32 %v8831_v4, %v7787_v11  ;;  %v7731_v11 = vld [vmem:[#allocation9 + $0x40] sm:$0xf]  ;;  %v8818_v4 = vld [vmem:[#allocation9 + $0x4c] sm:$0xf0] }
 0x396   :  { %4234 = vmatpush.bf16.msra.mxu2 %v7820_v46  ;;  %v8827_v46 = vld [vmem:[#allocation9 + $0x94] sm:$0xf0] }
 0x399   :  { %3894 = vmatpush.bf16.msra.mxu0 %v7569_v26  ;;  %3933 = vmatpush.bf16.msrb.mxu3 %v7581_v54  ;;  %v7781_v26 = vld [vmem:[#allocation9 + $0xb0] sm:$0xf0]  ;;  %v7792_v54 = vor.u32 %v8829_v9, %v7789_v8  ;;  %v7707_v9 = vld [vmem:[#allocation9 + $0x8] sm:$0xf] }
 0x39d   :  { %4208 = vmatpush.bf16.msrb.mxu0 %v7812_v56  ;;  %v7771_v56 = vld [vmem:[#allocation9 + $0x88] sm:$0xf] }
 0x3ed   :  { %v3254_v25 = vpop.f32.mrf.mxu0  ;;  %v3267_v49 = vpop.f32.mrf.mxu1 }
 0x3ee   :  { %v3297_v23 = vadd.f32 %v3254_v25, %v3049_v29  ;;  %v3298_v40 = vadd.f32 %v3267_v49, %v3050_v7  ;;  %v7795_v29 = vld [vmem:[#allocation9 + $0xc0] sm:$0xf]  ;;  %v8834_v7 = vld [vmem:[#allocation9 + $0xcc] sm:$0xf0]  ;;  %v7824_v25 = vor.u32 %v8837_v5, %v7821_v36  ;;  %v3371_v5 = vunpack.c.h.bf16 %v9641_v6  ;;  %v8825_v36 = vld [vmem:[#allocation9 + $0x8c] sm:$0xf] }
 0x3ef   :  { %v7796_v49 = vor.u32 %v8834_v7, %v7795_v29  ;;  %v7773_v29 = vld [vmem:[#allocation9 + $0x98] sm:$0xf0] }
 0x3f0   :  { %v7432_v22 = vmul.f32 -1.442695, %v3297_v23  ;;  %v7433_v53 = vmul.f32 -1.442695, %v3298_v40  ;;  %v7800_v23 = vor.u32 %v8832_v39, %v7797_v34  ;;  %v7803_v40 = vld [vmem:[#allocation9 + $0xc8] sm:$0xf]  ;;  %4247 = vmatpush.bf16.msra.mxu3 %v7824_v25  ;;  %v7776_v51 = vor.u32 %v8825_v36, %v7773_v29 }
 0x3f1   :  { %v7804_v62 = vor.u32 %v8835_v35, %v7803_v40  ;;  %4209 = vmatpush.bf16.msrb.mxu0 %v7796_v49  ;;  %v7747_v49 = vld [vmem:[#allocation9 + $0x60] sm:$0xf]  ;;  %v8822_v39 = vld [vmem:[#allocation9 + $0x6c] sm:$0xf0]  ;;  %v7749_v40 = vld [vmem:[#allocation9 + $0x70] sm:$0xf0] }
 0x3f2   :  { %9146 = vpow2.f32 %v7432_v22  ;;  %v7779_v22 = vld [vmem:[#allocation9 + $0xa0] sm:$0xf]  ;;  %4222 = vmatpush.bf16.msrb.mxu1 %v7800_v23  ;;  %v8820_v23 = vld [vmem:[#allocation9 + $0x64] sm:$0xf]  ;;  %v7741_v36 = vld [vmem:[#allocation9 + $0x58] sm:$0xf0] }
 0x3f3   :  { %9148 = vpow2.f32 %v7433_v53  ;;  %v8830_v53 = vld [vmem:[#allocation9 + $0xac] sm:$0xf0]  ;;  %4235 = vmatpush.bf16.msra.mxu2 %v7804_v62  ;;  %v7772_v62 = vor.u32 %v8827_v46, %v7771_v56  ;;  %v8819_v56 = vld [vmem:[#allocation9 + $0x54] sm:$0xf0]  ;;  %v8817_v46 = vld [vmem:[#allocation9 + $0x4c] sm:$0xf] }
 0x3f4   :  { %v3280_v0 = vpop.f32.mrf.mxu2  ;;  %v3293_v45 = vpop.f32.mrf.mxu3  ;;  %4248 = vmatpush.bf16.msra.mxu3 %v7808_v24  ;;  %v7780_v57 = vor.u32 %v8830_v53, %v7779_v22  ;;  %v7748_v24 = vor.u32 %v8822_v39, %v7747_v49  ;;  %v7755_v22 = vld [vmem:[#allocation9 + $0x68] sm:$0xf]  ;;  %v8823_v53 = vld [vmem:[#allocation9 + $0x74] sm:$0xf0]  ;;  %v7715_v39 = vld [vmem:[#allocation9 + $0x20] sm:$0xf] }
 0x3f5   :  { %v3300_v17 = vadd.f32 %v3293_v45, %v3052_v32  ;;  %v3256_v50 = vpop.f32.mrf.mxu0  ;;  %v3269_v42 = vpop.f32.mrf.mxu1  ;;  %v3299_v43 = vadd.f32 %v3280_v0, %v3051_v48  ;;  %v7784_v32 = vor.u32 %v8828_v16, %v7781_v26  ;;  %v8821_v26 = vld [vmem:[#allocation9 + $0x6c] sm:$0xf] }
 0x3f6   :  { %4210 = vmatpush.bf16.msrb.mxu0 %v7780_v57  ;;  %v7764_v50 = vor.u32 %v8826_v47, %v7763_v21  ;;  %v7765_v42 = vld [vmem:[#allocation9 + $0x90] sm:$0xf0]  ;;  %v7752_v57 = vor.u32 %v8820_v23, %v7749_v40  ;;  %v8816_v21 = vld [vmem:[#allocation9 + $0x44] sm:$0xf] }
 0x3f7   :  { %v7434_v55 = vmul.f32 -1.442695, %v3300_v17  ;;  %4223 = vmatpush.bf16.msrb.mxu1 %v7784_v32  ;;  %4236 = vmatpush.bf16.msra.mxu2 %v7788_v15  ;;  %v7768_v41 = vor.u32 %v8824_v60, %v7765_v42  ;;  %v7756_v32 = vor.u32 %v8823_v53, %v7755_v22  ;;  %v7739_v42 = vld [vmem:[#allocation9 + $0x48] sm:$0xf] }
 0x3f8   :  { %v9147_v12 = vpop.eup %9146  ;;  %4249 = vmatpush.bf16.msra.mxu3 %v7792_v54  ;;  %v7740_v49 = vor.u32 %v8819_v56, %v7739_v42 }
 0x3f9   :  { %v9149_v3 = vpop.eup %9148  ;;  %v10236_v31 = vadd.f32 1.0, %v9147_v12  ;;  %9150 = vpow2.f32 %v7434_v55 }
 0x3fa   :  { %v10238_v59 = vadd.f32 1.0, %v9149_v3  ;;  %4211 = vmatpush.bf16.msrb.mxu0 %v7764_v50  ;;  %v7732_v50 = vor.u32 %v8818_v4, %v7731_v11  ;;  %v8808_v11 = vld [vmem:[#allocation9 + $0x4] sm:$0xf] }
 0x3fb   :  { %9152 = vrcp.f32 %v10236_v31  ;;  %v3314_v14 = vand.u32 2147483647, %v10236_v31  ;;  %v3316_v27 = vand.u32 2147483648, %v10236_v31  ;;  %vm3310_vm1 = vweird.f32 %v10236_v31  ;;  %4224 = vmatpush.bf16.msrb.mxu1 %v7768_v41  ;;  %4237 = vmatpush.bf16.msra.mxu2 %v7772_v62  ;;  %v7717_v62 = vld [vmem:[#allocation9 + $0x30] sm:$0xf0] }
 0x3fc   :  { %9154 = vrcp.f32 %v10238_v59  ;;  %v3282_v20 = vpop.f32.mrf.mxu2  ;;  %v3295_v28 = vpop.f32.mrf.mxu3  ;;  %v3335_v0 = vand.u32 2147483648, %v10238_v59  ;;  %v3333_v25 = vand.u32 2147483647, %v10238_v59  ;;  %4250 = vmatpush.bf16.msra.mxu3 %v7776_v51  ;;  %vm3329_vm6 = vweird.f32 %v10238_v59  ;;  %v7723_v51 = vld [vmem:[#allocation9 + $0x28] sm:$0xf] }
 0x3fd   :  { %9156 = vtanh.f32 %v3299_v43  ;;  %vm10262_vm3 = vcmp.eq.f32.partialorder %v3314_v14, 8.507059e+37  ;;  %v3317_v12 = vor.u32 1.1754944e-38, %v3316_v27  ;;  %v7757_v43 = vld [vmem:[#allocation9 + $0x78] sm:$0xf0] }
 0x3fe   :  { %v3336_v16 = vor.u32 1.1754944e-38, %v3335_v0  ;;  %4212 = vmatpush.bf16.msrb.mxu0 %v7748_v24  ;;  %v7760_v54 = vor.u32 %v8821_v26, %v7757_v43  ;;  %v3373_v0 = vunpack.c.h.bf16 %v9709_v10  ;;  %vm10289_vm8 = vcmp.eq.f32.partialorder %v3333_v25, 8.507059e+37  ;;  %v8814_v25 = vld [vmem:[#allocation9 + $0x2c] sm:$0xf0] }
 0x3ff   :  { %v9151_v45 = vpop.eup %9150  ;;  %4225 = vmatpush.bf16.msrb.mxu1 %v7752_v57  ;;  %4238 = vmatpush.bf16.msra.mxu2 %v7756_v32  ;;  %v7716_v43 = vor.u32 %v8814_v25, %v7715_v39  ;;  %v7699_v57 = vld [vmem:[#allocation9] sm:$0xf]  ;;  %v8810_v32 = vld [vmem:[#allocation9 + $0xc] sm:$0xf0]  ;;  %v3372_v39 = vunpack.c.l.bf16 %v9709_v10 }
 0x400   :  { %v10246_v17 = vadd.f32 1.0, %v9151_v45  ;;  %4251 = vmatpush.bf16.msra.mxu3 %v7760_v54  ;;  %v8811_v54 = vld [vmem:[#allocation9 + $0x14] sm:$0xf0] }
 0x401   :  { %v10248_v19 = vpop.eup %9152  ;;  %v7708_v41 = vor.u32 %v8811_v54, %v7707_v9 }
 0x402   :  { %v10252_v7 = vpop.eup %9154  ;;  %v3306_v55 = vmul.f32 %v10248_v19, %v10236_v31  ;;  %9158 = vrcp.f32 %v10246_v17  ;;  %vm3311_vm2 = vweird.f32 %v10248_v19  ;;  %v7733_v31 = vld [vmem:[#allocation9 + $0x50] sm:$0xf0]  ;;  %4213 = vmatpush.bf16.msrb.mxu0 %v7732_v50  ;;  %vm3349_vm10 = vweird.f32 %v10246_v17 }
 0x403   :  { %v3325_v6 = vmul.f32 %v10252_v7, %v10238_v59  ;;  %vm3330_vm4 = vweird.f32 %v10252_v7  ;;  %v9157_v27 = vpop.eup %9156  ;;  %vm10273_vm5 = vmor %vm3310_vm1, %vm3311_vm2  ;;  %4239 = vmatpush.bf16.msra.mxu2 %v7740_v49  ;;  %v3355_v56 = vand.u32 2147483648, %v10246_v17 }
 0x404   :  { %v3307_v35 = vsub.f32 1.0, %v3306_v55  ;;  %v3575_v2 = vpop.f32.mrf.mxu0  ;;  %v3588_v3 = vpop.f32.mrf.mxu1  ;;  %vm10284_vm7 = vmor %vm3329_vm6, %vm3330_vm4  ;;  %v7736_v55 = vor.u32 %v8816_v21, %v7733_v31  ;;  %v8809_v21 = vld [vmem:[#allocation9 + $0xc] sm:$0xf] }
 0x405   :  { %v3326_v48 = vsub.f32 1.0, %v3325_v6  ;;  %v3618_v20 = vadd.f32 %v3575_v2, %v3370_v44  ;;  %v3619_v28 = vadd.f32 %v3588_v3, %v3371_v5  ;;  %v8812_v6 = vld [vmem:[#allocation9 + $0x24] sm:$0xf] }
 0x406   :  { %v3308_v14 = vmul.f32 %v10248_v19, %v3307_v35  ;;  %4226 = vmatpush.bf16.msrb.mxu1 %v7736_v55  ;;  %4214 = vmatpush.bf16.msrb.mxu0 %v7716_v43  ;;  %v3356_v55 = vor.u32 1.1754944e-38, %v3355_v56 }
 0x407   :  { %v3327_v15 = vmul.f32 %v10252_v7, %v3326_v48  ;;  %v7563_v8 = vmul.f32 -1.442695, %v3618_v20  ;;  %v7564_v45 = vmul.f32 -1.442695, %v3619_v28  ;;  %v8813_v20 = vld [vmem:[#allocation9 + $0x2c] sm:$0xf] }
 0x408   :  { %v10277_v47 = vpop.eup %9158  ;;  %v3309_v60 = vadd.f32 %v10248_v19, %v3308_v14  ;;  %v7725_v28 = vld [vmem:[#allocation9 + $0x38] sm:$0xf0]  ;;  %v7720_v14 = vor.u32 %v8812_v6, %v7717_v62 }
 0x409   :  { %v3328_v5 = vadd.f32 %v10252_v7, %v3327_v15  ;;  %v3345_v59 = vmul.f32 %v10277_v47, %v10246_v17  ;;  %9160 = vpow2.f32 %v7563_v8  ;;  %v7701_v15 = vld [vmem:[#allocation9 + $0x10] sm:$0xf0]  ;;  %vm3350_vm9 = vweird.f32 %v10277_v47 }
 0x40a   :  { %v3313_v29 = vsel %vm10273_vm5, %v10248_v19, %v3309_v60  ;;  %9162 = vpow2.f32 %v7564_v45  ;;  %v7744_v19 = vor.u32 %v8817_v46, %v7741_v36  ;;  %v7709_v60 = vld [vmem:[#allocation9 + $0x18] sm:$0xf0]  ;;  %4227 = vmatpush.bf16.msrb.mxu1 %v7720_v14  ;;  %v7704_v42 = vor.u32 %v8808_v11, %v7701_v15  ;;  %vm10324_vm11 = vmor %vm3349_vm10, %vm3350_vm9  ;;  %v7944_v46 = vld [vmem:[#allocation6 + $0xf0] sm:$0xf0] }
 0x40b   :  { %v3318_v23 = vsel %vm10262_vm3, %v3317_v12, %v3313_v29  ;;  %v3332_v40 = vsel %vm10284_vm7, %v10252_v7, %v3328_v5  ;;  %v3346_v35 = vsub.f32 1.0, %v3345_v59  ;;  %v10303_v2 = vpop.f32.mrf.mxu2  ;;  %v3614_v3 = vpop.f32.mrf.mxu3  ;;  %v8815_v12 = vld [vmem:[#allocation9 + $0x34] sm:$0xf0]  ;;  %v3353_v5 = vand.u32 2147483647, %v10246_v17 }
 0x40c   :  { %v3337_v24 = vsel %vm10289_vm8, %v3336_v16, %v3332_v40  ;;  %v3360_v22 = vmul.f32 %v9157_v27, %v3318_v23  ;;  %v3621_v53 = vadd.f32 %v3614_v3, %v3373_v0  ;;  %v3577_v48 = vpop.f32.mrf.mxu0  ;;  %v3590_v34 = vpop.f32.mrf.mxu1  ;;  %4252 = vmatpush.bf16.msra.mxu3 %v7744_v19  ;;  %v7724_v16 = vor.u32 %v8815_v12, %v7723_v51 }
 0x40d   :  { %v3359_v7 = vmul.f32 %v3337_v24, %v10202_v63  ;;  %v3347_v26 = vmul.f32 %v10277_v47, %v3346_v35  ;;  %v7728_v27 = vor.u32 %v8813_v20, %v7725_v28  ;;  %v7700_v63 = vor.u32 %v8810_v32, %v7699_v57 }
 0x40e   :  { %v7565_v4 = vmul.f32 -1.442695, %v3621_v53  ;;  %4240 = vmatpush.bf16.msra.mxu2 %v7724_v16  ;;  %v7712_v59 = vor.u32 %v8809_v21, %v7709_v60  ;;  %4228 = vmatpush.bf16.msrb.mxu1 %v7704_v42  ;;  %vm3354_vm12 = vcmp.eq.f32.partialorder %v3353_v5, 8.507059e+37  ;;  %v3620_v35 = vadd.f32 %v10303_v2, %v3372_v39  ;;  %v8870_v5 = vld [vmem:[#allocation6 + $0xec] sm:$0xf0] }
 0x40f   :  { %v9161_v8 = vpop.eup %9160  ;;  %v10309_v45 = vadd.f32 %v3360_v22, %v3359_v7  ;;  %v3348_v31 = vadd.f32 %v10277_v47, %v3347_v26  ;;  %4215 = vmatpush.bf16.msrb.mxu0 %v7700_v63  ;;  %v7952_v39 = vld [vmem:[#allocation6 + $0xf8] sm:$0xf0] }
 0x410   :  { %v9163_v0 = vpop.eup %9162  ;;  %v10312_v50 = vadd.f32 1.0, %v9161_v8  ;;  %9164 = vpow2.f32 %v7565_v4  ;;  %4253 = vmatpush.bf16.msra.mxu3 %v7728_v27 }
 0x411   :  { %9166 = vtanh.f32 %v10309_v45  ;;  %v10318_v44 = vadd.f32 1.0, %v9163_v0  ;;  %v3352_v17 = vsel %vm10324_vm11, %v10277_v47, %v3348_v31 }
 0x412   :  { %9168 = vrcp.f32 %v10312_v50  ;;  %4241 = vmatpush.bf16.msra.mxu2 %v7708_v41  ;;  %v3357_v23 = vsel %vm3354_vm12, %v3356_v55, %v3352_v17  ;;  %v3637_v10 = vand.u32 2147483648, %v10312_v50  ;;  %v3635_v34 = vand.u32 2147483647, %v10312_v50  ;;  %v8868_v41 = vld [vmem:[#allocation6 + $0xe4] sm:$0xf] }
 0x413   :  { %9170 = vrcp.f32 %v10318_v44  ;;  %v3603_v36 = vpop.f32.mrf.mxu2  ;;  %v3616_v29 = vpop.f32.mrf.mxu3  ;;  %v3656_v53 = vand.u32 2147483648, %v10318_v44  ;;  %v3654_v12 = vand.u32 2147483647, %v10318_v44  ;;  %vm3631_vm15 = vweird.f32 %v10312_v50 }
 0x414   :  { %4254 = vmatpush.bf16.msra.mxu3 %v7712_v59  ;;  %vm3650_vm0 = vweird.f32 %v10318_v44  ;;  %v3638_v7 = vor.u32 1.1754944e-38, %v3637_v10  ;;  %vm3636_vm3 = vcmp.eq.f32.partialorder %v3635_v34, 8.507059e+37  ;;  %v7950_v36 = vld [vmem:[#allocation6 + $0xe8] sm:$0xf]  ;;  %v8871_v29 = vld [vmem:[#allocation6 + $0xf4] sm:$0xf0]  ;;  %v7947_v17 = vor.u32 %v8868_v41, %v7944_v46 }
 0x415   :  { %v3657_v14 = vor.u32 1.1754944e-38, %v3656_v53  ;;  %vm3655_vm4 = vcmp.eq.f32.partialorder %v3654_v12, 8.507059e+37  ;;  %v7951_v55 = vor.u32 %v8871_v29, %v7950_v36  ;;  %v7910_v53 = vld [vmem:[#allocation6 + $0xa0] sm:$0xf]  ;;  %v8860_v34 = vld [vmem:[#allocation6 + $0xa4] sm:$0xf] }
 0x416   :  { %v9165_v49 = vpop.eup %9164  ;;  %v7912_v12 = vld [vmem:[#allocation6 + $0xb0] sm:$0xf0]  ;;  %v8853_v46 = vld [vmem:[#allocation6 + $0x6c] sm:$0xf]  ;;  %v7888_v36 = vld [vmem:[#allocation6 + $0x78] sm:$0xf0] }
 0x417   :  { %v9167_v25 = vpop.eup %9166  ;;  %v3664_v6 = vadd.f32 1.0, %v9165_v49  ;;  %v8869_v49 = vld [vmem:[#allocation6 + $0xec] sm:$0xf]  ;;  %v7891_v29 = vor.u32 %v8853_v46, %v7888_v36 }
 0x418   :  { %v9169_v40 = vpop.eup %9168  ;;  %v3363_v3 = vmul.f32 %v9167_v25, %v3357_v23  ;;  %v7955_v25 = vor.u32 %v8869_v49, %v7952_v39  ;;  %v8866_v23 = vld [vmem:[#allocation6 + $0xcc] sm:$0xf0]  ;;  %v8848_v49 = vld [vmem:[#allocation6 + $0x44] sm:$0xf] }
 0x419   :  { %v9171_v19 = vpop.eup %9170  ;;  %v3627_v62 = vmul.f32 %v9169_v40, %v10312_v50  ;;  %9172 = vrcp.f32 %v3664_v6  ;;  %vm3632_vm13 = vweird.f32 %v9169_v40  ;;  %v3676_v21 = vand.u32 2147483648, %v3664_v6 }
 0x41a   :  { %v3646_v47 = vmul.f32 %v9171_v19, %v10318_v44  ;;  %v3364_v24 = vpack.c.bf16 %v3363_v3, %v3363_v3  ;;  %9174 = vtanh.f32 %v3620_v35  ;;  %vm3651_vm14 = vweird.f32 %v9171_v19  ;;  %vm3633_vm1 = vmor %vm3631_vm15, %vm3632_vm13  ;;  %v7928_v3 = vld [vmem:[#allocation6 + $0xd0] sm:$0xf0] }
 0x41b   :  { %v3628_v51 = vsub.f32 1.0, %v3627_v62  ;;  %vm3652_vm2 = vmor %vm3650_vm0, %vm3651_vm14  ;;  %vm3670_vm6 = vweird.f32 %v3664_v6  ;;  %v3674_v60 = vand.u32 2147483647, %v3664_v6  ;;  %v3677_v50 = vor.u32 1.1754944e-38, %v3676_v21  ;;  %v8867_v62 = vld [vmem:[#allocation6 + $0xd4] sm:$0xf0] }
 0x41c   :  { %v3647_v22 = vsub.f32 1.0, %v3646_v47  ;;  %3366 = vst [vmem:[#allocation4 + $0x10] sm:$0xf] %v3364_v24  ;;  %3895 = vmatmul.bf16.vlgmr.msra.gmra.mxu0 %v3364_v24  ;;  %3908 = vmatmul.bf16.vlgmr.msra.gmra.mxu1 %v3364_v24  ;;  %v8857_v21 = vld [vmem:[#allocation6 + $0x8c] sm:$0xf] }
 0x41d   :  { %v3629_v48 = vmul.f32 %v9169_v40, %v3628_v51  ;;  %3921 = vmatmul.bf16.vlgmr.msrb.gmra.mxu2 %v3364_v24  ;;  %3934 = vmatmul.bf16.vlgmr.msrb.gmra.mxu3 %v3364_v24  ;;  %vm3675_vm8 = vcmp.eq.f32.partialorder %v3674_v60, 8.507059e+37  ;;  %v8865_v24 = vld [vmem:[#allocation6 + $0xcc] sm:$0xf]  ;;  %v7904_v60 = vld [vmem:[#allocation6 + $0x98] sm:$0xf0] }
 0x41e   :  { %v3648_v2 = vmul.f32 %v9171_v19, %v3647_v22  ;;  %4542 = vmatpush.bf16.msra.mxu1 %v7947_v17  ;;  %4555 = vmatpush.bf16.msrb.mxu2 %v7951_v55  ;;  %v7936_v22 = vld [vmem:[#allocation6 + $0xd8] sm:$0xf0]  ;;  %v7862_v17 = vld [vmem:[#allocation6 + $0x40] sm:$0xf]  ;;  %v8850_v55 = vld [vmem:[#allocation6 + $0x4c] sm:$0xf0] }
 0x41f   :  { %v9173_v20 = vpop.eup %9172  ;;  %v3630_v28 = vadd.f32 %v9169_v40, %v3629_v48  ;;  %4568 = vmatpush.bf16.msrb.mxu3 %v7955_v25  ;;  %v7939_v10 = vor.u32 %v8865_v24, %v7936_v22  ;;  %v8862_v48 = vld [vmem:[#allocation6 + $0xac] sm:$0xf0]  ;;  %v7863_v39 = vor.u32 %v8850_v55, %v7862_v17  ;;  %v7864_v25 = vld [vmem:[#allocation6 + $0x50] sm:$0xf0]  ;;  %v8081_v55 = vld [vmem:[#allocation9 + $0xe8] sm:$0xf] }
 0x420   :  { %v3649_v26 = vadd.f32 %v9171_v19, %v3648_v2  ;;  %v3666_v43 = vmul.f32 %v9173_v20, %v3664_v6  ;;  %v9175_v32 = vpop.eup %9174  ;;  %vm3671_vm5 = vweird.f32 %v9173_v20  ;;  %v7926_v6 = vld [vmem:[#allocation6 + $0xc0] sm:$0xf]  ;;  %v7911_v2 = vor.u32 %v8862_v48, %v7910_v53  ;;  %v8846_v53 = vld [vmem:[#allocation6 + $0x2c] sm:$0xf0]  ;;  %v8844_v48 = vld [vmem:[#allocation6 + $0x24] sm:$0xf] }
 0x421   :  { %v3634_v57 = vsel %vm3633_vm1, %v9169_v40, %v3630_v28  ;;  %vm3672_vm7 = vmor %vm3670_vm6, %vm3671_vm5  ;;  %v8864_v40 = vld [vmem:[#allocation6 + $0xc4] sm:$0xf]  ;;  %v7927_v35 = vor.u32 %v8866_v23, %v7926_v6  ;;  %v8863_v28 = vld [vmem:[#allocation6 + $0xb4] sm:$0xf0] }
 0x422   :  { %v3639_v11 = vsel %vm3636_vm3, %v3638_v7, %v3634_v57  ;;  %v3653_v4 = vsel %vm3652_vm2, %v9171_v19, %v3649_v26  ;;  %v3667_v16 = vsub.f32 1.0, %v3666_v43  ;;  %v7934_v19 = vld [vmem:[#allocation6 + $0xc8] sm:$0xf]  ;;  %v7931_v47 = vor.u32 %v8864_v40, %v7928_v3  ;;  %v8861_v43 = vld [vmem:[#allocation6 + $0xac] sm:$0xf] }
 0x423   :  { %v3658_v27 = vsel %vm3655_vm4, %v3657_v14, %v3653_v4  ;;  %v3681_v15 = vmul.f32 %v9175_v32, %v3639_v11  ;;  %v7935_v51 = vor.u32 %v8867_v62, %v7934_v19  ;;  %4569 = vmatpush.bf16.msrb.mxu3 %v7939_v10  ;;  %v7915_v7 = vor.u32 %v8860_v34, %v7912_v12  ;;  %v7920_v14 = vld [vmem:[#allocation6 + $0xb8] sm:$0xf0]  ;;  %v7894_v32 = vld [vmem:[#allocation6 + $0x80] sm:$0xf]  ;;  %v8858_v11 = vld [vmem:[#allocation6 + $0x8c] sm:$0xf0] }
 0x424   :  { %v3680_v9 = vmul.f32 %v3658_v27, %v10230_v33  ;;  %v3668_v8 = vmul.f32 %v9173_v20, %v3667_v16  ;;  %v7942_v33 = vld [vmem:[#allocation6 + $0xe0] sm:$0xf]  ;;  %4543 = vmatpush.bf16.msra.mxu1 %v7931_v47  ;;  %v7923_v57 = vor.u32 %v8861_v43, %v7920_v14  ;;  %v8856_v4 = vld [vmem:[#allocation6 + $0x84] sm:$0xf]  ;;  %v7895_v16 = vor.u32 %v8858_v11, %v7894_v32  ;;  %v7896_v27 = vld [vmem:[#allocation6 + $0x90] sm:$0xf0] }
 0x425   :  { %v7943_v59 = vor.u32 %v8870_v5, %v7942_v33  ;;  %4556 = vmatpush.bf16.msrb.mxu2 %v7935_v51  ;;  %v7886_v33 = vld [vmem:[#allocation6 + $0x68] sm:$0xf]  ;;  %v8855_v5 = vld [vmem:[#allocation6 + $0x74] sm:$0xf0]  ;;  %v7867_v40 = vor.u32 %v8848_v49, %v7864_v25  ;;  %v8849_v3 = vld [vmem:[#allocation6 + $0x4c] sm:$0xf]  ;;  %v3691_v62 = vunpack.c.l.bf16 %v9625_v52  ;;  %v3692_v47 = vunpack.c.h.bf16 %v9625_v52 }
 0x426   :  { %v10343_v63 = vadd.f32 %v3681_v15, %v3680_v9  ;;  %v3669_v54 = vadd.f32 %v9173_v20, %v3668_v8  ;;  %v7902_v15 = vld [vmem:[#allocation6 + $0x88] sm:$0xf]  ;;  %v8859_v9 = vld [vmem:[#allocation6 + $0x94] sm:$0xf0]  ;;  %v7899_v8 = vor.u32 %v8856_v4, %v7896_v27  ;;  %v7872_v19 = vld [vmem:[#allocation6 + $0x58] sm:$0xf0] }
 0x427   :  { %4529 = vmatpush.bf16.msra.mxu0 %v7943_v59  ;;  %4570 = vmatpush.bf16.msrb.mxu3 %v7923_v57  ;;  %v7887_v59 = vor.u32 %v8855_v5, %v7886_v33  ;;  %v7870_v6 = vld [vmem:[#allocation6 + $0x48] sm:$0xf]  ;;  %v8851_v23 = vld [vmem:[#allocation6 + $0x54] sm:$0xf0]  ;;  %v7875_v51 = vor.u32 %v8849_v3, %v7872_v19  ;;  %v7846_v10 = vld [vmem:[#allocation6 + $0x20] sm:$0xf] }
 0x428   :  { %9176 = vtanh.f32 %v10343_v63  ;;  %v3673_v0 = vsel %vm3672_vm7, %v9173_v20, %v3669_v54  ;;  %v7918_v20 = vld [vmem:[#allocation6 + $0xa8] sm:$0xf]  ;;  %4544 = vmatpush.bf16.msra.mxu1 %v7915_v7  ;;  %v7903_v54 = vor.u32 %v8859_v9, %v7902_v15  ;;  %v7847_v12 = vor.u32 %v8846_v53, %v7846_v10  ;;  %v8847_v7 = vld [vmem:[#allocation6 + $0x34] sm:$0xf0]  ;;  %v8845_v14 = vld [vmem:[#allocation6 + $0x2c] sm:$0xf] }
 0x429   :  { %v3678_v42 = vsel %vm3675_vm8, %v3677_v50, %v3673_v0  ;;  %v7919_v26 = vor.u32 %v8863_v28, %v7918_v20  ;;  %v7907_v0 = vor.u32 %v8857_v21, %v7904_v60  ;;  %v7878_v50 = vld [vmem:[#allocation6 + $0x60] sm:$0xf]  ;;  %v7848_v20 = vld [vmem:[#allocation6 + $0x30] sm:$0xf0]  ;;  %v7854_v28 = vld [vmem:[#allocation6 + $0x28] sm:$0xf]  ;;  %v3694_v21 = vunpack.c.h.bf16 %v9677_v38 }
 0x42a   :  { %v7855_v43 = vor.u32 %v8847_v7, %v7854_v28  ;;  %v7856_v52 = vld [vmem:[#allocation6 + $0x38] sm:$0xf0]  ;;  %v7830_v4 = vld [vmem:[#allocation6] sm:$0xf]  ;;  %v8840_v27 = vld [vmem:[#allocation6 + $0x4] sm:$0xf] }
 0x42b   :  { %4530 = vmatpush.bf16.msra.mxu0 %v7927_v35  ;;  %4557 = vmatpush.bf16.msrb.mxu2 %v7919_v26  ;;  %v7871_v35 = vor.u32 %v8851_v23, %v7870_v6  ;;  %v7851_v26 = vor.u32 %v8844_v48, %v7848_v20  ;;  %v7859_v11 = vor.u32 %v8845_v14, %v7856_v52  ;;  %v7832_v9 = vld [vmem:[#allocation6 + $0x10] sm:$0xf0]  ;;  %v8902_v5 = vld [vmem:[#allocation9 + $0xec] sm:$0xf0]  ;;  %v8903_v49 = vld [vmem:[#allocation9 + $0xf4] sm:$0xf0] }
 0x42c   :  { %4545 = vmatpush.bf16.msra.mxu1 %v7899_v8  ;;  %4571 = vmatpush.bf16.msrb.mxu3 %v7907_v0  ;;  %v7838_v8 = vld [vmem:[#allocation6 + $0x8] sm:$0xf]  ;;  %v7835_v60 = vor.u32 %v8840_v27, %v7832_v9  ;;  %v8082_v6 = vor.u32 %v8903_v49, %v8081_v55  ;;  %v8083_v23 = vld [vmem:[#allocation9 + $0xf8] sm:$0xf0]  ;;  %v8899_v53 = vld [vmem:[#allocation9 + $0xd4] sm:$0xf0] }
 0x42d   :  { %v8065_v10 = vld [vmem:[#allocation9 + $0xc8] sm:$0xf]  ;;  %v8897_v48 = vld [vmem:[#allocation9 + $0xcc] sm:$0xf]  ;;  %v8067_v20 = vld [vmem:[#allocation9 + $0xd8] sm:$0xf0] }
 0x42e   :  { %v9177_v31 = vpop.eup %9176  ;;  %v8070_v7 = vor.u32 %v8897_v48, %v8067_v20  ;;  %v8892_v14 = vld [vmem:[#allocation9 + $0xa4] sm:$0xf]  ;;  %v8895_v9 = vld [vmem:[#allocation9 + $0xb4] sm:$0xf0] }
 0x42f   :  { %v3684_v56 = vmul.f32 %v9177_v31, %v3678_v42  ;;  %4531 = vmatpush.bf16.msra.mxu0 %v7911_v2  ;;  %4558 = vmatpush.bf16.msrb.mxu2 %v7903_v54  ;;  %v8854_v31 = vld [vmem:[#allocation6 + $0x6c] sm:$0xf0]  ;;  %v8852_v42 = vld [vmem:[#allocation6 + $0x64] sm:$0xf]  ;;  %v8843_v54 = vld [vmem:[#allocation6 + $0x14] sm:$0xf0] }
 0x430   :  { %4572 = vmatpush.bf16.msrb.mxu3 %v7891_v29  ;;  %v7839_v0 = vor.u32 %v8843_v54, %v7838_v8  ;;  %v8891_v55 = vld [vmem:[#allocation9 + $0x94] sm:$0xf0] }
 0x431   :  { %v3685_v44 = vpack.c.bf16 %v3684_v56, %v3684_v56  ;;  %v7879_v56 = vor.u32 %v8854_v31, %v7878_v50  ;;  %v8841_v50 = vld [vmem:[#allocation6 + $0xc] sm:$0xf]  ;;  %v7840_v31 = vld [vmem:[#allocation6 + $0x18] sm:$0xf0] }
 0x432   :  { %v7843_v33 = vor.u32 %v8841_v50, %v7840_v31 }
 0x433   :  { %3687 = vst [vmem:[#allocation5 + $0xc] sm:$0xf] %v3685_v44  ;;  %4216 = vmatmul.bf16.vlgmr.msrb.gmra.mxu0 %v3685_v44  ;;  %4229 = vmatmul.bf16.vlgmr.msrb.gmra.mxu1 %v3685_v44 }
 0x434   :  { %4242 = vmatmul.bf16.vlgmr.msra.gmra.mxu2 %v3685_v44  ;;  %4255 = vmatmul.bf16.vlgmr.msra.gmra.mxu3 %v3685_v44  ;;  %v7880_v44 = vld [vmem:[#allocation6 + $0x70] sm:$0xf0] }
 0x435   :  { %4532 = vmatpush.bf16.msra.mxu0 %v7895_v16  ;;  %v7883_v41 = vor.u32 %v8852_v42, %v7880_v44  ;;  %4559 = vmatpush.bf16.msrb.mxu2 %v7887_v59  ;;  %v8842_v16 = vld [vmem:[#allocation6 + $0xc] sm:$0xf0]  ;;  %v8073_v42 = vld [vmem:[#allocation9 + $0xe0] sm:$0xf]  ;;  %v8075_v59 = vld [vmem:[#allocation9 + $0xf0] sm:$0xf0] }
 0x436   :  { %4573 = vmatpush.bf16.msrb.mxu3 %v7875_v51  ;;  %v7831_v15 = vor.u32 %v8842_v16, %v7830_v4  ;;  %v8074_v17 = vor.u32 %v8902_v5, %v8073_v42  ;;  %v8059_v51 = vld [vmem:[#allocation9 + $0xd0] sm:$0xf0]  ;;  %v8025_v42 = vld [vmem:[#allocation9 + $0x80] sm:$0xf] }
 0x437   :  { %4546 = vmatpush.bf16.msra.mxu1 %v7883_v41  ;;  %v8900_v41 = vld [vmem:[#allocation9 + $0xe4] sm:$0xf] }
 0x438   :  { %v8078_v25 = vor.u32 %v8900_v41, %v8075_v59  ;;  %v8027_v59 = vld [vmem:[#allocation9 + $0x90] sm:$0xf0] }
 0x439   :  { %4533 = vmatpush.bf16.msra.mxu0 %v7879_v56  ;;  %4560 = vmatpush.bf16.msrb.mxu2 %v7871_v35  ;;  %v8898_v35 = vld [vmem:[#allocation9 + $0xcc] sm:$0xf0] }
 0x43a   :  { %4574 = vmatpush.bf16.msrb.mxu3 %v7859_v11  ;;  %v3693_v11 = vunpack.c.l.bf16 %v9677_v38  ;;  %v8888_v38 = vld [vmem:[#allocation9 + $0x84] sm:$0xf] }
 0x43b   :  { %4547 = vmatpush.bf16.msra.mxu1 %v7867_v40  ;;  %v8057_v40 = vld [vmem:[#allocation9 + $0xc0] sm:$0xf] }
 0x43d   :  { %4534 = vmatpush.bf16.msra.mxu0 %v7863_v39  ;;  %4561 = vmatpush.bf16.msrb.mxu2 %v7855_v43  ;;  %v8901_v39 = vld [vmem:[#allocation9 + $0xec] sm:$0xf]  ;;  %v8894_v43 = vld [vmem:[#allocation9 + $0xac] sm:$0xf0] }
 0x43e   :  { %4575 = vmatpush.bf16.msrb.mxu3 %v7843_v33  ;;  %v8086_v19 = vor.u32 %v8901_v39, %v8083_v23  ;;  %v4013_v23 = vunpack.c.h.bf16 %v9633_v58 }
 0x43f   :  { %4548 = vmatpush.bf16.msra.mxu1 %v7851_v26  ;;  %v8041_v26 = vld [vmem:[#allocation9 + $0xa0] sm:$0xf] }
 0x440   :  { %v8042_v16 = vor.u32 %v8894_v43, %v8041_v26  ;;  %v8885_v43 = vld [vmem:[#allocation9 + $0x6c] sm:$0xf] }
 0x441   :  { %4535 = vmatpush.bf16.msra.mxu0 %v7847_v12  ;;  %4562 = vmatpush.bf16.msrb.mxu2 %v7839_v0  ;;  %v8066_v12 = vor.u32 %v8899_v53, %v8065_v10 }
 0x442   :  { %4889 = vmatpush.bf16.msra.mxu3 %v8086_v19 }
 0x443   :  { %4549 = vmatpush.bf16.msra.mxu1 %v7835_v60  ;;  %v8051_v60 = vld [vmem:[#allocation9 + $0xb8] sm:$0xf0] }
 0x445   :  { %4536 = vmatpush.bf16.msra.mxu0 %v7831_v15  ;;  %4876 = vmatpush.bf16.msra.mxu2 %v8082_v6  ;;  %v8049_v15 = vld [vmem:[#allocation9 + $0xa8] sm:$0xf]  ;;  %v4012_v6 = vunpack.c.l.bf16 %v9633_v58 }
 0x446   :  { %4890 = vmatpush.bf16.msra.mxu3 %v8070_v7  ;;  %v8050_v54 = vor.u32 %v8895_v9, %v8049_v15 }
 0x447   :  { %4863 = vmatpush.bf16.msrb.mxu1 %v8078_v25  ;;  %v8879_v25 = vld [vmem:[#allocation9 + $0x34] sm:$0xf0] }
 0x449   :  { %4850 = vmatpush.bf16.msrb.mxu0 %v8074_v17  ;;  %4877 = vmatpush.bf16.msra.mxu2 %v8066_v12  ;;  %v8033_v17 = vld [vmem:[#allocation9 + $0x88] sm:$0xf]  ;;  %v8887_v12 = vld [vmem:[#allocation9 + $0x74] sm:$0xf0] }
 0x44a   :  { %v8034_v48 = vor.u32 %v8891_v55, %v8033_v17  ;;  %v7977_v17 = vld [vmem:[#allocation9 + $0x20] sm:$0xf] }
 0x44d   :  { %4878 = vmatpush.bf16.msra.mxu2 %v8050_v54  ;;  %v8882_v54 = vld [vmem:[#allocation9 + $0x4c] sm:$0xf0] }
 0x451   :  { %4879 = vmatpush.bf16.msra.mxu2 %v8034_v48 }
 0x499   :  { %v3896_v24 = vpop.f32.mrf.mxu0  ;;  %v3909_v22 = vpop.f32.mrf.mxu1 }
 0x49a   :  { %v3939_v34 = vadd.f32 %v3896_v24, %v3691_v62  ;;  %v3940_v2 = vadd.f32 %v3909_v22, %v3692_v47  ;;  %v8058_v62 = vor.u32 %v8898_v35, %v8057_v40  ;;  %v8896_v47 = vld [vmem:[#allocation9 + $0xc4] sm:$0xf]  ;;  %v8889_v40 = vld [vmem:[#allocation9 + $0x8c] sm:$0xf]  ;;  %v8035_v35 = vld [vmem:[#allocation9 + $0x98] sm:$0xf0] }
 0x49b   :  { %v8062_v22 = vor.u32 %v8896_v47, %v8059_v51  ;;  %v8886_v51 = vld [vmem:[#allocation9 + $0x6c] sm:$0xf0]  ;;  %v8038_v26 = vor.u32 %v8889_v40, %v8035_v35 }
 0x49c   :  { %v7694_v57 = vmul.f32 -1.442695, %v3939_v34  ;;  %v7695_v32 = vmul.f32 -1.442695, %v3940_v2  ;;  %4851 = vmatpush.bf16.msrb.mxu0 %v8058_v62 }
 0x49d   :  { %4864 = vmatpush.bf16.msrb.mxu1 %v8062_v22  ;;  %v8011_v22 = vld [vmem:[#allocation9 + $0x70] sm:$0xf0] }
 0x49e   :  { %9178 = vpow2.f32 %v7694_v57 }
 0x49f   :  { %9180 = vpow2.f32 %v7695_v32  ;;  %v8043_v32 = vld [vmem:[#allocation9 + $0xb0] sm:$0xf0] }
 0x4a0   :  { %v10349_v56 = vpop.f32.mrf.mxu2  ;;  %v3935_v44 = vpop.f32.mrf.mxu3  ;;  %v8046_v27 = vor.u32 %v8892_v14, %v8043_v32  ;;  %4852 = vmatpush.bf16.msrb.mxu0 %v8042_v16 }
 0x4a1   :  { %v3942_v46 = vadd.f32 %v3935_v44, %v3694_v21  ;;  %v3898_v36 = vpop.f32.mrf.mxu0  ;;  %v3911_v29 = vpop.f32.mrf.mxu1  ;;  %v8893_v21 = vld [vmem:[#allocation9 + $0xac] sm:$0xf]  ;;  %v3941_v50 = vadd.f32 %v10349_v56, %v3693_v11  ;;  %v8890_v44 = vld [vmem:[#allocation9 + $0x8c] sm:$0xf0]  ;;  %v8030_v56 = vor.u32 %v8888_v38, %v8027_v59 }
 0x4a2   :  { %v8054_v31 = vor.u32 %v8893_v21, %v8051_v60  ;;  %4865 = vmatpush.bf16.msrb.mxu1 %v8046_v27  ;;  %v8026_v41 = vor.u32 %v8890_v44, %v8025_v42  ;;  %v8880_v21 = vld [vmem:[#allocation9 + $0x44] sm:$0xf]  ;;  %v8001_v42 = vld [vmem:[#allocation9 + $0x48] sm:$0xf]  ;;  %v8883_v44 = vld [vmem:[#allocation9 + $0x54] sm:$0xf0] }
 0x4a3   :  { %v7696_v3 = vmul.f32 -1.442695, %v3942_v46 }
 0x4a4   :  { %v9179_v24 = vpop.eup %9178  ;;  %4891 = vmatpush.bf16.msra.mxu3 %v8054_v31  ;;  %4853 = vmatpush.bf16.msrb.mxu0 %v8026_v41  ;;  %v7995_v31 = vld [vmem:[#allocation9 + $0x50] sm:$0xf0] }
 0x4a5   :  { %v9181_v34 = vpop.eup %9180  ;;  %v10351_v2 = vadd.f32 1.0, %v9179_v24  ;;  %9182 = vpow2.f32 %v7696_v3  ;;  %v8009_v3 = vld [vmem:[#allocation9 + $0x60] sm:$0xf]  ;;  %v8884_v24 = vld [vmem:[#allocation9 + $0x64] sm:$0xf]  ;;  %v7998_v35 = vor.u32 %v8880_v21, %v7995_v31 }
 0x4a6   :  { %v10353_v28 = vadd.f32 1.0, %v9181_v34  ;;  %4866 = vmatpush.bf16.msrb.mxu1 %v8030_v56  ;;  %v8017_v34 = vld [vmem:[#allocation9 + $0x68] sm:$0xf]  ;;  %v8010_v11 = vor.u32 %v8886_v51, %v8009_v3  ;;  %v8014_v27 = vor.u32 %v8884_v24, %v8011_v22  ;;  %v8003_v56 = vld [vmem:[#allocation9 + $0x58] sm:$0xf0]  ;;  %v8002_v3 = vor.u32 %v8883_v44, %v8001_v42 }
 0x4a7   :  { %9184 = vrcp.f32 %v10351_v2  ;;  %v3958_v4 = vand.u32 2147483648, %v10351_v2  ;;  %v3956_v8 = vand.u32 2147483647, %v10351_v2  ;;  %vm3952_vm10 = vweird.f32 %v10351_v2  ;;  %v7979_v22 = vld [vmem:[#allocation9 + $0x30] sm:$0xf0] }
 0x4a8   :  { %9186 = vrcp.f32 %v10353_v28  ;;  %v3924_v52 = vpop.f32.mrf.mxu2  ;;  %v3937_v57 = vpop.f32.mrf.mxu3  ;;  %v3975_v33 = vand.u32 2147483647, %v10353_v28  ;;  %v3977_v36 = vand.u32 2147483648, %v10353_v28  ;;  %4892 = vmatpush.bf16.msra.mxu3 %v8038_v26  ;;  %v8018_v15 = vor.u32 %v8887_v12, %v8017_v34  ;;  %4854 = vmatpush.bf16.msrb.mxu0 %v8010_v11  ;;  %v7987_v12 = vld [vmem:[#allocation9 + $0x38] sm:$0xf0] }
 0x4a9   :  { %v10367_v29 = vor.u32 1.1754944e-38, %v3958_v4  ;;  %vm10373_vm9 = vcmp.eq.f32.partialorder %v3956_v8, 8.507059e+37  ;;  %v8019_v4 = vld [vmem:[#allocation9 + $0x78] sm:$0xf0]  ;;  %v7993_v8 = vld [vmem:[#allocation9 + $0x40] sm:$0xf]  ;;  %vm3971_vm14 = vweird.f32 %v10353_v28 }
 0x4aa   :  { %v3978_v7 = vor.u32 1.1754944e-38, %v3977_v36  ;;  %v8022_v9 = vor.u32 %v8885_v43, %v8019_v4  ;;  %4867 = vmatpush.bf16.msrb.mxu1 %v8014_v27  ;;  %v8881_v36 = vld [vmem:[#allocation9 + $0x4c] sm:$0xf]  ;;  %vm10414_vm0 = vcmp.eq.f32.partialorder %v3975_v33, 8.507059e+37  ;;  %4880 = vmatpush.bf16.msra.mxu2 %v8018_v15  ;;  %v7961_v43 = vld [vmem:[#allocation9] sm:$0xf] }
 0x4ab   :  { %v9183_v0 = vpop.eup %9182  ;;  %v8006_v24 = vor.u32 %v8881_v36, %v8003_v56  ;;  %v7963_v11 = vld [vmem:[#allocation9 + $0x10] sm:$0xf0]  ;;  %v7969_v15 = vld [vmem:[#allocation9 + $0x8] sm:$0xf]  ;;  %v7971_v31 = vld [vmem:[#allocation9 + $0x18] sm:$0xf0] }
 0x4ac   :  { %v10362_v5 = vadd.f32 1.0, %v9183_v0  ;;  %v4015_v0 = vunpack.c.h.bf16 %v9705_v18  ;;  %4893 = vmatpush.bf16.msra.mxu3 %v8022_v9  ;;  %v8875_v9 = vld [vmem:[#allocation9 + $0x14] sm:$0xf0] }
 0x4ad   :  { %v10364_v46 = vpop.eup %9184 }
 0x4ae   :  { %v10369_v49 = vpop.eup %9186  ;;  %v3948_v39 = vmul.f32 %v10364_v46, %v10351_v2  ;;  %9188 = vrcp.f32 %v10362_v5  ;;  %vm3953_vm11 = vweird.f32 %v10364_v46  ;;  %4868 = vmatpush.bf16.msrb.mxu1 %v7998_v35  ;;  %4881 = vmatpush.bf16.msra.mxu2 %v8002_v3  ;;  %vm3991_vm2 = vweird.f32 %v10362_v5 }
 0x4af   :  { %v3967_v19 = vmul.f32 %v10369_v49, %v10353_v28  ;;  %9190 = vtanh.f32 %v3941_v50  ;;  %vm3972_vm12 = vweird.f32 %v10369_v49  ;;  %vm10390_vm13 = vmor %vm3952_vm10, %vm3953_vm11  ;;  %v7994_v50 = vor.u32 %v8882_v54, %v7993_v8 }
 0x4b0   :  { %v4217_v62 = vpop.f32.mrf.mxu0  ;;  %v4230_v47 = vpop.f32.mrf.mxu1  ;;  %v3949_v10 = vsub.f32 1.0, %v3948_v39  ;;  %vm10405_vm15 = vmor %vm3971_vm14, %vm3972_vm12  ;;  %4894 = vmatpush.bf16.msra.mxu3 %v8006_v24  ;;  %v3995_v42 = vand.u32 2147483647, %v10362_v5 }
 0x4b1   :  { %v4260_v53 = vadd.f32 %v4217_v62, %v4012_v6  ;;  %v4261_v58 = vadd.f32 %v4230_v47, %v4013_v23  ;;  %v3968_v20 = vsub.f32 1.0, %v3967_v19  ;;  %v8878_v19 = vld [vmem:[#allocation9 + $0x2c] sm:$0xf0]  ;;  %v8876_v62 = vld [vmem:[#allocation9 + $0x24] sm:$0xf]  ;;  %4855 = vmatpush.bf16.msrb.mxu0 %v7994_v50 }
 0x4b2   :  { %v3950_v14 = vmul.f32 %v10364_v46, %v3949_v10  ;;  %v7985_v10 = vld [vmem:[#allocation9 + $0x28] sm:$0xf]  ;;  %v7978_v34 = vor.u32 %v8878_v19, %v7977_v17  ;;  %v7982_v26 = vor.u32 %v8876_v62, %v7979_v22  ;;  %v8873_v50 = vld [vmem:[#allocation9 + $0xc] sm:$0xf]  ;;  %vm3996_vm4 = vcmp.eq.f32.partialorder %v3995_v42, 8.507059e+37 }
 0x4b3   :  { %v7825_v57 = vmul.f32 -1.442695, %v4260_v53  ;;  %v7826_v32 = vmul.f32 -1.442695, %v4261_v58  ;;  %v3969_v16 = vmul.f32 %v10369_v49, %v3968_v20  ;;  %v7974_v36 = vor.u32 %v8873_v50, %v7971_v31  ;;  %v8932_v19 = vld [vmem:[#allocation6 + $0xe4] sm:$0xf] }
 0x4b4   :  { %v10395_v60 = vpop.eup %9188  ;;  %v3951_v2 = vadd.f32 %v10364_v46, %v3950_v14  ;;  %v8874_v14 = vld [vmem:[#allocation9 + $0xc] sm:$0xf0]  ;;  %4869 = vmatpush.bf16.msrb.mxu1 %v7982_v26  ;;  %v8928_v22 = vld [vmem:[#allocation6 + $0xc4] sm:$0xf] }
 0x4b5   :  { %9192 = vpow2.f32 %v7825_v57  ;;  %v9191_v38 = vpop.eup %9190  ;;  %v3970_v41 = vadd.f32 %v10369_v49, %v3969_v16  ;;  %v3987_v59 = vmul.f32 %v10395_v60, %v10362_v5  ;;  %vm3992_vm1 = vweird.f32 %v10395_v60  ;;  %4856 = vmatpush.bf16.msrb.mxu0 %v7978_v34 }
 0x4b6   :  { %9194 = vpow2.f32 %v7826_v32  ;;  %v3955_v39 = vsel %vm10390_vm13, %v10364_v46, %v3951_v2  ;;  %v7986_v32 = vor.u32 %v8879_v25, %v7985_v10  ;;  %v7962_v21 = vor.u32 %v8874_v14, %v7961_v43  ;;  %vm3993_vm3 = vmor %vm3991_vm2, %vm3992_vm1  ;;  %v8190_v10 = vld [vmem:[#allocation6 + $0xd0] sm:$0xf0]  ;;  %v8924_v43 = vld [vmem:[#allocation6 + $0xa4] sm:$0xf] }
 0x4b7   :  { %v10418_v23 = vpop.f32.mrf.mxu2  ;;  %v4256_v40 = vpop.f32.mrf.mxu3  ;;  %v3960_v47 = vsel %vm10373_vm9, %v10367_v29, %v3955_v39  ;;  %v3974_v28 = vsel %vm10405_vm15, %v10369_v49, %v3970_v41  ;;  %v3988_v33 = vsub.f32 1.0, %v3987_v59  ;;  %v8877_v29 = vld [vmem:[#allocation9 + $0x2c] sm:$0xf]  ;;  %v3997_v2 = vand.u32 2147483648, %v10362_v5  ;;  %v8174_v14 = vld [vmem:[#allocation6 + $0xb0] sm:$0xf0] }
 0x4b8   :  { %v4219_v46 = vpop.f32.mrf.mxu0  ;;  %v4232_v51 = vpop.f32.mrf.mxu1  ;;  %v3979_v53 = vsel %vm10414_vm0, %v3978_v7, %v3974_v28  ;;  %v4002_v58 = vmul.f32 %v9191_v38, %v3960_v47  ;;  %v4263_v48 = vadd.f32 %v4256_v40, %v4015_v0  ;;  %v8872_v7 = vld [vmem:[#allocation9 + $0x4] sm:$0xf]  ;;  %4882 = vmatpush.bf16.msra.mxu2 %v7986_v32  ;;  %v7970_v41 = vor.u32 %v8875_v9, %v7969_v15 }
 0x4b9   :  { %v4001_v20 = vmul.f32 %v3979_v53, %v10309_v45  ;;  %v3989_v49 = vmul.f32 %v10395_v60, %v3988_v33  ;;  %v7990_v45 = vor.u32 %v8877_v29, %v7987_v12  ;;  %v7966_v0 = vor.u32 %v8872_v7, %v7963_v11  ;;  %4857 = vmatpush.bf16.msrb.mxu0 %v7962_v21 }
 0x4ba   :  { %v7827_v57 = vmul.f32 -1.442695, %v4263_v48  ;;  %v3998_v56 = vor.u32 1.1754944e-38, %v3997_v2  ;;  %v4014_v5 = vunpack.c.l.bf16 %v9705_v18  ;;  %v8193_v12 = vor.u32 %v8928_v22, %v8190_v10 }
 0x4bb   :  { %v9193_v52 = vpop.eup %9192  ;;  %v10430_v16 = vadd.f32 %v4002_v58, %v4001_v20  ;;  %v3990_v54 = vadd.f32 %v10395_v60, %v3989_v49  ;;  %4895 = vmatpush.bf16.msra.mxu3 %v7990_v45  ;;  %4870 = vmatpush.bf16.msrb.mxu1 %v7966_v0  ;;  %v8177_v15 = vor.u32 %v8924_v43, %v8174_v14  ;;  %v8908_v14 = vld [vmem:[#allocation6 + $0x24] sm:$0xf] }
 0x4bc   :  { %v9195_v4 = vpop.eup %9194  ;;  %v10433_v27 = vadd.f32 1.0, %v9193_v52  ;;  %9196 = vpow2.f32 %v7827_v57  ;;  %4883 = vmatpush.bf16.msra.mxu2 %v7970_v41  ;;  %v4262_v35 = vadd.f32 %v10418_v23, %v4014_v5  ;;  %v8920_v41 = vld [vmem:[#allocation6 + $0x84] sm:$0xf]  ;;  %v8212_v5 = vld [vmem:[#allocation6 + $0xe8] sm:$0xf] }
 0x4bd   :  { %v10435_v8 = vadd.f32 1.0, %v9195_v4  ;;  %9198 = vtanh.f32 %v10430_v16  ;;  %v3994_v59 = vsel %vm3993_vm3, %v10395_v60, %v3990_v54  ;;  %v8206_v60 = vld [vmem:[#allocation6 + $0xf0] sm:$0xf0] }
 0x4be   :  { %9200 = vrcp.f32 %v10433_v27  ;;  %v3999_v6 = vsel %vm3996_vm4, %v3998_v56, %v3994_v59  ;;  %v8209_v46 = vor.u32 %v8932_v19, %v8206_v60  ;;  %v4279_v24 = vand.u32 2147483648, %v10433_v27  ;;  %v8158_v59 = vld [vmem:[#allocation6 + $0x90] sm:$0xf0]  ;;  %v8204_v56 = vld [vmem:[#allocation6 + $0xe0] sm:$0xf] }
 0x4bf   :  { %v4245_v44 = vpop.f32.mrf.mxu2  ;;  %v4258_v38 = vpop.f32.mrf.mxu3  ;;  %9202 = vrcp.f32 %v10435_v8  ;;  %4896 = vmatpush.bf16.msra.mxu3 %v7974_v36  ;;  %v4298_v23 = vand.u32 2147483648, %v10435_v8  ;;  %v4277_v58 = vand.u32 2147483647, %v10433_v27  ;;  %v4296_v34 = vand.u32 2147483647, %v10435_v8 }
 0x4c0   :  { %vm4273_vm7 = vweird.f32 %v10433_v27  ;;  %vm4292_vm8 = vweird.f32 %v10435_v8  ;;  %v4280_v20 = vor.u32 1.1754944e-38, %v4279_v24  ;;  %v8161_v36 = vor.u32 %v8920_v41, %v8158_v59  ;;  %v8916_v19 = vld [vmem:[#allocation6 + $0x64] sm:$0xf]  ;;  %v8142_v60 = vld [vmem:[#allocation6 + $0x70] sm:$0xf0] }
 0x4c1   :  { %v4299_v52 = vor.u32 1.1754944e-38, %v4298_v23  ;;  %vm4278_vm11 = vcmp.eq.f32.partialorder %v4277_v58, 8.507059e+37  ;;  %vm4297_vm12 = vcmp.eq.f32.partialorder %v4296_v34, 8.507059e+37  ;;  %v8198_v24 = vld [vmem:[#allocation6 + $0xd8] sm:$0xf0] }
 0x4c2   :  { %v9197_v17 = vpop.eup %9196  ;;  %v8912_v23 = vld [vmem:[#allocation6 + $0x44] sm:$0xf]  ;;  %v8926_v34 = vld [vmem:[#allocation6 + $0xac] sm:$0xf0]  ;;  %v8150_v41 = vld [vmem:[#allocation6 + $0x78] sm:$0xf0] }
 0x4c3   :  { %v9199_v55 = vpop.eup %9198  ;;  %v10448_v39 = vadd.f32 1.0, %v9197_v17  ;;  %v8934_v17 = vld [vmem:[#allocation6 + $0xec] sm:$0xf0] }
 0x4c4   :  { %v9201_v40 = vpop.eup %9200  ;;  %v4005_v3 = vmul.f32 %v9199_v55, %v3999_v6  ;;  %v8205_v55 = vor.u32 %v8934_v17, %v8204_v56  ;;  %v8933_v6 = vld [vmem:[#allocation6 + $0xec] sm:$0xf]  ;;  %v8964_v56 = vld [vmem:[#allocation9 + $0xe4] sm:$0xf]  ;;  %v8337_v17 = vld [vmem:[#allocation9 + $0xf0] sm:$0xf0] }
 0x4c5   :  { %v9203_v62 = vpop.eup %9202  ;;  %v4269_v47 = vmul.f32 %v9201_v40, %v10433_v27  ;;  %9204 = vrcp.f32 %v10448_v39  ;;  %vm4274_vm5 = vweird.f32 %v9201_v40  ;;  %v4318_v2 = vand.u32 2147483648, %v10448_v39 }
 0x4c6   :  { %v4288_v18 = vmul.f32 %v9203_v62, %v10435_v8  ;;  %v4006_v33 = vpack.c.bf16 %v4005_v3, %v4005_v3  ;;  %9206 = vtanh.f32 %v4262_v35  ;;  %vm4293_vm6 = vweird.f32 %v9203_v62  ;;  %vm4275_vm9 = vmor %vm4273_vm7, %vm4274_vm5 }
 0x4c7   :  { %v4270_v28 = vsub.f32 1.0, %v4269_v47  ;;  %vm4294_vm10 = vmor %vm4292_vm8, %vm4293_vm6  ;;  %vm4312_vm14 = vweird.f32 %v10448_v39  ;;  %v4316_v0 = vand.u32 2147483647, %v10448_v39  ;;  %v4319_v31 = vor.u32 1.1754944e-38, %v4318_v2  ;;  %v8188_v47 = vld [vmem:[#allocation6 + $0xc0] sm:$0xf] }
 0x4c8   :  { %v4289_v51 = vsub.f32 1.0, %v4288_v18  ;;  %4008 = vst [vmem:[#allocation4 + $0x14] sm:$0xf] %v4006_v33  ;;  %4537 = vmatmul.bf16.vlgmr.msra.gmra.mxu0 %v4006_v33  ;;  %4550 = vmatmul.bf16.vlgmr.msra.gmra.mxu1 %v4006_v33  ;;  %v8930_v18 = vld [vmem:[#allocation6 + $0xcc] sm:$0xf0] }
 0x4c9   :  { %v4271_v53 = vmul.f32 %v9201_v40, %v4270_v28  ;;  %4563 = vmatmul.bf16.vlgmr.msrb.gmra.mxu2 %v4006_v33  ;;  %4576 = vmatmul.bf16.vlgmr.msrb.gmra.mxu3 %v4006_v33  ;;  %vm4317_vm0 = vcmp.eq.f32.partialorder %v4316_v0, 8.507059e+37  ;;  %v8196_v28 = vld [vmem:[#allocation6 + $0xc8] sm:$0xf]  ;;  %v8189_v33 = vor.u32 %v8930_v18, %v8188_v47  ;;  %v8094_v2 = vld [vmem:[#allocation6 + $0x10] sm:$0xf0] }
 0x4ca   :  { %v4290_v48 = vmul.f32 %v9203_v62, %v4289_v51  ;;  %5184 = vmatpush.bf16.msra.mxu1 %v8209_v46  ;;  %5171 = vmatpush.bf16.msra.mxu0 %v8205_v55  ;;  %v8931_v46 = vld [vmem:[#allocation6 + $0xd4] sm:$0xf0]  ;;  %v8929_v51 = vld [vmem:[#allocation6 + $0xcc] sm:$0xf]  ;;  %v8124_v55 = vld [vmem:[#allocation6 + $0x40] sm:$0xf] }
 0x4cb   :  { %v9205_v25 = vpop.eup %9204  ;;  %v4272_v29 = vadd.f32 %v9201_v40, %v4271_v53  ;;  %v8197_v22 = vor.u32 %v8931_v46, %v8196_v28  ;;  %v8201_v10 = vor.u32 %v8929_v51, %v8198_v24  ;;  %v8126_v53 = vld [vmem:[#allocation6 + $0x50] sm:$0xf0]  ;;  %v8960_v47 = vld [vmem:[#allocation9 + $0xc4] sm:$0xf]  ;;  %v4333_v28 = vunpack.c.l.bf16 %v9637_v1 }
 0x4cc   :  { %v4291_v49 = vadd.f32 %v9203_v62, %v4290_v48  ;;  %v4308_v26 = vmul.f32 %v9205_v25, %v10448_v39  ;;  %v9207_v32 = vpop.eup %9206  ;;  %vm4313_vm13 = vweird.f32 %v9205_v25  ;;  %v8935_v39 = vld [vmem:[#allocation6 + $0xf4] sm:$0xf0]  ;;  %v8129_v58 = vor.u32 %v8912_v23, %v8126_v53  ;;  %v8172_v48 = vld [vmem:[#allocation6 + $0xa0] sm:$0xf]  ;;  %v8321_v18 = vld [vmem:[#allocation9 + $0xd0] sm:$0xf0] }
 0x4cd   :  { %v4276_v57 = vsel %vm4275_vm9, %v9201_v40, %v4272_v29  ;;  %vm4314_vm15 = vmor %vm4312_vm14, %vm4313_vm13  ;;  %v8214_v40 = vld [vmem:[#allocation6 + $0xf8] sm:$0xf0]  ;;  %v8213_v35 = vor.u32 %v8935_v39, %v8212_v5  ;;  %v8173_v29 = vor.u32 %v8926_v34, %v8172_v48  ;;  %v8340_v5 = vor.u32 %v8964_v56, %v8337_v17  ;;  %v8914_v39 = vld [vmem:[#allocation6 + $0x4c] sm:$0xf0] }
 0x4ce   :  { %v4281_v7 = vsel %vm4278_vm11, %v4280_v20, %v4276_v57  ;;  %v4295_v11 = vsel %vm4294_vm10, %v9203_v62, %v4291_v49  ;;  %v4309_v4 = vsub.f32 1.0, %v4308_v26  ;;  %5185 = vmatpush.bf16.msra.mxu1 %v8193_v12  ;;  %v8217_v3 = vor.u32 %v8933_v6, %v8214_v40  ;;  %5172 = vmatpush.bf16.msra.mxu0 %v8189_v33  ;;  %v8927_v12 = vld [vmem:[#allocation6 + $0xb4] sm:$0xf0]  ;;  %v8925_v20 = vld [vmem:[#allocation6 + $0xac] sm:$0xf] }
 0x4cf   :  { %v4300_v27 = vsel %vm4297_vm12, %v4299_v52, %v4295_v11  ;;  %v4323_v45 = vmul.f32 %v9207_v32, %v4281_v7  ;;  %5197 = vmatpush.bf16.msrb.mxu2 %v8213_v35  ;;  %v8145_v62 = vor.u32 %v8916_v19, %v8142_v60  ;;  %v8182_v49 = vld [vmem:[#allocation6 + $0xb8] sm:$0xf0]  ;;  %v8110_v52 = vld [vmem:[#allocation6 + $0x30] sm:$0xf0]  ;;  %v8156_v32 = vld [vmem:[#allocation6 + $0x80] sm:$0xf]  ;;  %v8125_v40 = vor.u32 %v8914_v39, %v8124_v55 }
 0x4d0   :  { %v4322_v9 = vmul.f32 %v4300_v27, %v10343_v63  ;;  %v4310_v8 = vmul.f32 %v9205_v25, %v4309_v4  ;;  %5210 = vmatpush.bf16.msrb.mxu3 %v8217_v3  ;;  %v8185_v43 = vor.u32 %v8925_v20, %v8182_v49  ;;  %v8113_v57 = vor.u32 %v8908_v14, %v8110_v52  ;;  %v8922_v7 = vld [vmem:[#allocation6 + $0x8c] sm:$0xf0]  ;;  %v8164_v11 = vld [vmem:[#allocation6 + $0x88] sm:$0xf]  ;;  %v8923_v27 = vld [vmem:[#allocation6 + $0x94] sm:$0xf0] }
 0x4d1   :  { %v8157_v4 = vor.u32 %v8922_v7, %v8156_v32  ;;  %v8132_v6 = vld [vmem:[#allocation6 + $0x48] sm:$0xf]  ;;  %v8915_v35 = vld [vmem:[#allocation6 + $0x54] sm:$0xf0]  ;;  %v8913_v3 = vld [vmem:[#allocation6 + $0x4c] sm:$0xf]  ;;  %v4334_v33 = vunpack.c.h.bf16 %v9637_v1  ;;  %v8324_v46 = vor.u32 %v8960_v47, %v8321_v18 }
 0x4d2   :  { %v10464_v54 = vadd.f32 %v4323_v45, %v4322_v9  ;;  %v4311_v21 = vadd.f32 %v9205_v25, %v4310_v8  ;;  %5186 = vmatpush.bf16.msra.mxu1 %v8177_v15  ;;  %5173 = vmatpush.bf16.msra.mxu0 %v8173_v29  ;;  %v8921_v45 = vld [vmem:[#allocation6 + $0x8c] sm:$0xf]  ;;  %v8166_v15 = vld [vmem:[#allocation6 + $0x98] sm:$0xf0]  ;;  %v8165_v9 = vor.u32 %v8923_v27, %v8164_v11  ;;  %v8116_v23 = vld [vmem:[#allocation6 + $0x28] sm:$0xf] }
 0x4d3   :  { %5198 = vmatpush.bf16.msrb.mxu2 %v8197_v22  ;;  %v8169_v8 = vor.u32 %v8921_v45, %v8166_v15  ;;  %v8134_v19 = vld [vmem:[#allocation6 + $0x58] sm:$0xf0]  ;;  %v8133_v60 = vor.u32 %v8915_v35, %v8132_v6  ;;  %v8108_v22 = vld [vmem:[#allocation6 + $0x20] sm:$0xf]  ;;  %v8911_v34 = vld [vmem:[#allocation6 + $0x34] sm:$0xf0]  ;;  %v4336_v45 = vunpack.c.h.bf16 %v9679_v30 }
 0x4d4   :  { %9208 = vtanh.f32 %v10464_v54  ;;  %v4315_v50 = vsel %vm4314_vm15, %v9205_v25, %v4311_v21  ;;  %5211 = vmatpush.bf16.msrb.mxu3 %v8201_v10  ;;  %v8180_v25 = vld [vmem:[#allocation6 + $0xa8] sm:$0xf]  ;;  %v8904_v21 = vld [vmem:[#allocation6 + $0x4] sm:$0xf]  ;;  %v8910_v10 = vld [vmem:[#allocation6 + $0x2c] sm:$0xf0] }
 0x4d5   :  { %v4320_v63 = vsel %vm4317_vm0, %v4319_v31, %v4315_v50  ;;  %v8181_v26 = vor.u32 %v8927_v12, %v8180_v25  ;;  %v8097_v0 = vor.u32 %v8904_v21, %v8094_v2  ;;  %v8140_v50 = vld [vmem:[#allocation6 + $0x60] sm:$0xf]  ;;  %v8918_v31 = vld [vmem:[#allocation6 + $0x6c] sm:$0xf0]  ;;  %v8109_v48 = vor.u32 %v8910_v10, %v8108_v22  ;;  %v8909_v25 = vld [vmem:[#allocation6 + $0x2c] sm:$0xf] }
 0x4d6   :  { %5187 = vmatpush.bf16.msra.mxu1 %v8161_v36  ;;  %5174 = vmatpush.bf16.msra.mxu0 %v8157_v4  ;;  %v8118_v29 = vld [vmem:[#allocation6 + $0x38] sm:$0xf0]  ;;  %v8117_v12 = vor.u32 %v8911_v34, %v8116_v23  ;;  %v8956_v49 = vld [vmem:[#allocation9 + $0xa4] sm:$0xf]  ;;  %v8305_v1 = vld [vmem:[#allocation9 + $0xb0] sm:$0xf0] }
 0x4d7   :  { %5199 = vmatpush.bf16.msrb.mxu2 %v8181_v26  ;;  %v8121_v20 = vor.u32 %v8909_v25, %v8118_v29  ;;  %v8308_v14 = vor.u32 %v8956_v49, %v8305_v1  ;;  %v8092_v52 = vld [vmem:[#allocation6] sm:$0xf]  ;;  %v8100_v32 = vld [vmem:[#allocation6 + $0x8] sm:$0xf]  ;;  %v8907_v11 = vld [vmem:[#allocation6 + $0x14] sm:$0xf0]  ;;  %v4335_v49 = vunpack.c.l.bf16 %v9679_v30 }
 0x4d8   :  { %5212 = vmatpush.bf16.msrb.mxu3 %v8185_v43  ;;  %v8905_v4 = vld [vmem:[#allocation6 + $0xc] sm:$0xf]  ;;  %v8102_v27 = vld [vmem:[#allocation6 + $0x18] sm:$0xf0]  ;;  %v8101_v15 = vor.u32 %v8907_v11, %v8100_v32  ;;  %v8289_v21 = vld [vmem:[#allocation9 + $0x90] sm:$0xf0] }
 0x4d9   :  { %v8335_v2 = vld [vmem:[#allocation9 + $0xe0] sm:$0xf]  ;;  %v8965_v56 = vld [vmem:[#allocation9 + $0xec] sm:$0xf]  ;;  %v8345_v17 = vld [vmem:[#allocation9 + $0xf8] sm:$0xf0] }
 0x4da   :  { %v9209_v42 = vpop.eup %9208  ;;  %5188 = vmatpush.bf16.msra.mxu1 %v8145_v62  ;;  %v8137_v62 = vor.u32 %v8913_v3, %v8134_v19  ;;  %v8348_v39 = vor.u32 %v8965_v56, %v8345_v17  ;;  %v8273_v6 = vld [vmem:[#allocation9 + $0x70] sm:$0xf0]  ;;  %v8962_v35 = vld [vmem:[#allocation9 + $0xcc] sm:$0xf0]  ;;  %v8963_v47 = vld [vmem:[#allocation9 + $0xd4] sm:$0xf0] }
 0x4db   :  { %v4326_v44 = vmul.f32 %v9209_v42, %v4320_v63  ;;  %5200 = vmatpush.bf16.msrb.mxu2 %v8165_v9  ;;  %v8148_v42 = vld [vmem:[#allocation6 + $0x68] sm:$0xf]  ;;  %v8141_v63 = vor.u32 %v8918_v31, %v8140_v50  ;;  %v8105_v9 = vor.u32 %v8905_v4, %v8102_v27  ;;  %v8944_v10 = vld [vmem:[#allocation9 + $0x44] sm:$0xf]  ;;  %v8257_v23 = vld [vmem:[#allocation9 + $0x50] sm:$0xf0] }
 0x4dc   :  { %5213 = vmatpush.bf16.msrb.mxu3 %v8169_v8  ;;  %v8952_v8 = vld [vmem:[#allocation9 + $0x84] sm:$0xf]  ;;  %v8958_v34 = vld [vmem:[#allocation9 + $0xac] sm:$0xf0]  ;;  %v8311_v25 = vld [vmem:[#allocation9 + $0xa8] sm:$0xf] }
 0x4dd   :  { %v4327_v38 = vpack.c.bf16 %v4326_v44, %v4326_v44  ;;  %v8919_v44 = vld [vmem:[#allocation6 + $0x74] sm:$0xf0]  ;;  %5175 = vmatpush.bf16.msra.mxu0 %v8141_v63  ;;  %v8292_v31 = vor.u32 %v8952_v8, %v8289_v21  ;;  %v8343_v63 = vld [vmem:[#allocation9 + $0xe8] sm:$0xf]  ;;  %v8241_v32 = vld [vmem:[#allocation9 + $0x30] sm:$0xf0] }
 0x4de   :  { %5189 = vmatpush.bf16.msra.mxu1 %v8129_v58  ;;  %v8149_v59 = vor.u32 %v8919_v44, %v8148_v42  ;;  %v8966_v42 = vld [vmem:[#allocation9 + $0xec] sm:$0xf0]  ;;  %v8967_v44 = vld [vmem:[#allocation9 + $0xf4] sm:$0xf0]  ;;  %v8287_v27 = vld [vmem:[#allocation9 + $0x80] sm:$0xf] }
 0x4df   :  { %4329 = vst [vmem:[#allocation5 + $0x8] sm:$0xf] %v4327_v38  ;;  %4858 = vmatmul.bf16.vlgmr.msrb.gmra.mxu0 %v4327_v38  ;;  %4871 = vmatmul.bf16.vlgmr.msrb.gmra.mxu1 %v4327_v38  ;;  %v8344_v55 = vor.u32 %v8967_v44, %v8343_v63  ;;  %v8955_v21 = vld [vmem:[#allocation9 + $0x94] sm:$0xf0]  ;;  %v8953_v63 = vld [vmem:[#allocation9 + $0x8c] sm:$0xf] }
 0x4e0   :  { %4884 = vmatmul.bf16.vlgmr.msra.gmra.mxu2 %v4327_v38  ;;  %4897 = vmatmul.bf16.vlgmr.msra.gmra.mxu3 %v4327_v38  ;;  %v8917_v38 = vld [vmem:[#allocation6 + $0x6c] sm:$0xf]  ;;  %v8297_v44 = vld [vmem:[#allocation9 + $0x98] sm:$0xf0]  ;;  %v8936_v56 = vld [vmem:[#allocation9 + $0x4] sm:$0xf] }
 0x4e1   :  { %v8153_v36 = vor.u32 %v8917_v38, %v8150_v41  ;;  %5201 = vmatpush.bf16.msrb.mxu2 %v8149_v59  ;;  %5176 = vmatpush.bf16.msra.mxu0 %v8125_v40  ;;  %v8319_v40 = vld [vmem:[#allocation9 + $0xc0] sm:$0xf]  ;;  %v8225_v17 = vld [vmem:[#allocation9 + $0x10] sm:$0xf0] }
 0x4e2   :  { %5190 = vmatpush.bf16.msra.mxu1 %v8113_v57  ;;  %v8906_v57 = vld [vmem:[#allocation6 + $0xc] sm:$0xf0] }
 0x4e3   :  { %5214 = vmatpush.bf16.msrb.mxu3 %v8153_v36  ;;  %v8093_v7 = vor.u32 %v8906_v57, %v8092_v52  ;;  %v8336_v36 = vor.u32 %v8966_v42, %v8335_v2  ;;  %v8940_v57 = vld [vmem:[#allocation9 + $0x24] sm:$0xf] }
 0x4e4   :  { %v8244_v4 = vor.u32 %v8940_v57, %v8241_v32 }
 0x4e5   :  { %5202 = vmatpush.bf16.msrb.mxu2 %v8133_v60  ;;  %5177 = vmatpush.bf16.msra.mxu0 %v8109_v48  ;;  %v8320_v60 = vor.u32 %v8962_v35, %v8319_v40  ;;  %v8303_v48 = vld [vmem:[#allocation9 + $0xa0] sm:$0xf]  ;;  %v8950_v40 = vld [vmem:[#allocation9 + $0x6c] sm:$0xf0]  ;;  %v8279_v35 = vld [vmem:[#allocation9 + $0x68] sm:$0xf] }
 0x4e6   :  { %5191 = vmatpush.bf16.msra.mxu1 %v8097_v0  ;;  %v8304_v1 = vor.u32 %v8958_v34, %v8303_v48 }
 0x4e7   :  { %5215 = vmatpush.bf16.msrb.mxu3 %v8137_v62  ;;  %v8327_v62 = vld [vmem:[#allocation9 + $0xc8] sm:$0xf] }
 0x4e9   :  { %5203 = vmatpush.bf16.msrb.mxu2 %v8117_v12  ;;  %5178 = vmatpush.bf16.msra.mxu0 %v8093_v7 }
 0x4ea   :  { %5504 = vmatpush.bf16.msrb.mxu1 %v8340_v5  ;;  %v8948_v5 = vld [vmem:[#allocation9 + $0x64] sm:$0xf] }
 0x4eb   :  { %5216 = vmatpush.bf16.msrb.mxu3 %v8121_v20  ;;  %v8276_v19 = vor.u32 %v8948_v5, %v8273_v6  ;;  %v8959_v20 = vld [vmem:[#allocation9 + $0xb4] sm:$0xf0]  ;;  %v8271_v5 = vld [vmem:[#allocation9 + $0x60] sm:$0xf] }
 0x4ed   :  { %5204 = vmatpush.bf16.msrb.mxu2 %v8101_v15  ;;  %5491 = vmatpush.bf16.msrb.mxu0 %v8336_v36  ;;  %v8295_v15 = vld [vmem:[#allocation9 + $0x88] sm:$0xf]  ;;  %v4657_v36 = vunpack.c.h.bf16 %v9699_v61 }
 0x4ee   :  { %5505 = vmatpush.bf16.msrb.mxu1 %v8324_v46  ;;  %v8329_v46 = vld [vmem:[#allocation9 + $0xd8] sm:$0xf0]  ;;  %v8296_v42 = vor.u32 %v8955_v21, %v8295_v15 }
 0x4ef   :  { %5217 = vmatpush.bf16.msrb.mxu3 %v8105_v9 }
 0x4f1   :  { %5517 = vmatpush.bf16.msra.mxu2 %v8344_v55  ;;  %5492 = vmatpush.bf16.msrb.mxu0 %v8320_v60 }
 0x4f2   :  { %5506 = vmatpush.bf16.msrb.mxu1 %v8308_v14  ;;  %v8313_v14 = vld [vmem:[#allocation9 + $0xb8] sm:$0xf0] }
 0x4f3   :  { %5530 = vmatpush.bf16.msra.mxu3 %v8348_v39 }
 0x4f5   :  { %5493 = vmatpush.bf16.msrb.mxu0 %v8304_v1 }
 0x4f6   :  { %5507 = vmatpush.bf16.msrb.mxu1 %v8292_v31 }
 0x4fa   :  { %5508 = vmatpush.bf16.msrb.mxu1 %v8276_v19 }
 0x545   :  { %v4538_v51 = vpop.f32.mrf.mxu0  ;;  %v4551_v24 = vpop.f32.mrf.mxu1 }
 0x546   :  { %v4581_v53 = vadd.f32 %v4538_v51, %v4333_v28  ;;  %v4582_v58 = vadd.f32 %v4551_v24, %v4334_v33  ;;  %v8328_v28 = vor.u32 %v8963_v47, %v8327_v62  ;;  %v8961_v33 = vld [vmem:[#allocation9 + $0xcc] sm:$0xf]  ;;  %v8300_v62 = vor.u32 %v8953_v63, %v8297_v44  ;;  %v8247_v63 = vld [vmem:[#allocation9 + $0x28] sm:$0xf]  ;;  %v8943_v44 = vld [vmem:[#allocation9 + $0x34] sm:$0xf0] }
 0x547   :  { %v8332_v22 = vor.u32 %v8961_v33, %v8329_v46  ;;  %v8949_v47 = vld [vmem:[#allocation9 + $0x6c] sm:$0xf]  ;;  %v8228_v46 = vor.u32 %v8936_v56, %v8225_v17  ;;  %v8249_v17 = vld [vmem:[#allocation9 + $0x38] sm:$0xf0] }
 0x548   :  { %v7956_v26 = vmul.f32 -1.442695, %v4581_v53  ;;  %v7957_v43 = vmul.f32 -1.442695, %v4582_v58  ;;  %v8260_v58 = vor.u32 %v8944_v10, %v8257_v23  ;;  %5518 = vmatpush.bf16.msra.mxu2 %v8328_v28  ;;  %v8272_v23 = vor.u32 %v8950_v40, %v8271_v5 }
 0x549   :  { %5531 = vmatpush.bf16.msra.mxu3 %v8332_v22  ;;  %v8248_v40 = vor.u32 %v8943_v44, %v8247_v63  ;;  %v8978_v63 = vld [vmem:[%s10893_s5 + $0x30] sm:$0xff] }
 0x54a   :  { %9210 = vpow2.f32 %v7956_v26  ;;  %v8312_v26 = vor.u32 %v8959_v20, %v8311_v25  ;;  %5509 = vmatpush.bf16.msrb.mxu1 %v8260_v58  ;;  %v8255_v58 = vld [vmem:[#allocation9 + $0x40] sm:$0xf]  ;;  %v8947_v20 = vld [vmem:[#allocation9 + $0x54] sm:$0xf0] }
 0x54b   :  { %9212 = vpow2.f32 %v7957_v43  ;;  %v8957_v43 = vld [vmem:[#allocation9 + $0xac] sm:$0xf] }
 0x54c   :  { %v10473_v0 = vpop.f32.mrf.mxu2  ;;  %v4577_v50 = vpop.f32.mrf.mxu3  ;;  %v8316_v52 = vor.u32 %v8957_v43, %v8313_v14  ;;  %5519 = vmatpush.bf16.msra.mxu2 %v8312_v26  ;;  %v8945_v14 = vld [vmem:[#allocation9 + $0x4c] sm:$0xf] }
 0x54d   :  { %v4584_v38 = vadd.f32 %v4577_v50, %v4336_v45  ;;  %v4540_v41 = vpop.f32.mrf.mxu0  ;;  %v4553_v59 = vpop.f32.mrf.mxu1  ;;  %v4583_v11 = vadd.f32 %v10473_v0, %v4335_v49  ;;  %v8954_v45 = vld [vmem:[#allocation9 + $0x8c] sm:$0xf0]  ;;  %v4654_v0 = vunpack.c.l.bf16 %v9621_v37 }
 0x54e   :  { %5532 = vmatpush.bf16.msra.mxu3 %v8316_v52  ;;  %v8288_v30 = vor.u32 %v8954_v45, %v8287_v27  ;;  %v4655_v59 = vunpack.c.h.bf16 %v9621_v37  ;;  %5510 = vmatpush.bf16.msrb.mxu1 %v8244_v4  ;;  %v8951_v37 = vld [vmem:[#allocation9 + $0x74] sm:$0xf0]  ;;  %v8265_v52 = vld [vmem:[#allocation9 + $0x58] sm:$0xf0]  ;;  %v8239_v27 = vld [vmem:[#allocation9 + $0x20] sm:$0xf] }
 0x54f   :  { %v7958_v3 = vmul.f32 -1.442695, %v4584_v38  ;;  %v8280_v34 = vor.u32 %v8951_v37, %v8279_v35  ;;  %v8942_v45 = vld [vmem:[#allocation9 + $0x2c] sm:$0xf0] }
 0x550   :  { %v9211_v18 = vpop.eup %9210  ;;  %5494 = vmatpush.bf16.msrb.mxu0 %v8288_v30  ;;  %5520 = vmatpush.bf16.msra.mxu2 %v8296_v42  ;;  %v8268_v42 = vor.u32 %v8945_v14, %v8265_v52  ;;  %v8938_v35 = vld [vmem:[#allocation9 + $0xc] sm:$0xf0] }
 0x551   :  { %v9213_v51 = vpop.eup %9212  ;;  %v10475_v24 = vadd.f32 1.0, %v9211_v18  ;;  %9214 = vpow2.f32 %v7958_v3  ;;  %v8281_v18 = vld [vmem:[#allocation9 + $0x78] sm:$0xf0] }
 0x552   :  { %v10477_v53 = vadd.f32 1.0, %v9213_v51  ;;  %5533 = vmatpush.bf16.msra.mxu3 %v8300_v62  ;;  %5511 = vmatpush.bf16.msrb.mxu1 %v8228_v46  ;;  %v8284_v25 = vor.u32 %v8949_v47, %v8281_v18  ;;  %v8939_v62 = vld [vmem:[#allocation9 + $0x14] sm:$0xf0] }
 0x553   :  { %9216 = vrcp.f32 %v10475_v24  ;;  %v4598_v9 = vand.u32 2147483647, %v10475_v24  ;;  %v4600_v31 = vand.u32 2147483648, %v10475_v24  ;;  %vm4594_vm2 = vweird.f32 %v10475_v24 }
 0x554   :  { %9218 = vrcp.f32 %v10477_v53  ;;  %v4566_v29 = vpop.f32.mrf.mxu2  ;;  %v4579_v12 = vpop.f32.mrf.mxu3  ;;  %v4619_v50 = vand.u32 2147483648, %v10477_v53  ;;  %vm4613_vm1 = vweird.f32 %v10477_v53  ;;  %v4617_v33 = vand.u32 2147483647, %v10477_v53  ;;  %5495 = vmatpush.bf16.msrb.mxu0 %v8272_v23  ;;  %5521 = vmatpush.bf16.msra.mxu2 %v8280_v34 }
 0x555   :  { %v8946_v29 = vld [vmem:[#allocation9 + $0x4c] sm:$0xf0]  ;;  %v8263_v12 = vld [vmem:[#allocation9 + $0x48] sm:$0xf]  ;;  %v4601_v26 = vor.u32 1.1754944e-38, %v4600_v31  ;;  %vm4599_vm7 = vcmp.eq.f32.partialorder %v4598_v9, 8.507059e+37 }
 0x556   :  { %v8256_v43 = vor.u32 %v8946_v29, %v8255_v58  ;;  %v8264_v4 = vor.u32 %v8947_v20, %v8263_v12  ;;  %v4620_v30 = vor.u32 1.1754944e-38, %v4619_v50  ;;  %5534 = vmatpush.bf16.msra.mxu3 %v8284_v25  ;;  %vm4618_vm8 = vcmp.eq.f32.partialorder %v4617_v33, 8.507059e+37 }
 0x557   :  { %v9215_v7 = vpop.eup %9214  ;;  %v4656_v20 = vunpack.c.l.bf16 %v9699_v61  ;;  %v8979_v61 = vld [vmem:[%s10893_s5 + $0x38] sm:$0xff] }
 0x558   :  { %v10484_v8 = vadd.f32 1.0, %v9215_v7  ;;  %5496 = vmatpush.bf16.msrb.mxu0 %v8256_v43  ;;  %5522 = vmatpush.bf16.msra.mxu2 %v8264_v4 }
 0x559   :  { %v10486_v2 = vpop.eup %9216 }
 0x55a   :  { %v10491_v38 = vpop.eup %9218  ;;  %v4590_v41 = vmul.f32 %v10486_v2, %v10475_v24  ;;  %9220 = vrcp.f32 %v10484_v8  ;;  %vm4595_vm3 = vweird.f32 %v10486_v2  ;;  %5535 = vmatpush.bf16.msra.mxu3 %v8268_v42  ;;  %vm4633_vm10 = vweird.f32 %v10484_v8 }
 0x55b   :  { %v4609_v55 = vmul.f32 %v10491_v38, %v10477_v53  ;;  %9222 = vtanh.f32 %v4583_v11  ;;  %vm4614_vm4 = vweird.f32 %v10491_v38  ;;  %vm10514_vm5 = vmor %vm4594_vm2, %vm4595_vm3  ;;  %v4637_v23 = vand.u32 2147483647, %v10484_v8 }
 0x55c   :  { %v4859_v39 = vpop.f32.mrf.mxu0  ;;  %v4872_v6 = vpop.f32.mrf.mxu1  ;;  %v4591_v3 = vsub.f32 1.0, %v4590_v41  ;;  %vm10525_vm6 = vmor %vm4613_vm1, %vm4614_vm4  ;;  %5523 = vmatpush.bf16.msra.mxu2 %v8248_v40 }
 0x55d   :  { %v4902_v19 = vadd.f32 %v4859_v39, %v4654_v0  ;;  %v4903_v60 = vadd.f32 %v4872_v6, %v4655_v59  ;;  %v4610_v28 = vsub.f32 1.0, %v4609_v55  ;;  %v8240_v55 = vor.u32 %v8942_v45, %v8239_v27 }
 0x55e   :  { %v4592_v51 = vmul.f32 %v10486_v2, %v4591_v3  ;;  %vm4638_vm12 = vcmp.eq.f32.partialorder %v4637_v23, 8.507059e+37  ;;  %v4975_v23 = vunpack.c.l.bf16 %v9645_v13 }
 0x55f   :  { %v8087_v22 = vmul.f32 -1.442695, %v4902_v19  ;;  %v8088_v10 = vmul.f32 -1.442695, %v4903_v60  ;;  %v4611_v48 = vmul.f32 %v10491_v38, %v4610_v28  ;;  %v8231_v60 = vld [vmem:[#allocation9 + $0x8] sm:$0xf]  ;;  %5497 = vmatpush.bf16.msrb.mxu0 %v8240_v55 }
 0x560   :  { %v10507_v49 = vpop.eup %9220  ;;  %v4593_v1 = vadd.f32 %v10486_v2, %v4592_v51  ;;  %v8233_v28 = vld [vmem:[#allocation9 + $0x18] sm:$0xf0]  ;;  %v8977_v55 = vld [vmem:[%s10893_s5 + $0x28] sm:$0xff] }
 0x561   :  { %9224 = vpow2.f32 %v8087_v22  ;;  %v9223_v57 = vpop.eup %9222  ;;  %v4612_v7 = vadd.f32 %v10491_v38, %v4611_v48  ;;  %v4629_v11 = vmul.f32 %v10507_v49, %v10484_v8  ;;  %vm4634_vm9 = vweird.f32 %v10507_v49 }
 0x562   :  { %9226 = vpow2.f32 %v8088_v10  ;;  %v4597_v21 = vsel %vm10514_vm5, %v10486_v2, %v4593_v1  ;;  %v8941_v2 = vld [vmem:[#allocation9 + $0x2c] sm:$0xf]  ;;  %v4639_v22 = vand.u32 2147483648, %v10484_v8  ;;  %v8232_v10 = vor.u32 %v8939_v62, %v8231_v60  ;;  %vm4635_vm11 = vmor %vm4633_vm10, %vm4634_vm9 }
 0x563   :  { %v10536_v31 = vpop.f32.mrf.mxu2  ;;  %v4898_v0 = vpop.f32.mrf.mxu3  ;;  %v4602_v41 = vsel %vm4599_vm7, %v4601_v26, %v4597_v21  ;;  %v4616_v53 = vsel %vm10525_vm6, %v10491_v38, %v4612_v7  ;;  %v4630_v50 = vsub.f32 1.0, %v4629_v11  ;;  %v8223_v38 = vld [vmem:[#allocation9] sm:$0xf]  ;;  %v8252_v19 = vor.u32 %v8941_v2, %v8249_v17 }
 0x564   :  { %v4861_v59 = vpop.f32.mrf.mxu0  ;;  %v4874_v56 = vpop.f32.mrf.mxu1  ;;  %v4621_v24 = vsel %vm4618_vm8, %v4620_v30, %v4616_v53  ;;  %v4644_v9 = vmul.f32 %v9223_v57, %v4602_v41  ;;  %v4905_v5 = vadd.f32 %v4898_v0, %v4657_v36  ;;  %v8224_v51 = vor.u32 %v8938_v35, %v8223_v38  ;;  %5524 = vmatpush.bf16.msra.mxu2 %v8232_v10  ;;  %v8976_v38 = vld [vmem:[%s10893_s5 + $0x20] sm:$0xff]  ;;  %v8970_v10 = vld [vmem:[#allocation4 + $0x10] sm:$0xff] }
 0x565   :  { %v4643_v39 = vmul.f32 %v4621_v24, %v10430_v16  ;;  %v4631_v6 = vmul.f32 %v10507_v49, %v4630_v50  ;;  %v8937_v16 = vld [vmem:[#allocation9 + $0xc] sm:$0xf]  ;;  %5536 = vmatpush.bf16.msra.mxu3 %v8252_v19  ;;  %v4640_v29 = vor.u32 1.1754944e-38, %v4639_v22  ;;  %v4904_v14 = vadd.f32 %v10536_v31, %v4656_v20  ;;  %v8975_v19 = vld [vmem:[%s10893_s5 + $0x18] sm:$0xff] }
 0x566   :  { %v8089_v3 = vmul.f32 -1.442695, %v4905_v5  ;;  %v8236_v34 = vor.u32 %v8937_v16, %v8233_v28  ;;  %5498 = vmatpush.bf16.msrb.mxu0 %v8224_v51  ;;  %v8974_v28 = vld [vmem:[%s10893_s5 + $0x10] sm:$0xff]  ;;  %v8968_v51 = vld [vmem:[#allocation4] sm:$0xff]  ;;  %v8969_v22 = vld [vmem:[#allocation4 + $0x8] sm:$0xff] }
 0x567   :  { %v9225_v37 = vpop.eup %9224  ;;  %v10545_v18 = vadd.f32 %v4644_v9, %v4643_v39  ;;  %v4632_v46 = vadd.f32 %v10507_v49, %v4631_v6 }
 0x568   :  { %v9227_v47 = vpop.eup %9226  ;;  %v10548_v36 = vadd.f32 1.0, %v9225_v37  ;;  %9228 = vpow2.f32 %v8089_v3 }
 0x569   :  { %v10550_v33 = vadd.f32 1.0, %v9227_v47  ;;  %9230 = vtanh.f32 %v10545_v18  ;;  %v4636_v25 = vsel %vm4635_vm11, %v10507_v49, %v4632_v46  ;;  %5537 = vmatpush.bf16.msra.mxu3 %v8236_v34  ;;  %v8972_v46 = vld [vmem:[%s10893_s5] sm:$0xff] }
 0x56a   :  { %9232 = vrcp.f32 %v10548_v36  ;;  %v4641_v26 = vsel %vm4638_vm12, %v4640_v29, %v4636_v25  ;;  %v4921_v27 = vand.u32 2147483648, %v10548_v36  ;;  %v4919_v30 = vand.u32 2147483647, %v10548_v36 }
 0x56b   :  { %v4887_v58 = vpop.f32.mrf.mxu2  ;;  %v4900_v48 = vpop.f32.mrf.mxu3  ;;  %9234 = vrcp.f32 %v10550_v33  ;;  %v4940_v45 = vand.u32 2147483648, %v10550_v33  ;;  %v4938_v31 = vand.u32 2147483647, %v10550_v33  ;;  %vm4915_vm15 = vweird.f32 %v10548_v36 }
 0x56c   :  { %vm4934_vm0 = vweird.f32 %v10550_v33  ;;  %v4922_v44 = vor.u32 1.1754944e-38, %v4921_v27  ;;  %vm4920_vm3 = vcmp.eq.f32.partialorder %v4919_v30, 8.507059e+37  ;;  %v4976_v58 = vunpack.c.h.bf16 %v9645_v13  ;;  %v8991_v27 = vld [vmem:[%s10894_s6 + $0x38] sm:$0xff] }
 0x56d   :  { %v4941_v50 = vor.u32 1.1754944e-38, %v4940_v45  ;;  %vm4939_vm4 = vcmp.eq.f32.partialorder %v4938_v31, 8.507059e+37 }
 0x56e   :  { %v9229_v12 = vpop.eup %9228 }
 0x56f   :  { %v9231_v8 = vpop.eup %9230  ;;  %v10563_v1 = vadd.f32 1.0, %v9229_v12 }
 0x570   :  { %v9233_v43 = vpop.eup %9232  ;;  %v4647_v52 = vmul.f32 %v9231_v8, %v4641_v26  ;;  %v10966_v8 = vld [vmem:[#allocation16_spill] sm:$0xff] }
 0x571   :  { %v9235_v57 = vpop.eup %9234  ;;  %v4911_v32 = vmul.f32 %v9233_v43, %v10548_v36  ;;  %9236 = vrcp.f32 %v10563_v1  ;;  %vm4916_vm13 = vweird.f32 %v9233_v43  ;;  %v4960_v37 = vand.u32 2147483648, %v10563_v1 }
 0x572   :  { %v4930_v49 = vmul.f32 %v9235_v57, %v10550_v33  ;;  %v4648_v11 = vpack.c.bf16 %v4647_v52, %v4647_v52  ;;  %9238 = vtanh.f32 %v4904_v14  ;;  %vm4935_vm14 = vweird.f32 %v9235_v57  ;;  %vm4917_vm1 = vmor %vm4915_vm15, %vm4916_vm13  ;;  %v8973_v33 = vld [vmem:[%s10893_s5 + $0x8] sm:$0xff]  ;;  %s9370_s5 = smov [#allocation11]  }
 0x573   :  { %v4912_v7 = vsub.f32 1.0, %v4911_v32  ;;  %vm4936_vm2 = vmor %vm4934_vm0, %vm4935_vm14  ;;  %vm4954_vm6 = vweird.f32 %v10563_v1  ;;  %v4958_v3 = vand.u32 2147483647, %v10563_v1  ;;  %v4961_v60 = vor.u32 1.1754944e-38, %v4960_v37  ;;  %s6176_s23 = sshll.u32 %s9370_s5, 4  ;;  %s6177_s23 = int_to_ptr.vmem [resolvable:$true] %s6176_s23 }
 0x574   :  { %v4931_v4 = vsub.f32 1.0, %v4930_v49  ;;  %4650 = vst [vmem:[#allocation4 + $0x18] sm:$0xf] %v4648_v11  ;;  %5179 = vmatmul.bf16.vlgmr.msra.gmra.mxu0 %v4648_v11  ;;  %5192 = vmatmul.bf16.vlgmr.msra.gmra.mxu1 %v4648_v11  ;;  %v4977_v45 = vunpack.c.l.bf16 %v10966_v8 }
 0x575   :  { %v4913_v15 = vmul.f32 %v9233_v43, %v4912_v7  ;;  %5205 = vmatmul.bf16.vlgmr.msrb.gmra.mxu2 %v4648_v11  ;;  %5218 = vmatmul.bf16.vlgmr.msrb.gmra.mxu3 %v4648_v11  ;;  %vm4959_vm8 = vcmp.eq.f32.partialorder %v4958_v3, 8.507059e+37 }
 0x576   :  { %v4932_v21 = vmul.f32 %v9235_v57, %v4931_v4  ;;  %5833 = vmatpush.bf16.msra.mxu1 %v8979_v61  ;;  %5732 = vmatpush.bf16.msra.mxu0 %v8991_v27 }
 0x577   :  { %v9237_v0 = vpop.eup %9236  ;;  %v4914_v42 = vadd.f32 %v9233_v43, %v4913_v15 }
 0x578   :  { %v4933_v41 = vadd.f32 %v9235_v57, %v4932_v21  ;;  %v4950_v53 = vmul.f32 %v9237_v0, %v10563_v1  ;;  %v9239_v56 = vpop.eup %9238  ;;  %vm4955_vm5 = vweird.f32 %v9237_v0  ;;  %v4978_v1 = vunpack.c.h.bf16 %v10966_v8 }
 0x579   :  { %v4918_v59 = vsel %vm4917_vm1, %v9233_v43, %v4914_v42  ;;  %vm4956_vm7 = vmor %vm4954_vm6, %vm4955_vm5 }
 0x57a   :  { %v4923_v2 = vsel %vm4920_vm3, %v4922_v44, %v4918_v59  ;;  %v4937_v17 = vsel %vm4936_vm2, %v9235_v57, %v4933_v41  ;;  %v4951_v24 = vsub.f32 1.0, %v4950_v53  ;;  %5834 = vmatpush.bf16.msra.mxu1 %v8978_v63  ;;  %v10967_v44 = vld [vmem:[#allocation15_spill] sm:$0xff] }
 0x57b   :  { %v4942_v9 = vsel %vm4939_vm4, %v4941_v50, %v4937_v17  ;;  %v4965_v5 = vmul.f32 %v9239_v56, %v4923_v2  ;;  %v5295_v41 = vunpack.c.l.bf16 %v10967_v44  ;;  %v5296_v53 = vunpack.c.h.bf16 %v10967_v44 }
 0x57c   :  { %v4964_v39 = vmul.f32 %v4942_v9, %v10464_v54  ;;  %v4952_v6 = vmul.f32 %v9237_v0, %v4951_v24 }
 0x57e   :  { %v10587_v40 = vadd.f32 %v4965_v5, %v4964_v39  ;;  %5835 = vmatpush.bf16.msra.mxu1 %v8977_v55  ;;  %v4953_v35 = vadd.f32 %v9237_v0, %v4952_v6  ;;  %v8989_v6 = vld [vmem:[%s10894_s6 + $0x28] sm:$0xff] }
 0x580   :  { %9240 = vtanh.f32 %v10587_v40  ;;  %v4957_v54 = vsel %vm4956_vm7, %v9237_v0, %v4953_v35  ;;  %v8990_v0 = vld [vmem:[%s10894_s6 + $0x30] sm:$0xff] }
 0x581   :  { %v4962_v47 = vsel %vm4959_vm8, %v4961_v60, %v4957_v54  ;;  %5733 = vmatpush.bf16.msra.mxu0 %v8990_v0 }
 0x582   :  { %5836 = vmatpush.bf16.msra.mxu1 %v8976_v38 }
 0x585   :  { %5734 = vmatpush.bf16.msra.mxu0 %v8989_v6 }
 0x586   :  { %v9241_v62 = vpop.eup %9240  ;;  %5837 = vmatpush.bf16.msra.mxu1 %v8975_v19 }
 0x587   :  { %v4968_v36 = vmul.f32 %v9241_v62, %v4962_v47 }
 0x589   :  { %v4969_v16 = vpack.c.bf16 %v4968_v36, %v4968_v36 }
 0x58a   :  { %5838 = vmatpush.bf16.msra.mxu1 %v8974_v28 }
 0x58b   :  { %4971 = vst [vmem:[#allocation5 + $0x4] sm:$0xf] %v4969_v16  ;;  %5499 = vmatmul.bf16.vlgmr.msrb.gmra.mxu0 %v4969_v16  ;;  %5512 = vmatmul.bf16.vlgmr.msrb.gmra.mxu1 %v4969_v16 }
 0x58c   :  { %5525 = vmatmul.bf16.vlgmr.msra.gmra.mxu2 %v4969_v16  ;;  %5538 = vmatmul.bf16.vlgmr.msra.gmra.mxu3 %v4969_v16  ;;  %v8988_v16 = vld [vmem:[%s10894_s6 + $0x20] sm:$0xff] }
 0x58d   :  { %5735 = vmatpush.bf16.msra.mxu0 %v8988_v16 }
 0x58e   :  { %5839 = vmatpush.bf16.msra.mxu1 %v8973_v33 }
 0x592   :  { %5840 = vmatpush.bf16.msra.mxu1 %v8972_v46 }
 0x59b   :  { %5841 = vmatmul.bf16.vlgmr.msra.gmra.mxu1 %v8968_v51 }
 0x5ab   :  { %5846 = vmatmul.bf16.gmra.mxu1 %v8969_v22  ;;  %v10968_v22 = vld [vmem:[#allocation17_spill] sm:$0xff] }
 0x5ac   :  { %v5297_v0 = vunpack.c.l.bf16 %v10968_v22 }
 0x5bb   :  { %5851 = vmatmul.bf16.gmra.mxu1 %v8970_v10  ;;  %v5298_v10 = vunpack.c.h.bf16 %v10968_v22 }
 0x5f1   :  { %v5180_v48 = vpop.f32.mrf.mxu0  ;;  %v5193_v34 = vpop.f32.mrf.mxu1 }
 0x5f2   :  { %v5223_v25 = vadd.f32 %v5180_v48, %v4975_v23  ;;  %v5224_v29 = vadd.f32 %v5193_v34, %v4976_v58 }
 0x5f4   :  { %v8218_v12 = vmul.f32 -1.442695, %v5223_v25  ;;  %v8219_v20 = vmul.f32 -1.442695, %v5224_v29 }
 0x5f6   :  { %9242 = vpow2.f32 %v8218_v12 }
 0x5f7   :  { %9244 = vpow2.f32 %v8219_v20 }
 0x5f8   :  { %v5206_v26 = vpop.f32.mrf.mxu2  ;;  %v5219_v43 = vpop.f32.mrf.mxu3 }
 0x5f9   :  { %v5226_v14 = vadd.f32 %v5219_v43, %v4978_v1  ;;  %v5182_v52 = vpop.f32.mrf.mxu0  ;;  %v5195_v57 = vpop.f32.mrf.mxu1  ;;  %v5225_v30 = vadd.f32 %v5206_v26, %v4977_v45  ;;  %v8987_v43 = vld [vmem:[%s10894_s6 + $0x18] sm:$0xff]  ;;  %v8985_v45 = vld [vmem:[%s10894_s6 + $0x8] sm:$0xff] }
 0x5fa   :  { %5736 = vmatpush.bf16.msra.mxu0 %v8987_v43 }
 0x5fb   :  { %v8220_v32 = vmul.f32 -1.442695, %v5226_v14 }
 0x5fc   :  { %v9243_v49 = vpop.eup %9242 }
 0x5fd   :  { %v9245_v7 = vpop.eup %9244  ;;  %v5230_v11 = vadd.f32 1.0, %v9243_v49  ;;  %9246 = vpow2.f32 %v8220_v32 }
 0x5fe   :  { %v5249_v13 = vadd.f32 1.0, %v9245_v7 }
 0x5ff   :  { %9248 = vrcp.f32 %v5230_v11  ;;  %v5240_v55 = vand.u32 2147483647, %v5230_v11  ;;  %v5242_v39 = vand.u32 2147483648, %v5230_v11  ;;  %vm5236_vm12 = vweird.f32 %v5230_v11 }
 0x600   :  { %9250 = vrcp.f32 %v5249_v13  ;;  %v5208_v61 = vpop.f32.mrf.mxu2  ;;  %v5221_v4 = vpop.f32.mrf.mxu3  ;;  %v5261_v5 = vand.u32 2147483648, %v5249_v13  ;;  %v5259_v54 = vand.u32 2147483647, %v5249_v13  ;;  %vm5255_vm11 = vweird.f32 %v5249_v13 }
 0x601   :  { %v5243_v62 = vor.u32 1.1754944e-38, %v5242_v39  ;;  %vm5241_vm15 = vcmp.eq.f32.partialorder %v5240_v55, 8.507059e+37 }
 0x602   :  { %v5262_v33 = vor.u32 1.1754944e-38, %v5261_v5  ;;  %vm5260_vm0 = vcmp.eq.f32.partialorder %v5259_v54, 8.507059e+37 }
 0x603   :  { %v9247_v15 = vpop.eup %9246 }
 0x604   :  { %v10615_v21 = vadd.f32 1.0, %v9247_v15 }
 0x605   :  { %v9249_v31 = vpop.eup %9248 }
 0x606   :  { %v9251_v42 = vpop.eup %9250  ;;  %v5232_v63 = vmul.f32 %v9249_v31, %v5230_v11  ;;  %9252 = vrcp.f32 %v10615_v21  ;;  %vm5237_vm9 = vweird.f32 %v9249_v31  ;;  %vm5275_vm2 = vweird.f32 %v10615_v21 }
 0x607   :  { %v5251_v50 = vmul.f32 %v9251_v42, %v5249_v13  ;;  %9254 = vtanh.f32 %v5225_v30  ;;  %vm5256_vm10 = vweird.f32 %v9251_v42  ;;  %vm5238_vm13 = vmor %vm5236_vm12, %vm5237_vm9  ;;  %v5281_v13 = vand.u32 2147483648, %v10615_v21 }
 0x608   :  { %v5500_v59 = vpop.f32.mrf.mxu0  ;;  %v5513_v56 = vpop.f32.mrf.mxu1  ;;  %v5233_v2 = vsub.f32 1.0, %v5232_v63  ;;  %vm5257_vm14 = vmor %vm5255_vm11, %vm5256_vm10  ;;  %v5279_v61 = vand.u32 2147483647, %v10615_v21 }
 0x609   :  { %v5543_v17 = vadd.f32 %v5500_v59, %v5295_v41  ;;  %v5544_v24 = vadd.f32 %v5513_v56, %v5296_v53  ;;  %v5252_v9 = vsub.f32 1.0, %v5251_v50  ;;  %v5282_v30 = vor.u32 1.1754944e-38, %v5281_v13 }
 0x60a   :  { %v5234_v38 = vmul.f32 %v9249_v31, %v5233_v2  ;;  %vm5280_vm4 = vcmp.eq.f32.partialorder %v5279_v61, 8.507059e+37 }
 0x60b   :  { %v8349_v35 = vmul.f32 -1.442695, %v5543_v17  ;;  %v8350_v37 = vmul.f32 -1.442695, %v5544_v24  ;;  %v5253_v3 = vmul.f32 %v9251_v42, %v5252_v9 }
 0x60c   :  { %v9253_v19 = vpop.eup %9252  ;;  %v5235_v60 = vadd.f32 %v9249_v31, %v5234_v38 }
 0x60d   :  { %9256 = vpow2.f32 %v8349_v35  ;;  %v5254_v47 = vadd.f32 %v9251_v42, %v5253_v3  ;;  %v5271_v36 = vmul.f32 %v9253_v19, %v10615_v21  ;;  %v9255_v28 = vpop.eup %9254  ;;  %vm5276_vm1 = vweird.f32 %v9253_v19  ;;  %v8984_v21 = vld [vmem:[%s10894_s6] sm:$0xff] }
 0x60e   :  { %9258 = vpow2.f32 %v8350_v37  ;;  %v5239_v46 = vsel %vm5238_vm13, %v9249_v31, %v5235_v60  ;;  %vm5277_vm3 = vmor %vm5275_vm2, %vm5276_vm1  ;;  %vm5876_vm1 = vcmask 125952  }
 0x60f   :  { %v5526_v51 = vpop.f32.mrf.mxu2  ;;  %v5539_v23 = vpop.f32.mrf.mxu3  ;;  %v5244_v58 = vsel %vm5241_vm15, %v5243_v62, %v5239_v46  ;;  %v5258_v48 = vsel %vm5257_vm14, %v9251_v42, %v5254_v47  ;;  %v5272_v34 = vsub.f32 1.0, %v5271_v36 }
 0x610   :  { %v5502_v25 = vpop.f32.mrf.mxu0  ;;  %v5515_v29 = vpop.f32.mrf.mxu1  ;;  %v5263_v12 = vsel %vm5260_vm0, %v5262_v33, %v5258_v48  ;;  %v5286_v20 = vmul.f32 %v9255_v28, %v5244_v58  ;;  %v5546_v8 = vadd.f32 %v5539_v23, %v5298_v10  ;;  %v5545_v50 = vadd.f32 %v5526_v51, %v5297_v0 }
 0x611   :  { %v5285_v1 = vmul.f32 %v5263_v12, %v10545_v18  ;;  %v5273_v26 = vmul.f32 %v9253_v19, %v5272_v34  ;;  %v8986_v18 = vld [vmem:[%s10894_s6 + $0x10] sm:$0xff] }
 0x612   :  { %v8351_v52 = vmul.f32 -1.442695, %v5546_v8  ;;  %5737 = vmatpush.bf16.msra.mxu0 %v8986_v18 }
 0x613   :  { %v9257_v14 = vpop.eup %9256  ;;  %v5287_v32 = vadd.f32 %v5286_v20, %v5285_v1  ;;  %v5274_v7 = vadd.f32 %v9253_v19, %v5273_v26 }
 0x614   :  { %v9259_v57 = vpop.eup %9258  ;;  %v5550_v49 = vadd.f32 1.0, %v9257_v14  ;;  %9260 = vpow2.f32 %v8351_v52  ;;  %v8982_v14 = vld [vmem:[#allocation5 + $0x10] sm:$0xff]  ;;  %v8983_v52 = vld [vmem:[#allocation5 + $0x18] sm:$0xff] }
 0x615   :  { %v5569_v11 = vadd.f32 1.0, %v9259_v57  ;;  %9262 = vtanh.f32 %v5287_v32  ;;  %v5278_v15 = vsel %vm5277_vm3, %v9253_v19, %v5274_v7 }
 0x616   :  { %9264 = vrcp.f32 %v5550_v49  ;;  %v5283_v63 = vsel %vm5280_vm4, %v5282_v30, %v5278_v15  ;;  %5738 = vmatpush.bf16.msra.mxu0 %v8985_v45  ;;  %v5562_v5 = vand.u32 2147483648, %v5550_v49  ;;  %v5560_v6 = vand.u32 2147483647, %v5550_v49  ;;  %v10653_v15 = vld [vmem:[%s10895_s7] ss:$0 sm:$0xff] }
 0x617   :  { %v5528_v4 = vpop.f32.mrf.mxu2  ;;  %v5541_v27 = vpop.f32.mrf.mxu3  ;;  %9266 = vrcp.f32 %v5569_v11  ;;  %v5581_v55 = vand.u32 2147483648, %v5569_v11  ;;  %v5579_v35 = vand.u32 2147483647, %v5569_v11  ;;  %vm5556_vm7 = vweird.f32 %v5550_v49 }
 0x618   :  { %vm5575_vm8 = vweird.f32 %v5569_v11  ;;  %v5563_v54 = vor.u32 1.1754944e-38, %v5562_v5  ;;  %vm5561_vm11 = vcmp.eq.f32.partialorder %v5560_v6, 8.507059e+37  ;;  %v5842_v57 = vpop.f32.mrf.mxu1 }
 0x619   :  { %v5582_v62 = vor.u32 1.1754944e-38, %v5581_v55  ;;  %vm5580_vm12 = vcmp.eq.f32.partialorder %v5579_v35, 8.507059e+37 }
 0x61a   :  { %v9261_v31 = vpop.eup %9260  ;;  %5739 = vmatpush.bf16.msra.mxu0 %v8984_v21 }
 0x61b   :  { %v9263_v42 = vpop.eup %9262  ;;  %v5589_v44 = vadd.f32 1.0, %v9261_v31 }
 0x61c   :  { %v9265_v41 = vpop.eup %9264  ;;  %v5289_v53 = vmul.f32 %v9263_v42, %v5283_v63 }
 0x61d   :  { %v9267_v59 = vpop.eup %9266  ;;  %v5552_v56 = vmul.f32 %v9265_v41, %v5550_v49  ;;  %9268 = vrcp.f32 %v5589_v44  ;;  %vm5557_vm5 = vweird.f32 %v9265_v41  ;;  %v5601_v34 = vand.u32 2147483648, %v5589_v44 }
 0x61e   :  { %v5290_v2 = vpack.c.bf16 %v5289_v53, %v5289_v53  ;;  %v5571_v17 = vmul.f32 %v9267_v59, %v5569_v11  ;;  %9270 = vtanh.f32 %v5545_v50  ;;  %vm5576_vm6 = vweird.f32 %v9267_v59  ;;  %vm5558_vm9 = vmor %vm5556_vm7, %vm5557_vm5 }
 0x61f   :  { %v5553_v24 = vsub.f32 1.0, %v5552_v56  ;;  %vm5577_vm10 = vmor %vm5575_vm8, %vm5576_vm6  ;;  %vm5595_vm14 = vweird.f32 %v5589_v44  ;;  %v5599_v25 = vand.u32 2147483647, %v5589_v44  ;;  %v5602_v12 = vor.u32 1.1754944e-38, %v5601_v34 }
 0x620   :  { %5292 = vst [vmem:[#allocation4 + $0x1c] sm:$0xf] %v5290_v2  ;;  %v5572_v9 = vsub.f32 1.0, %v5571_v17  ;;  %v5844_v32 = vpop.f32.mrf.mxu1  ;;  %vm6163_vm8 = vcmask 130052  }
 0x621   :  { %v5554_v39 = vmul.f32 %v9265_v41, %v5553_v24  ;;  %vm5600_vm0 = vcmp.eq.f32.partialorder %v5599_v25, 8.507059e+37 }
 0x622   :  { %v5573_v38 = vmul.f32 %v9267_v59, %v5572_v9 }
 0x623   :  { %v9269_v37 = vpop.eup %9268  ;;  %v5555_v3 = vadd.f32 %v9265_v41, %v5554_v39 }
 0x624   :  { %v5574_v19 = vadd.f32 %v9267_v59, %v5573_v38  ;;  %v5591_v60 = vmul.f32 %v9269_v37, %v5589_v44  ;;  %v9271_v36 = vpop.eup %9270  ;;  %vm5596_vm13 = vweird.f32 %v9269_v37 }
 0x625   :  { %v5559_v47 = vsel %vm5558_vm9, %v9265_v41, %v5555_v3  ;;  %vm5597_vm15 = vmor %vm5595_vm14, %vm5596_vm13 }
 0x626   :  { %v5564_v16 = vsel %vm5561_vm11, %v5563_v54, %v5559_v47  ;;  %v5578_v28 = vsel %vm5577_vm10, %v9267_v59, %v5574_v19  ;;  %v5592_v33 = vsub.f32 1.0, %v5591_v60 }
 0x627   :  { %v5583_v46 = vsel %vm5580_vm12, %v5582_v62, %v5578_v28  ;;  %v5606_v51 = vmul.f32 %v9271_v36, %v5564_v16  ;;  %v8971_v22 = vld [vmem:[#allocation4 + $0x18] sm:$0xff] }
 0x628   :  { %v5605_v10 = vmul.f32 %v5583_v46, %v10587_v40  ;;  %v5593_v23 = vmul.f32 %v9269_v37, %v5592_v33  ;;  %5856 = vmatmul.bf16.gmra.mxu1 %v8971_v22  ;;  %v8981_v40 = vld [vmem:[#allocation5 + $0x8] sm:$0xff]  ;;  %v5847_v7 = vpop.f32.mrf.mxu1 }
 0x62a   :  { %v5607_v58 = vadd.f32 %v5606_v51, %v5605_v10  ;;  %v5594_v48 = vadd.f32 %v9269_v37, %v5593_v23 }
 0x62c   :  { %9272 = vtanh.f32 %v5607_v58  ;;  %v5598_v29 = vsel %vm5597_vm15, %v9269_v37, %v5594_v48 }
 0x62d   :  { %v5603_v8 = vsel %vm5600_vm0, %v5602_v12, %v5598_v29 }
 0x630   :  { %v5849_v18 = vpop.f32.mrf.mxu1 }
 0x632   :  { %v9273_v20 = vpop.eup %9272 }
 0x633   :  { %v5609_v1 = vmul.f32 %v9273_v20, %v5603_v8 }
 0x635   :  { %v5610_v26 = vpack.c.bf16 %v5609_v1, %v5609_v1 }
 0x637   :  { %5611 = vst [vmem:[#allocation5] sm:$0xf] %v5610_v26 }
 0x638   :  { %v5852_v4 = vpop.f32.mrf.mxu1 }
 0x63e   :  { %v8980_v43 = vld [vmem:[#allocation5] sm:$0xff] }
 0x63f   :  { %5740 = vmatmul.bf16.vlgmr.msra.gmra.mxu0 %v8980_v43 }
 0x640   :  { %v5854_v31 = vpop.f32.mrf.mxu1 }
 0x64f   :  { %5745 = vmatmul.bf16.gmra.mxu0 %v8981_v40 }
 0x65f   :  { %5750 = vmatmul.bf16.gmra.mxu0 %v8982_v14 }
 0x66f   :  { %5755 = vmatmul.bf16.gmra.mxu0 %v8983_v52 }
 0x6a5   :  { %v5857_v9 = vpop.f32.mrf.mxu1 }
 0x6bc   :  { %v5741_v49 = vpop.f32.mrf.mxu0 }
 0x6bd   :  { %v5843_v45 = vadd.f32 %v5842_v57, %v5741_v49 }
 0x6bf   :  { %v10656_v0 = vadd.f32 %v10653_v15, %v5843_v45 }
 0x6c1   :  { %v5902_v41 = vmul.f32 %v10656_v0, %v10656_v0  ;;  %v6015_v56 = vrot.slane %v10656_v0, 4  ;;  %v5877_v6 = vsel %vm5876_vm1, %v10656_v0, 0.0 }
 0x6c3   :  { %v6064_v5 = vrot.slane %v5902_v41, 4  ;;  %v6031_v54 = vsel %vm5876_vm1, %v6015_v56, 0.0  ;;  %v5910_v33 = vsel %vm5876_vm1, %v5902_v41, 0.0 }
 0x6c4   :  { %v5743_v11 = vpop.f32.mrf.mxu0 }
 0x6c5   :  { %v5845_v30 = vadd.f32 %v5844_v32, %v5743_v11  ;;  %v6080_v46 = vsel %vm5876_vm1, %v6064_v5, 0.0 }
 0x6c7   :  { %v10659_v42 = vadd.f32 %v10653_v15, %v5845_v30 }
 0x6c9   :  { %v5903_v53 = vmul.f32 %v10659_v42, %v10659_v42  ;;  %v6016_v2 = vrot.slane %v10659_v42, 4  ;;  %v5878_v38 = vsel %vm5876_vm1, %v10659_v42, 0.0 }
 0x6ca   :  { %v5879_v28 = vadd.f32 %v5878_v38, %v5877_v6 }
 0x6cb   :  { %v6065_v55 = vrot.slane %v5903_v53, 4  ;;  %v6032_v19 = vsel %vm5876_vm1, %v6016_v2, 0.0  ;;  %v5911_v60 = vsel %vm5876_vm1, %v5903_v53, 0.0 }
 0x6cc   :  { %v5746_v13 = vpop.f32.mrf.mxu0  ;;  %v6033_v34 = vadd.f32 %v6032_v19, %v6031_v54  ;;  %v5912_v29 = vadd.f32 %v5911_v60, %v5910_v33 }
 0x6cd   :  { %v5848_v63 = vadd.f32 %v5847_v7, %v5746_v13  ;;  %v6081_v51 = vsel %vm5876_vm1, %v6065_v55, 0.0  ;;  %v5859_v7 = vpop.f32.mrf.mxu1 }
 0x6ce   :  { %v6082_v14 = vadd.f32 %v6081_v51, %v6080_v46 }
 0x6cf   :  { %v10666_v50 = vadd.f32 %v10653_v15, %v5848_v63 }
 0x6d1   :  { %v6017_v35 = vrot.slane %v10666_v50, 4  ;;  %v5880_v3 = vsel %vm5876_vm1, %v10666_v50, 0.0  ;;  %v5904_v16 = vmul.f32 %v10666_v50, %v10666_v50 }
 0x6d2   :  { %v5881_v48 = vadd.f32 %v5880_v3, %v5879_v28 }
 0x6d3   :  { %v6034_v58 = vsel %vm5876_vm1, %v6017_v35, 0.0  ;;  %v5913_v1 = vsel %vm5876_vm1, %v5904_v16, 0.0  ;;  %v6066_v40 = vrot.slane %v5904_v16, 4 }
 0x6d4   :  { %v5748_v61 = vpop.f32.mrf.mxu0  ;;  %v6035_v43 = vadd.f32 %v6034_v58, %v6033_v34 }
 0x6d5   :  { %v5850_v21 = vadd.f32 %v5849_v18, %v5748_v61  ;;  %v5914_v61 = vadd.f32 %v5913_v1, %v5912_v29  ;;  %v6083_v41 = vsel %vm5876_vm1, %v6066_v40, 0.0 }
 0x6d6   :  { %v6084_v19 = vadd.f32 %v6083_v41, %v6082_v14 }
 0x6d7   :  { %v10671_v17 = vadd.f32 %v10653_v15, %v5850_v21 }
 0x6d9   :  { %v6018_v36 = vrot.slane %v10671_v17, 4  ;;  %v5882_v10 = vsel %vm5876_vm1, %v10671_v17, 0.0  ;;  %v5905_v25 = vmul.f32 %v10671_v17, %v10671_v17 }
 0x6da   :  { %v5883_v26 = vadd.f32 %v5882_v10, %v5881_v48 }
 0x6db   :  { %v6036_v8 = vsel %vm5876_vm1, %v6018_v36, 0.0  ;;  %v5915_v21 = vsel %vm5876_vm1, %v5905_v25, 0.0 }
 0x6dc   :  { %v5751_v27 = vpop.f32.mrf.mxu0  ;;  %v6037_v18 = vadd.f32 %v6036_v8, %v6035_v43  ;;  %v5916_v54 = vadd.f32 %v5915_v21, %v5914_v61 }
 0x6dd   :  { %v5853_v59 = vadd.f32 %v5852_v4, %v5751_v27  ;;  %v6067_v4 = vrot.slane %v5905_v25, 4 }
 0x6df   :  { %v10674_v39 = vadd.f32 %v10653_v15, %v5853_v59  ;;  %v6085_v55 = vsel %vm5876_vm1, %v6067_v4, 0.0 }
 0x6e0   :  { %v6086_v46 = vadd.f32 %v6085_v55, %v6084_v19 }
 0x6e1   :  { %v6019_v23 = vrot.slane %v10674_v39, 4  ;;  %v5884_v12 = vsel %vm5876_vm1, %v10674_v39, 0.0  ;;  %v5906_v49 = vmul.f32 %v10674_v39, %v10674_v39 }
 0x6e2   :  { %v5885_v13 = vadd.f32 %v5884_v12, %v5883_v26 }
 0x6e3   :  { %v6038_v32 = vsel %vm5876_vm1, %v6019_v23, 0.0  ;;  %v6068_v2 = vrot.slane %v5906_v49, 4  ;;  %v5917_v5 = vsel %vm5876_vm1, %v5906_v49, 0.0 }
 0x6e4   :  { %v5753_v44 = vpop.f32.mrf.mxu0  ;;  %v5918_v33 = vadd.f32 %v5917_v5, %v5916_v54 }
 0x6e5   :  { %v5855_v24 = vadd.f32 %v5854_v31, %v5753_v44  ;;  %v6039_v44 = vadd.f32 %v6038_v32, %v6037_v18  ;;  %v6087_v16 = vsel %vm5876_vm1, %v6068_v2, 0.0 }
 0x6e6   :  { %v6088_v48 = vadd.f32 %v6087_v16, %v6086_v46 }
 0x6e7   :  { %v10687_v62 = vadd.f32 %v10653_v15, %v5855_v24 }
 0x6e9   :  { %v6020_v20 = vrot.slane %v10687_v62, 4  ;;  %v5886_v52 = vsel %vm5876_vm1, %v10687_v62, 0.0  ;;  %v5907_v31 = vmul.f32 %v10687_v62, %v10687_v62 }
 0x6ea   :  { %v5887_v63 = vadd.f32 %v5886_v52, %v5885_v13 }
 0x6eb   :  { %v6040_v30 = vsel %vm5876_vm1, %v6020_v20, 0.0  ;;  %v6069_v35 = vrot.slane %v5907_v31, 4 }
 0x6ec   :  { %v5756_v37 = vpop.f32.mrf.mxu0 }
 0x6ed   :  { %v5858_v47 = vadd.f32 %v5857_v9, %v5756_v37  ;;  %v6041_v9 = vadd.f32 %v6040_v30, %v6039_v44  ;;  %v6089_v23 = vsel %vm5876_vm1, %v6069_v35, 0.0 }
 0x6ee   :  { %v6090_v12 = vadd.f32 %v6089_v23, %v6088_v48 }
 0x6ef   :  { %v10696_v22 = vadd.f32 %v10653_v15, %v5858_v47  ;;  %v5919_v47 = vsel %vm5876_vm1, %v5907_v31, 0.0 }
 0x6f0   :  { %v5920_v58 = vadd.f32 %v5919_v47, %v5918_v33 }
 0x6f1   :  { %v6021_v57 = vrot.slane %v10696_v22, 4  ;;  %v5888_v45 = vsel %vm5876_vm1, %v10696_v22, 0.0  ;;  %v5908_v56 = vmul.f32 %v10696_v22, %v10696_v22 }
 0x6f2   :  { %v5889_v24 = vadd.f32 %v5888_v45, %v5887_v63 }
 0x6f3   :  { %v6042_v59 = vsel %vm5876_vm1, %v6021_v57, 0.0  ;;  %v6070_v36 = vrot.slane %v5908_v56, 4  ;;  %v5921_v51 = vsel %vm5876_vm1, %v5908_v56, 0.0 }
 0x6f4   :  { %v5758_v11 = vpop.f32.mrf.mxu0  ;;  %v6043_v3 = vadd.f32 %v6042_v59, %v6041_v9  ;;  %v5922_v29 = vadd.f32 %v5921_v51, %v5920_v58 }
 0x6f5   :  { %v5860_v27 = vadd.f32 %v5859_v7, %v5758_v11  ;;  %v6091_v25 = vsel %vm5876_vm1, %v6070_v36, 0.0  ;;  %v10753_v36 = vld [vmem:[%s10896_s8] ss:$0 sm:$0xff] }
 0x6f6   :  { %v6092_v1 = vadd.f32 %v6091_v25, %v6090_v12  ;;  %v10770_v12 = vld [vmem:[%s10897_s9] ss:$0 sm:$0xff] }
 0x6f7   :  { %v10723_v53 = vadd.f32 %v10653_v15, %v5860_v27 }
 0x6f9   :  { %v5890_v6 = vsel %vm5876_vm1, %v10723_v53, 0.0  ;;  %v6022_v38 = vrot.slane %v10723_v53, 4  ;;  %v5909_v15 = vmul.f32 %v10723_v53, %v10723_v53 }
 0x6fa   :  { %v5891_v37 = vadd.f32 %v5890_v6, %v5889_v24 }
 0x6fb   :  { %v6044_v60 = vsel %vm5876_vm1, %v6022_v38, 0.0  ;;  %v6071_v10 = vrot.slane %v5909_v15, 4  ;;  %v5923_v34 = vsel %vm5876_vm1, %v5909_v15, 0.0 }
 0x6fc   :  { %5892 = vadd.xlane.f32.xlu0 %v5891_v37  ;;  %v6045_v28 = vadd.f32 %v6044_v60, %v6043_v3  ;;  %v5924_v8 = vadd.f32 %v5923_v34, %v5922_v29 }
 0x6fd   :  { %v6093_v20 = vsel %vm5876_vm1, %v6071_v10, 0.0 }
 0x6fe   :  { %6046 = vadd.xlane.f32.xlu1 %v6045_v28  ;;  %v6094_v26 = vadd.f32 %v6093_v20, %v6092_v1 }
 0x704   :  { %5925 = vadd.xlane.f32.xlu0 %v5924_v8 }
 0x706   :  { %6095 = vadd.xlane.f32.xlu1 %v6094_v26 }
 0x76f   :  { %v5893_v43 = vpop.xlane.xlu0 %5892 }
 0x770   :  { %v5894_v40 = vrot.slane %v5893_v43, 4 }
 0x771   :  { %v6047_v45 = vpop.xlane.xlu1 %6046 }
 0x772   :  { %v5895_v14 = vadd.f32 %v5894_v40, %v5893_v43  ;;  %v6048_v31 = vrot.slane %v6047_v45, 4 }
 0x774   :  { %v5896_v52 = vrot.slane %v5895_v14, 2  ;;  %v6049_v21 = vadd.f32 %v6048_v31, %v6047_v45 }
 0x776   :  { %v5897_v57 = vadd.f32 %v5896_v52, %v5895_v14  ;;  %v6050_v59 = vrot.slane %v6049_v21, 2 }
 0x777   :  { %v5926_v32 = vpop.xlane.xlu0 %5925 }
 0x778   :  { %v5927_v49 = vrot.slane %v5926_v32, 4  ;;  %v5898_v7 = vrot.slane %v5897_v57, 1  ;;  %v6051_v5 = vadd.f32 %v6050_v59, %v6049_v21  ;;  %v10801_v21 = vld [vmem:[%s10888_s0 + $0x10] sm:$0xff] }
 0x779   :  { %v6096_v30 = vpop.xlane.xlu1 %6095 }
 0x77a   :  { %v5928_v11 = vadd.f32 %v5927_v49, %v5926_v32  ;;  %v5899_v13 = vadd.f32 %v5898_v7, %v5897_v57  ;;  %v6097_v63 = vrot.slane %v6096_v30, 4  ;;  %v6052_v15 = vrot.slane %v6051_v5, 1 }
 0x77c   :  { %v5929_v18 = vrot.slane %v5928_v11, 2  ;;  %8994 = vpush %v5899_v13  ;;  %v6098_v41 = vadd.f32 %v6097_v63, %v6096_v30  ;;  %v6053_v54 = vadd.f32 %v6052_v15, %v6051_v5  ;;  %v10789_v30 = vld [vmem:[%s10888_s0] sm:$0xff]  ;;  %v10795_v63 = vld [vmem:[%s10888_s0 + $0x8] sm:$0xff]  ;;  %v10836_v15 = vld [vmem:[%s10888_s0 + $0x38] sm:$0xff] }
 0x77d   :  { %v10822_v5 = vld [vmem:[%s10888_s0 + $0x28] sm:$0xff] }
 0x77e   :  { %v5930_v61 = vadd.f32 %v5929_v18, %v5928_v11  ;;  %v6099_v2 = vrot.slane %v6098_v41, 2 }
 0x780   :  { %v5931_v4 = vrot.slane %v5930_v61, 1  ;;  %v6100_v55 = vadd.f32 %v6099_v2, %v6098_v41 }
 0x782   :  { %v5932_v27 = vadd.f32 %v5931_v4, %v5930_v61  ;;  %v6101_v35 = vrot.slane %v6100_v55, 1 }
 0x784   :  { %8996 = vpush %v5932_v27  ;;  %v6102_v19 = vadd.f32 %v6101_v35, %v6100_v55 }
 0x7ad   :  { %s8995_s7 = spop %8994 }
 0x7ae   :  { %s10743_s15 = smul.f32 0.001953125, %s8995_s7 }
 0x7b0   :  { %s5935_s16 = smul.f32 %s10743_s15, %s10743_s15  ;;  %v5938_v60 = vstv %s10743_s15 }
 0x7b1   :  { %v5939_v47 = vsub.f32 %v10656_v0, %v5938_v60  ;;  %v5940_v16 = vsub.f32 %v10659_v42, %v5938_v60  ;;  %v5941_v28 = vsub.f32 %v10666_v50, %v5938_v60  ;;  %v5942_v33 = vsub.f32 %v10671_v17, %v5938_v60 }
 0x7b2   :  { %v5943_v46 = vsub.f32 %v10674_v39, %v5938_v60  ;;  %v5944_v51 = vsub.f32 %v10687_v62, %v5938_v60  ;;  %v5945_v10 = vsub.f32 %v10696_v22, %v5938_v60  ;;  %v5946_v23 = vsub.f32 %v10723_v53, %v5938_v60 }
 0x7b3   :  { %v5950_v58 = vmul.f32 %v10753_v36, %v5939_v47  ;;  %v5951_v48 = vmul.f32 %v10753_v36, %v5940_v16  ;;  %v5952_v34 = vmul.f32 %v10753_v36, %v5941_v28  ;;  %v5953_v25 = vmul.f32 %v10753_v36, %v5942_v33 }
 0x7b4   :  { %v5954_v29 = vmul.f32 %v10753_v36, %v5943_v46  ;;  %v5955_v20 = vmul.f32 %v10753_v36, %v5944_v51  ;;  %v5956_v8 = vmul.f32 %v10753_v36, %v5945_v10  ;;  %v5957_v1 = vmul.f32 %v10753_v36, %v5946_v23 }
 0x7b5   :  { %s8997_s17 = spop %8996 }
 0x7b6   :  { %s5934_s18 = smul.f32 0.001953125, %s8997_s17 }
 0x7b8   :  { %s5936_s19 = ssub.f32 %s5934_s18, %s5935_s16 }
 0x7ba   :  { %s5937_s21 = smax.f32 %s9369_s20, %s5936_s19 }
 0x7bb   :  { %s5958_s22 = sadd.f32 1e-08, %s5937_s21 }
 0x7bd   :  { %v5959_v44 = vstv %s5958_s22 }
 0x7be   :  { %9274 = vrsqrt.f32 %v5959_v44  ;;  %vm5966_vm3 = vweird.f32 %v5959_v44 }
 0x7c4   :  { %v9275_v56 = vpop.eup %9274 }
 0x7c5   :  { %v5961_v24 = vmul.f32 %v9275_v56, %v5959_v44  ;;  %vm5967_vm2 = vweird.f32 %v9275_v56 }
 0x7c6   :  { %vm5968_vm4 = vmor %vm5966_vm3, %vm5967_vm2 }
 0x7c7   :  { %v5962_v9 = vmul.f32 %v9275_v56, %v5961_v24  ;;  %v10814_v24 = vld [vmem:[%s10888_s0 + $0x20] sm:$0xff] }
 0x7c9   :  { %v5963_v6 = vmul.f32 0.5, %v5962_v9 }
 0x7cb   :  { %v5964_v38 = vsub.f32 1.5, %v5963_v6  ;;  %v10829_v6 = vld [vmem:[%s10888_s0 + $0x30] sm:$0xff] }
 0x7cd   :  { %v5965_v37 = vmul.f32 %v9275_v56, %v5964_v38 }
 0x7cf   :  { %v5969_v3 = vsel %vm5968_vm4, %v9275_v56, %v5965_v37  ;;  %v10808_v56 = vld [vmem:[%s10888_s0 + $0x18] sm:$0xff] }
 0x7d0   :  { %8998 = vpush %v5969_v3 }
 0x7d1   :  { %9000 = vpush %v6053_v54 }
 0x7d2   :  { %9002 = vpush %v6102_v19 }
 0x801   :  { %s8999_s8 = spop %8998 }
 0x802   :  { %v5971_v26 = vstv %s8999_s8  ;;  %s9001_s25 = spop %9000 }
 0x803   :  { %v5972_v43 = vmul.f32 %v5971_v26, %v5950_v58  ;;  %v5973_v40 = vmul.f32 %v5971_v26, %v5951_v48  ;;  %v5974_v14 = vmul.f32 %v5971_v26, %v5952_v34  ;;  %v5975_v52 = vmul.f32 %v5971_v26, %v5953_v25  ;;  %s10775_s26 = smul.f32 0.001953125, %s9001_s25  ;;  %s9003_s27 = spop %9002 }
 0x804   :  { %v5976_v57 = vmul.f32 %v5971_v26, %v5954_v29  ;;  %v5977_v32 = vmul.f32 %v5971_v26, %v5955_v20  ;;  %v5978_v49 = vmul.f32 %v5971_v26, %v5956_v8  ;;  %v5979_v7 = vmul.f32 %v5971_v26, %v5957_v1  ;;  %s6104_s9 = smul.f32 0.001953125, %s9003_s27  ;;  %s9371_s25 = smov 128  }
 0x805   :  { %v5983_v11 = vadd.f32 %v10770_v12, %v5972_v43  ;;  %v5984_v13 = vadd.f32 %v10770_v12, %v5973_v40  ;;  %v5985_v18 = vadd.f32 %v10770_v12, %v5974_v14  ;;  %v5986_v61 = vadd.f32 %v10770_v12, %v5975_v52  ;;  %s6105_s1 = smul.f32 %s10775_s26, %s10775_s26 }
 0x806   :  { %v5987_v4 = vadd.f32 %v10770_v12, %v5976_v57  ;;  %v5988_v27 = vadd.f32 %v10770_v12, %v5977_v32  ;;  %v5989_v45 = vadd.f32 %v10770_v12, %v5978_v49  ;;  %v5990_v59 = vadd.f32 %v10770_v12, %v5979_v7 }
 0x807   :  { %v5991_v31 = vadd.f32 %v10789_v30, %v5983_v11  ;;  %v5992_v44 = vadd.f32 %v10795_v63, %v5984_v13  ;;  %v5993_v41 = vadd.f32 %v10801_v21, %v5985_v18  ;;  %s6106_s12 = ssub.f32 %s6104_s9, %s6105_s1  ;;  %v5994_v2 = vadd.f32 %v10808_v56, %v5986_v61 }
 0x808   :  { %v5995_v9 = vadd.f32 %v10814_v24, %v5987_v4  ;;  %v5996_v55 = vadd.f32 %v10822_v5, %v5988_v27  ;;  %v5997_v38 = vadd.f32 %v10829_v6, %v5989_v45  ;;  %v5998_v35 = vadd.f32 %v10836_v15, %v5990_v59 }
 0x809   :  { %5999 = vst.msk [vmem:[#allocation11] sm:$0xf] %vm5876_vm1, %v5991_v31  ;;  %s6107_s15 = smax.f32 %s9369_s20, %s6106_s12  ;;  %v6108_v33 = vstv %s10775_s26 }
 0x80a   :  { %6000 = vst.msk [vmem:[#allocation11 + $0x8] sm:$0xf] %vm5876_vm1, %v5992_v44  ;;  %s6125_s18 = sadd.f32 1e-08, %s6107_s15  ;;  %v6109_v46 = vsub.f32 %v10656_v0, %v6108_v33  ;;  %v6110_v51 = vsub.f32 %v10659_v42, %v6108_v33  ;;  %v6111_v10 = vsub.f32 %v10666_v50, %v6108_v33  ;;  %v6112_v23 = vsub.f32 %v10671_v17, %v6108_v33 }
 0x80b   :  { %6001 = vst.msk [vmem:[#allocation11 + $0x10] sm:$0xf] %vm5876_vm1, %v5993_v41  ;;  %v6113_v58 = vsub.f32 %v10674_v39, %v6108_v33  ;;  %v6114_v48 = vsub.f32 %v10687_v62, %v6108_v33  ;;  %v6115_v34 = vsub.f32 %v10696_v22, %v6108_v33  ;;  %v6116_v25 = vsub.f32 %v10723_v53, %v6108_v33 }
 0x80c   :  { %6002 = vst.msk [vmem:[#allocation11 + $0x18] sm:$0xf] %vm5876_vm1, %v5994_v2  ;;  %v6126_v37 = vstv %s6125_s18  ;;  %v6117_v29 = vmul.f32 %v10753_v36, %v6109_v46  ;;  %v6118_v20 = vmul.f32 %v10753_v36, %v6110_v51  ;;  %v6119_v0 = vmul.f32 %v10753_v36, %v6111_v10 }
 0x80d   :  { %6003 = vst.msk [vmem:[#allocation11 + $0x20] sm:$0xf] %vm5876_vm1, %v5995_v9  ;;  %9276 = vrsqrt.f32 %v6126_v37  ;;  %vm6133_vm6 = vweird.f32 %v6126_v37  ;;  %v6120_v42 = vmul.f32 %v10753_v36, %v6112_v23  ;;  %v6121_v50 = vmul.f32 %v10753_v36, %v6113_v58 }
 0x80e   :  { %6004 = vst.msk [vmem:[#allocation11 + $0x28] sm:$0xf] %vm5876_vm1, %v5996_v55  ;;  %v6122_v17 = vmul.f32 %v10753_v36, %v6114_v48  ;;  %v6123_v39 = vmul.f32 %v10753_v36, %v6115_v34  ;;  %v6124_v62 = vmul.f32 %v10753_v36, %v6116_v25 }
 0x80f   :  { %6005 = vst.msk [vmem:[#allocation11 + $0x30] sm:$0xf] %vm5876_vm1, %v5997_v38 }
 0x810   :  { %6006 = vst.msk [vmem:[#allocation11 + $0x38] sm:$0xf] %vm5876_vm1, %v5998_v35 }
 0x813   :  { %v9277_v3 = vpop.eup %9276 }
 0x814   :  { %v6128_v54 = vmul.f32 %v9277_v3, %v6126_v37  ;;  %vm6134_vm5 = vweird.f32 %v9277_v3 }
 0x815   :  { %vm6135_vm7 = vmor %vm6133_vm6, %vm6134_vm5 }
 0x816   :  { %v6129_v19 = vmul.f32 %v9277_v3, %v6128_v54 }
 0x818   :  { %v6130_v60 = vmul.f32 0.5, %v6129_v19 }
 0x81a   :  { %v6131_v47 = vsub.f32 1.5, %v6130_v60 }
 0x81c   :  { %v6132_v16 = vmul.f32 %v9277_v3, %v6131_v47 }
 0x81e   :  { %v6136_v28 = vsel %vm6135_vm7, %v9277_v3, %v6132_v16 }
 0x81f   :  { %9004 = vpush %v6136_v28 }
 0x850   :  { %s9005_s0 = spop %9004 }
 0x851   :  { %v6138_v22 = vstv %s9005_s0 }
 0x852   :  { %v6139_v8 = vmul.f32 %v6138_v22, %v6117_v29  ;;  %v6140_v53 = vmul.f32 %v6138_v22, %v6118_v20  ;;  %v6141_v1 = vmul.f32 %v6138_v22, %v6119_v0  ;;  %v6142_v26 = vmul.f32 %v6138_v22, %v6120_v42 }
 0x853   :  { %v6143_v43 = vmul.f32 %v6138_v22, %v6121_v50  ;;  %v6144_v40 = vmul.f32 %v6138_v22, %v6122_v17  ;;  %v6145_v14 = vmul.f32 %v6138_v22, %v6123_v39  ;;  %v6146_v52 = vmul.f32 %v6138_v22, %v6124_v62 }
 0x854   :  { %v6147_v57 = vadd.f32 %v10770_v12, %v6139_v8  ;;  %v6148_v32 = vadd.f32 %v10770_v12, %v6140_v53  ;;  %v6149_v49 = vadd.f32 %v10770_v12, %v6141_v1  ;;  %v6150_v7 = vadd.f32 %v10770_v12, %v6142_v26 }
 0x855   :  { %v6151_v11 = vadd.f32 %v10770_v12, %v6143_v43  ;;  %v6152_v36 = vadd.f32 %v10770_v12, %v6144_v40  ;;  %v6153_v13 = vadd.f32 %v10770_v12, %v6145_v14  ;;  %v6154_v27 = vadd.f32 %v10770_v12, %v6146_v52 }
 0x856   :  { %v6155_v18 = vadd.f32 %v10789_v30, %v6147_v57  ;;  %v6156_v61 = vadd.f32 %v10795_v63, %v6148_v32  ;;  %v6157_v4 = vadd.f32 %v10801_v21, %v6149_v49  ;;  %v6158_v45 = vadd.f32 %v10808_v56, %v6150_v7 }
 0x857   :  { %v6159_v31 = vadd.f32 %v10814_v24, %v6151_v11  ;;  %v6160_v44 = vadd.f32 %v10822_v5, %v6152_v36  ;;  %v6161_v30 = vadd.f32 %v10829_v6, %v6153_v13  ;;  %v6162_v12 = vadd.f32 %v10836_v15, %v6154_v27 }
 0x858   :  { %6164 = vst.msk [vmem:[#allocation11] sm:$0xf0] %vm6163_vm8, %v6155_v18 }
 0x859   :  { %6165 = vst.msk [vmem:[#allocation11 + $0x8] sm:$0xf0] %vm6163_vm8, %v6156_v61 }
 0x85a   :  { %6166 = vst.msk [vmem:[#allocation11 + $0x10] sm:$0xf0] %vm6163_vm8, %v6157_v4 }
 0x85b   :  { %6167 = vst.msk [vmem:[#allocation11 + $0x18] sm:$0xf0] %vm6163_vm8, %v6158_v45 }
 0x85c   :  { %6168 = vst.msk [vmem:[#allocation11 + $0x20] sm:$0xf0] %vm6163_vm8, %v6159_v31 }
 0x85d   :  { %6169 = vst.msk [vmem:[#allocation11 + $0x28] sm:$0xf0] %vm6163_vm8, %v6160_v44 }
 0x85e   :  { %6170 = vst.msk [vmem:[#allocation11 + $0x30] sm:$0xf0] %vm6163_vm8, %v6161_v30 }
 0x85f   :  { %6171 = vst.msk [vmem:[#allocation11 + $0x38] sm:$0xf0] %vm6163_vm8, %v6162_v12 }
 0x860   :  { %6184 = dma.vmem_to_hbm [thread:$0]  %s6177_s23, 1024, %s6179_s3, [#allocation8], %s9371_s25, %s9371_s25, %s9372_s10  }
 0x861   :  { %9362 = dma.done.wait [#allocation8], 1024  }
 0x862   :  { %9363 = vsyncadd [#allocation8], 4294966272 }
 0x863   :  { %6189 = vsyncpa [#allocation7], 1 }
 0x864   :  { %6190 = vsyncpa [#allocation10], 1 }
 0x865   :  { %6191 = vsyncpa [#allocation8], 1 }

</bundles_post_ra>
